<compile_context>
chip_gen: v7x
topology: tpu7x:2x2x1
jax: 0.10.0
libtpu: 0.0.40
codegen_flags: <defaults>
</compile_context>

<pallas_src>
import jax
import jax.numpy as jnp
from jax import lax
from jax.experimental import pallas as pl
from jax.experimental.pallas import tpu as pltpu

EPS = 1e-5


# ------------------------------ in-kernel helpers ----------------------------
def _store_padded(pad_ref, interior_bf16):
    """Zero border + interior write into the (H+2, W+2, C) bf16 pad scratch.

    The border is re-zeroed every grid step: the grid axis is "parallel", so on
    v7x each TensorCore has its own scratch copy (no cross-step init allowed).
    """
    Hp, Wp, C = pad_ref.shape
    H, W = Hp - 2, Wp - 2
    zrow = jnp.zeros((1, Wp, C), jnp.bfloat16)
    zcol = jnp.zeros((Hp, 1, C), jnp.bfloat16)
    pad_ref[0:1, :, :] = zrow
    pad_ref[Hp - 1:Hp, :, :] = zrow
    # TODO(synk): fold the two column strips into the interior store with a
    # lane-masked full-width write (minor win per review).
    pad_ref[:, 0:1, :] = zcol
    pad_ref[:, Wp - 1:Wp, :] = zcol
    pad_ref[1:H + 1, 1:W + 1, :] = interior_bf16


def _im2col_matmul(pad_ref, slab_ref, w_ref):
    """Build the (H*W, 9*Cin) bf16 im2col slab, then ONE deep-K MXU matmul."""
    Hp, Wp, Cin = pad_ref.shape
    H, W = Hp - 2, Wp - 2
    for dh in range(3):
        for dw in range(3):
            tap = dh * 3 + dw
            slab_ref[:, tap * Cin:(tap + 1) * Cin] = (
                pad_ref[dh:dh + H, dw:dw + W, :].reshape(H * W, Cin))
    return jnp.dot(slab_ref[...], w_ref[...],
                   preferred_element_type=jnp.float32)


def _store_moments(mom_ref, acc):
    """Per-sample [sum, centered sum-of-squares] (stable parallel-variance)."""
    count = acc.shape[0]
    s = jnp.sum(acc, axis=0, keepdims=True)               # (1, Cout)
    centered = acc - s * (1.0 / count)
    mom_ref[0, 0:1, :] = s
    mom_ref[0, 1:2, :] = jnp.sum(centered * centered, axis=0, keepdims=True)


# ---------------- kernel 1: conv1 (im2col) + BN1 partial moments -------------
def _conv1_moments_kernel(x_ref, w_ref, y_ref, mom_ref, pad_ref, slab_ref):
    # x_ref   : (1, H, W, Cin)   f32  one unpadded NHWC sample
    # w_ref   : (9*Cin, Cout)    bf16 im2col weights (row = tap*Cin + cin)
    # y_ref   : (1, H*W, Cout)   f32  raw conv1 output
    # mom_ref : (1, 2, Cout)     f32  [sum, centered sumsq]
    # pad_ref : (H+2, W+2, Cin)  bf16 scratch (per-sample zero-padded input)
    # slab_ref: (H*W, 9*Cin)     bf16 scratch (im2col LHS)
    _store_padded(pad_ref, x_ref[0].astype(jnp.bfloat16))
    acc = _im2col_matmul(pad_ref, slab_ref, w_ref)
    y_ref[0] = acc
    _store_moments(mom_ref, acc)


# --------- kernel 2: BN1 + ReLU + conv2 (im2col) + BN2 partial moments -------
def _bn_relu_conv2_moments_kernel(y1_ref, s1_ref, t1_ref, w_ref,
                                  y2_ref, mom_ref, pad_ref, slab_ref):
    # y1_ref : (1, H*W, C) f32 raw conv1 output; s1/t1: (1, C) fused BN1 scale/shift
    Hp, Wp, C = pad_ref.shape
    H, W = Hp - 2, Wp - 2
    a = jnp.maximum(y1_ref[0] * s1_ref[...] + t1_ref[...], 0.0)   # BN1+ReLU, f32
    _store_padded(pad_ref, a.astype(jnp.bfloat16).reshape(H, W, C))
    acc = _im2col_matmul(pad_ref, slab_ref, w_ref)
    y2_ref[0] = acc
    _store_moments(mom_ref, acc)


# ------------------- kernel 3: BN2 + residual (lane-dense) -------------------
def _bn2_residual_kernel(y2_ref, x_ref, s2_ref, t2_ref, o_ref):
    # tiles: (TR, L) data, (1, L) scale/shift; L is a multiple of 128 when possible
    o_ref[...] = y2_ref[...] * s2_ref[...] + t2_ref[...] + x_ref[...]


# --------------------------------- wrapper ----------------------------------
def _finalize_stats(mom, gamma, beta, per_sample_count):
    """(N, 2, C) per-sample [sum, centered sumsq] -> fused BN scale/shift (1, C)."""
    n = mom.shape[0]
    means = mom[:, 0, :] / per_sample_count                  # (N, C)
    gmean = jnp.mean(means, axis=0)                          # (C,)
    css = jnp.sum(mom[:, 1, :], axis=0)                      # (C,)
    var = (css + per_sample_count * jnp.sum((means - gmean) ** 2, axis=0)) \
        / (n * per_sample_count)                             # biased variance
    scale = gamma.reshape(-1) * lax.rsqrt(jnp.maximum(var, 0.0) + EPS)
    shift = beta.reshape(-1) - gmean * scale
    return (scale.reshape(1, -1).astype(jnp.float32),
            shift.reshape(1, -1).astype(jnp.float32))


def _pass3_layout(N, H, W, C):
    """Lane-dense flat layout (R, L) + row tile TR for the elementwise pass."""
    L, R = W * C, N * H
    # Fold whole (W, C) rows into the lane dim until it is a multiple of 128
    # (dense vst instead of masked partial stores); channel period is preserved.
    while L % 128 != 0 and R % 2 == 0:
        L *= 2
        R //= 2
    # Largest row tile that is a multiple of 8, divides R, keeps each
    # double-buffered f32 block <= ~1 MiB, and leaves grid >= 2 when possible.
    cap = max(8, min(512, (1 << 20) // max(1, 4 * L)))
    if R >= 16:
        cap = min(cap, R // 2)
    tr = R                                       # fallback: full extent (legal)
    for cand in range(min(cap, R), 7, -1):
        if cand % 8 == 0 and R % cand == 0:
            tr = cand
            break
    return R, L, tr


@jax.jit
def basic_block(x_nchw, w1, g1, b1, w2, g2, b2):
    """x_nchw: (N, C, H, W) f32; w*: (9, Cin, Cout); g*/b*: (1, Cout) -> NCHW."""
    N, C, H, W = x_nchw.shape
    Cout = w1.shape[-1]
    assert C == Cout, "BasicBlock with downsample=None requires in == out channels"

    x_nhwc = jnp.transpose(x_nchw, (0, 2, 3, 1)).astype(jnp.float32)
    w1_im2col = w1.reshape(9 * C, Cout).astype(jnp.bfloat16)       # row = tap*Cin + cin
    w2_im2col = w2.reshape(9 * Cout, Cout).astype(jnp.bfloat16)

    par = pltpu.CompilerParams(dimension_semantics=("parallel",),
                               vmem_limit_bytes=48 * 1024 * 1024)

    # ---- pass 1: conv1 as one K=9*Cin im2col matmul + fused BN1 moments ----
    y1_raw, mom1 = pl.pallas_call(
        _conv1_moments_kernel,
        out_shape=(jax.ShapeDtypeStruct((N, H * W, Cout), jnp.float32),
                   jax.ShapeDtypeStruct((N, 2, Cout), jnp.float32)),
        grid=(N,),
        in_specs=[pl.BlockSpec((1, H, W, C), lambda n: (n, 0, 0, 0)),
                  pl.BlockSpec((9 * C, Cout), lambda n: (0, 0))],
        out_specs=[pl.BlockSpec((1, H * W, Cout), lambda n: (n, 0, 0)),
                   pl.BlockSpec((1, 2, Cout), lambda n: (n, 0, 0))],
        scratch_shapes=[pltpu.VMEM((H + 2, W + 2, C), jnp.bfloat16),
                        pltpu.VMEM((H * W, 9 * C), jnp.bfloat16)],
        compiler_params=par,
    )(x_nhwc, w1_im2col)

    s1, t1 = _finalize_stats(mom1, g1, b1, H * W)

    # ---- pass 2: BN1 + ReLU + conv2 (im2col) + fused BN2 moments ----
    y2_raw, mom2 = pl.pallas_call(
        _bn_relu_conv2_moments_kernel,
        out_shape=(jax.ShapeDtypeStruct((N, H * W, Cout), jnp.float32),
                   jax.ShapeDtypeStruct((N, 2, Cout), jnp.float32)),
        grid=(N,),
        in_specs=[pl.BlockSpec((1, H * W, Cout), lambda n: (n, 0, 0)),
                  pl.BlockSpec((1, Cout), lambda n: (0, 0)),
                  pl.BlockSpec((1, Cout), lambda n: (0, 0)),
                  pl.BlockSpec((9 * Cout, Cout), lambda n: (0, 0))],
        out_specs=[pl.BlockSpec((1, H * W, Cout), lambda n: (n, 0, 0)),
                   pl.BlockSpec((1, 2, Cout), lambda n: (n, 0, 0))],
        scratch_shapes=[pltpu.VMEM((H + 2, W + 2, Cout), jnp.bfloat16),
                        pltpu.VMEM((H * W, 9 * Cout), jnp.bfloat16)],
        compiler_params=par,
    )(y1_raw, s1, t1, w2_im2col)

    s2, t2 = _finalize_stats(mom2, g2, b2, H * W)

    # ---- pass 3: BN2 + residual add on a lane-dense (R, L) layout ----
    R, L, TR = _pass3_layout(N, H, W, Cout)
    y2_flat = y2_raw.reshape(R, L)            # row-major == flattened NHWC
    x_flat = x_nhwc.reshape(R, L)
    s2_t = jnp.tile(s2, (1, L // Cout))       # per-channel -> per-lane pattern
    t2_t = jnp.tile(t2, (1, L // Cout))
    out_flat = pl.pallas_call(
        _bn2_residual_kernel,
        out_shape=jax.ShapeDtypeStruct((R, L), jnp.float32),
        grid=(R // TR,),
        in_specs=[pl.BlockSpec((TR, L), lambda r: (r, 0)),
                  pl.BlockSpec((TR, L), lambda r: (r, 0)),
                  pl.BlockSpec((1, L), lambda r: (0, 0)),
                  pl.BlockSpec((1, L), lambda r: (0, 0))],
        out_specs=pl.BlockSpec((TR, L), lambda r: (r, 0)),
        compiler_params=par,
    )(y2_flat, x_flat, s2_t, t2_t)

    out = out_flat.reshape(N, H, W, Cout)
    return jnp.transpose(out, (0, 3, 1, 2)).astype(x_nchw.dtype)


# ------------------------------ plain-JAX reference --------------------------
def _bn_train(y, gamma, beta, eps=EPS):
    mean = jnp.mean(y, axis=(0, 1, 2), keepdims=True)
    var = jnp.mean((y - mean) ** 2, axis=(0, 1, 2), keepdims=True)
    return (y - mean) * lax.rsqrt(var + eps) * gamma + beta


def _conv3x3_ref(x_nhwc, w_9io, operand_dtype):
    Cin, Cout = w_9io.shape[1], w_9io.shape[2]
    w_hwio = w_9io.reshape(3, 3, Cin, Cout).astype(operand_dtype)
    dn = lax.conv_dimension_numbers(x_nhwc.shape, w_hwio.shape,
                                    ("NHWC", "HWIO", "NHWC"))
    return lax.conv_general_dilated(
        x_nhwc.astype(operand_dtype), w_hwio, (1, 1), "SAME",
        dimension_numbers=dn, preferred_element_type=jnp.float32)


def basic_block_ref(x_nchw, w1, g1, b1, w2, g2, b2, operand_dtype=jnp.float32):
    x = jnp.transpose(x_nchw, (0, 2, 3, 1)).astype(jnp.float32)
    out = _conv3x3_ref(x, w1, operand_dtype)
    out = jnp.maximum(_bn_train(out, g1, b1), 0.0)
    out = _conv3x3_ref(out, w2, operand_dtype)
    out = _bn_train(out, g2, b2)
    out = out + x
    return jnp.transpose(out, (0, 3, 1, 2))


if __name__ == "__main__":
    key = jax.random.PRNGKey(0)
    N, C, H, W = 2, 4, 16, 16            # in_channels == out_channels, stride=1
    Cout = C

    k_x, k_w1, k_w2 = jax.random.split(key, 3)
    x = jax.random.normal(k_x, (N, C, H, W), jnp.float32)

    # conv weights: PyTorch (Cout, Cin, 3, 3) -> kernel layout (9, Cin, Cout), tap = dh*3+dw
    w1_t = jax.random.normal(k_w1, (Cout, C, 3, 3), jnp.float32) * 0.1
    w2_t = jax.random.normal(k_w2, (Cout, Cout, 3, 3), jnp.float32) * 0.1
    w1 = jnp.transpose(w1_t, (2, 3, 1, 0)).reshape(9, C, Cout)
    w2 = jnp.transpose(w2_t, (2, 3, 1, 0)).reshape(9, Cout, Cout)

    # BatchNorm params (PyTorch init: gamma=1, beta=0)
    g1 = jnp.ones((1, Cout), jnp.float32)
    b1 = jnp.zeros((1, Cout), jnp.float32)
    g2 = jnp.ones((1, Cout), jnp.float32)
    b2 = jnp.zeros((1, Cout), jnp.float32)

    out = jax.block_until_ready(basic_block(x, w1, g1, b1, w2, g2, b2))
    assert out.shape == (N, C, H, W)

    # tight check vs a reference that quantizes conv (MXU) operands to bf16
    # exactly like the kernel does (everything else in f32)
    ref_bf16 = jax.block_until_ready(
        basic_block_ref(x, w1, g1, b1, w2, g2, b2, operand_dtype=jnp.bfloat16))
    assert jnp.allclose(out, ref_bf16, atol=2e-3, rtol=2e-3), \
        "mismatch vs bf16-operand reference"

    # loose sanity check vs the pure-f32 reference (gap = bf16 MXU operand rounding)
    ref_f32 = jax.block_until_ready(basic_block_ref(x, w1, g1, b1, w2, g2, b2))
    assert jnp.allclose(out, ref_f32, atol=6e-2, rtol=6e-2), \
        "mismatch vs f32 reference"

    print("KERNEL_OK")
</pallas_src>

<mosaic_0001>
module attributes {stable_mosaic.version = 11 : i64} {
  func.func @_conv1_moments_kernel(%arg0: i32, %arg1: memref<1x16x16x4xf32, #tpu.memory_space<vmem>>, %arg2: memref<36x4xbf16, #tpu.memory_space<vmem>>, %arg3: memref<1x256x4xf32, #tpu.memory_space<vmem>>, %arg4: memref<1x2x4xf32, #tpu.memory_space<vmem>>, %arg5: memref<18x18x4xbf16, #tpu.memory_space<vmem>>, %arg6: memref<256x36xbf16, #tpu.memory_space<vmem>>) attributes {dimension_semantics = [#tpu.dimension_semantics<parallel>], iteration_bounds = array<i64: 2>, scalar_prefetch = 0 : i64, scratch_operands = 2 : i64, tpu.core_type = #tpu.core_type<tc>, window_params = [{transform_indices = @transform_0, window_bounds = array<i64: 1, 16, 16, 4>}, {pipeline_mode = #tpu.pipeline_mode<synchronous>, transform_indices = @transform_1, window_bounds = array<i64: 36, 4>}, {transform_indices = @transform_2, window_bounds = array<i64: 1, 256, 4>}, {transform_indices = @transform_3, window_bounds = array<i64: 1, 2, 4>}]} {
    %c0 = arith.constant 0 : index
    %c0_0 = arith.constant 0 : index
    %c0_1 = arith.constant 0 : index
    %c0_2 = arith.constant 0 : index
    %0 = vector.load %arg1[%c0, %c0_0, %c0_1, %c0_2] : memref<1x16x16x4xf32, #tpu.memory_space<vmem>>, vector<1x16x16x4xf32>
    %1 = vector.shape_cast %0 : vector<1x16x16x4xf32> to vector<16x16x4xf32>
    %2 = arith.truncf %1 : vector<16x16x4xf32> to vector<16x16x4xbf16>
    %cst = arith.constant 0.000000e+00 : bf16
    %3 = vector.broadcast %cst : bf16 to vector<1x18x4xbf16>
    %cst_3 = arith.constant 0.000000e+00 : bf16
    %4 = vector.broadcast %cst_3 : bf16 to vector<18x1x4xbf16>
    %c0_4 = arith.constant 0 : index
    %c0_5 = arith.constant 0 : index
    %c0_6 = arith.constant 0 : index
    %5 = vector.load %arg5[%c0_4, %c0_5, %c0_6] : memref<18x18x4xbf16, #tpu.memory_space<vmem>>, vector<1x18x4xbf16>
    tpu.vector_store %arg5[%c0_4, %c0_5, %c0_6], %3 {strides = array<i32>} : memref<18x18x4xbf16, #tpu.memory_space<vmem>>, vector<1x18x4xbf16>,
    %c17 = arith.constant 17 : index
    %c0_7 = arith.constant 0 : index
    %c0_8 = arith.constant 0 : index
    %6 = vector.load %arg5[%c17, %c0_7, %c0_8] : memref<18x18x4xbf16, #tpu.memory_space<vmem>>, vector<1x18x4xbf16>
    tpu.vector_store %arg5[%c17, %c0_7, %c0_8], %3 {strides = array<i32>} : memref<18x18x4xbf16, #tpu.memory_space<vmem>>, vector<1x18x4xbf16>,
    %c0_9 = arith.constant 0 : index
    %c0_10 = arith.constant 0 : index
    %c0_11 = arith.constant 0 : index
    %7 = vector.load %arg5[%c0_9, %c0_10, %c0_11] : memref<18x18x4xbf16, #tpu.memory_space<vmem>>, vector<18x1x4xbf16>
    tpu.vector_store %arg5[%c0_9, %c0_10, %c0_11], %4 {strides = array<i32>} : memref<18x18x4xbf16, #tpu.memory_space<vmem>>, vector<18x1x4xbf16>,
    %c0_12 = arith.constant 0 : index
    %c17_13 = arith.constant 17 : index
    %c0_14 = arith.constant 0 : index
    %8 = vector.load %arg5[%c0_12, %c17_13, %c0_14] : memref<18x18x4xbf16, #tpu.memory_space<vmem>>, vector<18x1x4xbf16>
    tpu.vector_store %arg5[%c0_12, %c17_13, %c0_14], %4 {strides = array<i32>} : memref<18x18x4xbf16, #tpu.memory_space<vmem>>, vector<18x1x4xbf16>,
    %c1 = arith.constant 1 : index
    %c1_15 = arith.constant 1 : index
    %c0_16 = arith.constant 0 : index
    %9 = vector.load %arg5[%c1, %c1_15, %c0_16] : memref<18x18x4xbf16, #tpu.memory_space<vmem>>, vector<16x16x4xbf16>
    tpu.vector_store %arg5[%c1, %c1_15, %c0_16], %2 {strides = array<i32>} : memref<18x18x4xbf16, #tpu.memory_space<vmem>>, vector<16x16x4xbf16>,
    %c0_17 = arith.constant 0 : index
    %c0_18 = arith.constant 0 : index
    %c0_19 = arith.constant 0 : index
    %10 = vector.load %arg5[%c0_17, %c0_18, %c0_19] : memref<18x18x4xbf16, #tpu.memory_space<vmem>>, vector<16x16x4xbf16>
    %11 = vector.shape_cast %10 : vector<16x16x4xbf16> to vector<256x4xbf16>
    %c0_20 = arith.constant 0 : index
    %c0_21 = arith.constant 0 : index
    %12 = vector.load %arg6[%c0_20, %c0_21] : memref<256x36xbf16, #tpu.memory_space<vmem>>, vector<256x4xbf16>
    tpu.vector_store %arg6[%c0_20, %c0_21], %11 {strides = array<i32>} : memref<256x36xbf16, #tpu.memory_space<vmem>>, vector<256x4xbf16>,
    %c0_22 = arith.constant 0 : index
    %c1_23 = arith.constant 1 : index
    %c0_24 = arith.constant 0 : index
    %13 = vector.load %arg5[%c0_22, %c1_23, %c0_24] : memref<18x18x4xbf16, #tpu.memory_space<vmem>>, vector<16x16x4xbf16>
    %14 = vector.shape_cast %13 : vector<16x16x4xbf16> to vector<256x4xbf16>
    %c0_25 = arith.constant 0 : index
    %c4 = arith.constant 4 : index
    %15 = vector.load %arg6[%c0_25, %c4] : memref<256x36xbf16, #tpu.memory_space<vmem>>, vector<256x4xbf16>
    tpu.vector_store %arg6[%c0_25, %c4], %14 {strides = array<i32>} : memref<256x36xbf16, #tpu.memory_space<vmem>>, vector<256x4xbf16>,
    %c0_26 = arith.constant 0 : index
    %c2 = arith.constant 2 : index
    %c0_27 = arith.constant 0 : index
    %16 = vector.load %arg5[%c0_26, %c2, %c0_27] : memref<18x18x4xbf16, #tpu.memory_space<vmem>>, vector<16x16x4xbf16>
    %17 = vector.shape_cast %16 : vector<16x16x4xbf16> to vector<256x4xbf16>
    %c0_28 = arith.constant 0 : index
    %c8 = arith.constant 8 : index
    %18 = vector.load %arg6[%c0_28, %c8] : memref<256x36xbf16, #tpu.memory_space<vmem>>, vector<256x4xbf16>
    tpu.vector_store %arg6[%c0_28, %c8], %17 {strides = array<i32>} : memref<256x36xbf16, #tpu.memory_space<vmem>>, vector<256x4xbf16>,
    %c1_29 = arith.constant 1 : index
    %c0_30 = arith.constant 0 : index
    %c0_31 = arith.constant 0 : index
    %19 = vector.load %arg5[%c1_29, %c0_30, %c0_31] : memref<18x18x4xbf16, #tpu.memory_space<vmem>>, vector<16x16x4xbf16>
    %20 = vector.shape_cast %19 : vector<16x16x4xbf16> to vector<256x4xbf16>
    %c0_32 = arith.constant 0 : index
    %c12 = arith.constant 12 : index
    %21 = vector.load %arg6[%c0_32, %c12] : memref<256x36xbf16, #tpu.memory_space<vmem>>, vector<256x4xbf16>
    tpu.vector_store %arg6[%c0_32, %c12], %20 {strides = array<i32>} : memref<256x36xbf16, #tpu.memory_space<vmem>>, vector<256x4xbf16>,
    %c1_33 = arith.constant 1 : index
    %c1_34 = arith.constant 1 : index
    %c0_35 = arith.constant 0 : index
    %22 = vector.load %arg5[%c1_33, %c1_34, %c0_35] : memref<18x18x4xbf16, #tpu.memory_space<vmem>>, vector<16x16x4xbf16>
    %23 = vector.shape_cast %22 : vector<16x16x4xbf16> to vector<256x4xbf16>
    %c0_36 = arith.constant 0 : index
    %c16 = arith.constant 16 : index
    %24 = vector.load %arg6[%c0_36, %c16] : memref<256x36xbf16, #tpu.memory_space<vmem>>, vector<256x4xbf16>
    tpu.vector_store %arg6[%c0_36, %c16], %23 {strides = array<i32>} : memref<256x36xbf16, #tpu.memory_space<vmem>>, vector<256x4xbf16>,
    %c1_37 = arith.constant 1 : index
    %c2_38 = arith.constant 2 : index
    %c0_39 = arith.constant 0 : index
    %25 = vector.load %arg5[%c1_37, %c2_38, %c0_39] : memref<18x18x4xbf16, #tpu.memory_space<vmem>>, vector<16x16x4xbf16>
    %26 = vector.shape_cast %25 : vector<16x16x4xbf16> to vector<256x4xbf16>
    %c0_40 = arith.constant 0 : index
    %c20 = arith.constant 20 : index
    %27 = vector.load %arg6[%c0_40, %c20] : memref<256x36xbf16, #tpu.memory_space<vmem>>, vector<256x4xbf16>
    tpu.vector_store %arg6[%c0_40, %c20], %26 {strides = array<i32>} : memref<256x36xbf16, #tpu.memory_space<vmem>>, vector<256x4xbf16>,
    %c2_41 = arith.constant 2 : index
    %c0_42 = arith.constant 0 : index
    %c0_43 = arith.constant 0 : index
    %28 = vector.load %arg5[%c2_41, %c0_42, %c0_43] : memref<18x18x4xbf16, #tpu.memory_space<vmem>>, vector<16x16x4xbf16>
    %29 = vector.shape_cast %28 : vector<16x16x4xbf16> to vector<256x4xbf16>
    %c0_44 = arith.constant 0 : index
    %c24 = arith.constant 24 : index
    %30 = vector.load %arg6[%c0_44, %c24] : memref<256x36xbf16, #tpu.memory_space<vmem>>, vector<256x4xbf16>
    tpu.vector_store %arg6[%c0_44, %c24], %29 {strides = array<i32>} : memref<256x36xbf16, #tpu.memory_space<vmem>>, vector<256x4xbf16>,
    %c2_45 = arith.constant 2 : index
    %c1_46 = arith.constant 1 : index
    %c0_47 = arith.constant 0 : index
    %31 = vector.load %arg5[%c2_45, %c1_46, %c0_47] : memref<18x18x4xbf16, #tpu.memory_space<vmem>>, vector<16x16x4xbf16>
    %32 = vector.shape_cast %31 : vector<16x16x4xbf16> to vector<256x4xbf16>
    %c0_48 = arith.constant 0 : index
    %c28 = arith.constant 28 : index
    %33 = vector.load %arg6[%c0_48, %c28] : memref<256x36xbf16, #tpu.memory_space<vmem>>, vector<256x4xbf16>
    tpu.vector_store %arg6[%c0_48, %c28], %32 {strides = array<i32>} : memref<256x36xbf16, #tpu.memory_space<vmem>>, vector<256x4xbf16>,
    %c2_49 = arith.constant 2 : index
    %c2_50 = arith.constant 2 : index
    %c0_51 = arith.constant 0 : index
    %34 = vector.load %arg5[%c2_49, %c2_50, %c0_51] : memref<18x18x4xbf16, #tpu.memory_space<vmem>>, vector<16x16x4xbf16>
    %35 = vector.shape_cast %34 : vector<16x16x4xbf16> to vector<256x4xbf16>
    %c0_52 = arith.constant 0 : index
    %c32 = arith.constant 32 : index
    %36 = vector.load %arg6[%c0_52, %c32] : memref<256x36xbf16, #tpu.memory_space<vmem>>, vector<256x4xbf16>
    tpu.vector_store %arg6[%c0_52, %c32], %35 {strides = array<i32>} : memref<256x36xbf16, #tpu.memory_space<vmem>>, vector<256x4xbf16>,
    %c0_53 = arith.constant 0 : index
    %c0_54 = arith.constant 0 : index
    %37 = vector.load %arg6[%c0_53, %c0_54] : memref<256x36xbf16, #tpu.memory_space<vmem>>, vector<256x36xbf16>
    %c0_55 = arith.constant 0 : index
    %c0_56 = arith.constant 0 : index
    %38 = vector.load %arg2[%c0_55, %c0_56] : memref<36x4xbf16, #tpu.memory_space<vmem>>, vector<36x4xbf16>
    %cst_57 = arith.constant dense<0.000000e+00> : vector<256x4xf32>
    %39 = tpu.matmul %37, %38, %cst_57 {dimension_numbers = #tpu.dot_dimension_numbers<[1], [0], [0], [1], [0, 0, 1, 1], [], []>} : vector<256x36xbf16>, vector<36x4xbf16>, vector<256x4xf32> -> vector<256x4xf32>
    %c0_58 = arith.constant 0 : index
    %c0_59 = arith.constant 0 : index
    %c0_60 = arith.constant 0 : index
    %40 = vector.load %arg3[%c0_58, %c0_59, %c0_60] : memref<1x256x4xf32, #tpu.memory_space<vmem>>, vector<1x256x4xf32>
    %41 = vector.shape_cast %40 : vector<1x256x4xf32> to vector<256x4xf32>
    %42 = vector.shape_cast %39 : vector<256x4xf32> to vector<1x256x4xf32>
    tpu.vector_store %arg3[%c0_58, %c0_59, %c0_60], %42 {strides = array<i32>} : memref<1x256x4xf32, #tpu.memory_space<vmem>>, vector<1x256x4xf32>,
    %cst_61 = arith.constant dense<0.000000e+00> : vector<4xf32>
    %43 = vector.multi_reduction <add>, %39, %cst_61 [0] : vector<256x4xf32> to vector<4xf32>
    %44 = vector.shape_cast %43 : vector<4xf32> to vector<1x4xf32>
    %cst_62 = arith.constant 3.906250e-03 : f32
    %45 = vector.broadcast %cst_62 : f32 to vector<1x4xf32>
    %46 = arith.mulf %44, %45 : vector<1x4xf32>
    %47 = vector.broadcast %46 : vector<1x4xf32> to vector<256x4xf32>
    %48 = arith.subf %39, %47 : vector<256x4xf32>
    %c0_63 = arith.constant 0 : index
    %c0_64 = arith.constant 0 : index
    %c0_65 = arith.constant 0 : index
    %49 = vector.load %arg4[%c0_63, %c0_64, %c0_65] : memref<1x2x4xf32, #tpu.memory_space<vmem>>, vector<1x1x4xf32>
    %50 = vector.shape_cast %49 : vector<1x1x4xf32> to vector<1x4xf32>
    %51 = vector.shape_cast %44 : vector<1x4xf32> to vector<1x1x4xf32>
    tpu.vector_store %arg4[%c0_63, %c0_64, %c0_65], %51 {strides = array<i32>} : memref<1x2x4xf32, #tpu.memory_space<vmem>>, vector<1x1x4xf32>,
    %52 = arith.mulf %48, %48 : vector<256x4xf32>
    %cst_66 = arith.constant dense<0.000000e+00> : vector<4xf32>
    %53 = vector.multi_reduction <add>, %52, %cst_66 [0] : vector<256x4xf32> to vector<4xf32>
    %54 = vector.shape_cast %53 : vector<4xf32> to vector<1x4xf32>
    %c0_67 = arith.constant 0 : index
    %c1_68 = arith.constant 1 : index
    %c0_69 = arith.constant 0 : index
    %55 = vector.load %arg4[%c0_67, %c1_68, %c0_69] : memref<1x2x4xf32, #tpu.memory_space<vmem>>, vector<1x1x4xf32>
    %56 = vector.shape_cast %55 : vector<1x1x4xf32> to vector<1x4xf32>
    %57 = vector.shape_cast %54 : vector<1x4xf32> to vector<1x1x4xf32>
    tpu.vector_store %arg4[%c0_67, %c1_68, %c0_69], %57 {strides = array<i32>} : memref<1x2x4xf32, #tpu.memory_space<vmem>>, vector<1x1x4xf32>,
    return
  }
  func.func @transform_0(%arg0: i32) -> (i32, i32, i32, i32) {
    %c0_i32 = arith.constant 0 : i32
    %c0_i32_0 = arith.constant 0 : i32
    %c0_i32_1 = arith.constant 0 : i32
    %c0_i32_2 = arith.constant 0 : i32
    return %arg0, %c0_i32, %c0_i32_0, %c0_i32_1 : i32, i32, i32, i32
  }
  func.func @transform_1(%arg0: i32) -> (i32, i32) {
    %c0_i32 = arith.constant 0 : i32
    %c0_i32_0 = arith.constant 0 : i32
    %c0_i32_1 = arith.constant 0 : i32
    return %c0_i32, %c0_i32_0 : i32, i32
  }
  func.func @transform_2(%arg0: i32) -> (i32, i32, i32) {
    %c0_i32 = arith.constant 0 : i32
    %c0_i32_0 = arith.constant 0 : i32
    %c0_i32_1 = arith.constant 0 : i32
    return %arg0, %c0_i32, %c0_i32_0 : i32, i32, i32
  }
  func.func @transform_3(%arg0: i32) -> (i32, i32, i32) {
    %c0_i32 = arith.constant 0 : i32
    %c0_i32_0 = arith.constant 0 : i32
    %c0_i32_1 = arith.constant 0 : i32
    return %arg0, %c0_i32, %c0_i32_0 : i32, i32, i32
  }
}

module attributes {stable_mosaic.version = 11 : i64} {
  func.func @_bn_relu_conv2_moments_kernel(%arg0: i32, %arg1: memref<1x256x4xf32, #tpu.memory_space<vmem>>, %arg2: memref<1x4xf32, #tpu.memory_space<vmem>>, %arg3: memref<1x4xf32, #tpu.memory_space<vmem>>, %arg4: memref<36x4xbf16, #tpu.memory_space<vmem>>, %arg5: memref<1x256x4xf32, #tpu.memory_space<vmem>>, %arg6: memref<1x2x4xf32, #tpu.memory_space<vmem>>, %arg7: memref<18x18x4xbf16, #tpu.memory_space<vmem>>, %arg8: memref<256x36xbf16, #tpu.memory_space<vmem>>) attributes {dimension_semantics = [#tpu.dimension_semantics<parallel>], iteration_bounds = array<i64: 2>, scalar_prefetch = 0 : i64, scratch_operands = 2 : i64, tpu.core_type = #tpu.core_type<tc>, window_params = [{transform_indices = @transform_0, window_bounds = array<i64: 1, 256, 4>}, {pipeline_mode = #tpu.pipeline_mode<synchronous>, transform_indices = @transform_1, window_bounds = array<i64: 1, 4>}, {pipeline_mode = #tpu.pipeline_mode<synchronous>, transform_indices = @transform_2, window_bounds = array<i64: 1, 4>}, {pipeline_mode = #tpu.pipeline_mode<synchronous>, transform_indices = @transform_3, window_bounds = array<i64: 36, 4>}, {transform_indices = @transform_4, window_bounds = array<i64: 1, 256, 4>}, {transform_indices = @transform_5, window_bounds = array<i64: 1, 2, 4>}]} {
    %c0 = arith.constant 0 : index
    %c0_0 = arith.constant 0 : index
    %c0_1 = arith.constant 0 : index
    %0 = vector.load %arg1[%c0, %c0_0, %c0_1] : memref<1x256x4xf32, #tpu.memory_space<vmem>>, vector<1x256x4xf32>
    %1 = vector.shape_cast %0 : vector<1x256x4xf32> to vector<256x4xf32>
    %c0_2 = arith.constant 0 : index
    %c0_3 = arith.constant 0 : index
    %2 = vector.load %arg2[%c0_2, %c0_3] : memref<1x4xf32, #tpu.memory_space<vmem>>, vector<1x4xf32>
    %3 = vector.broadcast %2 : vector<1x4xf32> to vector<256x4xf32>
    %4 = arith.mulf %1, %3 : vector<256x4xf32>
    %c0_4 = arith.constant 0 : index
    %c0_5 = arith.constant 0 : index
    %5 = vector.load %arg3[%c0_4, %c0_5] : memref<1x4xf32, #tpu.memory_space<vmem>>, vector<1x4xf32>
    %6 = vector.broadcast %5 : vector<1x4xf32> to vector<256x4xf32>
    %7 = arith.addf %4, %6 : vector<256x4xf32>
    %cst = arith.constant 0.000000e+00 : f32
    %8 = vector.broadcast %cst : f32 to vector<256x4xf32>
    %9 = arith.maximumf %7, %8 : vector<256x4xf32>
    %10 = arith.truncf %9 : vector<256x4xf32> to vector<256x4xbf16>
    %11 = vector.shape_cast %10 : vector<256x4xbf16> to vector<16x16x4xbf16>
    %cst_6 = arith.constant 0.000000e+00 : bf16
    %12 = vector.broadcast %cst_6 : bf16 to vector<1x18x4xbf16>
    %cst_7 = arith.constant 0.000000e+00 : bf16
    %13 = vector.broadcast %cst_7 : bf16 to vector<18x1x4xbf16>
    %c0_8 = arith.constant 0 : index
    %c0_9 = arith.constant 0 : index
    %c0_10 = arith.constant 0 : index
    %14 = vector.load %arg7[%c0_8, %c0_9, %c0_10] : memref<18x18x4xbf16, #tpu.memory_space<vmem>>, vector<1x18x4xbf16>
    tpu.vector_store %arg7[%c0_8, %c0_9, %c0_10], %12 {strides = array<i32>} : memref<18x18x4xbf16, #tpu.memory_space<vmem>>, vector<1x18x4xbf16>,
    %c17 = arith.constant 17 : index
    %c0_11 = arith.constant 0 : index
    %c0_12 = arith.constant 0 : index
    %15 = vector.load %arg7[%c17, %c0_11, %c0_12] : memref<18x18x4xbf16, #tpu.memory_space<vmem>>, vector<1x18x4xbf16>
    tpu.vector_store %arg7[%c17, %c0_11, %c0_12], %12 {strides = array<i32>} : memref<18x18x4xbf16, #tpu.memory_space<vmem>>, vector<1x18x4xbf16>,
    %c0_13 = arith.constant 0 : index
    %c0_14 = arith.constant 0 : index
    %c0_15 = arith.constant 0 : index
    %16 = vector.load %arg7[%c0_13, %c0_14, %c0_15] : memref<18x18x4xbf16, #tpu.memory_space<vmem>>, vector<18x1x4xbf16>
    tpu.vector_store %arg7[%c0_13, %c0_14, %c0_15], %13 {strides = array<i32>} : memref<18x18x4xbf16, #tpu.memory_space<vmem>>, vector<18x1x4xbf16>,
    %c0_16 = arith.constant 0 : index
    %c17_17 = arith.constant 17 : index
    %c0_18 = arith.constant 0 : index
    %17 = vector.load %arg7[%c0_16, %c17_17, %c0_18] : memref<18x18x4xbf16, #tpu.memory_space<vmem>>, vector<18x1x4xbf16>
    tpu.vector_store %arg7[%c0_16, %c17_17, %c0_18], %13 {strides = array<i32>} : memref<18x18x4xbf16, #tpu.memory_space<vmem>>, vector<18x1x4xbf16>,
    %c1 = arith.constant 1 : index
    %c1_19 = arith.constant 1 : index
    %c0_20 = arith.constant 0 : index
    %18 = vector.load %arg7[%c1, %c1_19, %c0_20] : memref<18x18x4xbf16, #tpu.memory_space<vmem>>, vector<16x16x4xbf16>
    tpu.vector_store %arg7[%c1, %c1_19, %c0_20], %11 {strides = array<i32>} : memref<18x18x4xbf16, #tpu.memory_space<vmem>>, vector<16x16x4xbf16>,
    %c0_21 = arith.constant 0 : index
    %c0_22 = arith.constant 0 : index
    %c0_23 = arith.constant 0 : index
    %19 = vector.load %arg7[%c0_21, %c0_22, %c0_23] : memref<18x18x4xbf16, #tpu.memory_space<vmem>>, vector<16x16x4xbf16>
    %20 = vector.shape_cast %19 : vector<16x16x4xbf16> to vector<256x4xbf16>
    %c0_24 = arith.constant 0 : index
    %c0_25 = arith.constant 0 : index
    %21 = vector.load %arg8[%c0_24, %c0_25] : memref<256x36xbf16, #tpu.memory_space<vmem>>, vector<256x4xbf16>
    tpu.vector_store %arg8[%c0_24, %c0_25], %20 {strides = array<i32>} : memref<256x36xbf16, #tpu.memory_space<vmem>>, vector<256x4xbf16>,
    %c0_26 = arith.constant 0 : index
    %c1_27 = arith.constant 1 : index
    %c0_28 = arith.constant 0 : index
    %22 = vector.load %arg7[%c0_26, %c1_27, %c0_28] : memref<18x18x4xbf16, #tpu.memory_space<vmem>>, vector<16x16x4xbf16>
    %23 = vector.shape_cast %22 : vector<16x16x4xbf16> to vector<256x4xbf16>
    %c0_29 = arith.constant 0 : index
    %c4 = arith.constant 4 : index
    %24 = vector.load %arg8[%c0_29, %c4] : memref<256x36xbf16, #tpu.memory_space<vmem>>, vector<256x4xbf16>
    tpu.vector_store %arg8[%c0_29, %c4], %23 {strides = array<i32>} : memref<256x36xbf16, #tpu.memory_space<vmem>>, vector<256x4xbf16>,
    %c0_30 = arith.constant 0 : index
    %c2 = arith.constant 2 : index
    %c0_31 = arith.constant 0 : index
    %25 = vector.load %arg7[%c0_30, %c2, %c0_31] : memref<18x18x4xbf16, #tpu.memory_space<vmem>>, vector<16x16x4xbf16>
    %26 = vector.shape_cast %25 : vector<16x16x4xbf16> to vector<256x4xbf16>
    %c0_32 = arith.constant 0 : index
    %c8 = arith.constant 8 : index
    %27 = vector.load %arg8[%c0_32, %c8] : memref<256x36xbf16, #tpu.memory_space<vmem>>, vector<256x4xbf16>
    tpu.vector_store %arg8[%c0_32, %c8], %26 {strides = array<i32>} : memref<256x36xbf16, #tpu.memory_space<vmem>>, vector<256x4xbf16>,
    %c1_33 = arith.constant 1 : index
    %c0_34 = arith.constant 0 : index
    %c0_35 = arith.constant 0 : index
    %28 = vector.load %arg7[%c1_33, %c0_34, %c0_35] : memref<18x18x4xbf16, #tpu.memory_space<vmem>>, vector<16x16x4xbf16>
    %29 = vector.shape_cast %28 : vector<16x16x4xbf16> to vector<256x4xbf16>
    %c0_36 = arith.constant 0 : index
    %c12 = arith.constant 12 : index
    %30 = vector.load %arg8[%c0_36, %c12] : memref<256x36xbf16, #tpu.memory_space<vmem>>, vector<256x4xbf16>
    tpu.vector_store %arg8[%c0_36, %c12], %29 {strides = array<i32>} : memref<256x36xbf16, #tpu.memory_space<vmem>>, vector<256x4xbf16>,
    %c1_37 = arith.constant 1 : index
    %c1_38 = arith.constant 1 : index
    %c0_39 = arith.constant 0 : index
    %31 = vector.load %arg7[%c1_37, %c1_38, %c0_39] : memref<18x18x4xbf16, #tpu.memory_space<vmem>>, vector<16x16x4xbf16>
    %32 = vector.shape_cast %31 : vector<16x16x4xbf16> to vector<256x4xbf16>
    %c0_40 = arith.constant 0 : index
    %c16 = arith.constant 16 : index
    %33 = vector.load %arg8[%c0_40, %c16] : memref<256x36xbf16, #tpu.memory_space<vmem>>, vector<256x4xbf16>
    tpu.vector_store %arg8[%c0_40, %c16], %32 {strides = array<i32>} : memref<256x36xbf16, #tpu.memory_space<vmem>>, vector<256x4xbf16>,
    %c1_41 = arith.constant 1 : index
    %c2_42 = arith.constant 2 : index
    %c0_43 = arith.constant 0 : index
    %34 = vector.load %arg7[%c1_41, %c2_42, %c0_43] : memref<18x18x4xbf16, #tpu.memory_space<vmem>>, vector<16x16x4xbf16>
    %35 = vector.shape_cast %34 : vector<16x16x4xbf16> to vector<256x4xbf16>
    %c0_44 = arith.constant 0 : index
    %c20 = arith.constant 20 : index
    %36 = vector.load %arg8[%c0_44, %c20] : memref<256x36xbf16, #tpu.memory_space<vmem>>, vector<256x4xbf16>
    tpu.vector_store %arg8[%c0_44, %c20], %35 {strides = array<i32>} : memref<256x36xbf16, #tpu.memory_space<vmem>>, vector<256x4xbf16>,
    %c2_45 = arith.constant 2 : index
    %c0_46 = arith.constant 0 : index
    %c0_47 = arith.constant 0 : index
    %37 = vector.load %arg7[%c2_45, %c0_46, %c0_47] : memref<18x18x4xbf16, #tpu.memory_space<vmem>>, vector<16x16x4xbf16>
    %38 = vector.shape_cast %37 : vector<16x16x4xbf16> to vector<256x4xbf16>
    %c0_48 = arith.constant 0 : index
    %c24 = arith.constant 24 : index
    %39 = vector.load %arg8[%c0_48, %c24] : memref<256x36xbf16, #tpu.memory_space<vmem>>, vector<256x4xbf16>
    tpu.vector_store %arg8[%c0_48, %c24], %38 {strides = array<i32>} : memref<256x36xbf16, #tpu.memory_space<vmem>>, vector<256x4xbf16>,
    %c2_49 = arith.constant 2 : index
    %c1_50 = arith.constant 1 : index
    %c0_51 = arith.constant 0 : index
    %40 = vector.load %arg7[%c2_49, %c1_50, %c0_51] : memref<18x18x4xbf16, #tpu.memory_space<vmem>>, vector<16x16x4xbf16>
    %41 = vector.shape_cast %40 : vector<16x16x4xbf16> to vector<256x4xbf16>
    %c0_52 = arith.constant 0 : index
    %c28 = arith.constant 28 : index
    %42 = vector.load %arg8[%c0_52, %c28] : memref<256x36xbf16, #tpu.memory_space<vmem>>, vector<256x4xbf16>
    tpu.vector_store %arg8[%c0_52, %c28], %41 {strides = array<i32>} : memref<256x36xbf16, #tpu.memory_space<vmem>>, vector<256x4xbf16>,
    %c2_53 = arith.constant 2 : index
    %c2_54 = arith.constant 2 : index
    %c0_55 = arith.constant 0 : index
    %43 = vector.load %arg7[%c2_53, %c2_54, %c0_55] : memref<18x18x4xbf16, #tpu.memory_space<vmem>>, vector<16x16x4xbf16>
    %44 = vector.shape_cast %43 : vector<16x16x4xbf16> to vector<256x4xbf16>
    %c0_56 = arith.constant 0 : index
    %c32 = arith.constant 32 : index
    %45 = vector.load %arg8[%c0_56, %c32] : memref<256x36xbf16, #tpu.memory_space<vmem>>, vector<256x4xbf16>
    tpu.vector_store %arg8[%c0_56, %c32], %44 {strides = array<i32>} : memref<256x36xbf16, #tpu.memory_space<vmem>>, vector<256x4xbf16>,
    %c0_57 = arith.constant 0 : index
    %c0_58 = arith.constant 0 : index
    %46 = vector.load %arg8[%c0_57, %c0_58] : memref<256x36xbf16, #tpu.memory_space<vmem>>, vector<256x36xbf16>
    %c0_59 = arith.constant 0 : index
    %c0_60 = arith.constant 0 : index
    %47 = vector.load %arg4[%c0_59, %c0_60] : memref<36x4xbf16, #tpu.memory_space<vmem>>, vector<36x4xbf16>
    %cst_61 = arith.constant dense<0.000000e+00> : vector<256x4xf32>
    %48 = tpu.matmul %46, %47, %cst_61 {dimension_numbers = #tpu.dot_dimension_numbers<[1], [0], [0], [1], [0, 0, 1, 1], [], []>} : vector<256x36xbf16>, vector<36x4xbf16>, vector<256x4xf32> -> vector<256x4xf32>
    %c0_62 = arith.constant 0 : index
    %c0_63 = arith.constant 0 : index
    %c0_64 = arith.constant 0 : index
    %49 = vector.load %arg5[%c0_62, %c0_63, %c0_64] : memref<1x256x4xf32, #tpu.memory_space<vmem>>, vector<1x256x4xf32>
    %50 = vector.shape_cast %49 : vector<1x256x4xf32> to vector<256x4xf32>
    %51 = vector.shape_cast %48 : vector<256x4xf32> to vector<1x256x4xf32>
    tpu.vector_store %arg5[%c0_62, %c0_63, %c0_64], %51 {strides = array<i32>} : memref<1x256x4xf32, #tpu.memory_space<vmem>>, vector<1x256x4xf32>,
    %cst_65 = arith.constant dense<0.000000e+00> : vector<4xf32>
    %52 = vector.multi_reduction <add>, %48, %cst_65 [0] : vector<256x4xf32> to vector<4xf32>
    %53 = vector.shape_cast %52 : vector<4xf32> to vector<1x4xf32>
    %cst_66 = arith.constant 3.906250e-03 : f32
    %54 = vector.broadcast %cst_66 : f32 to vector<1x4xf32>
    %55 = arith.mulf %53, %54 : vector<1x4xf32>
    %56 = vector.broadcast %55 : vector<1x4xf32> to vector<256x4xf32>
    %57 = arith.subf %48, %56 : vector<256x4xf32>
    %c0_67 = arith.constant 0 : index
    %c0_68 = arith.constant 0 : index
    %c0_69 = arith.constant 0 : index
    %58 = vector.load %arg6[%c0_67, %c0_68, %c0_69] : memref<1x2x4xf32, #tpu.memory_space<vmem>>, vector<1x1x4xf32>
    %59 = vector.shape_cast %58 : vector<1x1x4xf32> to vector<1x4xf32>
    %60 = vector.shape_cast %53 : vector<1x4xf32> to vector<1x1x4xf32>
    tpu.vector_store %arg6[%c0_67, %c0_68, %c0_69], %60 {strides = array<i32>} : memref<1x2x4xf32, #tpu.memory_space<vmem>>, vector<1x1x4xf32>,
    %61 = arith.mulf %57, %57 : vector<256x4xf32>
    %cst_70 = arith.constant dense<0.000000e+00> : vector<4xf32>
    %62 = vector.multi_reduction <add>, %61, %cst_70 [0] : vector<256x4xf32> to vector<4xf32>
    %63 = vector.shape_cast %62 : vector<4xf32> to vector<1x4xf32>
    %c0_71 = arith.constant 0 : index
    %c1_72 = arith.constant 1 : index
    %c0_73 = arith.constant 0 : index
    %64 = vector.load %arg6[%c0_71, %c1_72, %c0_73] : memref<1x2x4xf32, #tpu.memory_space<vmem>>, vector<1x1x4xf32>
    %65 = vector.shape_cast %64 : vector<1x1x4xf32> to vector<1x4xf32>
    %66 = vector.shape_cast %63 : vector<1x4xf32> to vector<1x1x4xf32>
    tpu.vector_store %arg6[%c0_71, %c1_72, %c0_73], %66 {strides = array<i32>} : memref<1x2x4xf32, #tpu.memory_space<vmem>>, vector<1x1x4xf32>,
    return
  }
  func.func @transform_0(%arg0: i32) -> (i32, i32, i32) {
    %c0_i32 = arith.constant 0 : i32
    %c0_i32_0 = arith.constant 0 : i32
    %c0_i32_1 = arith.constant 0 : i32
    return %arg0, %c0_i32, %c0_i32_0 : i32, i32, i32
  }
  func.func @transform_1(%arg0: i32) -> (i32, i32) {
    %c0_i32 = arith.constant 0 : i32
    %c0_i32_0 = arith.constant 0 : i32
    %c0_i32_1 = arith.constant 0 : i32
    return %c0_i32, %c0_i32_0 : i32, i32
  }
  func.func @transform_2(%arg0: i32) -> (i32, i32) {
    %c0_i32 = arith.constant 0 : i32
    %c0_i32_0 = arith.constant 0 : i32
    %c0_i32_1 = arith.constant 0 : i32
    return %c0_i32, %c0_i32_0 : i32, i32
  }
  func.func @transform_3(%arg0: i32) -> (i32, i32) {
    %c0_i32 = arith.constant 0 : i32
    %c0_i32_0 = arith.constant 0 : i32
    %c0_i32_1 = arith.constant 0 : i32
    return %c0_i32, %c0_i32_0 : i32, i32
  }
  func.func @transform_4(%arg0: i32) -> (i32, i32, i32) {
    %c0_i32 = arith.constant 0 : i32
    %c0_i32_0 = arith.constant 0 : i32
    %c0_i32_1 = arith.constant 0 : i32
    return %arg0, %c0_i32, %c0_i32_0 : i32, i32, i32
  }
  func.func @transform_5(%arg0: i32) -> (i32, i32, i32) {
    %c0_i32 = arith.constant 0 : i32
    %c0_i32_0 = arith.constant 0 : i32
    %c0_i32_1 = arith.constant 0 : i32
    return %arg0, %c0_i32, %c0_i32_0 : i32, i32, i32
  }
}

module attributes {stable_mosaic.version = 11 : i64} {
  func.func @_bn2_residual_kernel(%arg0: i32, %arg1: memref<8x128xf32, #tpu.memory_space<vmem>>, %arg2: memref<8x128xf32, #tpu.memory_space<vmem>>, %arg3: memref<1x128xf32, #tpu.memory_space<vmem>>, %arg4: memref<1x128xf32, #tpu.memory_space<vmem>>, %arg5: memref<8x128xf32, #tpu.memory_space<vmem>>) attributes {dimension_semantics = [#tpu.dimension_semantics<parallel>], iteration_bounds = array<i64: 2>, scalar_prefetch = 0 : i64, scratch_operands = 0 : i64, tpu.core_type = #tpu.core_type<tc>, window_params = [{transform_indices = @transform_0, window_bounds = array<i64: 8, 128>}, {transform_indices = @transform_1, window_bounds = array<i64: 8, 128>}, {pipeline_mode = #tpu.pipeline_mode<synchronous>, transform_indices = @transform_2, window_bounds = array<i64: 1, 128>}, {pipeline_mode = #tpu.pipeline_mode<synchronous>, transform_indices = @transform_3, window_bounds = array<i64: 1, 128>}, {transform_indices = @transform_4, window_bounds = array<i64: 8, 128>}]} {
    %c0 = arith.constant 0 : index
    %c0_0 = arith.constant 0 : index
    %0 = vector.load %arg1[%c0, %c0_0] : memref<8x128xf32, #tpu.memory_space<vmem>>, vector<8x128xf32>
    %c0_1 = arith.constant 0 : index
    %c0_2 = arith.constant 0 : index
    %1 = vector.load %arg3[%c0_1, %c0_2] : memref<1x128xf32, #tpu.memory_space<vmem>>, vector<1x128xf32>
    %2 = vector.broadcast %1 : vector<1x128xf32> to vector<8x128xf32>
    %3 = arith.mulf %0, %2 : vector<8x128xf32>
    %c0_3 = arith.constant 0 : index
    %c0_4 = arith.constant 0 : index
    %4 = vector.load %arg4[%c0_3, %c0_4] : memref<1x128xf32, #tpu.memory_space<vmem>>, vector<1x128xf32>
    %5 = vector.broadcast %4 : vector<1x128xf32> to vector<8x128xf32>
    %6 = arith.addf %3, %5 : vector<8x128xf32>
    %c0_5 = arith.constant 0 : index
    %c0_6 = arith.constant 0 : index
    %7 = vector.load %arg2[%c0_5, %c0_6] : memref<8x128xf32, #tpu.memory_space<vmem>>, vector<8x128xf32>
    %8 = arith.addf %6, %7 : vector<8x128xf32>
    %c0_7 = arith.constant 0 : index
    %c0_8 = arith.constant 0 : index
    %9 = vector.load %arg5[%c0_7, %c0_8] : memref<8x128xf32, #tpu.memory_space<vmem>>, vector<8x128xf32>
    tpu.vector_store %arg5[%c0_7, %c0_8], %8 {strides = array<i32>} : memref<8x128xf32, #tpu.memory_space<vmem>>, vector<8x128xf32>,
    return
  }
  func.func @transform_0(%arg0: i32) -> (i32, i32) {
    %c0_i32 = arith.constant 0 : i32
    %c0_i32_0 = arith.constant 0 : i32
    return %arg0, %c0_i32 : i32, i32
  }
  func.func @transform_1(%arg0: i32) -> (i32, i32) {
    %c0_i32 = arith.constant 0 : i32
    %c0_i32_0 = arith.constant 0 : i32
    return %arg0, %c0_i32 : i32, i32
  }
  func.func @transform_2(%arg0: i32) -> (i32, i32) {
    %c0_i32 = arith.constant 0 : i32
    %c0_i32_0 = arith.constant 0 : i32
    %c0_i32_1 = arith.constant 0 : i32
    return %c0_i32, %c0_i32_0 : i32, i32
  }
  func.func @transform_3(%arg0: i32) -> (i32, i32) {
    %c0_i32 = arith.constant 0 : i32
    %c0_i32_0 = arith.constant 0 : i32
    %c0_i32_1 = arith.constant 0 : i32
    return %c0_i32, %c0_i32_0 : i32, i32
  }
  func.func @transform_4(%arg0: i32) -> (i32, i32) {
    %c0_i32 = arith.constant 0 : i32
    %c0_i32_0 = arith.constant 0 : i32
    return %arg0, %c0_i32 : i32, i32
  }
}

</mosaic_0001>

<bundles_post_ra>
// kernel: basic_block.5
= control target key start
LH: loop header
LB: loop body
LE: loop exit
PB: predicated region body
PF: predicated region fallthrough
CT: control target
= control target key end

     0   :  { %s319_s15 = smov 0   ;;  %s363_s0 = inlined_call_operand.vmem [shape: f32[16,128], index: 0, kind: input, shape index: {}]   ;;  %s364_s1 = inlined_call_operand.vmem [shape: f32[16,128], index: 1, kind: input, shape index: {}]   ;;  %s365_s2 = inlined_call_operand.vmem [shape: f32[1,128], index: 2, kind: input, shape index: {}]   ;;  %s366_s3 = inlined_call_operand.vmem [shape: f32[1,128], index: 3, kind: input, shape index: {}]   ;;  %s367_s4 = inlined_call_operand.vmem [shape: f32[16,128], index: 4, kind: output, shape index: {}]  }
   0x1 LB: > { %s295_s16 = sadd.s32 4294967295, %s321_s15   ;;  %p299_p0 = scmp.ge.s32.totalorder %s321_s15, 1  ;;  %s321_s15 = sphi %s319_s15, %s14_s15  }
   0x2   : > { %p170_p1 = scmp.lt.s32.totalorder %s321_s15, 3 }
   0x4   : > { %p171_p2 = pnand %p299_p0, %p170_p1 }
   0x5   : > { %p198_p3 = scmp.lt.s32.totalorder (!%p171_p2), %s295_s16, 1  ;;  %v303_v0 = vld [vmem:[%s365_s2] ss:$0 sm:$0xff] (!%p171_p2) }
   0x6   : > { %174 = sbr.rel (%p171_p2) target bundleno = 24 (0x18), region = 36  ;;  %v304_v2 = vld [vmem:[%s366_s3] ss:$0 sm:$0xff] (!%p171_p2) }
   0xd   : > { %s369_s16 = smov (!%p198_p3, %s295_s16), 1 }
   0xe   : > { %s300_s17 = sshll.u32 %s369_s16, 3 }
   0xf   : > { %s201_s22 = scalar_lea.vmem %s363_s0, %s300_s17  ;;  %s205_s25 = scalar_lea.vmem %s364_s1, %s300_s17 }
  0x10   : > { %v210_v1 = vld [vmem:[%s201_s22] sm:$0xff]  ;;  %s209_s30 = scalar_lea.vmem %s367_s4, %s300_s17 }
  0x11   : > { %v218_v3 = vmul.f32 %v303_v0, %v210_v1  ;;  %v227_v4 = vld [vmem:[%s205_s25] sm:$0xff] }
  0x13   : > { %v226_v5 = vadd.f32 %v304_v2, %v218_v3 }
  0x15   : > { %v228_v6 = vadd.f32 %v227_v4, %v226_v5 }
  0x17   : > { %229 = vst [vmem:[%s209_s30] sm:$0xff] %v228_v6 }
  0x18 PF: > { %s14_s15 = sadd.s32 1, %s321_s15  }
  0x19   : > { %p11_p4 = scmp.ge.s32.totalorder %s14_s15, 4  }
  0x1b   :  { %13 = sbr.rel (!%p11_p4) target bundleno = 1 (0x1), region = 69 }

// kernel: basic_block.4
= control target key start
LH: loop header
LB: loop body
LE: loop exit
PB: predicated region body
PF: predicated region fallthrough
CT: control target
= control target key end

     0   :  { %s5188_s18 = smov 0   ;;  %s7028_s0 = inlined_call_operand.vmem [shape: f32[2,256,4], index: 0, kind: input, shape index: {}]   ;;  %s7029_s1 = inlined_call_operand.vmem [shape: f32[1,4], index: 1, kind: input, shape index: {}]   ;;  %s7030_s2 = inlined_call_operand.vmem [shape: f32[1,4], index: 2, kind: input, shape index: {}]   ;;  %s7031_s3 = inlined_call_operand.vmem [shape: bf16[36,4], index: 3, kind: input, shape index: {}]   ;;  %s7032_s4 = inlined_call_operand.vmem [shape: f32[2,256,4], index: 4, kind: output, shape index: {0}]   ;;  %s7033_s5 = inlined_call_operand.vmem [shape: f32[2,2,4], index: 5, kind: output, shape index: {1}]  }
   0x1 LB: > { %s4711_s19 = sadd.s32 4294967295, %s5147_s18   ;;  %p4715_p0 = scmp.ge.s32.totalorder %s5147_s18, 1  ;;  %s5147_s18 = sphi %s5188_s18, %s16_s18  }
   0x2   : > { %p190_p1 = scmp.lt.s32.totalorder %s5147_s18, 3 }
   0x4   : > { %p191_p2 = pnand %p4715_p0, %p190_p1 }
   0x5   : > { %vm395_vm0 = vcmask (!%p191_p2), 27648   ;;  %vm7034_vm1 = vcmask (!%p191_p2), 24576   ;;  %vm405_vm2 = vsmask.f32 (!%p191_p2), 256  ;;  %v5149_v0 = vmov (!%p191_p2), 0   ;;  %p222_p3 = scmp.lt.s32.totalorder (!%p191_p2), %s4711_s19, 1 }
   0x6   : > { %194 = sbr.rel (%p191_p2) target bundleno = 875 (0x36b), region = 36  ;;  %396 = vst.msk [vmem:[#allocation2] sm:$0xf] (!%p191_p2), %vm395_vm0, %v5149_v0  ;;  %397 = vst.msk [vmem:[#allocation2 + $0x4] sm:$0xf] (!%p191_p2), %vm395_vm0, %v5149_v0  ;;  %vm1823_vm5 = vcmask (!%p191_p2), 1042432  }
   0x7   : > { %399 = vst.msk [vmem:[#allocation2 + $0x8] sm:$0x1] (!%p191_p2), %vm7034_vm1, %v5149_v0  ;;  %403 = vst.msk [vmem:[#allocation2 + $0xd4] sm:$0x1] (!%p191_p2), %vm7034_vm1, %v5149_v0  ;;  %vm461_vm4 = vsmask.f32 (!%p191_p2), 7938 }
   0x8   : > { %401 = vst.msk [vmem:[#allocation2 + $0xcc] sm:$0xf] (!%p191_p2), %vm395_vm0, %v5149_v0  ;;  %402 = vst.msk [vmem:[#allocation2 + $0xd0] sm:$0xf] (!%p191_p2), %vm395_vm0, %v5149_v0  ;;  %vm1824_vm6 = vcmask (!%p191_p2), 1046532   ;;  %s5150_s28 = smov (!%p191_p2), 8  }
   0x9   : > { %vm5204_vm3 = vmand (!%p191_p2), %vm7034_vm1, %vm405_vm2  ;;  %v413_v2 = vld [vmem:[#allocation2 + $0x18] sm:$0x1] (!%p191_p2)  ;;  %v410_v4 = vld [vmem:[#allocation2 + $0xc] sm:$0x1] (!%p191_p2)  ;;  %vm1227_vm9 = vsmask.f32 (!%p191_p2), 3328 }
   0xa   : > { %v414_v3 = vsel (!%p191_p2), %vm5204_vm3, 0, %v413_v2  ;;  %v416_v5 = vld [vmem:[#allocation2 + $0x24] sm:$0x1] (!%p191_p2)  ;;  %v411_v6 = vsel (!%p191_p2), %vm5204_vm3, 0, %v410_v4  ;;  %v419_v8 = vld [vmem:[#allocation2 + $0x30] sm:$0x1] (!%p191_p2)  ;;  %vm5218_vm7 = vmand (!%p191_p2), %vm7034_vm1, %vm461_vm4 }
   0xb   : > { %415 = vst [vmem:[#allocation2 + $0x18] sm:$0x1] (!%p191_p2), %v414_v3  ;;  %v417_v7 = vsel (!%p191_p2), %vm5204_vm3, 0, %v416_v5  ;;  %v5226_v10 = vld [vmem:[%s7029_s1] ss:$0 sm:$0xff] (!%p191_p2)  ;;  %v420_v11 = vsel (!%p191_p2), %vm5204_vm3, 0, %v419_v8  ;;  %vm5232_vm8 = vmor (!%p191_p2), %vm1823_vm5, %vm1824_vm6 }
   0xc   : > { %412 = vst [vmem:[#allocation2 + $0xc] sm:$0x1] (!%p191_p2), %v411_v6  ;;  %418 = vst [vmem:[#allocation2 + $0x24] sm:$0x1] (!%p191_p2), %v417_v7  ;;  %v466_v12 = vld [vmem:[#allocation2 + $0x14] sm:$0x1] (!%p191_p2) }
   0xd   : > { %s7180_s19 = smov (!%p222_p3, %s4711_s19), 1  ;;  %v5246_v14 = vld [vmem:[%s7030_s2] ss:$0 sm:$0xff]  ;;  %421 = vst [vmem:[#allocation2 + $0x30] sm:$0x1] %v420_v11  ;;  %v467_v15 = vsel %vm5218_vm7, 0, %v466_v12  ;;  %vm5298_vm13 = vmand %vm395_vm0, %vm461_vm4 }
   0xe   : > { %s4968_s20 = sshll.u32 %s7180_s19, 8  ;;  %v469_v16 = vld [vmem:[#allocation2 + $0x20] sm:$0x1]  ;;  %v463_v17 = vld [vmem:[#allocation2 + $0x8] sm:$0x1]  ;;  %s5151_s29 = smov 4  }
   0xf   : > { %s5241_s25 = scalar_lea.vmem %s7028_s0, %s4968_s20  ;;  %v1727_v18 = vld [vmem:[#allocation2] sm:$0xe]  ;;  %v1728_v19 = vld [vmem:[#allocation2 + $0x4] sm:$0xf]  ;;  %vm1228_vm10 = vsmask.f32 7440 }
  0x10   : > { %468 = vst [vmem:[#allocation2 + $0x14] sm:$0x1] %v467_v15  ;;  %v464_v20 = vsel %vm5218_vm7, 0, %v463_v17  ;;  %v4787_v21 = vrot.slane %v1727_v18, 9  ;;  %v1828_v22 = vrot.slane %v1728_v19, 5  ;;  %v239_v24 = vld [vmem:[%s5241_s25 + $0x10] sm:$0xff]  ;;  %vm5290_vm12 = vmor %vm1227_vm9, %vm1228_vm10 }
  0x11   : > { %v407_v23 = vld [vmem:[#allocation2] sm:$0x1]  ;;  %465 = vst [vmem:[#allocation2 + $0x8] sm:$0x1] %v464_v20  ;;  %v1180_v26 = vld [vmem:[#allocation2 + $0x4] sm:$0xf]  ;;  %v278_v28 = vmul.f32 %v5226_v10, %v239_v24 }
  0x12   : > { %v408_v25 = vsel %vm5204_vm3, 0, %v407_v23  ;;  %v240_v27 = vld [vmem:[%s5241_s25 + $0x18] sm:$0xff]  ;;  %v237_v29 = vld [vmem:[%s5241_s25] sm:$0xff]  ;;  %v470_v30 = vsel %vm5218_vm7, 0, %v469_v16  ;;  %v5262_v31 = vsel %vm5232_vm8, %v4787_v21, %v1828_v22  ;;  %v1830_v32 = vrot.slane %v1828_v22, 4  ;;  %v238_v35 = vld [vmem:[%s5241_s25 + $0x8] sm:$0xff] }
  0x13   : > { %409 = vst [vmem:[#allocation2] sm:$0x1] %v408_v25  ;;  %v1240_v33 = vshll.u32 %v1180_v26, 16  ;;  %v1244_v34 = vshrl.u32 %v1180_v26, 16  ;;  %v241_v36 = vld [vmem:[%s5241_s25 + $0x20] sm:$0xff]  ;;  %v242_v37 = vld [vmem:[%s5241_s25 + $0x28] sm:$0xff]  ;;  %v279_v38 = vmul.f32 %v5226_v10, %v240_v27  ;;  %v317_v39 = vadd.f32 %v5246_v14, %v278_v28 }
  0x14   : > { %471 = vst [vmem:[#allocation2 + $0x20] sm:$0x1] %v470_v30  ;;  %vm597_vm11 = vsmask.f32 4368  ;;  %v276_v40 = vmul.f32 %v5226_v10, %v237_v29  ;;  %v277_v41 = vmul.f32 %v5226_v10, %v238_v35  ;;  %v243_v42 = vld [vmem:[%s5241_s25 + $0x30] sm:$0xff]  ;;  %v280_v45 = vmul.f32 %v5226_v10, %v241_v36  ;;  %v244_v51 = vld [vmem:[%s5241_s25 + $0x38] sm:$0xff] }
  0x15   : > { %v5272_v43 = vrot.slane %v1240_v33, 5  ;;  %v1246_v44 = vrot.slane %v1244_v34, 4  ;;  %v281_v46 = vmul.f32 %v5226_v10, %v242_v37  ;;  %v318_v47 = vadd.f32 %v5246_v14, %v279_v38  ;;  %v929_v26 = vld [vmem:[#allocation2 + $0x18] sm:$0xf]  ;;  %vm5308_vm14 = vmor %vm405_vm2, %vm597_vm11  ;;  %s5152_s30 = smov 12   ;;  %s5153_s6 = smov 24  }
  0x16   : > { %v349_v48 = vmax.f32 %v317_v39, 0.0  ;;  %v315_v49 = vadd.f32 %v5246_v14, %v276_v40  ;;  %v316_v50 = vadd.f32 %v5246_v14, %v277_v41  ;;  %v319_v53 = vadd.f32 %v5246_v14, %v280_v45  ;;  %v922_v39 = vld [vmem:[#allocation2 + $0xc] sm:$0xf]  ;;  %s5154_s7 = smov 20   ;;  %s5155_s8 = smov 32  }
  0x17   : > { %v1247_v52 = vor.u32 %v1246_v44, %v5272_v43  ;;  %v320_v54 = vadd.f32 %v5246_v14, %v281_v46  ;;  %v282_v55 = vmul.f32 %v5226_v10, %v243_v42  ;;  %v350_v56 = vmax.f32 %v318_v47, 0.0  ;;  %s5156_s9 = smov 16   ;;  %s5157_s10 = smov 28   ;;  %v514_v21 = vld [vmem:[#allocation2 + $0xd4] sm:$0x1] }
  0x18   : > { %v4972_v57 = vpack.c.bf16 %v349_v48, %v349_v48  ;;  %v347_v58 = vmax.f32 %v315_v49, 0.0  ;;  %v348_v59 = vmax.f32 %v316_v50, 0.0  ;;  %v1729_v60 = vld [vmem:[#allocation2 + $0x8] sm:$0x1]  ;;  %v351_v63 = vmax.f32 %v319_v53, 0.0 }
  0x19   : > { %v1181_v61 = vld [vmem:[#allocation2 + $0x8] sm:$0x1]  ;;  %v1248_v62 = vrot.slane %v1247_v52, 4  ;;  %v283_v0 = vmul.f32 %v5226_v10, %v244_v51  ;;  %v5286_v2 = vadd.f32 %v5246_v14, %v282_v55  ;;  %v1831_v3 = vrot.slane %v1729_v60, 5  ;;  %v472_v55 = vld [vmem:[#allocation2 + $0x2c] sm:$0x1] }
  0x1a   : > { %v1179_v4 = vld [vmem:[#allocation2] sm:$0xf]  ;;  %v1250_v5 = vshll.u32 %v1181_v61, 16  ;;  %v4973_v6 = vpack.c.bf16 %v350_v56, %v350_v56  ;;  %v617_v7 = vshrl.u32 %v4972_v57, 16  ;;  %v620_v15 = vshll.u32 %v4972_v57, 16 }
  0x1b   : > { %v1231_v11 = vshrl.u32 %v1179_v4, 16  ;;  %v1234_v12 = vshll.u32 %v1179_v4, 16  ;;  %v4970_v16 = vpack.c.bf16 %v347_v58, %v347_v58  ;;  %v1832_v17 = vsel %vm5232_vm8, %v1830_v32, %v1831_v3  ;;  %v933_v60 = vld [vmem:[#allocation2 + $0x20] sm:$0x1] }
  0x1c   : > { %v1252_v18 = vrot.slane %v1250_v5, 5  ;;  %v619_v19 = vrot.slane %v617_v7, 7  ;;  %v625_v20 = vshrl.u32 %v4973_v6, 16  ;;  %v4803_v22 = vcombine.low %v5262_v31, %v1832_v17  ;;  %v936_v7 = vld [vmem:[#allocation2 + $0x24] sm:$0xf] }
  0x1d   : > { %v1233_v23 = vrot.slane %v1231_v11, 4  ;;  %v1236_v24 = vrot.slane %v1234_v12, 5  ;;  %v628_v25 = vshll.u32 %v4973_v6, 16  ;;  %v4971_v31 = vpack.c.bf16 %v348_v59, %v348_v59 }
  0x1e   : > { %v1253_v27 = vsel %vm5290_vm12, %v1248_v62, %v1252_v18  ;;  %v622_v28 = vor.u32 %v620_v15, %v619_v19  ;;  %v623_v29 = vrot.slane %v619_v19, 4  ;;  %v627_v30 = vrot.slane %v625_v20, 7  ;;  %1986 = vrot.lane.b32.xlu1 %v4803_v22, %s5150_s28  ;;  %v245_v19 = vld [vmem:[%s5241_s25 + $0x40] sm:$0xff] }
  0x1f   : > { %v1237_v32 = vor.u32 %v1236_v24, %v1233_v23  ;;  %v600_v34 = vshrl.u32 %v4970_v16, 16  ;;  %v603_v35 = vshll.u32 %v4970_v16, 16  ;;  %v352_v40 = vmax.f32 %v320_v54, 0.0  ;;  %v926_v54 = vld [vmem:[#allocation2 + $0x14] sm:$0x1] }
  0x20   : > { %v630_v36 = vor.u32 %v628_v25, %v627_v30  ;;  %v632_v37 = vrot.slane %v627_v30, 4  ;;  %v930_v38 = vsel %vm5298_vm13, %v622_v28, %v929_v26  ;;  %v608_v44 = vshrl.u32 %v4971_v31, 16 }
  0x21   : > { %v1238_v41 = vrot.slane %v1237_v32, 4  ;;  %931 = vst [vmem:[#allocation2 + $0x18] sm:$0xf] %v930_v38  ;;  %v602_v42 = vrot.slane %v600_v34, 7  ;;  %v611_v45 = vshll.u32 %v4971_v31, 16  ;;  %v4974_v47 = vpack.c.bf16 %v351_v63, %v351_v63 }
  0x22   : > { %v631_v46 = vsel %vm5308_vm14, %v623_v29, %v630_v36  ;;  %v4975_v48 = vpack.c.bf16 %v352_v40, %v352_v40  ;;  %v322_v49 = vadd.f32 %v5246_v14, %v283_v0  ;;  %v610_v53 = vrot.slane %v608_v44, 7  ;;  %v247_v36 = vld [vmem:[%s5241_s25 + $0x50] sm:$0xff] }
  0x23   : > { %v1243_v50 = vsel %vm5290_vm12, %v1238_v41, %v5272_v43  ;;  %932 = vst.msk [vmem:[#allocation2 + $0x1c] sm:$0xf] %vm395_vm0, %v631_v46  ;;  %v605_v51 = vor.u32 %v603_v35, %v602_v42  ;;  %v606_v52 = vrot.slane %v602_v42, 4  ;;  %v634_v57 = vshrl.u32 %v4974_v47, 16  ;;  %v246_v35 = vld [vmem:[%s5241_s25 + $0x48] sm:$0xff] }
  0x24   : > { %v4771_v56 = vcombine.low %v1243_v50, %v1253_v27  ;;  %v637_v58 = vshll.u32 %v4974_v47, 16  ;;  %v642_v59 = vshrl.u32 %v4975_v48, 16  ;;  %v613_v61 = vor.u32 %v611_v45, %v610_v53 }
  0x25   : > { %v615_v62 = vrot.slane %v610_v53, 4  ;;  %v923_v63 = vsel %vm5298_vm13, %v605_v51, %v922_v39  ;;  %v645_v0 = vshll.u32 %v4975_v48, 16  ;;  %v636_v43 = vrot.slane %v634_v57, 7 }
  0x26   : > { %1662 = vrot.lane.b32.xlu0 %v4771_v56, %s5151_s29  ;;  %924 = vst [vmem:[#allocation2 + $0xc] sm:$0xf] %v923_v63  ;;  %v5324_v3 = vrot.slane %v642_v59, 7  ;;  %v353_v4 = vmax.f32 %v5286_v2, 0.0  ;;  %v354_v5 = vmax.f32 %v322_v49, 0.0  ;;  %v614_v6 = vsel %vm5308_vm14, %v606_v52, %v613_v61  ;;  %v248_v52 = vld [vmem:[%s5241_s25 + $0x58] sm:$0xff] }
  0x27   : > { %v927_v11 = vsel %vm5204_vm3, %v615_v62, %v926_v54  ;;  %v934_v12 = vsel %vm5204_vm3, %v632_v37, %v933_v60  ;;  %v473_v15 = vsel %vm5218_vm7, 0, %v472_v55  ;;  %925 = vst.msk [vmem:[#allocation2 + $0x10] sm:$0xf] %vm395_vm0, %v614_v6  ;;  %v639_v16 = vor.u32 %v637_v58, %v636_v43  ;;  %v943_v37 = vld [vmem:[#allocation2 + $0x30] sm:$0xf] }
  0x28   : > { %v640_v17 = vrot.slane %v636_v43, 4  ;;  %v647_v2 = vor.u32 %v645_v0, %v5324_v3  ;;  %v649_v18 = vrot.slane %v5324_v3, 4  ;;  %928 = vst [vmem:[#allocation2 + $0x14] sm:$0x1] %v927_v11  ;;  %935 = vst [vmem:[#allocation2 + $0x20] sm:$0x1] %v934_v12  ;;  %v4976_v20 = vpack.c.bf16 %v353_v4, %v353_v4 }
  0x29   : > { %474 = vst [vmem:[#allocation2 + $0x2c] sm:$0x1] %v473_v15  ;;  %v4977_v22 = vpack.c.bf16 %v354_v5, %v354_v5  ;;  %v5339_v23 = vld [vmem:[#allocation2 + $0x18] sm:$0xe]  ;;  %v937_v28 = vsel %vm5298_vm13, %v639_v16, %v936_v7  ;;  %v284_v46 = vmul.f32 %v5226_v10, %v245_v19  ;;  %v285_v62 = vmul.f32 %v5226_v10, %v246_v35 }
  0x2a   : > { %v5341_v24 = vld [vmem:[#allocation2 + $0x18] sm:$0xe]  ;;  %v648_v27 = vsel %vm5308_vm14, %v640_v17, %v647_v2  ;;  %v4852_v29 = vrot.slane %v5339_v23, 9  ;;  %938 = vst [vmem:[#allocation2 + $0x24] sm:$0xf] %v937_v28  ;;  %v651_v30 = vshrl.u32 %v4976_v20, 16  ;;  %v286_v63 = vmul.f32 %v5226_v10, %v247_v36 }
  0x2b   : > { %v5343_v25 = vld [vmem:[#allocation2 + $0x18] sm:$0xf]  ;;  %939 = vst.msk [vmem:[#allocation2 + $0x28] sm:$0xf] %vm395_vm0, %v648_v27  ;;  %v654_v32 = vshll.u32 %v4976_v20, 16  ;;  %v659_v31 = vshrl.u32 %v4977_v22, 16  ;;  %v5373_v17 = vadd.f32 %v5246_v14, %v284_v46  ;;  %v287_v2 = vmul.f32 %v5226_v10, %v248_v52 }
  0x2c   : > { %v5084_v26 = vld [vmem:[#allocation2 + $0x18] sm:$0xff]   ;;  %v662_v34 = vshll.u32 %v4977_v22, 16  ;;  %v4915_v40 = vrot.slane %v5341_v24, 9  ;;  %v2301_v41 = vshrl.u32 %v5343_v25, 16  ;;  %v653_v42 = vrot.slane %v651_v30, 7 }
  0x2d   : > { %2165 = vrot.lane.b32.xlu1 %v5084_v26, %s5152_s30  ;;  %v2777_v38 = vld [vmem:[#allocation2 + $0x1c] sm:$0xf]  ;;  %v5356_v44 = vrot.slane %v659_v31, 7  ;;  %v1730_v45 = vld [vmem:[#allocation2 + $0xc] sm:$0xe]  ;;  %v5379_v31 = vadd.f32 %v5246_v14, %v285_v62  ;;  %vm7035_vm15 = vcmask 31744  }
  0x2e   : > { %v3818_v39 = vld [vmem:[#allocation2 + $0x1c] sm:$0xf]  ;;  %v4788_v47 = vrot.slane %v1730_v45, 9  ;;  %v2773_v48 = vld [vmem:[#allocation2 + $0xc] sm:$0xe]  ;;  %v2878_v49 = vrot.slane %v2777_v38, 5  ;;  %v656_v55 = vor.u32 %v654_v32, %v653_v42 }
  0x2f   : > { %v3915_v50 = vrot.slane %v3818_v39, 5  ;;  %v5359_v51 = vrot.slane %v2301_v41, 4  ;;  %v5085_v53 = vld [vmem:[#allocation2 + $0xc] sm:$0xff]   ;;  %v5087_v54 = vld [vmem:[#allocation2 + $0x18] sm:$0xff]   ;;  %v657_v56 = vrot.slane %v653_v42, 4  ;;  %v664_v57 = vor.u32 %v662_v34, %v5356_v44 }
  0x30   : > { %v666_v58 = vrot.slane %v5356_v44, 4  ;;  %v1731_v59 = vld [vmem:[#allocation2 + $0x10] sm:$0xf]  ;;  %v1732_v60 = vld [vmem:[#allocation2 + $0x14] sm:$0x1]  ;;  %2163 = vrot.lane.b32.xlu0 %v5085_v53, %s5152_s30  ;;  %v944_v43 = vsel %vm5298_vm13, %v656_v55, %v943_v37  ;;  %v4851_v12 = vrot.slane %v2773_v48, 9  ;;  %v5382_v34 = vadd.f32 %v5246_v14, %v286_v63 }
  0x31   : > { %v2774_v61 = vld [vmem:[#allocation2 + $0x10] sm:$0xf]  ;;  %v665_v0 = vsel %vm5308_vm14, %v657_v56, %v664_v57  ;;  %v1835_v4 = vrot.slane %v1731_v59, 5  ;;  %v1838_v5 = vrot.slane %v1732_v60, 5  ;;  %v2775_v6 = vld [vmem:[#allocation2 + $0x14] sm:$0x1]  ;;  %v5394_v41 = vsel %vm5232_vm8, %v4852_v29, %v2878_v49 }
  0x32   : > { %v2778_v7 = vld [vmem:[#allocation2 + $0x20] sm:$0x1]  ;;  %v5086_v11 = vld [vmem:[#allocation2 + $0x24] sm:$0xff]   ;;  %945 = vst [vmem:[#allocation2 + $0x30] sm:$0xf] %v944_v43  ;;  %v2871_v19 = vrot.slane %v2774_v61, 5  ;;  %v3916_v42 = vsel %vm5232_vm8, %v4915_v40, %v3915_v50  ;;  %v5407_v40 = vadd.f32 %v5246_v14, %v287_v2 }
  0x33   : > { %946 = vst.msk [vmem:[#allocation2 + $0x34] sm:$0xf] %vm395_vm0, %v665_v0  ;;  %v5089_v15 = vld [vmem:[#allocation2 + $0x24] sm:$0xff]   ;;  %v1837_v16 = vrot.slane %v1835_v4, 4  ;;  %3209 = vrot.lane.b32.xlu1 %v5086_v11, %s5153_s6  ;;  %v2874_v20 = vrot.slane %v2775_v6, 5  ;;  %v2880_v22 = vrot.slane %v2878_v49, 4  ;;  %v1836_v35 = vsel %vm5232_vm8, %v4788_v47, %v1835_v4 }
  0x34   : > { %v2881_v24 = vrot.slane %v2778_v7, 5  ;;  %v3819_v26 = vld [vmem:[#allocation2 + $0x20] sm:$0x1]  ;;  %3207 = vrot.lane.b32.xlu0 %v5087_v54, %s5153_s6  ;;  %v3917_v27 = vrot.slane %v3915_v50, 4  ;;  %v940_v30 = vld [vmem:[#allocation2 + $0x2c] sm:$0x1]  ;;  %v2872_v37 = vsel %vm5232_vm8, %v4851_v12, %v2871_v19 }
  0x35   : > { %v3918_v28 = vrot.slane %v3819_v26, 5  ;;  %v1736_v32 = vld [vmem:[#allocation2 + $0x24] sm:$0xe]  ;;  %v1839_v36 = vsel %vm5232_vm8, %v1837_v16, %v1838_v5  ;;  %v2873_v38 = vrot.slane %v2871_v19, 4  ;;  %v1737_v39 = vld [vmem:[#allocation2 + $0x28] sm:$0xf]  ;;  %v941_v46 = vsel %vm5204_vm3, %v649_v18, %v940_v30 }
  0x36   : > { %v3820_v47 = vld [vmem:[#allocation2 + $0x24] sm:$0xe]  ;;  %v3821_v48 = vld [vmem:[#allocation2 + $0x28] sm:$0xf]  ;;  %v2232_v52 = vld [vmem:[#allocation2 + $0x1c] sm:$0xf]  ;;  %v4804_v3 = vcombine.low %v1836_v35, %v1839_v36  ;;  %v2882_v18 = vsel %vm5232_vm8, %v2880_v22, %v2881_v24 }
  0x37   : > { %v3919_v45 = vsel %vm5232_vm8, %v3917_v27, %v3918_v28  ;;  %v2875_v23 = vsel %vm5232_vm8, %v2873_v38, %v2874_v20  ;;  %942 = vst [vmem:[#allocation2 + $0x2c] sm:$0x1] %v941_v46  ;;  %v4790_v29 = vrot.slane %v1736_v32, 9  ;;  %v1849_v49 = vrot.slane %v1737_v39, 5  ;;  %v2233_v53 = vld [vmem:[#allocation2 + $0x20] sm:$0x1] }
  0x38   : > { %v1733_v54 = vld [vmem:[#allocation2 + $0x18] sm:$0xe]  ;;  %2167 = vrot.lane.b32.xlu0 %v5089_v15, %s5152_s30  ;;  %v4867_v55 = vcombine.low %v2872_v37, %v2875_v23  ;;  %v3922_v56 = vrot.slane %v3821_v48, 5  ;;  %v4931_v57 = vcombine.low %v3916_v42, %v3919_v45  ;;  %v4916_v59 = vrot.slane %v3820_v47, 9  ;;  %v1734_v62 = vld [vmem:[#allocation2 + $0x1c] sm:$0xf] }
  0x39   : > { %v2304_v60 = vshll.u32 %v5343_v25, 16  ;;  %v2310_v61 = vshll.u32 %v2232_v52, 16  ;;  %v1851_v63 = vrot.slane %v1849_v49, 4  ;;  %v2314_v0 = vshrl.u32 %v2232_v52, 16  ;;  %v1735_v4 = vld [vmem:[#allocation2 + $0x20] sm:$0x1] }
  0x3a   : > { %v5088_v50 = vld [vmem:[#allocation2 + $0x30] sm:$0xff]   ;;  %v3924_v14 = vrot.slane %v3922_v56, 4  ;;  %v2320_v43 = vshll.u32 %v2233_v53, 16  ;;  %v4789_v7 = vrot.slane %v1733_v54, 9  ;;  %v1842_v11 = vrot.slane %v1734_v62, 5 }
  0x3b   : > { %2169 = vrot.lane.b32.xlu1 %v5088_v50, %s5152_s30  ;;  %v2306_v5 = vrot.slane %v2304_v60, 5  ;;  %v2312_v6 = vrot.slane %v2310_v61, 5  ;;  %v3275_v12 = vld [vmem:[#allocation2 + $0x24] sm:$0xf]  ;;  %v2316_v15 = vrot.slane %v2314_v0, 4  ;;  %v1845_v25 = vrot.slane %v1735_v4, 5 }
  0x3c   : > { %3029 = vrot.lane.b32.xlu0 %v4867_v55, %s5154_s7  ;;  %v2322_v16 = vrot.slane %v2320_v43, 5  ;;  %v3345_v2 = vshrl.u32 %v3275_v12, 16  ;;  %v1843_v20 = vsel %vm5232_vm8, %v4789_v7, %v1842_v11  ;;  %v1844_v22 = vrot.slane %v1842_v11, 4  ;;  %v3276_v36 = vld [vmem:[#allocation2 + $0x28] sm:$0xf] }
  0x3d   : > { %v2307_v19 = vor.u32 %v2306_v5, %v5359_v51  ;;  %v3348_v24 = vshll.u32 %v3275_v12, 16  ;;  %v4868_v26 = vcombine.low %v5394_v41, %v2882_v18  ;;  %v1850_v28 = vsel %vm5232_vm8, %v4790_v29, %v1849_v49  ;;  %v1182_v49 = vld [vmem:[#allocation2 + $0xc] sm:$0xf]  ;;  %v1183_v53 = vld [vmem:[#allocation2 + $0x10] sm:$0xf] }
  0x3e   : > { %v1738_v27 = vld [vmem:[#allocation2 + $0x2c] sm:$0x1]  ;;  %v3923_v32 = vsel %vm5232_vm8, %v4916_v59, %v3922_v56  ;;  %v2317_v35 = vor.u32 %v2316_v15, %v2312_v6  ;;  %v1846_v39 = vsel %vm5232_vm8, %v1844_v22, %v1845_v25  ;;  %v3347_v46 = vrot.slane %v3345_v2, 4  ;;  %v1184_v18 = vld [vmem:[#allocation2 + $0x14] sm:$0x1] }
  0x3f   : > { %1988 = vrot.lane.b32.xlu1 %v4804_v3, %s5150_s28  ;;  %v3822_v30 = vld [vmem:[#allocation2 + $0x2c] sm:$0x1]  ;;  %v1852_v51 = vrot.slane %v1738_v27, 5  ;;  %v2308_v38 = vrot.slane %v2307_v19, 4  ;;  %v4805_v42 = vcombine.low %v1843_v20, %v1846_v39  ;;  %v3350_v47 = vrot.slane %v3348_v24, 5 }
  0x40   : > { %v3925_v37 = vrot.slane %v3822_v30, 5  ;;  %4073 = vrot.lane.b32.xlu0 %v4931_v57, %s5155_s8  ;;  %v2318_v41 = vrot.slane %v2317_v35, 4  ;;  %v3277_v45 = vld [vmem:[#allocation2 + $0x2c] sm:$0x1]  ;;  %v3354_v29 = vshll.u32 %v3276_v36, 16  ;;  %v3358_v59 = vshrl.u32 %v3276_v36, 16 }
  0x41   : > { %v1853_v48 = vsel %vm5232_vm8, %v1851_v63, %v1852_v51  ;;  %v2313_v23 = vsel %vm5290_vm12, %v2308_v38, %v2312_v6  ;;  %v3351_v55 = vor.u32 %v3350_v47, %v3347_v46  ;;  %v3364_v60 = vshll.u32 %v3277_v45, 16  ;;  %v1185_v0 = vld [vmem:[#allocation2 + $0x18] sm:$0xf]  ;;  %v1186_v7 = vld [vmem:[#allocation2 + $0x1c] sm:$0xf] }
  0x42   : > { %v3926_v52 = vsel %vm5232_vm8, %v3924_v14, %v3925_v37  ;;  %v4806_v54 = vcombine.low %v1850_v28, %v1853_v48  ;;  %v2323_v3 = vsel %vm5290_vm12, %v2318_v41, %v2322_v16  ;;  %v3356_v57 = vrot.slane %v3354_v29, 5  ;;  %v1187_v25 = vld [vmem:[#allocation2 + $0x20] sm:$0x1]  ;;  %v2228_v30 = vld [vmem:[#allocation2 + $0xc] sm:$0xf] }
  0x43   : > { %3031 = vrot.lane.b32.xlu1 %v4868_v26, %s5154_s7  ;;  %v4932_v50 = vcombine.low %v3923_v32, %v3926_v52  ;;  %v4836_v56 = vcombine.low %v2313_v23, %v2323_v3  ;;  %v3352_v61 = vrot.slane %v3351_v55, 4  ;;  %v1255_v62 = vshrl.u32 %v1182_v49, 16  ;;  %v2229_v45 = vld [vmem:[#allocation2 + $0x10] sm:$0xf] }
  0x44   : > { %v1258_v63 = vshll.u32 %v1182_v49, 16  ;;  %v1264_v14 = vshll.u32 %v1183_v53, 16  ;;  %v3360_v43 = vrot.slane %v3358_v59, 4  ;;  %v3366_v4 = vrot.slane %v3364_v60, 5 }
  0x45   : > { %4075 = vrot.lane.b32.xlu0 %v4932_v50, %s5155_s8  ;;  %v1268_v5 = vshrl.u32 %v1183_v53, 16  ;;  %v1274_v6 = vshll.u32 %v1184_v18, 16  ;;  %v3357_v11 = vsel %vm5290_vm12, %v3352_v61, %v3356_v57  ;;  %v1257_v12 = vrot.slane %v1255_v62, 4  ;;  %v2230_v53 = vld [vmem:[#allocation2 + $0x14] sm:$0x1] }
  0x46   : > { %v1260_v15 = vrot.slane %v1258_v63, 5  ;;  %v1266_v16 = vrot.slane %v1264_v14, 5  ;;  %v3361_v2 = vor.u32 %v3360_v43, %v3356_v57  ;;  %v1279_v22 = vshrl.u32 %v1185_v0, 16  ;;  %v1189_v61 = vld [vmem:[#allocation2 + $0x28] sm:$0xf] }
  0x47   : > { %1992 = vrot.lane.b32.xlu1 %v4806_v54, %s5150_s28  ;;  %v1270_v19 = vrot.slane %v1268_v5, 4  ;;  %v1276_v20 = vrot.slane %v1274_v6, 5  ;;  %v1282_v26 = vshll.u32 %v1185_v0, 16  ;;  %v1288_v27 = vshll.u32 %v1186_v7, 16  ;;  %v1188_v54 = vld [vmem:[#allocation2 + $0x24] sm:$0xf] }
  0x48   : > { %v1261_v24 = vor.u32 %v1260_v15, %v1257_v12  ;;  %v1292_v28 = vshrl.u32 %v1186_v7, 16  ;;  %v3362_v32 = vrot.slane %v3361_v2, 4  ;;  %v1281_v36 = vrot.slane %v1279_v22, 4  ;;  %v1190_v0 = vld [vmem:[#allocation2 + $0x2c] sm:$0x1] }
  0x49   : > { %1990 = vrot.lane.b32.xlu0 %v4805_v42, %s5150_s28  ;;  %v1271_v35 = vor.u32 %v1270_v19, %v1266_v16  ;;  %v1298_v51 = vshll.u32 %v1187_v25, 16  ;;  %v1284_v38 = vrot.slane %v1282_v26, 5  ;;  %v1290_v39 = vrot.slane %v1288_v27, 5  ;;  %v3273_v27 = vld [vmem:[#allocation2 + $0x1c] sm:$0xf] }
  0x4a   : > { %v1262_v37 = vrot.slane %v1261_v24, 4  ;;  %v1294_v41 = vrot.slane %v1292_v28, 4  ;;  %v3367_v42 = vsel %vm5290_vm12, %v3362_v32, %v3366_v4  ;;  %v2277_v48 = vshrl.u32 %v2228_v30, 16 }
  0x4b   : > { %2710 = vrot.lane.b32.xlu1 %v4836_v56, %s5156_s9  ;;  %v1272_v46 = vrot.slane %v1271_v35, 4  ;;  %v1300_v47 = vrot.slane %v1298_v51, 5  ;;  %v4900_v52 = vcombine.low %v3357_v11, %v3367_v42  ;;  %v1285_v29 = vor.u32 %v1284_v38, %v1281_v36  ;;  %v3272_v11 = vld [vmem:[#allocation2 + $0x18] sm:$0xf]  ;;  %v2234_v42 = vld [vmem:[#allocation2 + $0x24] sm:$0xf] }
  0x4c   : > { %v1267_v23 = vsel %vm5290_vm12, %v1262_v37, %v1266_v16  ;;  %v1295_v49 = vor.u32 %v1294_v41, %v1290_v39  ;;  %v2279_v3 = vrot.slane %v2277_v48, 4  ;;  %v2280_v55 = vshll.u32 %v2228_v30, 16  ;;  %v3274_v37 = vld [vmem:[#allocation2 + $0x20] sm:$0x1] }
  0x4d   : > { %v1277_v50 = vsel %vm5290_vm12, %v1272_v46, %v1276_v20  ;;  %v2286_v18 = vshll.u32 %v2229_v45, 16  ;;  %v1286_v57 = vrot.slane %v1285_v29, 4  ;;  %v2290_v60 = vshrl.u32 %v2229_v45, 16 }
  0x4e   : > { %v4772_v56 = vcombine.low %v1267_v23, %v1277_v50  ;;  %v1296_v59 = vrot.slane %v1295_v49, 4  ;;  %v2282_v62 = vrot.slane %v2280_v55, 5  ;;  %v2296_v14 = vshll.u32 %v2230_v53, 16  ;;  %v475_v50 = vld [vmem:[#allocation2 + $0x38] sm:$0x1] }
  0x4f   : > { %3754 = vrot.lane.b32.xlu1 %v4900_v52, %s5157_s10  ;;  %v2288_v63 = vrot.slane %v2286_v18, 5  ;;  %v1303_v43 = vshrl.u32 %v1188_v54, 16  ;;  %v1291_v4 = vsel %vm5290_vm12, %v1286_v57, %v1290_v39  ;;  %v2292_v6 = vrot.slane %v2290_v60, 4 }
  0x50   : > { %1664 = vrot.lane.b32.xlu0 %v4772_v56, %s5151_s29  ;;  %v1301_v5 = vsel %vm5290_vm12, %v1296_v59, %v1300_v47  ;;  %v1306_v7 = vshll.u32 %v1188_v54, 16  ;;  %v2283_v15 = vor.u32 %v2282_v62, %v2279_v3  ;;  %v2298_v16 = vrot.slane %v2296_v14, 5  ;;  %v2235_v54 = vld [vmem:[#allocation2 + $0x28] sm:$0xf]  ;;  %v2236_v56 = vld [vmem:[#allocation2 + $0x2c] sm:$0x1] }
  0x51   : > { %v4773_v12 = vcombine.low %v1291_v4, %v1301_v5  ;;  %v1305_v25 = vrot.slane %v1303_v43, 4  ;;  %v2293_v2 = vor.u32 %v2292_v6, %v2288_v63  ;;  %v1312_v20 = vshll.u32 %v1189_v61, 16  ;;  %v2238_v5 = vld [vmem:[#allocation2 + $0x34] sm:$0xf] }
  0x52   : > { %v1308_v19 = vrot.slane %v1306_v7, 5  ;;  %v1316_v22 = vshrl.u32 %v1189_v61, 16  ;;  %v2284_v24 = vrot.slane %v2283_v15, 4  ;;  %v1322_v26 = vshll.u32 %v1190_v0, 16 }
  0x53   : > { %1666 = vrot.lane.b32.xlu1 %v4773_v12, %s5151_s29  ;;  %v3321_v28 = vshrl.u32 %v3272_v11, 16  ;;  %v3324_v30 = vshll.u32 %v3272_v11, 16  ;;  %v2294_v32 = vrot.slane %v2293_v2, 4  ;;  %v1314_v36 = vrot.slane %v1312_v20, 5  ;;  %v2780_v20 = vld [vmem:[#allocation2 + $0x28] sm:$0xf] }
  0x54   : > { %v1309_v35 = vor.u32 %v1308_v19, %v1305_v25  ;;  %v1318_v51 = vrot.slane %v1316_v22, 4  ;;  %v2289_v38 = vsel %vm5290_vm12, %v2284_v24, %v2288_v63  ;;  %v1324_v39 = vrot.slane %v1322_v26, 5  ;;  %v2237_v63 = vld [vmem:[#allocation2 + $0x30] sm:$0xf]  ;;  %v2779_v19 = vld [vmem:[#allocation2 + $0x24] sm:$0xe] }
  0x55   : > { %v3323_v41 = vrot.slane %v3321_v28, 4  ;;  %v3326_v45 = vrot.slane %v3324_v30, 5  ;;  %v2299_v46 = vsel %vm5290_vm12, %v2294_v32, %v2298_v16  ;;  %v3330_v52 = vshll.u32 %v3273_v27, 16  ;;  %v2781_v28 = vld [vmem:[#allocation2 + $0x2c] sm:$0x1] }
  0x56   : > { %v1310_v47 = vrot.slane %v1309_v35, 4  ;;  %v1319_v48 = vor.u32 %v1318_v51, %v1314_v36  ;;  %v4835_v23 = vcombine.low %v2289_v38, %v2299_v46  ;;  %v3334_v49 = vshrl.u32 %v3273_v27, 16 }
  0x57   : > { %v3327_v29 = vor.u32 %v3326_v45, %v3323_v41  ;;  %v3340_v53 = vshll.u32 %v3274_v37, 16  ;;  %v3332_v18 = vrot.slane %v3330_v52, 5  ;;  %v2325_v57 = vshrl.u32 %v2234_v42, 16  ;;  %v5471_v41 = vld [vmem:[#allocation2 + $0x30] sm:$0xe]  ;;  %v249_v45 = vld [vmem:[%s5241_s25 + $0x60] sm:$0xff] }
  0x58   : > { %v1315_v3 = vsel %vm5290_vm12, %v1310_v47, %v1314_v36  ;;  %v1320_v55 = vrot.slane %v1319_v48, 4  ;;  %2708 = vrot.lane.b32.xlu0 %v4835_v23, %s5156_s9  ;;  %v3336_v60 = vrot.slane %v3334_v49, 4  ;;  %v2328_v62 = vshll.u32 %v2234_v42, 16  ;;  %v250_v52 = vld [vmem:[%s5241_s25 + $0x68] sm:$0xff] }
  0x59   : > { %v3328_v59 = vrot.slane %v3327_v29, 4  ;;  %v3342_v61 = vrot.slane %v3340_v53, 5  ;;  %v2327_v0 = vrot.slane %v2325_v57, 4  ;;  %v2334_v43 = vshll.u32 %v2235_v54, 16 }
  0x5a   : > { %v1325_v14 = vsel %vm5290_vm12, %v1320_v55, %v1324_v39  ;;  %v2338_v4 = vshrl.u32 %v2235_v54, 16  ;;  %v3337_v11 = vor.u32 %v3336_v60, %v3332_v18  ;;  %v2330_v12 = vrot.slane %v2328_v62, 5  ;;  %v5479_v54 = vld [vmem:[#allocation2 + $0x34] sm:$0xf] }
  0x5b   : > { %v4774_v6 = vcombine.low %v1315_v3, %v1325_v14  ;;  %v3333_v7 = vsel %vm5290_vm12, %v3328_v59, %v3332_v18  ;;  %v2336_v15 = vrot.slane %v2334_v43, 5  ;;  %v2344_v25 = vshll.u32 %v2236_v56, 16  ;;  %v422_v18 = vld [vmem:[#allocation2 + $0x3c] sm:$0x1]  ;;  %v3279_v62 = vld [vmem:[#allocation2 + $0x34] sm:$0xf] }
  0x5c   : > { %v2340_v16 = vrot.slane %v2338_v4, 4  ;;  %v476_v2 = vsel %vm5218_vm7, 0, %v475_v50  ;;  %v3338_v22 = vrot.slane %v3337_v11, 4  ;;  %v2331_v24 = vor.u32 %v2330_v12, %v2327_v0  ;;  %v478_v12 = vld [vmem:[#allocation2 + $0x44] sm:$0x1] }
  0x5d   : > { %1668 = vrot.lane.b32.xlu1 %v4774_v6, %s5151_s29  ;;  %477 = vst [vmem:[#allocation2 + $0x38] sm:$0x1] %v476_v2  ;;  %v2349_v26 = vshrl.u32 %v2237_v63, 16  ;;  %v2352_v27 = vshll.u32 %v2237_v63, 16  ;;  %v2346_v32 = vrot.slane %v2344_v25, 5  ;;  %v2358_v35 = vshll.u32 %v2238_v5, 16 }
  0x5e   : > { %v2341_v30 = vor.u32 %v2340_v16, %v2336_v15  ;;  %v2362_v36 = vshrl.u32 %v2238_v5, 16  ;;  %v3343_v51 = vsel %vm5290_vm12, %v3338_v22, %v3342_v61  ;;  %v2332_v37 = vrot.slane %v2331_v24, 4  ;;  %v3278_v61 = vld [vmem:[#allocation2 + $0x30] sm:$0xf] }
  0x5f   : > { %v2351_v38 = vrot.slane %v2349_v26, 4  ;;  %v2354_v39 = vrot.slane %v2352_v27, 5  ;;  %v4899_v42 = vcombine.low %v3333_v7, %v3343_v51  ;;  %v5474_v47 = vrot.slane %v2358_v35, 5  ;;  %v3823_v16 = vld [vmem:[#allocation2 + $0x30] sm:$0xe] }
  0x60   : > { %v2342_v46 = vrot.slane %v2341_v30, 4  ;;  %v2364_v48 = vrot.slane %v2362_v36, 4  ;;  %v2337_v23 = vsel %vm5290_vm12, %v2332_v37, %v2336_v15  ;;  %v4853_v49 = vrot.slane %v2779_v19, 9  ;;  %v5090_v51 = vld [vmem:[#allocation2 + $0x30] sm:$0xff]  }
  0x61   : > { %v2355_v29 = vor.u32 %v2354_v39, %v2351_v38  ;;  %v2885_v53 = vrot.slane %v2780_v20, 5  ;;  %3752 = vrot.lane.b32.xlu0 %v4899_v42, %s5157_s10  ;;  %v2888_v55 = vrot.slane %v2781_v28, 5  ;;  %v288_v56 = vmul.f32 %v5226_v10, %v249_v45  ;;  %v3824_v20 = vld [vmem:[#allocation2 + $0x34] sm:$0xf]  ;;  %v1191_v28 = vld [vmem:[#allocation2 + $0x30] sm:$0xf] }
  0x62   : > { %v2347_v50 = vsel %vm5290_vm12, %v2342_v46, %v2346_v32  ;;  %v2365_v3 = vor.u32 %v2364_v48, %v5474_v47  ;;  %v5489_v63 = vmul.f32 %v5226_v10, %v250_v52  ;;  %v4854_v0 = vrot.slane %v5471_v41, 9 }
  0x63   : > { %v4837_v57 = vcombine.low %v2337_v23, %v2347_v50  ;;  %v2886_v59 = vsel %vm5232_vm8, %v4853_v49, %v2885_v53  ;;  %v2887_v60 = vrot.slane %v2885_v53, 4  ;;  %v2892_v43 = vrot.slane %v5479_v54, 5 }
  0x64   : > { %v947_v14 = vld [vmem:[#allocation2 + $0x38] sm:$0x1]  ;;  %v355_v4 = vmax.f32 %v5373_v17, 0.0  ;;  %v356_v5 = vmax.f32 %v5379_v31, 0.0  ;;  %v5499_v7 = vrot.slane %v2355_v29, 4  ;;  %v423_v11 = vsel %vm5204_vm3, 0, %v422_v18 }
  0x65   : > { %v948_v6 = vsel %vm5204_vm3, %v666_v58, %v947_v14  ;;  %v2889_v10 = vsel %vm5232_vm8, %v2887_v60, %v2888_v55  ;;  %2712 = vrot.lane.b32.xlu0 %v4837_v57, %s5156_s9  ;;  %v5506_v17 = vrot.slane %v2365_v3, 4  ;;  %v2894_v15 = vrot.slane %v2892_v43, 4  ;;  %424 = vst [vmem:[#allocation2 + $0x3c] sm:$0x1] %v423_v11  ;;  %v1192_v18 = vld [vmem:[#allocation2 + $0x34] sm:$0xf] }
  0x66   : > { %949 = vst [vmem:[#allocation2 + $0x38] sm:$0x1] %v948_v6  ;;  %v4869_v31 = vcombine.low %v2886_v59, %v2889_v10  ;;  %v4978_v44 = vpack.c.bf16 %v355_v4, %v355_v4  ;;  %v4979_v58 = vpack.c.bf16 %v356_v5, %v356_v5  ;;  %v3369_v25 = vshrl.u32 %v3278_v61, 16  ;;  %v5514_v57 = vld [vmem:[%s7030_s2] ss:$0 sm:$0xff] }
  0x67   : > { %v3372_v2 = vshll.u32 %v3278_v61, 16  ;;  %v3378_v19 = vshll.u32 %v3279_v62, 16  ;;  %v3382_v26 = vshrl.u32 %v3279_v62, 16  ;;  %v479_v27 = vsel %vm5218_vm7, 0, %v478_v12 }
  0x68   : > { %v668_v22 = vshrl.u32 %v4978_v44, 16  ;;  %v671_v24 = vshll.u32 %v4978_v44, 16  ;;  %v676_v30 = vshrl.u32 %v4979_v58, 16  ;;  %v679_v32 = vshll.u32 %v4979_v58, 16  ;;  %480 = vst [vmem:[#allocation2 + $0x44] sm:$0x1] %v479_v27 }
  0x69   : > { %v3371_v35 = vrot.slane %v3369_v25, 4  ;;  %v3374_v36 = vrot.slane %v3372_v2, 5  ;;  %3033 = vrot.lane.b32.xlu0 %v4869_v31, %s5154_s7  ;;  %v3380_v38 = vrot.slane %v3378_v19, 5  ;;  %v3384_v39 = vrot.slane %v3382_v26, 4 }
  0x6a   : > { %v670_v37 = vrot.slane %v668_v22, 7  ;;  %v4917_v41 = vrot.slane %v3823_v16, 9  ;;  %v678_v45 = vrot.slane %v676_v30, 7  ;;  %v3929_v46 = vrot.slane %v3824_v20, 5 }
  0x6b   : > { %v3375_v42 = vor.u32 %v3374_v36, %v3371_v35  ;;  %v1327_v48 = vshrl.u32 %v1191_v28, 16  ;;  %v3385_v29 = vor.u32 %v3384_v39, %v3380_v38  ;;  %v1330_v49 = vshll.u32 %v1191_v28, 16 }
  0x6c   : > { %v673_v52 = vor.u32 %v671_v24, %v670_v37  ;;  %v674_v23 = vrot.slane %v670_v37, 4  ;;  %v681_v50 = vor.u32 %v679_v32, %v678_v45  ;;  %v683_v3 = vrot.slane %v678_v45, 4  ;;  %v950_v4 = vld [vmem:[#allocation2 + $0x3c] sm:$0xf]  ;;  %v1739_v24 = vld [vmem:[#allocation2 + $0x30] sm:$0xe] }
  0x6d   : > { %v2239_v53 = vld [vmem:[#allocation2 + $0x38] sm:$0x1]  ;;  %v3376_v55 = vrot.slane %v3375_v42, 4  ;;  %v5517_v59 = vadd.f32 %v5514_v57, %v288_v56  ;;  %v2361_v60 = vsel %vm5290_vm12, %v5499_v7, %v5474_v47  ;;  %v5525_v62 = vsel %vm5232_vm8, %v4854_v0, %v2892_v43  ;;  %3211 = vrot.lane.b32.xlu0 %v5090_v51, %s5153_s6  ;;  %v5547_v32 = vld [vmem:[#allocation2 + $0x34] sm:$0xf] }
  0x6e   : > { %v2784_v54 = vld [vmem:[#allocation2 + $0x38] sm:$0x1]  ;;  %v2368_v61 = vshll.u32 %v2239_v53, 16  ;;  %v682_v6 = vsel %vm5308_vm14, %v674_v23, %v681_v50  ;;  %v951_v56 = vsel %vm5298_vm13, %v673_v52, %v950_v4  ;;  %v3386_v10 = vrot.slane %v3385_v29, 4 }
  0x6f   : > { %v2895_v14 = vrot.slane %v2784_v54, 5  ;;  %v3280_v5 = vld [vmem:[#allocation2 + $0x38] sm:$0x1]  ;;  %v5534_v47 = vsel %vm5232_vm8, %v4917_v41, %v3929_v46  ;;  %952 = vst [vmem:[#allocation2 + $0x3c] sm:$0xf] %v951_v56  ;;  %v3931_v44 = vrot.slane %v3929_v46, 4  ;;  %v3381_v16 = vsel %vm5290_vm12, %v3376_v55, %v3380_v38 }
  0x70   : > { %v3825_v11 = vld [vmem:[#allocation2 + $0x38] sm:$0x1]  ;;  %v2370_v0 = vrot.slane %v2368_v61, 5  ;;  %953 = vst.msk [vmem:[#allocation2 + $0x40] sm:$0xf] %vm395_vm0, %v682_v6  ;;  %v3388_v12 = vshll.u32 %v3280_v5, 16 }
  0x71   : > { %v1193_v7 = vld [vmem:[#allocation2 + $0x38] sm:$0x1]  ;;  %v2896_v43 = vsel %vm5232_vm8, %v2894_v15, %v2895_v14  ;;  %v954_v31 = vld [vmem:[#allocation2 + $0x44] sm:$0x1]  ;;  %v3932_v25 = vrot.slane %v3825_v11, 5  ;;  %v1329_v2 = vrot.slane %v1327_v48, 4 }
  0x72   : > { %v955_v58 = vsel %vm5204_vm3, %v683_v3, %v954_v31  ;;  %v2371_v19 = vsel %vm5290_vm12, %v5506_v17, %v2370_v0  ;;  %v3390_v15 = vrot.slane %v3388_v12, 5  ;;  %v1332_v20 = vrot.slane %v1330_v49, 5  ;;  %v5549_v35 = vld [vmem:[#allocation2 + $0x38] sm:$0x1]  ;;  %v251_v38 = vld [vmem:[%s5241_s25 + $0x70] sm:$0xff] }
  0x73   : > { %956 = vst [vmem:[#allocation2 + $0x44] sm:$0x1] %v955_v58  ;;  %v1336_v22 = vshll.u32 %v1192_v18, 16  ;;  %v4838_v26 = vcombine.low %v2361_v60, %v2371_v19  ;;  %v4870_v27 = vcombine.low %v5525_v62, %v2896_v43  ;;  %v1340_v28 = vshrl.u32 %v1192_v18, 16  ;;  %v252_v46 = vld [vmem:[%s5241_s25 + $0x78] sm:$0xff] }
  0x74   : > { %v1346_v30 = vshll.u32 %v1193_v7, 16  ;;  %v3391_v36 = vsel %vm5290_vm12, %v3386_v10, %v3390_v15  ;;  %v3933_v17 = vsel %vm5232_vm8, %v3931_v44, %v3932_v25  ;;  %v1333_v51 = vor.u32 %v1332_v20, %v1329_v2  ;;  %v5567_v3 = vld [vmem:[%s7029_s1] ss:$0 sm:$0xff] }
  0x75   : > { %v1338_v37 = vrot.slane %v1336_v22, 5  ;;  %2714 = vrot.lane.b32.xlu1 %v4838_v26, %s5156_s9  ;;  %v4901_v39 = vcombine.low %v3381_v16, %v3391_v36  ;;  %v1342_v41 = vrot.slane %v1340_v28, 4  ;;  %v4791_v42 = vrot.slane %v1739_v24, 9 }
  0x76   : > { %v1348_v45 = vrot.slane %v1346_v30, 5  ;;  %v1334_v48 = vrot.slane %v1333_v51, 4  ;;  %v1856_v52 = vrot.slane %v5547_v32, 5  ;;  %v1859_v23 = vrot.slane %v5549_v35, 5  ;;  %v3281_v18 = vld [vmem:[#allocation2 + $0x3c] sm:$0xf] }
  0x77   : > { %v357_v29 = vmax.f32 %v5382_v34, 0.0  ;;  %v5091_v49 = vld [vmem:[#allocation2 + $0x3c] sm:$0xff]   ;;  %3756 = vrot.lane.b32.xlu0 %v4901_v39, %s5157_s10  ;;  %v4933_v53 = vcombine.low %v5534_v47, %v3933_v17  ;;  %v1343_v54 = vor.u32 %v1342_v41, %v1338_v37  ;;  %v358_v50 = vmax.f32 %v5407_v40, 0.0 }
  0x78   : > { %v5570_v55 = vmul.f32 %v5567_v3, %v251_v38  ;;  %v3282_v60 = vld [vmem:[#allocation2 + $0x40] sm:$0xf]  ;;  %v1339_v34 = vsel %vm5290_vm12, %v1334_v48, %v1338_v37  ;;  %v3826_v61 = vld [vmem:[#allocation2 + $0x3c] sm:$0xe]  ;;  %v5578_v62 = vsel %vm5232_vm8, %v4791_v42, %v1856_v52  ;;  %v5582_v40 = vadd.f32 %v5514_v57, %v5489_v63 }
  0x79   : > { %v5585_v14 = vmul.f32 %v5567_v3, %v252_v46  ;;  %3035 = vrot.lane.b32.xlu1 %v4870_v27, %s5154_s7  ;;  %v3393_v5 = vshrl.u32 %v3281_v18, 16  ;;  %v3396_v6 = vshll.u32 %v3281_v18, 16  ;;  %v3402_v56 = vshll.u32 %v3282_v60, 16  ;;  %v3827_v7 = vld [vmem:[#allocation2 + $0x40] sm:$0xf] }
  0x7a   : > { %v3283_v4 = vld [vmem:[#allocation2 + $0x44] sm:$0x1]  ;;  %v3406_v10 = vshrl.u32 %v3282_v60, 16  ;;  %v1344_v47 = vrot.slane %v1343_v54, 4  ;;  %v5588_v43 = vpack.c.bf16 %v357_v29, %v357_v29  ;;  %v5590_v12 = vpack.c.bf16 %v358_v50, %v358_v50  ;;  %v1194_v58 = vld [vmem:[#allocation2 + $0x3c] sm:$0xf] }
  0x7b   : > { %v3412_v11 = vshll.u32 %v3283_v4, 16  ;;  %v3828_v0 = vld [vmem:[#allocation2 + $0x44] sm:$0x1]  ;;  %v3395_v63 = vrot.slane %v3393_v5, 4  ;;  %v3398_v31 = vrot.slane %v3396_v6, 5  ;;  %v3404_v44 = vrot.slane %v3402_v56, 5  ;;  %4077 = vrot.lane.b32.xlu0 %v4933_v53, %s5155_s8 }
  0x7c   : > { %v3408_v16 = vrot.slane %v3406_v10, 4  ;;  %v1349_v2 = vsel %vm5290_vm12, %v1344_v47, %v1348_v45  ;;  %v4918_v19 = vrot.slane %v3826_v61, 9  ;;  %v3936_v15 = vrot.slane %v3827_v7, 5  ;;  %v1195_v20 = vld [vmem:[#allocation2 + $0x40] sm:$0xf] }
  0x7d   : > { %v3414_v25 = vrot.slane %v3412_v11, 5  ;;  %3213 = vrot.lane.b32.xlu1 %v5091_v49, %s5153_s6  ;;  %v3399_v22 = vor.u32 %v3398_v31, %v3395_v63  ;;  %v4775_v26 = vcombine.low %v1339_v34, %v1349_v2  ;;  %v3939_v27 = vrot.slane %v3828_v0, 5  ;;  %v1196_v28 = vld [vmem:[#allocation2 + $0x44] sm:$0x1]  ;;  %v1742_v37 = vld [vmem:[#allocation2 + $0x3c] sm:$0xe] }
  0x7e   : > { %v3409_v24 = vor.u32 %v3408_v16, %v3404_v44  ;;  %v3937_v30 = vsel %vm5232_vm8, %v4918_v19, %v3936_v15  ;;  %v3938_v36 = vrot.slane %v3936_v15, 4  ;;  %v1351_v17 = vshrl.u32 %v1194_v58, 16  ;;  %v1743_v38 = vld [vmem:[#allocation2 + $0x40] sm:$0xf]  ;;  %v1744_v46 = vld [vmem:[#allocation2 + $0x44] sm:$0x1] }
  0x7f   : > { %v1354_v51 = vshll.u32 %v1194_v58, 16  ;;  %v3400_v39 = vrot.slane %v3399_v22, 4  ;;  %v1360_v45 = vshll.u32 %v1195_v20, 16  ;;  %v1364_v42 = vshrl.u32 %v1195_v20, 16  ;;  %v425_v34 = vld [vmem:[#allocation2 + $0x48] sm:$0x1] }
  0x80   : > { %v3410_v41 = vrot.slane %v3409_v24, 4  ;;  %v3940_v48 = vsel %vm5232_vm8, %v3938_v36, %v3939_v27  ;;  %v1353_v29 = vrot.slane %v1351_v17, 4  ;;  %v1370_v53 = vshll.u32 %v1196_v28, 16  ;;  %v2241_v58 = vld [vmem:[#allocation2 + $0x40] sm:$0xf] }
  0x81   : > { %v1356_v49 = vrot.slane %v1354_v51, 5  ;;  %v3405_v54 = vsel %vm5290_vm12, %v3400_v39, %v3404_v44  ;;  %v4934_v18 = vcombine.low %v3937_v30, %v3940_v48  ;;  %v1362_v60 = vrot.slane %v1360_v45, 5  ;;  %v2240_v44 = vld [vmem:[#allocation2 + $0x3c] sm:$0xf]  ;;  %v2242_v24 = vld [vmem:[#allocation2 + $0x44] sm:$0x1] }
  0x82   : > { %v3415_v50 = vsel %vm5290_vm12, %v3410_v41, %v3414_v25  ;;  %v1366_v5 = vrot.slane %v1364_v42, 4  ;;  %v1372_v6 = vrot.slane %v1370_v53, 5  ;;  %v1858_v56 = vrot.slane %v1856_v52, 4  ;;  %v481_v25 = vld [vmem:[#allocation2 + $0x50] sm:$0x1]  ;;  %v5092_v28 = vld [vmem:[#allocation2 + $0x3c] sm:$0xff]  }
  0x83   : > { %v4902_v61 = vcombine.low %v3405_v54, %v3415_v50  ;;  %v1357_v4 = vor.u32 %v1356_v49, %v1353_v29  ;;  %4079 = vrot.lane.b32.xlu0 %v4934_v18, %s5155_s8  ;;  %v4792_v10 = vrot.slane %v1742_v37, 9  ;;  %v1863_v11 = vrot.slane %v1743_v38, 5  ;;  %v2785_v17 = vld [vmem:[#allocation2 + $0x3c] sm:$0xe]  ;;  %v2786_v39 = vld [vmem:[#allocation2 + $0x40] sm:$0xf] }
  0x84   : > { %v1866_v47 = vrot.slane %v1744_v46, 5  ;;  %v1367_v0 = vor.u32 %v1366_v5, %v1362_v60  ;;  %v426_v63 = vsel %vm5204_vm3, 0, %v425_v34  ;;  %v685_v31 = vshrl.u32 %v5588_v43, 16  ;;  %v2787_v46 = vld [vmem:[#allocation2 + $0x44] sm:$0x1] }
  0x85   : > { %3758 = vrot.lane.b32.xlu1 %v4902_v61, %s5157_s10  ;;  %v1358_v7 = vrot.slane %v1357_v4, 4  ;;  %v1860_v16 = vsel %vm5232_vm8, %v1858_v56, %v1859_v23  ;;  %v1865_v32 = vrot.slane %v1863_v11, 4  ;;  %427 = vst [vmem:[#allocation2 + $0x48] sm:$0x1] %v426_v63  ;;  %v688_v52 = vshll.u32 %v5588_v43, 16 }
  0x86   : > { %v5618_v2 = vadd.f32 %v5514_v57, %v5570_v55  ;;  %v1368_v15 = vrot.slane %v1367_v0, 4  ;;  %v4807_v20 = vcombine.low %v5578_v62, %v1860_v16  ;;  %v687_v35 = vrot.slane %v685_v31, 7  ;;  %v428_v54 = vld [vmem:[#allocation2 + $0x54] sm:$0x1]  ;;  %v484_v50 = vld [vmem:[#allocation2 + $0x5c] sm:$0x1] }
  0x87   : > { %v1363_v19 = vsel %vm5290_vm12, %v1358_v7, %v1362_v60  ;;  %v1864_v23 = vsel %vm5232_vm8, %v4792_v10, %v1863_v11  ;;  %v693_v22 = vshrl.u32 %v5590_v12, 16  ;;  %v696_v43 = vshll.u32 %v5590_v12, 16  ;;  %v431_v63 = vld [vmem:[#allocation2 + $0x60] sm:$0x1] }
  0x88   : > { %v2373_v27 = vshrl.u32 %v2240_v44, 16  ;;  %v1373_v55 = vsel %vm5290_vm12, %v1368_v15, %v1372_v6  ;;  %1994 = vrot.lane.b32.xlu0 %v4807_v20, %s5150_s28  ;;  %v1867_v62 = vsel %vm5232_vm8, %v1865_v32, %v1866_v47  ;;  %v690_v30 = vor.u32 %v688_v52, %v687_v35  ;;  %v5107_v52 = vld [vmem:[%s7031_s3] sm:$0xff]  }
  0x89   : > { %1670 = vrot.lane.b32.xlu1 %v4775_v26, %s5151_s29  ;;  %v691_v36 = vrot.slane %v687_v35, 4  ;;  %v4776_v51 = vcombine.low %v1363_v19, %v1373_v55  ;;  %v695_v37 = vrot.slane %v693_v22, 7  ;;  %v2376_v12 = vshll.u32 %v2240_v44, 16  ;;  %v487_v35 = vld [vmem:[#allocation2 + $0x68] sm:$0x1]  ;;  %5021 = vmatprep.subr.bf16.mxu0 %v5107_v52 }
  0x8a   : > { %v2375_v38 = vrot.slane %v2373_v27, 4  ;;  %v2382_v41 = vshll.u32 %v2241_v58, 16  ;;  %v2386_v45 = vshrl.u32 %v2241_v58, 16  ;;  %v2392_v26 = vshll.u32 %v2242_v24, 16  ;;  %5059 = vmatprep.subr.bf16.mxu1 %v5107_v52  ;;  %5022 = vmatpush3.bf16.msra.mxu0 %v5107_v52 }
  0x8b   : > { %v482_v42 = vsel %vm5218_vm7, 0, %v481_v25  ;;  %v4808_v48 = vcombine.low %v1864_v23, %v1867_v62  ;;  %v698_v29 = vor.u32 %v696_v43, %v695_v37  ;;  %v700_v49 = vrot.slane %v695_v37, 4  ;;  %5062 = vmatpush3.bf16.msra.mxu1 %v5107_v52 }
  0x8c   : > { %v2378_v53 = vrot.slane %v2376_v12, 5  ;;  %483 = vst [vmem:[#allocation2 + $0x50] sm:$0x1] %v482_v42  ;;  %2171 = vrot.lane.b32.xlu0 %v5092_v28, %s5152_s30  ;;  %v957_v18 = vld [vmem:[#allocation2 + $0x48] sm:$0xf]  ;;  %v2384_v60 = vrot.slane %v2382_v41, 5 }
  0x8d   : > { %1672 = vrot.lane.b32.xlu1 %v4776_v51, %s5151_s29  ;;  %v2388_v34 = vrot.slane %v2386_v45, 4  ;;  %v4855_v61 = vrot.slane %v2785_v17, 9  ;;  %v2899_v4 = vrot.slane %v2786_v39, 5  ;;  %v699_v5 = vsel %vm5308_vm14, %v691_v36, %v698_v29 }
  0x8e   : > { %v958_v6 = vsel %vm5298_vm13, %v690_v30, %v957_v18  ;;  %v2379_v56 = vor.u32 %v2378_v53, %v2375_v38  ;;  %v2902_v10 = vrot.slane %v2787_v46, 5  ;;  %960 = vst.msk [vmem:[#allocation2 + $0x4c] sm:$0xf] %vm395_vm0, %v699_v5  ;;  %v2394_v47 = vrot.slane %v2392_v26, 5  ;;  %v253_v30 = vld [vmem:[%s5241_s25 + $0x80] sm:$0xff]  ;;  %v254_v38 = vld [vmem:[%s5241_s25 + $0x88] sm:$0xff] }
  0x8f   : > { %959 = vst [vmem:[#allocation2 + $0x48] sm:$0xf] %v958_v6  ;;  %v2389_v11 = vor.u32 %v2388_v34, %v2384_v60  ;;  %v2901_v7 = vrot.slane %v2899_v4, 4  ;;  %v359_v0 = vmax.f32 %v5517_v59, 0.0  ;;  %v360_v44 = vmax.f32 %v5582_v40, 0.0 }
  0x90   : > { %v2380_v31 = vrot.slane %v2379_v56, 4  ;;  %v429_v16 = vsel %vm5204_vm3, 0, %v428_v54  ;;  %v485_v32 = vsel %vm5218_vm7, 0, %v484_v50  ;;  %v2900_v59 = vsel %vm5232_vm8, %v4855_v61, %v2899_v4 }
  0x91   : > { %1996 = vrot.lane.b32.xlu1 %v4808_v48, %s5150_s28  ;;  %v2390_v58 = vrot.slane %v2389_v11, 4  ;;  %430 = vst [vmem:[#allocation2 + $0x54] sm:$0x1] %v429_v16  ;;  %v4982_v25 = vpack.c.bf16 %v359_v0, %v359_v0  ;;  %486 = vst [vmem:[#allocation2 + $0x5c] sm:$0x1] %v485_v32  ;;  %v5656_v40 = vadd.f32 %v5514_v57, %v5585_v14  ;;  %v432_v14 = vsel %vm5204_vm3, 0, %v431_v63  ;;  %v5683_v63 = vpop.permute.xlu1 %1986 }
  0x92   : > { %v2385_v19 = vsel %vm5290_vm12, %v2380_v31, %v2384_v60  ;;  %v2903_v15 = vsel %vm5232_vm8, %v2901_v7, %v2902_v10  ;;  %v4983_v20 = vpack.c.bf16 %v360_v44, %v360_v44  ;;  %v361_v28 = vmax.f32 %v5618_v2, 0.0  ;;  %433 = vst [vmem:[#allocation2 + $0x60] sm:$0x1] %v432_v14  ;;  %v5109_v31 = vld [vmem:[%s7031_s3 + $0x8] sm:$0xff]  }
  0x93   : > { %v2395_v23 = vsel %vm5290_vm12, %v2390_v58, %v2394_v47  ;;  %v961_v22 = vld [vmem:[#allocation2 + $0x50] sm:$0x1]  ;;  %v702_v43 = vshrl.u32 %v4982_v25, 16  ;;  %v705_v24 = vshll.u32 %v4982_v25, 16  ;;  %v362_v51 = vmax.f32 %v5656_v40, 0.0  ;;  %5023 = vmatprep.subr.bf16.mxu0 %v5109_v31  ;;  %5060 = vmatprep.subr.bf16.mxu1 %v5109_v31 }
  0x94   : > { %v4839_v27 = vcombine.low %v2385_v19, %v2395_v23  ;;  %v962_v55 = vsel %vm5204_vm3, %v700_v49, %v961_v22  ;;  %v710_v62 = vshrl.u32 %v4983_v20, 16  ;;  %v713_v17 = vshll.u32 %v4983_v20, 16  ;;  %5024 = vmatpush3.bf16.msra.mxu0 %v5109_v31  ;;  %5063 = vmatpush3.bf16.msra.mxu1 %v5109_v31 }
  0x95   : > { %963 = vst [vmem:[#allocation2 + $0x50] sm:$0x1] %v962_v55  ;;  %v704_v36 = vrot.slane %v702_v43, 7  ;;  %v488_v37 = vsel %vm5218_vm7, 0, %v487_v35  ;;  %v4871_v39 = vcombine.low %v2900_v59, %v2903_v15  ;;  %v2244_v26 = vld [vmem:[#allocation2 + $0x4c] sm:$0xf]  ;;  %v292_v48 = vmul.f32 %v5567_v3, %v253_v30 }
  0x96   : > { %v5093_v12 = vld [vmem:[#allocation2 + $0x48] sm:$0xff]   ;;  %2716 = vrot.lane.b32.xlu0 %v4839_v27, %s5156_s9  ;;  %v5675_v41 = vrot.slane %v710_v62, 7  ;;  %489 = vst [vmem:[#allocation2 + $0x68] sm:$0x1] %v488_v37  ;;  %v2406_v53 = vshll.u32 %v2244_v26, 16  ;;  %v2410_v54 = vshrl.u32 %v2244_v26, 16  ;;  %v293_v61 = vmul.f32 %v5567_v3, %v254_v38 }
  0x97   : > { %v2243_v45 = vld [vmem:[#allocation2 + $0x48] sm:$0xf]  ;;  %v707_v46 = vor.u32 %v705_v24, %v704_v36  ;;  %2173 = vrot.lane.b32.xlu1 %v5093_v12, %s5152_s30  ;;  %v2789_v50 = vld [vmem:[#allocation2 + $0x4c] sm:$0xf]  ;;  %v708_v47 = vrot.slane %v704_v36, 4  ;;  %v5691_v25 = vadd.f32 %v5514_v57, %v292_v48  ;;  %v255_v26 = vld [vmem:[%s5241_s25 + $0x90] sm:$0xff] }
  0x98   : > { %v2788_v42 = vld [vmem:[#allocation2 + $0x48] sm:$0xe]  ;;  %v2397_v29 = vshrl.u32 %v2243_v45, 16  ;;  %v2400_v49 = vshll.u32 %v2243_v45, 16  ;;  %v2906_v60 = vrot.slane %v2789_v50, 5  ;;  %v715_v34 = vor.u32 %v713_v17, %v5675_v41  ;;  %v5695_v22 = vpop.permute.xlu0 %1662 }
  0x99   : > { %v4856_v18 = vrot.slane %v2788_v42, 9  ;;  %v2408_v6 = vrot.slane %v2406_v53, 5  ;;  %v2412_v56 = vrot.slane %v2410_v54, 4  ;;  %v5094_v10 = vld [vmem:[#allocation2 + $0x48] sm:$0xff]   ;;  %v717_v7 = vrot.slane %v5675_v41, 4 }
  0x9a   : > { %v2399_v4 = vrot.slane %v2397_v29, 4  ;;  %v2402_v5 = vrot.slane %v2400_v49, 5  ;;  %3037 = vrot.lane.b32.xlu0 %v4871_v39, %s5154_s7  ;;  %v2908_v11 = vrot.slane %v2906_v60, 4  ;;  %v964_v0 = vld [vmem:[#allocation2 + $0x54] sm:$0xf]  ;;  %v716_v20 = vsel %vm5308_vm14, %v708_v47, %v715_v34 }
  0x9b   : > { %v2413_v32 = vor.u32 %v2412_v56, %v2408_v6  ;;  %v965_v58 = vsel %vm5298_vm13, %v707_v46, %v964_v0  ;;  %v3284_v59 = vld [vmem:[#allocation2 + $0x48] sm:$0xf]  ;;  %v3285_v35 = vld [vmem:[#allocation2 + $0x4c] sm:$0xf]  ;;  %v5698_v43 = vadd.f32 %v5514_v57, %v293_v61  ;;  %967 = vst.msk [vmem:[#allocation2 + $0x58] sm:$0xf] %vm395_vm0, %v716_v20  ;;  %v2907_v36 = vsel %vm5232_vm8, %v4856_v18, %v2906_v60 }
  0x9c   : > { %v2245_v44 = vld [vmem:[#allocation2 + $0x50] sm:$0x1]  ;;  %v2403_v16 = vor.u32 %v2402_v5, %v2399_v4  ;;  %966 = vst [vmem:[#allocation2 + $0x54] sm:$0xf] %v965_v58  ;;  %v3417_v27 = vshrl.u32 %v3284_v59, 16  ;;  %v3420_v55 = vshll.u32 %v3284_v59, 16  ;;  %v5718_v56 = vmul.f32 %v5567_v3, %v255_v26 }
  0x9d   : > { %v2790_v52 = vld [vmem:[#allocation2 + $0x50] sm:$0x1]  ;;  %v2416_v19 = vshll.u32 %v2245_v44, 16  ;;  %v2414_v14 = vrot.slane %v2413_v32, 4  ;;  %v968_v62 = vld [vmem:[#allocation2 + $0x5c] sm:$0x1] }
  0x9e   : > { %v2909_v15 = vrot.slane %v2790_v52, 5  ;;  %v3286_v23 = vld [vmem:[#allocation2 + $0x50] sm:$0x1]  ;;  %v2404_v24 = vrot.slane %v2403_v16, 4  ;;  %3215 = vrot.lane.b32.xlu0 %v5094_v10, %s5153_s6  ;;  %v3426_v17 = vshll.u32 %v3285_v35, 16  ;;  %v3430_v57 = vshrl.u32 %v3285_v35, 16 }
  0x9f   : > { %v2418_v30 = vrot.slane %v2416_v19, 5  ;;  %v3829_v37 = vld [vmem:[#allocation2 + $0x48] sm:$0xe]  ;;  %v3419_v39 = vrot.slane %v3417_v27, 4  ;;  %v3422_v41 = vrot.slane %v3420_v55, 5  ;;  %v3436_v29 = vshll.u32 %v3286_v23, 16  ;;  %v5711_v53 = vpop.permute.xlu1 %2165 }
  0xa0   : > { %v2409_v38 = vsel %vm5290_vm12, %v2404_v24, %v2408_v6  ;;  %v2910_v12 = vsel %vm5232_vm8, %v2908_v11, %v2909_v15  ;;  %v3830_v45 = vld [vmem:[#allocation2 + $0x4c] sm:$0xf]  ;;  %v3428_v46 = vrot.slane %v3426_v17, 5  ;;  %v3432_v48 = vrot.slane %v3430_v57, 4  ;;  %v1197_v49 = vld [vmem:[#allocation2 + $0x48] sm:$0xf] }
  0xa1   : > { %v2419_v42 = vsel %vm5290_vm12, %v2414_v14, %v2418_v30  ;;  %v3423_v50 = vor.u32 %v3422_v41, %v3419_v39  ;;  %v969_v18 = vsel %vm5204_vm3, %v717_v7, %v968_v62  ;;  %v3831_v60 = vld [vmem:[#allocation2 + $0x50] sm:$0x1]  ;;  %v4919_v34 = vrot.slane %v3829_v37, 9  ;;  %v1198_v15 = vld [vmem:[#allocation2 + $0x4c] sm:$0xf] }
  0xa2   : > { %v4840_v54 = vcombine.low %v2409_v38, %v2419_v42  ;;  %v3433_v61 = vor.u32 %v3432_v48, %v3428_v46  ;;  %v3438_v4 = vrot.slane %v3436_v29, 5  ;;  %970 = vst [vmem:[#allocation2 + $0x5c] sm:$0x1] %v969_v18  ;;  %v3943_v5 = vrot.slane %v3830_v45, 5  ;;  %v5715_v6 = vpop.permute.xlu0 %2163  ;;  %v3288_v44 = vld [vmem:[#allocation2 + $0x58] sm:$0xf] }
  0xa3   : > { %v4872_v10 = vcombine.low %v2907_v36, %v2910_v12  ;;  %v3424_v11 = vrot.slane %v3423_v50, 4  ;;  %v3287_v47 = vld [vmem:[#allocation2 + $0x54] sm:$0xf]  ;;  %v1375_v0 = vshrl.u32 %v1197_v49, 16  ;;  %v5724_v7 = vpack.c.bf16 %v361_v28, %v361_v28  ;;  %v1199_v23 = vld [vmem:[#allocation2 + $0x50] sm:$0x1] }
  0xa4   : > { %2718 = vrot.lane.b32.xlu1 %v4840_v54, %s5156_s9  ;;  %v3434_v31 = vrot.slane %v3433_v61, 4  ;;  %v3944_v16 = vsel %vm5232_vm8, %v4919_v34, %v3943_v5  ;;  %v3946_v32 = vrot.slane %v3831_v60, 5  ;;  %v5731_v52 = vpack.c.bf16 %v362_v51, %v362_v51  ;;  %v5095_v51 = vld [vmem:[#allocation2 + $0x54] sm:$0xff]  }
  0xa5   : > { %v3429_v58 = vsel %vm5290_vm12, %v3424_v11, %v3428_v46  ;;  %v3441_v59 = vshrl.u32 %v3287_v47, 16  ;;  %v3444_v19 = vshll.u32 %v3287_v47, 16  ;;  %v3450_v2 = vshll.u32 %v3288_v44, 16  ;;  %v5737_v14 = vpop.permute.xlu1 %3209  ;;  %v3832_v36 = vld [vmem:[#allocation2 + $0x54] sm:$0xe] }
  0xa6   : > { %v3439_v28 = vsel %vm5290_vm12, %v3434_v31, %v3438_v4  ;;  %v3454_v20 = vshrl.u32 %v3288_v44, 16  ;;  %v3945_v35 = vrot.slane %v3943_v5, 4  ;;  %v1377_v24 = vrot.slane %v1375_v0, 4  ;;  %v5739_v40 = vpop.permute.xlu0 %3207  ;;  %v3833_v12 = vld [vmem:[#allocation2 + $0x58] sm:$0xf] }
  0xa7   : > { %v4903_v27 = vcombine.low %v3429_v58, %v3439_v28  ;;  %v3443_v55 = vrot.slane %v3441_v59, 4  ;;  %v3446_v62 = vrot.slane %v3444_v19, 5  ;;  %v3452_v30 = vrot.slane %v3450_v2, 5  ;;  %v1200_v46 = vld [vmem:[#allocation2 + $0x54] sm:$0xf] }
  0xa8   : > { %3039 = vrot.lane.b32.xlu1 %v4872_v10, %s5154_s7  ;;  %v3456_v17 = vrot.slane %v3454_v20, 4  ;;  %v3947_v57 = vsel %vm5232_vm8, %v3945_v35, %v3946_v32  ;;  %v1378_v37 = vshll.u32 %v1197_v49, 16  ;;  %v1384_v38 = vshll.u32 %v1198_v15, 16  ;;  %v1201_v32 = vld [vmem:[#allocation2 + $0x58] sm:$0xf] }
  0xa9   : > { %3760 = vrot.lane.b32.xlu0 %v4903_v27, %s5157_s10  ;;  %v3289_v39 = vld [vmem:[#allocation2 + $0x5c] sm:$0x1]  ;;  %v3447_v41 = vor.u32 %v3446_v62, %v3443_v55  ;;  %v4935_v45 = vcombine.low %v3944_v16, %v3947_v57  ;;  %v1388_v26 = vshrl.u32 %v1198_v15, 16  ;;  %v1394_v42 = vshll.u32 %v1199_v23, 16  ;;  %v1745_v19 = vld [vmem:[#allocation2 + $0x48] sm:$0xe] }
  0xaa   : > { %v3457_v48 = vor.u32 %v3456_v17, %v3452_v30  ;;  %v3460_v29 = vshll.u32 %v3289_v39, 16  ;;  %v1380_v54 = vrot.slane %v1378_v37, 5  ;;  %v1386_v50 = vrot.slane %v1384_v38, 5  ;;  %v3834_v18 = vld [vmem:[#allocation2 + $0x5c] sm:$0x1]  ;;  %v5745_v60 = vpop.permute.xlu0 %2167 }
  0xab   : > { %v3448_v49 = vrot.slane %v3447_v41, 4  ;;  %v1390_v34 = vrot.slane %v1388_v26, 4  ;;  %v1396_v61 = vrot.slane %v1394_v42, 5  ;;  %v4920_v4 = vrot.slane %v3832_v36, 9  ;;  %v1202_v58 = vld [vmem:[#allocation2 + $0x5c] sm:$0x1] }
  0xac   : > { %3217 = vrot.lane.b32.xlu1 %v5095_v51, %s5153_s6  ;;  %v3458_v5 = vrot.slane %v3457_v48, 4  ;;  %v3462_v10 = vrot.slane %v3460_v29, 5  ;;  %v1381_v11 = vor.u32 %v1380_v54, %v1377_v24  ;;  %v3950_v47 = vrot.slane %v3833_v12, 5  ;;  %v1746_v35 = vld [vmem:[#allocation2 + $0x4c] sm:$0xf] }
  0xad   : > { %v5748_v0 = vpop.permute.xlu1 %2169  ;;  %v3453_v31 = vsel %vm5290_vm12, %v3448_v49, %v3452_v30  ;;  %4081 = vrot.lane.b32.xlu0 %v4935_v45, %s5155_s8  ;;  %v1391_v44 = vor.u32 %v1390_v34, %v1386_v50  ;;  %v3953_v16 = vrot.slane %v3834_v18, 5  ;;  %v1399_v59 = vshrl.u32 %v1200_v46, 16  ;;  %v1747_v57 = vld [vmem:[#allocation2 + $0x50] sm:$0x1]  ;;  %v1748_v37 = vld [vmem:[#allocation2 + $0x54] sm:$0xe] }
  0xae   : > { %v3463_v2 = vsel %vm5290_vm12, %v3458_v5, %v3462_v10  ;;  %v1382_v15 = vrot.slane %v1381_v11, 4  ;;  %v3951_v28 = vsel %vm5232_vm8, %v4920_v4, %v3950_v47  ;;  %v3952_v20 = vrot.slane %v3950_v47, 4  ;;  %v5757_v23 = vpop.permute.xlu0 %3029  ;;  %v1749_v26 = vld [vmem:[#allocation2 + $0x58] sm:$0xf]  ;;  %v1750_v42 = vld [vmem:[#allocation2 + $0x5c] sm:$0x1] }
  0xaf   : > { %v4904_v24 = vcombine.low %v3453_v31, %v3463_v2  ;;  %v1392_v51 = vrot.slane %v1391_v44, 4  ;;  %v1401_v27 = vrot.slane %v1399_v59, 4  ;;  %v1402_v55 = vshll.u32 %v1200_v46, 16 }
  0xb0   : > { %v1387_v62 = vsel %vm5290_vm12, %v1382_v15, %v1386_v50  ;;  %v3954_v30 = vsel %vm5232_vm8, %v3952_v20, %v3953_v16  ;;  %v1408_v36 = vshll.u32 %v1201_v32, 16  ;;  %v1412_v17 = vshrl.u32 %v1201_v32, 16  ;;  %v971_v15 = vld [vmem:[#allocation2 + $0x60] sm:$0xf] }
  0xb1   : > { %v5763_v38 = vpop.permute.xlu1 %1988  ;;  %3762 = vrot.lane.b32.xlu1 %v4904_v24, %s5157_s10  ;;  %v1397_v12 = vsel %vm5290_vm12, %v1392_v51, %v1396_v61  ;;  %v4936_v39 = vcombine.low %v3951_v28, %v3954_v30  ;;  %v1404_v41 = vrot.slane %v1402_v55, 5  ;;  %v1418_v45 = vshll.u32 %v1202_v58, 16  ;;  %v256_v28 = vld [vmem:[%s5241_s25 + $0x98] sm:$0xff]  ;;  %v2246_v55 = vld [vmem:[#allocation2 + $0x54] sm:$0xf] }
  0xb2   : > { %v4777_v46 = vcombine.low %v1387_v62, %v1397_v12  ;;  %v1410_v48 = vrot.slane %v1408_v36, 5  ;;  %v1414_v29 = vrot.slane %v1412_v17, 4  ;;  %v4793_v54 = vrot.slane %v1745_v19, 9  ;;  %v5768_v50 = vpop.permute.xlu0 %4073  ;;  %v2247_v62 = vld [vmem:[#allocation2 + $0x58] sm:$0xf] }
  0xb3   : > { %4083 = vrot.lane.b32.xlu0 %v4936_v39, %s5155_s8  ;;  %v1405_v18 = vor.u32 %v1404_v41, %v1401_v27  ;;  %v1420_v49 = vrot.slane %v1418_v45, 5  ;;  %v1870_v34 = vrot.slane %v1746_v35, 5  ;;  %v1873_v4 = vrot.slane %v1747_v57, 5  ;;  %v2248_v57 = vld [vmem:[#allocation2 + $0x5c] sm:$0x1]  ;;  %v5096_v41 = vld [vmem:[#allocation2 + $0x54] sm:$0xff]  }
  0xb4   : > { %v1415_v5 = vor.u32 %v1414_v29, %v1410_v48  ;;  %v4794_v61 = vrot.slane %v1748_v37, 9  ;;  %v1877_v10 = vrot.slane %v1749_v26, 5  ;;  %v1880_v11 = vrot.slane %v1750_v42, 5  ;;  %v5793_v37 = vld [vmem:[#allocation2 + $0x54] sm:$0xe] }
  0xb5   : > { %v5771_v47 = vpop.permute.xlu1 %3031  ;;  %1674 = vrot.lane.b32.xlu1 %v4777_v46, %s5151_s29  ;;  %v1406_v31 = vrot.slane %v1405_v18, 4  ;;  %v1871_v44 = vsel %vm5232_vm8, %v4793_v54, %v1870_v34  ;;  %v1872_v16 = vrot.slane %v1870_v34, 4  ;;  %v719_v32 = vshrl.u32 %v5724_v7, 16  ;;  %v975_v42 = vld [vmem:[#allocation2 + $0x68] sm:$0x1]  ;;  %v5098_v34 = vld [vmem:[#allocation2] sm:$0xff]  }
  0xb6   : > { %v1416_v58 = vrot.slane %v1415_v5, 4  ;;  %v1878_v59 = vsel %vm5232_vm8, %v4794_v61, %v1877_v10  ;;  %v1879_v19 = vrot.slane %v1877_v10, 4  ;;  %v722_v2 = vshll.u32 %v5724_v7, 16  ;;  %v5797_v46 = vld [vmem:[#allocation2 + $0x58] sm:$0xf]  ;;  %1163 = vst.msk [vmem:[#allocation3] sm:$0xff] %vm7035_vm15, %v5098_v34 }
  0xb7   : > { %v5781_v20 = vpop.permute.xlu0 %4075  ;;  %v1411_v35 = vsel %vm5290_vm12, %v1406_v31, %v1410_v48  ;;  %v1874_v24 = vsel %vm5232_vm8, %v1872_v16, %v1873_v4  ;;  %v721_v51 = vrot.slane %v719_v32, 7  ;;  %v727_v27 = vshrl.u32 %v5731_v52, 16  ;;  %v5103_v4 = vld [vmem:[#allocation2 + $0xc] sm:$0xff]   ;;  %v5106_v5 = vld [vmem:[#allocation2 + $0x18] sm:$0xff]  }
  0xb8   : > { %v1421_v30 = vsel %vm5290_vm12, %v1416_v58, %v1420_v49  ;;  %v4809_v36 = vcombine.low %v1871_v44, %v1874_v24  ;;  %v1881_v7 = vsel %vm5232_vm8, %v1879_v19, %v1880_v11  ;;  %v730_v17 = vshll.u32 %v5731_v52, 16  ;;  %v5803_v49 = vld [vmem:[#allocation2 + $0x5c] sm:$0x1]  ;;  %v5108_v44 = vld [vmem:[#allocation2 + $0x24] sm:$0xff]   ;;  %v5113_v16 = vld [vmem:[#allocation2 + $0x30] sm:$0xff]   ;;  %1164 = vst.msk [vmem:[#allocation3 + $0x8] sm:$0xff] %vm7035_vm15, %v5103_v4 }
  0xb9   : > { %v5795_v12 = vpop.permute.xlu1 %1992  ;;  %v4778_v39 = vcombine.low %v1411_v35, %v1421_v30  ;;  %v724_v45 = vor.u32 %v722_v2, %v721_v51  ;;  %v725_v26 = vrot.slane %v721_v51, 4  ;;  %v5800_v48 = vmul.f32 %v5567_v3, %v256_v28  ;;  %v5114_v24 = vld [vmem:[#allocation2 + $0x3c] sm:$0xff]   ;;  %1165 = vst.msk [vmem:[#allocation3 + $0x10] sm:$0xff] %vm7035_vm15, %v5106_v5  ;;  %1166 = vst.msk [vmem:[#allocation3 + $0x18] sm:$0xff] %vm7035_vm15, %v5108_v44 }
  0xba   : > { %1998 = vrot.lane.b32.xlu0 %v4809_v36, %s5150_s28  ;;  %v729_v29 = vrot.slane %v727_v27, 7  ;;  %v2421_v54 = vshrl.u32 %v2246_v55, 16  ;;  %v2424_v52 = vshll.u32 %v2246_v55, 16  ;;  %v2430_v18 = vshll.u32 %v2247_v62, 16  ;;  %1167 = vst.msk [vmem:[#allocation3 + $0x20] sm:$0xff] %vm7035_vm15, %v5113_v16  ;;  %1168 = vst.msk [vmem:[#allocation3 + $0x28] sm:$0xff] %vm7035_vm15, %v5114_v24 }
  0xbb   : > { %1676 = vrot.lane.b32.xlu1 %v4778_v39, %s5151_s29  ;;  %v4810_v61 = vcombine.low %v1878_v59, %v1881_v7  ;;  %v972_v10 = vsel %vm5298_vm13, %v724_v45, %v971_v15  ;;  %v2434_v11 = vshrl.u32 %v2247_v62, 16  ;;  %v2440_v31 = vshll.u32 %v2248_v57, 16  ;;  %v5810_v35 = vpop.permute.xlu0 %1990  ;;  %v434_v7 = vld [vmem:[#allocation2 + $0x6c] sm:$0x1]  ;;  %v260_v24 = vld [vmem:[%s5241_s25 + $0xb8] sm:$0xff] }
  0xbc   : > { %v732_v32 = vor.u32 %v730_v17, %v729_v29  ;;  %v734_v58 = vrot.slane %v729_v29, 4  ;;  %973 = vst [vmem:[#allocation2 + $0x60] sm:$0xf] %v972_v10  ;;  %v2423_v19 = vrot.slane %v2421_v54, 4  ;;  %v2426_v2 = vrot.slane %v2424_v52, 5  ;;  %v257_v52 = vld [vmem:[%s5241_s25 + $0xa0] sm:$0xff] }
  0xbd   : > { %v5808_v28 = vpop.permute.xlu1 %2710  ;;  %v2432_v51 = vrot.slane %v2430_v18, 5  ;;  %v2436_v27 = vrot.slane %v2434_v11, 4  ;;  %v4857_v59 = vrot.slane %v5793_v37, 9  ;;  %v2913_v15 = vrot.slane %v5797_v46, 5  ;;  %v258_v18 = vld [vmem:[%s5241_s25 + $0xa8] sm:$0xff] }
  0xbe   : > { %2175 = vrot.lane.b32.xlu0 %v5096_v41, %s5152_s30  ;;  %v733_v55 = vsel %vm5308_vm14, %v725_v26, %v732_v32  ;;  %v2427_v62 = vor.u32 %v2426_v2, %v2423_v19  ;;  %v2442_v30 = vrot.slane %v2440_v31, 5  ;;  %v976_v36 = vsel %vm5204_vm3, %v734_v58, %v975_v42 }
  0xbf   : > { %2000 = vrot.lane.b32.xlu1 %v4810_v61, %s5150_s28  ;;  %974 = vst.msk [vmem:[#allocation2 + $0x64] sm:$0xf] %vm395_vm0, %v733_v55  ;;  %v2437_v17 = vor.u32 %v2436_v27, %v2432_v51  ;;  %977 = vst [vmem:[#allocation2 + $0x68] sm:$0x1] %v976_v36  ;;  %v2915_v57 = vrot.slane %v2913_v15, 4  ;;  %v2916_v37 = vrot.slane %v5803_v49, 5  ;;  %v2914_v34 = vsel %vm5232_vm8, %v4857_v59, %v2913_v15 }
  0xc0   : > { %v2428_v39 = vrot.slane %v2427_v62, 4  ;;  %vm1710_vm2 = vcmask 64544   ;;  %v363_v41 = vmax.f32 %v5691_v25, 0.0  ;;  %v364_v45 = vmax.f32 %v5698_v43, 0.0 }
  0xc1   : > { %v5825_v26 = vpop.permute.xlu1 %3754  ;;  %v2438_v42 = vrot.slane %v2437_v17, 4  ;;  %1711 = vst.msk [vmem:[#allocation3] sm:$0xff] %vm1710_vm2, %v5695_v22  ;;  %v435_v25 = vsel %vm5204_vm3, 0, %v434_v7  ;;  %vm2034_vm4 = vcmask 97344   ;;  %v2917_v4 = vsel %vm5232_vm8, %v2915_v57, %v2916_v37 }
  0xc2   : > { %v2433_v43 = vsel %vm5290_vm12, %v2428_v39, %v2432_v51  ;;  %436 = vst [vmem:[#allocation2 + $0x6c] sm:$0x1] %v435_v25  ;;  %v4986_v46 = vpack.c.bf16 %v363_v41, %v363_v41  ;;  %v5838_v29 = vpack.c.bf16 %v364_v45, %v364_v45  ;;  %2035 = vst.msk [vmem:[#allocation3] sm:$0xff] %vm2034_vm4, %v5683_v63  ;;  %v1665_v54 = vpop.permute.xlu0 %1664  ;;  %v5853_v63 = vld [vmem:[%s7030_s2] ss:$0 sm:$0xff]  ;;  %vm2211_vm5 = vcmask 130144  }
  0xc3   : > { %v2443_v22 = vsel %vm5290_vm12, %v2438_v42, %v2442_v30  ;;  %v2249_v49 = vld [vmem:[#allocation2 + $0x60] sm:$0xf]  ;;  %v5857_v61 = vadd.f32 %v5853_v63, %v5718_v56  ;;  %1712 = vst.msk [vmem:[#allocation3 + $0x8] sm:$0xff] %vm1710_vm2, %v1665_v54  ;;  %v5862_v44 = vadd.f32 %v5853_v63, %v5800_v48  ;;  %v259_v56 = vld [vmem:[%s5241_s25 + $0xb0] sm:$0xff]  ;;  %v4873_v15 = vcombine.low %v2914_v34, %v2917_v4 }
  0xc4   : > { %v2794_v5 = vld [vmem:[#allocation2 + $0x60] sm:$0xe]  ;;  %v4841_v10 = vcombine.low %v2433_v43, %v2443_v22  ;;  %v2445_v11 = vshrl.u32 %v2249_v49, 16  ;;  %v2448_v31 = vshll.u32 %v2249_v49, 16  ;;  %2036 = vst.msk [vmem:[#allocation3 + $0x8] sm:$0xff] %vm2034_vm4, %v5763_v38  ;;  %v736_v32 = vshrl.u32 %v4986_v46, 16 }
  0xc5   : > { %v4858_v16 = vrot.slane %v2794_v5, 9  ;;  %v739_v58 = vshll.u32 %v4986_v46, 16  ;;  %v744_v19 = vshrl.u32 %v5838_v29, 16  ;;  %v1667_v2 = vpop.permute.xlu1 %1666  ;;  %v5871_v48 = vmul.f32 %v5567_v3, %v257_v52  ;;  %v3290_v17 = vld [vmem:[#allocation2 + $0x60] sm:$0xf]  ;;  %2212 = vst.msk [vmem:[#allocation3] sm:$0xff] %vm2211_vm5, %v5715_v6 }
  0xc6   : > { %v5097_v51 = vld [vmem:[#allocation2 + $0x60] sm:$0xff]   ;;  %2720 = vrot.lane.b32.xlu0 %v4841_v10, %s5156_s9  ;;  %v2447_v59 = vrot.slane %v2445_v11, 4  ;;  %v5874_v55 = vmul.f32 %v5567_v3, %v258_v18  ;;  %1713 = vst.msk [vmem:[#allocation3 + $0x10] sm:$0xff] %vm1710_vm2, %v1667_v2  ;;  %v2251_v38 = vld [vmem:[#allocation2 + $0x68] sm:$0x1]  ;;  %v2450_v62 = vrot.slane %v2448_v31, 5 }
  0xc7   : > { %v2250_v27 = vld [vmem:[#allocation2 + $0x64] sm:$0xf]  ;;  %v747_v7 = vshll.u32 %v5838_v29, 16  ;;  %2037 = vst.msk [vmem:[#allocation3 + $0x10] sm:$0xff] %vm2034_vm4, %v5810_v35  ;;  %2177 = vrot.lane.b32.xlu1 %v5097_v51, %s5152_s30  ;;  %v2464_v57 = vshll.u32 %v2251_v38, 16  ;;  %v738_v41 = vrot.slane %v736_v32, 7 }
  0xc8   : > { %v2454_v30 = vshll.u32 %v2250_v27, 16  ;;  %v2458_v36 = vshrl.u32 %v2250_v27, 16  ;;  %v2795_v37 = vld [vmem:[#allocation2 + $0x64] sm:$0xf]  ;;  %v2796_v39 = vld [vmem:[#allocation2 + $0x68] sm:$0x1]  ;;  %v2451_v25 = vor.u32 %v2450_v62, %v2447_v59 }
  0xc9   : > { %v5884_v3 = vld [vmem:[%s7029_s1] ss:$0 sm:$0xff]  ;;  %v2920_v46 = vrot.slane %v2795_v37, 5  ;;  %v2466_v29 = vrot.slane %v2464_v57, 5  ;;  %v2923_v54 = vrot.slane %v2796_v39, 5  ;;  %v741_v18 = vor.u32 %v739_v58, %v738_v41  ;;  %2213 = vst.msk [vmem:[#allocation3 + $0x8] sm:$0xff] %vm2211_vm5, %v5711_v53 }
  0xca   : > { %v5887_v45 = vmul.f32 %v5884_v3, %v259_v56  ;;  %v5890_v42 = vmul.f32 %v5884_v3, %v260_v24  ;;  %v2456_v43 = vrot.slane %v2454_v30, 5  ;;  %v2460_v35 = vrot.slane %v2458_v36, 4  ;;  %3041 = vrot.lane.b32.xlu0 %v4873_v15, %s5154_s7  ;;  %v5099_v52 = vld [vmem:[#allocation2 + $0x60] sm:$0xff]   ;;  %v978_v49 = vld [vmem:[#allocation2 + $0x6c] sm:$0xf]  ;;  %2214 = vst.msk [vmem:[#allocation3 + $0x10] sm:$0xff] %vm2211_vm5, %v5745_v60  ;;  %v5915_v36 = vpop.permute.xlu0 %2708 }
  0xcb   : > { %v742_v22 = vrot.slane %v738_v41, 4  ;;  %v2452_v34 = vrot.slane %v2451_v25, 4  ;;  %v5895_v5 = vsel %vm5232_vm8, %v4858_v16, %v2920_v46  ;;  %v2922_v10 = vrot.slane %v2920_v46, 4  ;;  %v490_v11 = vld [vmem:[#allocation2 + $0x74] sm:$0x1] }
  0xcc   : > { %v2461_v4 = vor.u32 %v2460_v35, %v2456_v43  ;;  %v5897_v31 = vrot.slane %v744_v19, 7  ;;  %v979_v32 = vsel %vm5298_vm13, %v741_v18, %v978_v49  ;;  %v3291_v2 = vld [vmem:[#allocation2 + $0x64] sm:$0xf]  ;;  %v3465_v56 = vshrl.u32 %v3290_v17, 16  ;;  %v3292_v16 = vld [vmem:[#allocation2 + $0x68] sm:$0x1] }
  0xcd   : > { %v2457_v58 = vsel %vm5290_vm12, %v2452_v34, %v2456_v43  ;;  %v2924_v51 = vsel %vm5232_vm8, %v2922_v10, %v2923_v54  ;;  %980 = vst [vmem:[#allocation2 + $0x6c] sm:$0xf] %v979_v32  ;;  %v3468_v19 = vshll.u32 %v3290_v17, 16  ;;  %v3835_v27 = vld [vmem:[#allocation2 + $0x60] sm:$0xe]  ;;  %v3474_v57 = vshll.u32 %v3291_v2, 16 }
  0xce   : > { %v2462_v24 = vrot.slane %v2461_v4, 4  ;;  %v4874_v59 = vcombine.low %v5895_v5, %v2924_v51  ;;  %3219 = vrot.lane.b32.xlu0 %v5099_v52, %s5153_s6  ;;  %v749_v15 = vor.u32 %v747_v7, %v5897_v31  ;;  %v751_v38 = vrot.slane %v5897_v31, 4  ;;  %v3836_v30 = vld [vmem:[#allocation2 + $0x64] sm:$0xf]  ;;  %v3837_v6 = vld [vmem:[#allocation2 + $0x68] sm:$0x1] }
  0xcf   : > { %v3467_v62 = vrot.slane %v3465_v56, 4  ;;  %v3470_v53 = vrot.slane %v3468_v19, 5  ;;  %v3478_v37 = vshrl.u32 %v3291_v2, 16  ;;  %v1203_v60 = vld [vmem:[#allocation2 + $0x60] sm:$0xf]  ;;  %v1669_v39 = vpop.permute.xlu1 %1668  ;;  %v3484_v7 = vshll.u32 %v3292_v16, 16 }
  0xd0   : > { %v2467_v17 = vsel %vm5290_vm12, %v2462_v24, %v2466_v29  ;;  %v750_v25 = vsel %vm5308_vm14, %v742_v22, %v749_v15  ;;  %v491_v43 = vsel %vm5218_vm7, 0, %v490_v11  ;;  %v1204_v35 = vld [vmem:[#allocation2 + $0x64] sm:$0xf]  ;;  %1714 = vst.msk [vmem:[#allocation3 + $0x18] sm:$0xff] %vm1710_vm2, %v1669_v39  ;;  %v3476_v29 = vrot.slane %v3474_v57, 5 }
  0xd1   : > { %v4842_v41 = vcombine.low %v2457_v58, %v2467_v17  ;;  %981 = vst.msk [vmem:[#allocation2 + $0x70] sm:$0xf] %vm395_vm0, %v750_v25  ;;  %v3471_v46 = vor.u32 %v3470_v53, %v3467_v62  ;;  %v3480_v54 = vrot.slane %v3478_v37, 4  ;;  %492 = vst [vmem:[#allocation2 + $0x74] sm:$0x1] %v491_v43  ;;  %v4921_v52 = vrot.slane %v3835_v27, 9 }
  0xd2   : > { %2038 = vst.msk [vmem:[#allocation3 + $0x18] sm:$0xff] %vm2034_vm4, %v5795_v12  ;;  %v3486_v18 = vrot.slane %v3484_v7, 5  ;;  %v3957_v22 = vrot.slane %v3836_v30, 5  ;;  %v3960_v49 = vrot.slane %v3837_v6, 5  ;;  %v1423_v34 = vshrl.u32 %v1203_v60, 16 }
  0xd3   : > { %2722 = vrot.lane.b32.xlu1 %v4842_v41, %s5156_s9  ;;  %2215 = vst.msk [vmem:[#allocation3 + $0x18] sm:$0xff] %vm2211_vm5, %v5748_v0  ;;  %v3472_v4 = vrot.slane %v3471_v46, 4  ;;  %v3481_v5 = vor.u32 %v3480_v54, %v3476_v29  ;;  %v1426_v10 = vshll.u32 %v1203_v60, 16  ;;  %v1432_v11 = vshll.u32 %v1204_v35, 16  ;;  %v5936_v24 = vpop.permute.xlu0 %3752  ;;  %v1205_v15 = vld [vmem:[#allocation2 + $0x68] sm:$0x1] }
  0xd4   : > { %v3293_v32 = vld [vmem:[#allocation2 + $0x6c] sm:$0xf]  ;;  %v3958_v2 = vsel %vm5232_vm8, %v4921_v52, %v3957_v22  ;;  %v3959_v56 = vrot.slane %v3957_v22, 4  ;;  %v1425_v58 = vrot.slane %v1423_v34, 4  ;;  %v5934_v12 = vadd.f32 %v5853_v63, %v5871_v48 }
  0xd5   : > { %v3477_v51 = vsel %vm5290_vm12, %v3472_v4, %v3476_v29  ;;  %v3482_v0 = vrot.slane %v3481_v5, 4  ;;  %v3489_v16 = vshrl.u32 %v3293_v32, 16  ;;  %v3492_v19 = vshll.u32 %v3293_v32, 16  ;;  %v1206_v57 = vld [vmem:[#allocation2 + $0x6c] sm:$0xf] }
  0xd6   : > { %v3961_v27 = vsel %vm5232_vm8, %v3959_v56, %v3960_v49  ;;  %v1428_v62 = vrot.slane %v1426_v10, 5  ;;  %v5943_v30 = vrot.slane %v1432_v11, 5  ;;  %v1436_v6 = vshrl.u32 %v1204_v35, 16  ;;  %v3838_v31 = vld [vmem:[#allocation2 + $0x6c] sm:$0xe] }
  0xd7   : > { %3043 = vrot.lane.b32.xlu1 %v4874_v59, %s5154_s7  ;;  %v3487_v48 = vsel %vm5290_vm12, %v3482_v0, %v3486_v18  ;;  %v3491_v17 = vrot.slane %v3489_v16, 4  ;;  %v3494_v53 = vrot.slane %v3492_v19, 5  ;;  %v5949_v37 = vadd.f32 %v5853_v63, %v5874_v55  ;;  %v5951_v7 = vpop.permute.xlu0 %2712  ;;  %v261_v18 = vld [vmem:[%s5241_s25 + $0xc0] sm:$0xff] }
  0xd8   : > { %v5100_v59 = vld [vmem:[#allocation2 + $0x6c] sm:$0xff]   ;;  %v4905_v60 = vcombine.low %v3477_v51, %v3487_v48  ;;  %v982_v39 = vld [vmem:[#allocation2 + $0x74] sm:$0x1]  ;;  %v1429_v41 = vor.u32 %v1428_v62, %v1425_v58  ;;  %v1438_v25 = vrot.slane %v1436_v6, 4  ;;  %v5955_v43 = vadd.f32 %v5853_v63, %v5887_v45  ;;  %v1751_v4 = vld [vmem:[#allocation2 + $0x60] sm:$0xe] }
  0xd9   : > { %v983_v35 = vsel %vm5204_vm3, %v751_v38, %v982_v39  ;;  %v3294_v46 = vld [vmem:[#allocation2 + $0x70] sm:$0xf]  ;;  %v3495_v29 = vor.u32 %v3494_v53, %v3491_v17  ;;  %v4937_v55 = vcombine.low %v3958_v2, %v3961_v27  ;;  %v1442_v54 = vshll.u32 %v1205_v15, 16  ;;  %v1752_v32 = vld [vmem:[#allocation2 + $0x64] sm:$0xf] }
  0xda   : > { %v3839_v52 = vld [vmem:[#allocation2 + $0x70] sm:$0xf]  ;;  %3764 = vrot.lane.b32.xlu0 %v4905_v60, %s5157_s10  ;;  %984 = vst [vmem:[#allocation2 + $0x74] sm:$0x1] %v983_v35  ;;  %v3498_v22 = vshll.u32 %v3294_v46, 16  ;;  %v3502_v49 = vshrl.u32 %v3294_v46, 16  ;;  %v1439_v34 = vor.u32 %v1438_v25, %v5943_v30  ;;  %v5967_v2 = vadd.f32 %v5853_v63, %v5890_v42 }
  0xdb   : > { %3221 = vrot.lane.b32.xlu1 %v5100_v59, %s5153_s6  ;;  %v1430_v45 = vrot.slane %v1429_v41, 4  ;;  %v1444_v5 = vrot.slane %v1442_v54, 5  ;;  %v3964_v38 = vrot.slane %v3839_v52, 5  ;;  %v1207_v10 = vld [vmem:[#allocation2 + $0x70] sm:$0xf]  ;;  %v1447_v11 = vshrl.u32 %v1206_v57, 16  ;;  %v5972_v6 = vpop.permute.xlu0 %3033 }
  0xdc   : > { %v3500_v56 = vrot.slane %v3498_v22, 5  ;;  %v3504_v58 = vrot.slane %v3502_v49, 4  ;;  %v1440_v51 = vrot.slane %v1439_v34, 4  ;;  %v5970_v0 = vmul.f32 %v5884_v3, %v261_v18  ;;  %v1753_v62 = vld [vmem:[#allocation2 + $0x68] sm:$0x1] }
  0xdd   : > { %v3496_v16 = vrot.slane %v3495_v29, 4  ;;  %v4922_v19 = vrot.slane %v3838_v31, 9  ;;  %v1449_v27 = vrot.slane %v1447_v11, 4  ;;  %v1450_v15 = vshll.u32 %v1206_v57, 16  ;;  %v1754_v29 = vld [vmem:[#allocation2 + $0x6c] sm:$0xe] }
  0xde   : > { %v3505_v48 = vor.u32 %v3504_v58, %v3500_v56  ;;  %4085 = vrot.lane.b32.xlu0 %v4937_v55, %s5155_s8  ;;  %v1435_v42 = vsel %vm5290_vm12, %v1430_v45, %v5943_v30  ;;  %v1445_v17 = vsel %vm5290_vm12, %v1440_v51, %v1444_v5  ;;  %v1456_v53 = vshll.u32 %v1207_v10, 16  ;;  %v1755_v5 = vld [vmem:[#allocation2 + $0x70] sm:$0xf] }
  0xdf   : > { %v3966_v59 = vrot.slane %v3964_v38, 4  ;;  %v1452_v60 = vrot.slane %v1450_v15, 5  ;;  %v1460_v39 = vshrl.u32 %v1207_v10, 16  ;;  %v4795_v41 = vrot.slane %v1751_v4, 9  ;;  %v5988_v51 = vpop.permute.xlu0 %3211  ;;  %v437_v15 = vld [vmem:[#allocation2 + $0x78] sm:$0x1] }
  0xe0   : > { %v3506_v25 = vrot.slane %v3505_v48, 4  ;;  %v1458_v57 = vrot.slane %v1456_v53, 5  ;;  %v1884_v35 = vrot.slane %v1752_v32, 5  ;;  %v1887_v46 = vrot.slane %v1753_v62, 5  ;;  %v2252_v62 = vld [vmem:[#allocation2 + $0x6c] sm:$0xf] }
  0xe1   : > { %v3295_v54 = vld [vmem:[#allocation2 + $0x74] sm:$0x1]  ;;  %v3501_v55 = vsel %vm5290_vm12, %v3496_v16, %v3500_v56  ;;  %v5982_v52 = vcombine.low %v1435_v42, %v1445_v17  ;;  %v3965_v18 = vsel %vm5232_vm8, %v4922_v19, %v3964_v38  ;;  %v1453_v49 = vor.u32 %v1452_v60, %v1449_v27 }
  0xe2   : > { %v3840_v30 = vld [vmem:[#allocation2 + $0x74] sm:$0x1]  ;;  %v3508_v45 = vshll.u32 %v3295_v54, 16  ;;  %v1462_v31 = vrot.slane %v1460_v39, 4  ;;  %v1885_v11 = vsel %vm5232_vm8, %v4795_v41, %v1884_v35  ;;  %v1886_v32 = vrot.slane %v1884_v35, 4 }
  0xe3   : > { %v1208_v22 = vld [vmem:[#allocation2 + $0x74] sm:$0x1]  ;;  %v3967_v34 = vrot.slane %v3840_v30, 5  ;;  %v1454_v10 = vrot.slane %v1453_v49, 4  ;;  %v4796_v56 = vrot.slane %v1754_v29, 9  ;;  %v1891_v53 = vrot.slane %v1755_v5, 5 }
  0xe4   : > { %v1466_v4 = vshll.u32 %v1208_v22, 16  ;;  %v1756_v58 = vld [vmem:[#allocation2 + $0x74] sm:$0x1]  ;;  %v3510_v16 = vrot.slane %v3508_v45, 5  ;;  %v1463_v19 = vor.u32 %v1462_v31, %v1458_v57  ;;  %v1888_v17 = vsel %vm5232_vm8, %v1886_v32, %v1887_v46  ;;  %v2253_v30 = vld [vmem:[#allocation2 + $0x70] sm:$0xf] }
  0xe5   : > { %v3968_v38 = vsel %vm5232_vm8, %v3966_v59, %v3967_v34  ;;  %v1459_v42 = vsel %vm5290_vm12, %v1454_v10, %v1458_v57  ;;  %v4811_v41 = vcombine.low %v1885_v11, %v1888_v17  ;;  %v1894_v35 = vrot.slane %v1756_v58, 5  ;;  %v5119_v49 = vld [vmem:[#allocation2 + $0x48] sm:$0xff]   ;;  %v2254_v31 = vld [vmem:[#allocation2 + $0x74] sm:$0x1]  ;;  %v493_v5 = vld [vmem:[#allocation2 + $0x80] sm:$0x1] }
  0xe6   : > { %v1468_v27 = vrot.slane %v1466_v4, 5  ;;  %v4938_v48 = vcombine.low %v3965_v18, %v3968_v38  ;;  %v3511_v60 = vsel %vm5290_vm12, %v3506_v25, %v3510_v16  ;;  %v1464_v39 = vrot.slane %v1463_v19, 4  ;;  %v5101_v11 = vld [vmem:[#allocation2 + $0x6c] sm:$0xff]   ;;  %1169 = vst.msk [vmem:[#allocation3 + $0x30] sm:$0xff] %vm7035_vm15, %v5119_v49 }
  0xe7   : > { %v4906_v29 = vcombine.low %v3501_v55, %v3511_v60  ;;  %v6001_v59 = vsel %vm5232_vm8, %v4796_v56, %v1891_v53  ;;  %v1893_v54 = vrot.slane %v1891_v53, 4  ;;  %v365_v57 = vmax.f32 %v5857_v61, 0.0  ;;  %v6004_v18 = vpop.permute.xlu1 %2714  ;;  %v2797_v16 = vld [vmem:[#allocation2 + $0x6c] sm:$0xe] }
  0xe8   : > { %4087 = vrot.lane.b32.xlu0 %v4938_v48, %s5155_s8  ;;  %v1469_v46 = vsel %vm5290_vm12, %v1464_v39, %v1468_v27  ;;  %v366_v25 = vmax.f32 %v5862_v44, 0.0  ;;  %v438_v55 = vsel %vm5204_vm3, 0, %v437_v15  ;;  %v2469_v22 = vshrl.u32 %v2252_v62, 16  ;;  %v5120_v39 = vld [vmem:[#allocation2 + $0x54] sm:$0xff]  }
  0xe9   : > { %3766 = vrot.lane.b32.xlu1 %v4906_v29, %s5157_s10  ;;  %v4780_v45 = vcombine.low %v1459_v42, %v1469_v46  ;;  %v6014_v34 = vsel %vm5232_vm8, %v1893_v54, %v1894_v35  ;;  %439 = vst [vmem:[#allocation2 + $0x78] sm:$0x1] %v438_v55  ;;  %v4988_v61 = vpack.c.bf16 %v365_v57, %v365_v57  ;;  %v2472_v4 = vshll.u32 %v2252_v62, 16  ;;  %v6016_v10 = vpop.permute.xlu0 %3756  ;;  %v2798_v62 = vld [vmem:[#allocation2 + $0x70] sm:$0xf] }
  0xea   : > { %v4812_v44 = vcombine.low %v6001_v59, %v6014_v34  ;;  %v4989_v32 = vpack.c.bf16 %v366_v25, %v366_v25  ;;  %v2471_v58 = vrot.slane %v2469_v22, 4  ;;  %v2478_v56 = vshll.u32 %v2253_v30, 16  ;;  %1170 = vst.msk [vmem:[#allocation3 + $0x38] sm:$0xff] %vm7035_vm15, %v5120_v39  ;;  %v443_v39 = vld [vmem:[#allocation2 + $0x90] sm:$0x1] }
  0xeb   : > { %v753_v38 = vshrl.u32 %v4988_v61, 16  ;;  %v756_v19 = vshll.u32 %v4988_v61, 16  ;;  %v2474_v27 = vrot.slane %v2472_v4, 5  ;;  %v2482_v15 = vshrl.u32 %v2253_v30, 16  ;;  %v3036_v48 = vpop.permute.xlu1 %3035  ;;  %v2799_v30 = vld [vmem:[#allocation2 + $0x74] sm:$0x1] }
  0xec   : > { %2002 = vrot.lane.b32.xlu0 %v4811_v41, %s5150_s28  ;;  %v761_v42 = vshrl.u32 %v4989_v32, 16  ;;  %v764_v17 = vshll.u32 %v4989_v32, 16  ;;  %v2480_v53 = vrot.slane %v2478_v56, 5  ;;  %v2488_v60 = vshll.u32 %v2254_v31, 16 }
  0xed   : > { %1678 = vrot.lane.b32.xlu1 %v5982_v52, %s5151_s29  ;;  %v755_v35 = vrot.slane %v753_v38, 7  ;;  %v2475_v29 = vor.u32 %v2474_v27, %v2471_v58  ;;  %v2484_v54 = vrot.slane %v2482_v15, 4  ;;  %v494_v41 = vsel %vm5218_vm7, 0, %v493_v5  ;;  %v6030_v31 = vpop.permute.xlu0 %4077  ;;  %v262_v38 = vld [vmem:[%s5241_s25 + $0xc8] sm:$0xff] }
  0xee   : > { %v6026_v57 = vrot.slane %v761_v42, 7  ;;  %v2490_v46 = vrot.slane %v2488_v60, 5  ;;  %495 = vst [vmem:[#allocation2 + $0x80] sm:$0x1] %v494_v41  ;;  %v4859_v25 = vrot.slane %v2797_v16, 9  ;;  %v2927_v55 = vrot.slane %v2798_v62, 5 }
  0xef   : > { %v758_v22 = vor.u32 %v756_v19, %v755_v35  ;;  %v759_v52 = vrot.slane %v755_v35, 4  ;;  %v2476_v49 = vrot.slane %v2475_v29, 4  ;;  %v2485_v61 = vor.u32 %v2484_v54, %v2480_v53  ;;  %v3214_v16 = vpop.permute.xlu1 %3213  ;;  %v440_v62 = vld [vmem:[#allocation2 + $0x84] sm:$0x1]  ;;  %v496_v42 = vld [vmem:[#allocation2 + $0x8c] sm:$0x1] }
  0xf0   : > { %2179 = vrot.lane.b32.xlu0 %v5101_v11, %s5152_s30  ;;  %v766_v4 = vor.u32 %v764_v17, %v6026_v57  ;;  %v768_v5 = vrot.slane %v6026_v57, 4  ;;  %v985_v32 = vld [vmem:[#allocation2 + $0x78] sm:$0xf]  ;;  %v6036_v58 = vsel %vm5232_vm8, %v4859_v25, %v2927_v55  ;;  %v2929_v56 = vrot.slane %v2927_v55, 4 }
  0xf1   : > { %1680 = vrot.lane.b32.xlu1 %v4780_v45, %s5151_s29  ;;  %v986_v11 = vsel %vm5298_vm13, %v758_v22, %v985_v32  ;;  %v2481_v19 = vsel %vm5290_vm12, %v2476_v49, %v2480_v53  ;;  %v2486_v27 = vrot.slane %v2485_v61, 4  ;;  %v2930_v15 = vrot.slane %v2799_v30, 5  ;;  %v5110_v45 = vld [vmem:[%s7031_s3 + $0x10] ss:$0 sps:$4 sm:$0x33]   ;;  %v264_v41 = vld [vmem:[%s5241_s25 + $0xd8] sm:$0xff] }
  0xf2   : > { %v767_v17 = vsel %vm5308_vm14, %v759_v52, %v766_v4  ;;  %987 = vst [vmem:[#allocation2 + $0x78] sm:$0xf] %v986_v11  ;;  %vm7038_vm6 = vcmask 162944   ;;  %vm7037_vm9 = vcmask 195744   ;;  %vm7036_vm10 = vcmask 228544  }
  0xf3   : > { %988 = vst.msk [vmem:[#allocation2 + $0x7c] sm:$0xf] %vm395_vm0, %v767_v17  ;;  %v2491_v53 = vsel %vm5290_vm12, %v2486_v27, %v2490_v46  ;;  %v6054_v60 = vsel %vm5232_vm8, %v2929_v56, %v2930_v15  ;;  %vm3800_vm11 = vcmask 261344   ;;  %v6065_v35 = vmul.f32 %v5884_v3, %v262_v38 }
  0xf4   : > { %2758 = vst.msk [vmem:[#allocation3 + $0x8] sm:$0xff] %vm7038_vm6, %v5808_v28  ;;  %2757 = vst.msk [vmem:[#allocation3] sm:$0xff] %vm7038_vm6, %v5915_v36  ;;  %v4843_v29 = vcombine.low %v2481_v19, %v2491_v53  ;;  %vm4121_vm1 = vcmask 294144   ;;  %v367_v28 = vmax.f32 %v5934_v12, 0.0  ;;  %v368_v54 = vmax.f32 %v5949_v37, 0.0 }
  0xf5   : > { %2759 = vst.msk [vmem:[#allocation3 + $0x10] sm:$0xff] %vm7038_vm6, %v5951_v7  ;;  %2760 = vst.msk [vmem:[#allocation3 + $0x18] sm:$0xff] %vm7038_vm6, %v6004_v18  ;;  %v499_v36 = vld [vmem:[#allocation2 + $0x98] sm:$0x1]  ;;  %2004 = vrot.lane.b32.xlu1 %v4812_v44, %s5150_s28  ;;  %v989_v7 = vld [vmem:[#allocation2 + $0x80] sm:$0x1]  ;;  %v4080_v37 = vpop.permute.xlu0 %4079  ;;  %v6132_v52 = vadd.f32 %v5853_v63, %v5970_v0  ;;  %v6139_v38 = vadd.f32 %v5853_v63, %v6065_v35  ;;  %v6143_v0 = vmul.f32 %v5884_v3, %v264_v41 }
  0xf6   : > { %3079 = vst.msk [vmem:[#allocation3 + $0x8] sm:$0xff] %vm7037_vm9, %v5771_v47  ;;  %3078 = vst.msk [vmem:[#allocation3] sm:$0xff] %vm7037_vm9, %v5757_v23  ;;  %v4875_v47 = vcombine.low %v6036_v58, %v6054_v60  ;;  %v441_v23 = vsel %vm5204_vm3, 0, %v440_v62  ;;  %v497_v12 = vsel %vm5218_vm7, 0, %v496_v42  ;;  %vm4223_vm15 = vcmask 1041408   ;;  %2724 = vrot.lane.b32.xlu0 %v4843_v29, %s5156_s9 }
  0xf7   : > { %3080 = vst.msk [vmem:[#allocation3 + $0x10] sm:$0xff] %vm7037_vm9, %v5972_v6  ;;  %3081 = vst.msk [vmem:[#allocation3 + $0x18] sm:$0xff] %vm7037_vm9, %v3036_v48  ;;  %v6100_v6 = vpack.c.bf16 %v368_v54, %v368_v54  ;;  %5065 = vmatprep.subr.msk.bf16.mxu0 %vm4223_vm15, %v5110_v45  ;;  %v3759_v59 = vpop.permute.xlu1 %3758  ;;  %v444_v18 = vsel %vm5204_vm3, 0, %v443_v39  ;;  %v500_v34 = vsel %vm5218_vm7, 0, %v499_v36  ;;  %5066 = vmatprep.subr.msk.bf16.mxu1 %vm4223_vm15, %v5110_v45  ;;  %v515_v33 = vsel %vm5218_vm7, 0, %v514_v21 }
  0xf8   : > { %3257 = vst.msk [vmem:[#allocation3 + $0x8] sm:$0xff] %vm7036_vm10, %v5737_v14  ;;  %3256 = vst.msk [vmem:[#allocation3] sm:$0xff] %vm7036_vm10, %v5739_v40  ;;  %v990_v14 = vsel %vm5204_vm3, %v768_v5, %v989_v7  ;;  %v6098_v40 = vpack.c.bf16 %v367_v28, %v367_v28 }
  0xf9   : > { %3258 = vst.msk [vmem:[#allocation3 + $0x10] sm:$0xff] %vm7036_vm10, %v5988_v51  ;;  %3259 = vst.msk [vmem:[#allocation3 + $0x18] sm:$0xff] %vm7036_vm10, %v3214_v16  ;;  %v4225_v51 = vsel %vm4223_vm15, %v5110_v45, 0  ;;  %vm4174_vm10 = vcmask 293888   ;;  %v778_v44 = vshrl.u32 %v6100_v6, 16  ;;  %v781_v48 = vshll.u32 %v6100_v6, 16 }
  0xfa   : > { %3802 = vst.msk [vmem:[#allocation3 + $0x8] sm:$0xff] %vm3800_vm11, %v5825_v26  ;;  %442 = vst [vmem:[#allocation2 + $0x84] sm:$0x1] %v441_v23  ;;  %5026 = vmatpush3.bf16.msra.mxu0 %v4225_v51  ;;  %v369_v26 = vmax.f32 %v5955_v43, 0.0  ;;  %5064 = vmatpush3.bf16.msra.mxu1 %v4225_v51  ;;  %v2255_v57 = vld [vmem:[#allocation2 + $0x78] sm:$0xf]  ;;  %v1995_v49 = vpop.permute.xlu0 %1994 }
  0xfb   : > { %498 = vst [vmem:[#allocation2 + $0x8c] sm:$0x1] %v497_v12  ;;  %3801 = vst.msk [vmem:[#allocation3] sm:$0xff] %vm3800_vm11, %v5936_v24  ;;  %v370_v24 = vmax.f32 %v5967_v2, 0.0  ;;  %v2800_v46 = vld [vmem:[#allocation2 + $0x78] sm:$0xe]  ;;  %3045 = vrot.lane.b32.xlu0 %v4875_v47, %s5154_s7  ;;  %v1671_v22 = vpop.permute.xlu1 %1670 }
  0xfc   : > { %3803 = vst.msk [vmem:[#allocation3 + $0x10] sm:$0xff] %vm3800_vm11, %v6016_v10  ;;  %991 = vst [vmem:[#allocation2 + $0x80] sm:$0x1] %v990_v14  ;;  %v773_v10 = vshll.u32 %v6098_v40, 16  ;;  %v5102_v30 = vld [vmem:[#allocation2 + $0x78] sm:$0xff]   ;;  %v2493_v55 = vshrl.u32 %v2255_v57, 16 }
  0xfd   : > { %4123 = vst.msk [vmem:[#allocation3 + $0x8] sm:$0xff] %vm4121_vm1, %v5781_v20  ;;  %4122 = vst.msk [vmem:[#allocation3] sm:$0xff] %vm4121_vm1, %v5768_v50  ;;  %v263_v20 = vld [vmem:[%s5241_s25 + $0xd0] sm:$0xff]  ;;  %v770_v50 = vshrl.u32 %v6098_v40, 16  ;;  %v2256_v25 = vld [vmem:[#allocation2 + $0x7c] sm:$0xf]  ;;  %2181 = vrot.lane.b32.xlu1 %v5102_v30, %s5152_s30 }
  0xfe   : > { %3804 = vst.msk [vmem:[#allocation3 + $0x18] sm:$0xff] %vm3800_vm11, %v3759_v59  ;;  %445 = vst [vmem:[#allocation2 + $0x90] sm:$0x1] %v444_v18  ;;  %v302_v61 = vmul.f32 %v5884_v3, %v263_v20  ;;  %v2502_v4 = vshll.u32 %v2256_v25, 16  ;;  %v2506_v5 = vshrl.u32 %v2256_v25, 16  ;;  %v4860_v58 = vrot.slane %v2800_v46, 9  ;;  %v2172_v35 = vpop.permute.xlu0 %2171 }
  0xff   : > { %4124 = vst.msk [vmem:[#allocation3 + $0x10] sm:$0xff] %vm4121_vm1, %v6030_v31  ;;  %501 = vst [vmem:[#allocation2 + $0x98] sm:$0x1] %v500_v34  ;;  %v2496_v31 = vshll.u32 %v2255_v57, 16  ;;  %v2801_v32 = vld [vmem:[#allocation2 + $0x7c] sm:$0xf]  ;;  %v1673_v39 = vpop.permute.xlu1 %1672 }
 0x100   : > { %4125 = vst.msk [vmem:[#allocation3 + $0x18] sm:$0xff] %vm4121_vm1, %v4080_v37  ;;  %v2495_v56 = vrot.slane %v2493_v55, 4  ;;  %v2934_v16 = vrot.slane %v2801_v32, 5  ;;  %v2504_v19 = vrot.slane %v2502_v4, 5  ;;  %v2508_v27 = vrot.slane %v2506_v5, 4  ;;  %v5104_v15 = vld [vmem:[#allocation2 + $0x78] sm:$0xff]  }
 0x101   : > { %1715 = vst.msk [vmem:[#allocation3 + $0x20] sm:$0xff] %vm1710_vm2, %v1671_v22  ;;  %v2498_v11 = vrot.slane %v2496_v31, 5  ;;  %v772_v62 = vrot.slane %v770_v50, 7  ;;  %v780_v60 = vrot.slane %v778_v44, 7  ;;  %v6150_v29 = vadd.f32 %v5853_v63, %v302_v61  ;;  %3223 = vrot.lane.b32.xlu0 %v5104_v15, %s5153_s6  ;;  %v992_v7 = vld [vmem:[#allocation2 + $0x84] sm:$0xf] }
 0x102   : > { %2039 = vst.msk [vmem:[#allocation3 + $0x20] sm:$0xff] %vm2034_vm4, %v1995_v49  ;;  %v6147_v45 = vsel %vm5232_vm8, %v4860_v58, %v2934_v16  ;;  %v2936_v53 = vrot.slane %v2934_v16, 4  ;;  %v2509_v28 = vor.u32 %v2508_v27, %v2504_v19  ;;  %v3296_v47 = vld [vmem:[#allocation2 + $0x78] sm:$0xf]  ;;  %v3297_v40 = vld [vmem:[#allocation2 + $0x7c] sm:$0xf] }
 0x103   : > { %v2257_v42 = vld [vmem:[#allocation2 + $0x80] sm:$0x1]  ;;  %v2499_v3 = vor.u32 %v2498_v11, %v2495_v56  ;;  %1716 = vst.msk [vmem:[#allocation3 + $0x28] sm:$0xff] %vm1710_vm2, %v1673_v39  ;;  %v775_v23 = vor.u32 %v773_v10, %v772_v62  ;;  %v776_v12 = vrot.slane %v772_v62, 4  ;;  %v783_v37 = vor.u32 %v781_v48, %v780_v60  ;;  %v996_v34 = vld [vmem:[#allocation2 + $0x8c] sm:$0x1]  ;;  %v1997_v30 = vpop.permute.xlu1 %1996 }
 0x104   : > { %v2802_v17 = vld [vmem:[#allocation2 + $0x80] sm:$0x1]  ;;  %v2512_v54 = vshll.u32 %v2257_v42, 16  ;;  %2216 = vst.msk [vmem:[#allocation3 + $0x20] sm:$0xff] %vm2211_vm5, %v2172_v35  ;;  %v785_v14 = vrot.slane %v780_v60, 4  ;;  %v2510_v51 = vrot.slane %v2509_v28, 4 }
 0x105   : > { %v2937_v36 = vrot.slane %v2802_v17, 5  ;;  %v3298_v6 = vld [vmem:[#allocation2 + $0x80] sm:$0x1]  ;;  %v2500_v63 = vrot.slane %v2499_v3, 4  ;;  %v4138_v20 = vld [vmem:[#allocation3] sm:$0xff]  ;;  %v784_v44 = vsel %vm5308_vm14, %v776_v12, %v783_v37  ;;  %v993_v10 = vsel %vm5298_vm13, %v775_v23, %v992_v7  ;;  %2040 = vst.msk [vmem:[#allocation3 + $0x28] sm:$0xff] %vm2034_vm4, %v1997_v30 }
 0x106   : > { %v2514_v59 = vrot.slane %v2512_v54, 5  ;;  %v3513_v48 = vshrl.u32 %v3296_v47, 16  ;;  %v3841_v41 = vld [vmem:[#allocation2 + $0x78] sm:$0xe]  ;;  %v3842_v57 = vld [vmem:[#allocation2 + $0x7c] sm:$0xf]  ;;  %5027 = vmatprep.mubr.msk.bf16.mxu0 %vm4174_vm10, %v4138_v20  ;;  %v997_v27 = vsel %vm5204_vm3, %v785_v14, %v996_v34  ;;  %v6192_v34 = vpack.c.bf16 %v370_v24, %v370_v24 }
 0x107   : > { %v2938_v18 = vsel %vm5232_vm8, %v2936_v53, %v2937_v36  ;;  %v4139_v46 = vld [vmem:[#allocation3 + $0x8] sm:$0xff]  ;;  %v2505_v25 = vsel %vm5290_vm12, %v2500_v63, %v2504_v19  ;;  %994 = vst [vmem:[#allocation2 + $0x84] sm:$0xf] %v993_v10  ;;  %995 = vst.msk [vmem:[#allocation2 + $0x88] sm:$0xf] %vm395_vm0, %v784_v44  ;;  %v3516_v22 = vshll.u32 %v3296_v47, 16 }
 0x108   : > { %v4876_v50 = vcombine.low %v6147_v45, %v2938_v18  ;;  %v2515_v55 = vsel %vm5290_vm12, %v2510_v51, %v2514_v59  ;;  %v3522_v49 = vshll.u32 %v3297_v40, 16  ;;  %v3843_v61 = vld [vmem:[#allocation2 + $0x80] sm:$0x1]  ;;  %v1209_v31 = vld [vmem:[#allocation2 + $0x78] sm:$0xf]  ;;  %5028 = vmatmul.mubr.msk.bf16.vlgmr.msra.gmra.mrb[0].mxu0 %vm4174_vm10, %v4139_v46  ;;  %v3515_v5 = vrot.slane %v3513_v48, 4  ;;  %v2717_v3 = vpop.permute.xlu0 %2716 }
 0x109   : > { %v4844_v4 = vcombine.low %v2505_v25, %v2515_v55  ;;  %v3526_v32 = vshrl.u32 %v3297_v40, 16  ;;  %v3532_v58 = vshll.u32 %v3298_v6, 16  ;;  %v1210_v56 = vld [vmem:[#allocation2 + $0x7c] sm:$0xf]  ;;  %v4140_v16 = vld [vmem:[#allocation3 + $0x10] sm:$0xff]  ;;  %v3518_v11 = vrot.slane %v3516_v22, 5  ;;  %v2174_v40 = vpop.permute.xlu1 %2173 }
 0x10a   : > { %v3524_v19 = vrot.slane %v3522_v49, 5  ;;  %v4923_v15 = vrot.slane %v3841_v41, 9  ;;  %5031 = vmatprep.mubr.msk.bf16.mxu0 %vm4174_vm10, %v4140_v16  ;;  %998 = vst [vmem:[#allocation2 + $0x8c] sm:$0x1] %v997_v27  ;;  %v3971_v17 = vrot.slane %v3842_v57, 5  ;;  %v3974_v45 = vrot.slane %v3843_v61, 5 }
 0x10b   : > { %2726 = vrot.lane.b32.xlu1 %v4844_v4, %s5156_s9  ;;  %v3528_v62 = vrot.slane %v3526_v32, 4  ;;  %v3534_v42 = vrot.slane %v3532_v58, 5  ;;  %v3519_v53 = vor.u32 %v3518_v11, %v3515_v5  ;;  %v1471_v60 = vshrl.u32 %v1209_v31, 16  ;;  %v4141_v47 = vld [vmem:[#allocation3 + $0x18] sm:$0xff]  ;;  %2761 = vst.msk [vmem:[#allocation3 + $0x20] sm:$0xff] %vm7038_vm6, %v2717_v3 }
 0x10c   : > { %v1474_v39 = vshll.u32 %v1209_v31, 16  ;;  %v1480_v35 = vshll.u32 %v1210_v56, 16  ;;  %v6176_v54 = vsel %vm5232_vm8, %v4923_v15, %v3971_v17  ;;  %v3973_v36 = vrot.slane %v3971_v17, 4  ;;  %v1211_v59 = vld [vmem:[#allocation2 + $0x80] sm:$0x1]  ;;  %2217 = vst.msk [vmem:[#allocation3 + $0x28] sm:$0xff] %vm2211_vm5, %v2174_v40  ;;  %v3038_v43 = vpop.permute.xlu0 %3037 }
 0x10d   : > { %v3529_v28 = vor.u32 %v3528_v62, %v3524_v19  ;;  %v1484_v7 = vshrl.u32 %v1210_v56, 16  ;;  %v3520_v23 = vrot.slane %v3519_v53, 4  ;;  %v1473_v12 = vrot.slane %v1471_v60, 4  ;;  %3082 = vst.msk [vmem:[#allocation3 + $0x20] sm:$0xff] %vm7037_vm9, %v3038_v43  ;;  %516 = vst [vmem:[#allocation2 + $0xd4] sm:$0x1] %v515_v33 }
 0x10e   : > { %v1476_v37 = vrot.slane %v1474_v39, 5  ;;  %v6179_v14 = vrot.slane %v1480_v35, 5  ;;  %v5105_v6 = vld [vmem:[#allocation2 + $0x84] sm:$0xff]   ;;  %v3975_v51 = vsel %vm5232_vm8, %v3973_v36, %v3974_v45  ;;  %v6187_v18 = vpack.c.bf16 %v369_v26, %v369_v26 }
 0x10f   : > { %3047 = vrot.lane.b32.xlu1 %v4876_v50, %s5154_s7  ;;  %v3530_v63 = vrot.slane %v3529_v28, 4  ;;  %v3525_v20 = vsel %vm5290_vm12, %v3520_v23, %v3524_v19  ;;  %v3299_v50 = vld [vmem:[#allocation2 + $0x84] sm:$0xf]  ;;  %v3300_v44 = vld [vmem:[#allocation2 + $0x88] sm:$0xf]  ;;  %v4939_v10 = vcombine.low %v6176_v54, %v3975_v51  ;;  %v1486_v41 = vrot.slane %v1484_v7, 4 }
 0x110   : > { %v1477_v48 = vor.u32 %v1476_v37, %v1473_v12  ;;  %5032 = vmatmul.mubr.msk.bf16.gmra.mrb[4].mxu0 %vm4174_vm10, %v4141_v47  ;;  %v3537_v26 = vshrl.u32 %v3299_v50, 16  ;;  %v3540_v24 = vshll.u32 %v3299_v50, 16  ;;  %v3546_v57 = vshll.u32 %v3300_v44, 16  ;;  %v3844_v46 = vld [vmem:[#allocation2 + $0x84] sm:$0xe]  ;;  %v3216_v15 = vpop.permute.xlu0 %3215 }
 0x111   : > { %v3535_v2 = vsel %vm5290_vm12, %v3530_v63, %v3534_v42  ;;  %v3301_v25 = vld [vmem:[#allocation2 + $0x8c] sm:$0x1]  ;;  %v3550_v55 = vshrl.u32 %v3300_v44, 16  ;;  %v1487_v49 = vor.u32 %v1486_v41, %v6179_v14  ;;  %v3845_v61 = vld [vmem:[#allocation2 + $0x88] sm:$0xf]  ;;  %v1490_v19 = vshll.u32 %v1211_v59, 16 }
 0x112   : > { %v4907_v30 = vcombine.low %v3525_v20, %v3535_v2  ;;  %v1478_v22 = vrot.slane %v1477_v48, 4  ;;  %v3539_v31 = vrot.slane %v3537_v26, 4  ;;  %v3542_v4 = vrot.slane %v3540_v24, 5  ;;  %v3846_v58 = vld [vmem:[#allocation2 + $0x8c] sm:$0x1] }
 0x113   : > { %3225 = vrot.lane.b32.xlu1 %v5105_v6, %s5153_s6  ;;  %v3548_v5 = vrot.slane %v3546_v57, 5  ;;  %v3556_v32 = vshll.u32 %v3301_v25, 16  ;;  %v3552_v56 = vrot.slane %v3550_v55, 4  ;;  %v1488_v11 = vrot.slane %v1487_v49, 4  ;;  %v1212_v27 = vld [vmem:[#allocation2 + $0x84] sm:$0xf] }
 0x114   : > { %3768 = vrot.lane.b32.xlu0 %v4907_v30, %s5157_s10  ;;  %v1483_v16 = vsel %vm5290_vm12, %v1478_v22, %v6179_v14  ;;  %v3543_v62 = vor.u32 %v3542_v4, %v3539_v31  ;;  %v4924_v17 = vrot.slane %v3844_v46, 9  ;;  %v3978_v45 = vrot.slane %v3845_v61, 5  ;;  %v1213_v53 = vld [vmem:[#allocation2 + $0x88] sm:$0xf]  ;;  %v1757_v28 = vld [vmem:[#allocation2 + $0x78] sm:$0xe] }
 0x115   : > { %v3558_v42 = vrot.slane %v3556_v32, 5  ;;  %vm7051_vm15 = vcmask 228544   ;;  %v3553_v60 = vor.u32 %v3552_v56, %v3548_v5  ;;  %v1492_v39 = vrot.slane %v1490_v19, 5  ;;  %v1214_v47 = vld [vmem:[#allocation2 + $0x8c] sm:$0x1] }
 0x116   : > { %3260 = vst.msk [vmem:[#allocation3 + $0x20] sm:$0xff] %vm7051_vm15, %v3216_v15  ;;  %v3981_v35 = vrot.slane %v3846_v58, 5  ;;  %v1495_v3 = vshrl.u32 %v1212_v27, 16  ;;  %v3544_v54 = vrot.slane %v3543_v62, 4  ;;  %v3979_v36 = vsel %vm5232_vm8, %v4924_v17, %v3978_v45  ;;  %v1758_v12 = vld [vmem:[#allocation2 + $0x7c] sm:$0xf]  ;;  %v2719_v24 = vpop.permute.xlu1 %2718 }
 0x117   : > { %v3980_v7 = vrot.slane %v3978_v45, 4  ;;  %v1498_v23 = vshll.u32 %v1212_v27, 16  ;;  %v1759_v37 = vld [vmem:[#allocation2 + $0x80] sm:$0x1]  ;;  %v3554_v14 = vrot.slane %v3553_v60, 4  ;;  %v1493_v40 = vsel %vm5290_vm12, %v1488_v11, %v1492_v39  ;;  %2762 = vst.msk [vmem:[#allocation3 + $0x28] sm:$0xff] %vm7038_vm6, %v2719_v24 }
 0x118   : > { %4089 = vrot.lane.b32.xlu0 %v4939_v10, %s5155_s8  ;;  %v1497_v6 = vrot.slane %v1495_v3, 4  ;;  %v1504_v63 = vshll.u32 %v1213_v53, 16  ;;  %v1760_v51 = vld [vmem:[#allocation2 + $0x84] sm:$0xe]  ;;  %v3549_v59 = vsel %vm5290_vm12, %v3544_v54, %v3548_v5  ;;  %v4781_v20 = vcombine.low %v1483_v16, %v1493_v40  ;;  %v1761_v48 = vld [vmem:[#allocation2 + $0x88] sm:$0xf] }
 0x119   : > { %v3982_v50 = vsel %vm5232_vm8, %v3980_v7, %v3981_v35  ;;  %v1500_v44 = vrot.slane %v1498_v23, 5  ;;  %v3559_v41 = vsel %vm5290_vm12, %v3554_v14, %v3558_v42  ;;  %v1508_v2 = vshrl.u32 %v1213_v53, 16  ;;  %v1762_v26 = vld [vmem:[#allocation2 + $0x8c] sm:$0x1]  ;;  %v2258_v19 = vld [vmem:[#allocation2 + $0x84] sm:$0xf] }
 0x11a   : > { %v4940_v43 = vcombine.low %v3979_v36, %v3982_v50  ;;  %v1506_v10 = vrot.slane %v1504_v63, 5  ;;  %v4908_v57 = vcombine.low %v3549_v59, %v3559_v41  ;;  %v1514_v30 = vshll.u32 %v1214_v47, 16  ;;  %v3040_v27 = vpop.permute.xlu1 %3039  ;;  %v999_v17 = vld [vmem:[#allocation2 + $0x90] sm:$0xf]  ;;  %v2259_v45 = vld [vmem:[#allocation2 + $0x88] sm:$0xf] }
 0x11b   : > { %v1501_v46 = vor.u32 %v1500_v44, %v1497_v6  ;;  %v4797_v25 = vrot.slane %v1757_v28, 9  ;;  %v1510_v55 = vrot.slane %v1508_v2, 4  ;;  %v1898_v22 = vrot.slane %v1758_v12, 5  ;;  %3083 = vst.msk [vmem:[#allocation3 + $0x28] sm:$0xff] %vm7037_vm9, %v3040_v27  ;;  %v6233_v53 = vld [vmem:[%s7030_s2] ss:$0 sm:$0xff]  ;;  %v3761_v36 = vpop.permute.xlu0 %3760 }
 0x11c   : > { %4091 = vrot.lane.b32.xlu0 %v4940_v43, %s5155_s8  ;;  %v1901_v49 = vrot.slane %v1759_v37, 5  ;;  %v4798_v61 = vrot.slane %v1760_v51, 9  ;;  %3770 = vrot.lane.b32.xlu1 %v4908_v57, %s5157_s10  ;;  %v1516_v4 = vrot.slane %v1514_v30, 5  ;;  %v1905_v5 = vrot.slane %v1761_v48, 5  ;;  %v5125_v39 = vld [vmem:[#allocation2 + $0x60] sm:$0xff]   ;;  %v5126_v7 = vld [vmem:[#allocation2 + $0x6c] sm:$0xff]  }
 0x11d   : > { %v1502_v31 = vrot.slane %v1501_v46, 4  ;;  %v1908_v32 = vrot.slane %v1762_v26, 5  ;;  %v1511_v58 = vor.u32 %v1510_v55, %v1506_v10  ;;  %v1899_v56 = vsel %vm5232_vm8, %v4797_v25, %v1898_v22  ;;  %v2260_v54 = vld [vmem:[#allocation2 + $0x8c] sm:$0x1]  ;;  %v6246_v37 = vld [vmem:[#allocation2 + $0x84] sm:$0xe] }
 0x11e   : > { %v1900_v16 = vrot.slane %v1898_v22, 4  ;;  %v787_v11 = vshrl.u32 %v6187_v18, 16  ;;  %v1907_v62 = vrot.slane %v1905_v5, 4  ;;  %v790_v42 = vshll.u32 %v6187_v18, 16  ;;  %v6248_v14 = vld [vmem:[#allocation2 + $0x88] sm:$0xf]  ;;  %v3218_v59 = vpop.permute.xlu1 %3217 }
 0x11f   : > { %v1507_v15 = vsel %vm5290_vm12, %v1502_v31, %v1506_v10  ;;  %v6237_v60 = vadd.f32 %v6233_v53, %v6143_v0  ;;  %v1512_v35 = vrot.slane %v1511_v58, 4  ;;  %v795_v18 = vshrl.u32 %v6192_v34, 16  ;;  %3805 = vst.msk [vmem:[#allocation3 + $0x20] sm:$0xff] %vm3800_vm11, %v3761_v36  ;;  %v1003_v26 = vld [vmem:[#allocation2 + $0x98] sm:$0x1]  ;;  %v4082_v24 = vpop.permute.xlu0 %4081 }
 0x120   : > { %v1902_v3 = vsel %vm5232_vm8, %v1900_v16, %v1901_v49  ;;  %v789_v28 = vrot.slane %v787_v11, 7  ;;  %1682 = vrot.lane.b32.xlu1 %v4781_v20, %s5151_s29  ;;  %v1906_v23 = vsel %vm5232_vm8, %v4798_v61, %v1905_v5  ;;  %v798_v0 = vshll.u32 %v6192_v34, 16  ;;  %v5111_v20 = vld [vmem:[#allocation2 + $0x84] sm:$0xff]   ;;  %v2805_v55 = vld [vmem:[#allocation2 + $0x8c] sm:$0x1]  ;;  %4126 = vst.msk [vmem:[#allocation3 + $0x20] sm:$0xff] %vm4121_vm1, %v4082_v24 }
 0x121   : > { %v4813_v47 = vcombine.low %v1899_v56, %v1902_v3  ;;  %v2517_v12 = vshrl.u32 %v2258_v19, 16  ;;  %vm7052_vm15 = vcmask 31744   ;;  %v1517_v40 = vsel %vm5290_vm12, %v1512_v35, %v1516_v4  ;;  %v446_v22 = vld [vmem:[#allocation2 + $0x9c] sm:$0x1]  ;;  %v502_v5 = vld [vmem:[#allocation2 + $0xa4] sm:$0x1] }
 0x122   : > { %1171 = vst.msk [vmem:[#allocation3 + $0x40] sm:$0xff] %vm7052_vm15, %v5125_v39  ;;  %v1909_v6 = vsel %vm5232_vm8, %v1907_v62, %v1908_v32  ;;  %v792_v63 = vor.u32 %v790_v42, %v789_v28  ;;  %v793_v51 = vrot.slane %v789_v28, 4  ;;  %vm7053_vm9 = vmmov %vm7052_vm15  ;;  %v4782_v34 = vcombine.low %v1507_v15, %v1517_v40  ;;  %v265_v35 = vld [vmem:[%s5241_s25 + $0xe0] sm:$0xff] }
 0x123   : > { %1172 = vst.msk [vmem:[#allocation3 + $0x48] sm:$0xff] %vm7053_vm9, %v5126_v7  ;;  %2006 = vrot.lane.b32.xlu0 %v4813_v47, %s5150_s28  ;;  %v797_v50 = vrot.slane %v795_v18, 7  ;;  %v2519_v44 = vrot.slane %v2517_v12, 4  ;;  %v2520_v48 = vshll.u32 %v2258_v19, 16  ;;  %vm7054_vm6 = vcmask 228544   ;;  %v3763_v62 = vpop.permute.xlu1 %3762 }
 0x124   : > { %3261 = vst.msk [vmem:[#allocation3 + $0x28] sm:$0xff] %vm7054_vm6, %v3218_v59  ;;  %v1000_v41 = vsel %vm5298_vm13, %v792_v63, %v999_v17  ;;  %v2526_v43 = vshll.u32 %v2259_v45, 16  ;;  %v2530_v10 = vshrl.u32 %v2259_v45, 16  ;;  %v2536_v2 = vshll.u32 %v2260_v54, 16  ;;  %1684 = vrot.lane.b32.xlu1 %v4782_v34, %s5151_s29  ;;  %vm7055_vm6 = vmmov %vm7053_vm9 }
 0x125   : > { %v4814_v57 = vcombine.low %v1906_v23, %v1909_v6  ;;  %v800_v46 = vor.u32 %v798_v0, %v797_v50  ;;  %v802_v30 = vrot.slane %v797_v50, 4  ;;  %1001 = vst [vmem:[#allocation2 + $0x90] sm:$0xf] %v1000_v41  ;;  %v2522_v25 = vrot.slane %v2520_v48, 5  ;;  %3806 = vst.msk [vmem:[#allocation3 + $0x28] sm:$0xff] %vm3800_vm11, %v3763_v62  ;;  %v266_v48 = vld [vmem:[%s5241_s25 + $0xe8] sm:$0xff] }
 0x126   : > { %v2528_v49 = vrot.slane %v2526_v43, 5  ;;  %v2532_v61 = vrot.slane %v2530_v10, 4  ;;  %v4861_v31 = vrot.slane %v6246_v37, 9  ;;  %v2941_v4 = vrot.slane %v6248_v14, 5  ;;  %v6295_v37 = vld [vmem:[%s7029_s1] ss:$0 sm:$0xff]  ;;  %vm7056_vm9 = vmmov %vm7055_vm6 }
 0x127   : > { %2183 = vrot.lane.b32.xlu0 %v5111_v20, %s5152_s30  ;;  %v801_v32 = vsel %vm5308_vm14, %v793_v51, %v800_v46  ;;  %v2523_v58 = vor.u32 %v2522_v25, %v2519_v44  ;;  %v2538_v56 = vrot.slane %v2536_v2, 5  ;;  %v1004_v16 = vsel %vm5204_vm3, %v802_v30, %v1003_v26  ;;  %v1675_v12 = vpop.permute.xlu1 %1674  ;;  %v4142_v59 = vld [vmem:[#allocation3 + $0x20] sm:$0xff] }
 0x128   : > { %1002 = vst.msk [vmem:[#allocation2 + $0x94] sm:$0xf] %vm395_vm0, %v801_v32  ;;  %v2533_v11 = vor.u32 %v2532_v61, %v2528_v49  ;;  %1005 = vst [vmem:[#allocation2 + $0x98] sm:$0x1] %v1004_v16  ;;  %v2943_v19 = vrot.slane %v2941_v4, 4  ;;  %v2944_v27 = vrot.slane %v2805_v55, 5  ;;  %2008 = vrot.lane.b32.xlu1 %v4814_v57, %s5150_s28  ;;  %v2942_v47 = vsel %vm5232_vm8, %v4861_v31, %v2941_v4 }
 0x129   : > { %v371_v15 = vmax.f32 %v6132_v52, 0.0  ;;  %v2524_v42 = vrot.slane %v2523_v58, 4  ;;  %v372_v17 = vmax.f32 %v6139_v38, 0.0  ;;  %v447_v45 = vsel %vm5204_vm3, 0, %v446_v22  ;;  %v4084_v52 = vpop.permute.xlu0 %4083  ;;  %1717 = vst.msk [vmem:[#allocation3 + $0x30] sm:$0xff] %vm1710_vm2, %v1675_v12  ;;  %5035 = vmatprep.mubr.msk.bf16.mxu0 %vm4174_vm10, %v4142_v59  ;;  %v5130_v12 = vld [vmem:[#allocation2 + $0x84] sm:$0xff]  }
 0x12a   : > { %v503_v39 = vsel %vm5218_vm7, 0, %v502_v5  ;;  %v2534_v3 = vrot.slane %v2533_v11, 4  ;;  %448 = vst [vmem:[#allocation2 + $0x9c] sm:$0x1] %v447_v45  ;;  %v373_v38 = vmax.f32 %v6150_v29, 0.0  ;;  %4127 = vst.msk [vmem:[#allocation3 + $0x28] sm:$0xff] %vm4121_vm1, %v4084_v52  ;;  %v2945_v23 = vsel %vm5232_vm8, %v2943_v19, %v2944_v27 }
 0x12b   : > { %v4994_v28 = vpack.c.bf16 %v371_v15, %v371_v15  ;;  %504 = vst [vmem:[#allocation2 + $0xa4] sm:$0x1] %v503_v39  ;;  %v2529_v18 = vsel %vm5290_vm12, %v2524_v42, %v2528_v49  ;;  %v6282_v54 = vpack.c.bf16 %v372_v17, %v372_v17  ;;  %v304_v14 = vmul.f32 %v6295_v37, %v265_v35  ;;  %v5129_v39 = vld [vmem:[#allocation2 + $0x78] sm:$0xff]  }
 0x12c   : > { %v2539_v36 = vsel %vm5290_vm12, %v2534_v3, %v2538_v56  ;;  %v2261_v7 = vld [vmem:[#allocation2 + $0x90] sm:$0xf]  ;;  %v374_v51 = vmax.f32 %v6237_v60, 0.0  ;;  %v4877_v2 = vcombine.low %v2942_v47, %v2945_v23  ;;  %v6307_v4 = vmul.f32 %v6295_v37, %v266_v48  ;;  %1173 = vst.msk [vmem:[#allocation3 + $0x50] sm:$0xff] %vm7055_vm6, %v5129_v39 }
 0x12d   : > { %v2806_v0 = vld [vmem:[#allocation2 + $0x90] sm:$0xe]  ;;  %v4845_v40 = vcombine.low %v2529_v18, %v2539_v36  ;;  %v2541_v6 = vshrl.u32 %v2261_v7, 16  ;;  %v2544_v63 = vshll.u32 %v2261_v7, 16  ;;  %v804_v20 = vshrl.u32 %v4994_v28, 16  ;;  %v1999_v32 = vpop.permute.xlu0 %1998  ;;  %v1677_v19 = vpop.permute.xlu1 %1676  ;;  %1174 = vst.msk [vmem:[#allocation3 + $0x58] sm:$0xff] %vm7056_vm9, %v5130_v12 }
 0x12e   : > { %v4862_v34 = vrot.slane %v2806_v0, 9  ;;  %v807_v50 = vshll.u32 %v4994_v28, 16  ;;  %v812_v44 = vshrl.u32 %v6282_v54, 16  ;;  %v815_v30 = vshll.u32 %v6282_v54, 16  ;;  %v3302_v25 = vld [vmem:[#allocation2 + $0x90] sm:$0xf] }
 0x12f   : > { %v5112_v41 = vld [vmem:[#allocation2 + $0x90] sm:$0xff]   ;;  %2728 = vrot.lane.b32.xlu0 %v4845_v40, %s5156_s9  ;;  %v2543_v10 = vrot.slane %v2541_v6, 4  ;;  %v2263_v26 = vld [vmem:[#allocation2 + $0x98] sm:$0x1]  ;;  %v2546_v24 = vrot.slane %v2544_v63, 5  ;;  %v806_v31 = vrot.slane %v804_v20, 7  ;;  %v6310_v5 = vadd.f32 %v6233_v53, %v304_v14 }
 0x130   : > { %v2262_v43 = vld [vmem:[#allocation2 + $0x94] sm:$0xf]  ;;  %2185 = vrot.lane.b32.xlu1 %v5112_v41, %s5152_s30  ;;  %v2560_v55 = vshll.u32 %v2263_v26, 16  ;;  %v2808_v49 = vld [vmem:[#allocation2 + $0x98] sm:$0x1]  ;;  %2041 = vst.msk [vmem:[#allocation3 + $0x30] sm:$0xff] %vm2034_vm4, %v1999_v32 }
 0x131   : > { %v2550_v57 = vshll.u32 %v2262_v43, 16  ;;  %v2554_v46 = vshrl.u32 %v2262_v43, 16  ;;  %v2807_v22 = vld [vmem:[#allocation2 + $0x94] sm:$0xf]  ;;  %v2547_v58 = vor.u32 %v2546_v24, %v2543_v10  ;;  %v4143_v27 = vld [vmem:[#allocation3 + $0x28] sm:$0xff]  ;;  %v2951_v62 = vrot.slane %v2808_v49, 5  ;;  %v2176_v0 = vpop.permute.xlu0 %2175  ;;  %v2001_v20 = vpop.permute.xlu1 %2000 }
 0x132   : > { %v5115_v61 = vld [vmem:[#allocation2 + $0x90] sm:$0xff]   ;;  %v2948_v11 = vrot.slane %v2807_v22, 5  ;;  %v2562_v15 = vrot.slane %v2560_v55, 5  ;;  %v809_v42 = vor.u32 %v807_v50, %v806_v31  ;;  %v810_v17 = vrot.slane %v806_v31, 4  ;;  %v1006_v45 = vld [vmem:[#allocation2 + $0x9c] sm:$0xf]  ;;  %5036 = vmatmul.mubr.msk.bf16.gmra.mrb[8].mxu0 %vm4174_vm10, %v4143_v27 }
 0x133   : > { %v2552_v56 = vrot.slane %v2550_v57, 5  ;;  %v2556_v16 = vrot.slane %v2554_v46, 4  ;;  %3049 = vrot.lane.b32.xlu0 %v4877_v2, %s5154_s7  ;;  %1718 = vst.msk [vmem:[#allocation3 + $0x38] sm:$0xff] %vm1710_vm2, %v1677_v19  ;;  %v2548_v35 = vrot.slane %v2547_v58, 4  ;;  %v3303_v18 = vld [vmem:[#allocation2 + $0x94] sm:$0xf] }
 0x134   : > { %v6318_v28 = vsel %vm5232_vm8, %v4862_v34, %v2948_v11  ;;  %v2950_v52 = vrot.slane %v2948_v11, 4  ;;  %v814_v54 = vrot.slane %v812_v44, 7  ;;  %v1007_v36 = vsel %vm5298_vm13, %v809_v42, %v1006_v45  ;;  %v3304_v7 = vld [vmem:[#allocation2 + $0x98] sm:$0x1]  ;;  %v1010_v59 = vld [vmem:[#allocation2 + $0xa4] sm:$0x1] }
 0x135   : > { %v2557_v3 = vor.u32 %v2556_v16, %v2552_v56  ;;  %v3561_v47 = vshrl.u32 %v3302_v25, 16  ;;  %v3564_v23 = vshll.u32 %v3302_v25, 16  ;;  %v2553_v14 = vsel %vm5290_vm12, %v2548_v35, %v2552_v56  ;;  %1008 = vst [vmem:[#allocation2 + $0x9c] sm:$0xf] %v1007_v36  ;;  %v3847_v34 = vld [vmem:[#allocation2 + $0x90] sm:$0xe] }
 0x136   : > { %v2952_v6 = vsel %vm5232_vm8, %v2950_v52, %v2951_v62  ;;  %v3570_v63 = vshll.u32 %v3303_v18, 16  ;;  %2218 = vst.msk [vmem:[#allocation3 + $0x30] sm:$0xff] %vm2211_vm5, %v2176_v0  ;;  %v817_v44 = vor.u32 %v815_v30, %v814_v54  ;;  %v819_v48 = vrot.slane %v814_v54, 4  ;;  %v3848_v43 = vld [vmem:[#allocation2 + $0x94] sm:$0xf] }
 0x137   : > { %v2558_v40 = vrot.slane %v2557_v3, 4  ;;  %v4878_v50 = vcombine.low %v6318_v28, %v2952_v6  ;;  %3227 = vrot.lane.b32.xlu0 %v5115_v61, %s5153_s6  ;;  %v3563_v41 = vrot.slane %v3561_v47, 4  ;;  %v3849_v10 = vld [vmem:[#allocation2 + $0x98] sm:$0x1]  ;;  %2042 = vst.msk [vmem:[#allocation3 + $0x38] sm:$0xff] %vm2034_vm4, %v2001_v20  ;;  %v3566_v26 = vrot.slane %v3564_v23, 5 }
 0x138   : > { %v3572_v24 = vrot.slane %v3570_v63, 5  ;;  %v3574_v57 = vshrl.u32 %v3303_v18, 16  ;;  %v1215_v46 = vld [vmem:[#allocation2 + $0x90] sm:$0xf]  ;;  %v818_v30 = vsel %vm5308_vm14, %v810_v17, %v817_v44  ;;  %v3580_v55 = vshll.u32 %v3304_v7, 16  ;;  %v2721_v28 = vpop.permute.xlu0 %2720 }
 0x139   : > { %v2563_v2 = vsel %vm5290_vm12, %v2558_v40, %v2562_v15  ;;  %v1011_v22 = vsel %vm5204_vm3, %v819_v48, %v1010_v59  ;;  %1009 = vst.msk [vmem:[#allocation2 + $0xa0] sm:$0xf] %vm395_vm0, %v818_v30  ;;  %v3567_v49 = vor.u32 %v3566_v26, %v3563_v41  ;;  %v4925_v31 = vrot.slane %v3847_v34, 9  ;;  %v267_v58 = vld [vmem:[%s5241_s25 + $0xf0] sm:$0xff]  ;;  %v1217_v47 = vld [vmem:[#allocation2 + $0x98] sm:$0x1] }
 0x13a   : > { %v4846_v25 = vcombine.low %v2553_v14, %v2563_v2  ;;  %v3576_v61 = vrot.slane %v3574_v57, 4  ;;  %1012 = vst [vmem:[#allocation2 + $0xa4] sm:$0x1] %v1011_v22  ;;  %v3985_v32 = vrot.slane %v3848_v43, 5  ;;  %v3582_v56 = vrot.slane %v3580_v55, 5  ;;  %v2178_v14 = vpop.permute.xlu1 %2177 }
 0x13b   : > { %v3988_v16 = vrot.slane %v3849_v10, 5  ;;  %v1216_v11 = vld [vmem:[#allocation2 + $0x94] sm:$0xf]  ;;  %v1519_v19 = vshrl.u32 %v1215_v46, 16  ;;  %v1522_v27 = vshll.u32 %v1215_v46, 16  ;;  %v3568_v15 = vrot.slane %v3567_v49, 4 }
 0x13c   : > { %2730 = vrot.lane.b32.xlu1 %v4846_v25, %s5156_s9  ;;  %v3577_v62 = vor.u32 %v3576_v61, %v3572_v24  ;;  %v3987_v42 = vrot.slane %v3985_v32, 4  ;;  %v6343_v17 = vadd.f32 %v6233_v53, %v6307_v4  ;;  %v3305_v45 = vld [vmem:[#allocation2 + $0x9c] sm:$0xf]  ;;  %v6347_v39 = vsel %vm5232_vm8, %v4925_v31, %v3985_v32  ;;  %2219 = vst.msk [vmem:[#allocation3 + $0x38] sm:$0xff] %vm2211_vm5, %v2178_v14  ;;  %v3042_v2 = vpop.permute.xlu0 %3041  ;;  %v5131_v32 = vld [vmem:[#allocation2 + $0x90] sm:$0xff]  }
 0x13d   : > { %v1521_v35 = vrot.slane %v1519_v19, 4  ;;  %v1524_v3 = vrot.slane %v1522_v27, 5  ;;  %v6350_v52 = vmul.f32 %v6295_v37, %v267_v58  ;;  %v3573_v18 = vsel %vm5290_vm12, %v3568_v15, %v3572_v24  ;;  %v3850_v59 = vld [vmem:[#allocation2 + $0x9c] sm:$0xe] }
 0x13e   : > { %v3578_v54 = vrot.slane %v3577_v62, 4  ;;  %v3585_v36 = vshrl.u32 %v3305_v45, 16  ;;  %v3588_v7 = vshll.u32 %v3305_v45, 16  ;;  %vm7057_vm15 = vcmask 162944   ;;  %v1218_v43 = vld [vmem:[#allocation2 + $0x9c] sm:$0xf] }
 0x13f   : > { %2763 = vst.msk [vmem:[#allocation3 + $0x30] sm:$0xff] %vm7057_vm15, %v2721_v28  ;;  %v3989_v4 = vsel %vm5232_vm8, %v3987_v42, %v3988_v16  ;;  %v1525_v23 = vor.u32 %v1524_v3, %v1521_v35  ;;  %v1528_v0 = vshll.u32 %v1216_v11, 16  ;;  %v1532_v12 = vshrl.u32 %v1216_v11, 16 }
 0x140   : > { %3051 = vrot.lane.b32.xlu1 %v4878_v50, %s5154_s7  ;;  %v3583_v40 = vsel %vm5290_vm12, %v3578_v54, %v3582_v56  ;;  %v3587_v6 = vrot.slane %v3585_v36, 4  ;;  %v3590_v63 = vrot.slane %v3588_v7, 5  ;;  %v6363_v34 = vpack.c.bf16 %v373_v38, %v373_v38  ;;  %v5116_v20 = vld [vmem:[#allocation2 + $0x9c] sm:$0xff]   ;;  %v3220_v27 = vpop.permute.xlu0 %3219  ;;  %v1763_v36 = vld [vmem:[#allocation2 + $0x90] sm:$0xe] }
 0x141   : > { %v4909_v50 = vcombine.low %v3573_v18, %v3583_v40  ;;  %v3306_v44 = vld [vmem:[#allocation2 + $0xa0] sm:$0xf]  ;;  %v4941_v48 = vcombine.low %v6347_v39, %v3989_v4  ;;  %v1526_v41 = vrot.slane %v1525_v23, 4  ;;  %v6370_v10 = vpack.c.bf16 %v374_v51, %v374_v51  ;;  %v3307_v26 = vld [vmem:[#allocation2 + $0xa4] sm:$0x1] }
 0x142   : > { %v3591_v29 = vor.u32 %v3590_v63, %v3587_v6  ;;  %v3594_v24 = vshll.u32 %v3306_v44, 16  ;;  %v3598_v38 = vshrl.u32 %v3306_v44, 16  ;;  %v1530_v57 = vrot.slane %v1528_v0, 5  ;;  %v3851_v55 = vld [vmem:[#allocation2 + $0xa0] sm:$0xf] }
 0x143   : > { %vm7058_vm6 = vcmask 195744   ;;  %3772 = vrot.lane.b32.xlu0 %v4909_v50, %s5157_s10  ;;  %v3604_v46 = vshll.u32 %v3307_v26, 16  ;;  %v1534_v25 = vrot.slane %v1532_v12, 4  ;;  %v1538_v30 = vshll.u32 %v1217_v47, 16  ;;  %v3852_v31 = vld [vmem:[#allocation2 + $0xa4] sm:$0x1] }
 0x144   : > { %3084 = vst.msk [vmem:[#allocation3 + $0x30] sm:$0xff] %vm7058_vm6, %v3042_v2  ;;  %3229 = vrot.lane.b32.xlu1 %v5116_v20, %s5153_s6  ;;  %v4926_v60 = vrot.slane %v3850_v59, 9  ;;  %v3592_v22 = vrot.slane %v3591_v29, 4  ;;  %v3596_v51 = vrot.slane %v3594_v24, 5  ;;  %v3600_v49 = vrot.slane %v3598_v38, 4  ;;  %v5132_v15 = vld [vmem:[#allocation2 + $0x9c] sm:$0xff]  }
 0x145   : > { %v1531_v61 = vsel %vm5290_vm12, %v1526_v41, %v1530_v57  ;;  %v3606_v58 = vrot.slane %v3604_v46, 5  ;;  %v1535_v56 = vor.u32 %v1534_v25, %v1530_v57  ;;  %v1540_v16 = vrot.slane %v1538_v30, 5  ;;  %v1219_v19 = vld [vmem:[#allocation2 + $0xa0] sm:$0xf]  ;;  %v1220_v39 = vld [vmem:[#allocation2 + $0xa4] sm:$0x1]  ;;  %v2723_v20 = vpop.permute.xlu1 %2722 }
 0x146   : > { %v3992_v11 = vrot.slane %v3851_v55, 5  ;;  %v3597_v62 = vsel %vm5290_vm12, %v3592_v22, %v3596_v51  ;;  %v3601_v42 = vor.u32 %v3600_v49, %v3596_v51  ;;  %v3995_v45 = vrot.slane %v3852_v31, 5  ;;  %v1764_v7 = vld [vmem:[#allocation2 + $0x94] sm:$0xf]  ;;  %v1765_v63 = vld [vmem:[#allocation2 + $0x98] sm:$0x1] }
 0x147   : > { %v1543_v35 = vshrl.u32 %v1218_v43, 16  ;;  %vm7059_vm9 = vcmask 228544   ;;  %vm7060_vm15 = vcmask 31744   ;;  %4093 = vrot.lane.b32.xlu0 %v4941_v48, %s5155_s8  ;;  %v1536_v3 = vrot.slane %v1535_v56, 4  ;;  %v1766_v59 = vld [vmem:[#allocation2 + $0x9c] sm:$0xe] }
 0x148   : > { %3262 = vst.msk [vmem:[#allocation3 + $0x30] sm:$0xff] %vm7059_vm9, %v3220_v27  ;;  %v3993_v28 = vsel %vm5232_vm8, %v4926_v60, %v3992_v11  ;;  %v3994_v18 = vrot.slane %v3992_v11, 4  ;;  %v1546_v54 = vshll.u32 %v1218_v43, 16  ;;  %vm7061_vm6 = vmmov %vm7060_vm15  ;;  %v3602_v4 = vrot.slane %v3601_v42, 4  ;;  %v1767_v43 = vld [vmem:[#allocation2 + $0xa0] sm:$0xf] }
 0x149   : > { %1175 = vst.msk [vmem:[#allocation3 + $0x60] sm:$0xff] %vm7060_vm15, %v5131_v32  ;;  %v1545_v47 = vrot.slane %v1543_v35, 4  ;;  %v1552_v23 = vshll.u32 %v1219_v19, 16  ;;  %v1556_v0 = vshrl.u32 %v1219_v19, 16  ;;  %v1541_v12 = vsel %vm5290_vm12, %v1536_v3, %v1540_v16  ;;  %v1768_v2 = vld [vmem:[#allocation2 + $0xa4] sm:$0x1] }
 0x14a   : > { %1176 = vst.msk [vmem:[#allocation3 + $0x68] sm:$0xff] %vm7061_vm6, %v5132_v15  ;;  %v3996_v14 = vsel %vm5232_vm8, %v3994_v18, %v3995_v45  ;;  %v1548_v40 = vrot.slane %v1546_v54, 5  ;;  %v1562_v6 = vshll.u32 %v1220_v39, 16  ;;  %v3607_v50 = vsel %vm5290_vm12, %v3602_v4, %v3606_v58  ;;  %v449_v57 = vld [vmem:[#allocation2 + $0xa8] sm:$0x1] }
 0x14b   : > { %v4783_v44 = vcombine.low %v1531_v61, %v1541_v12  ;;  %v4942_v48 = vcombine.low %v3993_v28, %v3996_v14  ;;  %v1554_v41 = vrot.slane %v1552_v23, 5  ;;  %vm7062_vm9 = vcmask 162944   ;;  %v3044_v61 = vpop.permute.xlu1 %3043  ;;  %v2264_v15 = vld [vmem:[#allocation2 + $0x9c] sm:$0xf]  ;;  %v2265_v3 = vld [vmem:[#allocation2 + $0xa0] sm:$0xf] }
 0x14c   : > { %2764 = vst.msk [vmem:[#allocation3 + $0x38] sm:$0xff] %vm7062_vm9, %v2723_v20  ;;  %v4910_v26 = vcombine.low %v3597_v62, %v3607_v50  ;;  %v1549_v29 = vor.u32 %v1548_v40, %v1545_v47  ;;  %v1558_v24 = vrot.slane %v1556_v0, 4  ;;  %v1564_v38 = vrot.slane %v1562_v6, 5  ;;  %v268_v62 = vld [vmem:[%s5241_s25 + $0xf8] sm:$0xff]  ;;  %v505_v4 = vld [vmem:[#allocation2 + $0xb0] sm:$0x1]  ;;  %v3765_v23 = vpop.permute.xlu0 %3764 }
 0x14d   : > { %4095 = vrot.lane.b32.xlu0 %v4942_v48, %s5155_s8  ;;  %v4799_v46 = vrot.slane %v1763_v36, 9  ;;  %v1912_v25 = vrot.slane %v1764_v7, 5  ;;  %v1915_v30 = vrot.slane %v1765_v63, 5  ;;  %v4800_v55 = vrot.slane %v1766_v59, 9  ;;  %v2266_v7 = vld [vmem:[#allocation2 + $0xa4] sm:$0x1] }
 0x14e   : > { %3774 = vrot.lane.b32.xlu1 %v4910_v26, %s5157_s10  ;;  %v1550_v60 = vrot.slane %v1549_v29, 4  ;;  %v1559_v22 = vor.u32 %v1558_v24, %v1554_v41  ;;  %v1919_v51 = vrot.slane %v1767_v43, 5  ;;  %v1922_v49 = vrot.slane %v1768_v2, 5  ;;  %v2809_v40 = vld [vmem:[#allocation2 + $0x9c] sm:$0xe]  ;;  %3807 = vst.msk [vmem:[#allocation3 + $0x30] sm:$0xff] %vm3800_vm11, %v3765_v23 }
 0x14f   : > { %v1913_v31 = vsel %vm5232_vm8, %v4799_v46, %v1912_v25  ;;  %v1914_v32 = vrot.slane %v1912_v25, 4  ;;  %v450_v58 = vsel %vm5204_vm3, 0, %v449_v57  ;;  %v821_v56 = vshrl.u32 %v6363_v34, 16  ;;  %v3222_v47 = vpop.permute.xlu1 %3221  ;;  %v2810_v50 = vld [vmem:[#allocation2 + $0xa0] sm:$0xf] }
 0x150   : > { %vm7063_vm15 = vcmask 195744   ;;  %v1555_v16 = vsel %vm5290_vm12, %v1550_v60, %v1554_v41  ;;  %v1560_v11 = vrot.slane %v1559_v22, 4  ;;  %v6404_v19 = vsel %vm5232_vm8, %v4800_v55, %v1919_v51  ;;  %451 = vst [vmem:[#allocation2 + $0xa8] sm:$0x1] %v450_v58  ;;  %v2811_v2 = vld [vmem:[#allocation2 + $0xa4] sm:$0x1]  ;;  %v4086_v46 = vpop.permute.xlu0 %4085 }
 0x151   : > { %3085 = vst.msk [vmem:[#allocation3 + $0x38] sm:$0xff] %vm7063_vm15, %v3044_v61  ;;  %v1921_v27 = vrot.slane %v1919_v51, 4  ;;  %v1916_v42 = vsel %vm5232_vm8, %v1914_v32, %v1915_v30  ;;  %v823_v45 = vrot.slane %v821_v56, 7  ;;  %v824_v39 = vshll.u32 %v6363_v34, 16  ;;  %v5117_v34 = vld [vmem:[#allocation2 + $0x9c] sm:$0xff]  }
 0x152   : > { %v829_v35 = vshrl.u32 %v6370_v10, 16  ;;  %1686 = vrot.lane.b32.xlu1 %v4783_v44, %s5151_s29  ;;  %v1565_v28 = vsel %vm5290_vm12, %v1560_v11, %v1564_v38  ;;  %v4815_v18 = vcombine.low %v1913_v31, %v1916_v42  ;;  %v832_v36 = vshll.u32 %v6370_v10, 16  ;;  %v452_v26 = vld [vmem:[#allocation2 + $0xb4] sm:$0x1]  ;;  %v508_v57 = vld [vmem:[#allocation2 + $0xbc] sm:$0x1] }
 0x153   : > { %v1923_v54 = vsel %vm5232_vm8, %v1921_v27, %v1922_v49  ;;  %v4784_v0 = vcombine.low %v1555_v16, %v1565_v28  ;;  %v826_v12 = vor.u32 %v824_v39, %v823_v45  ;;  %v827_v14 = vrot.slane %v823_v45, 4  ;;  %4128 = vst.msk [vmem:[#allocation3 + $0x30] sm:$0xff] %vm4121_vm1, %v4086_v46  ;;  %v511_v28 = vld [vmem:[#allocation2 + $0xc8] sm:$0x1] }
 0x154   : > { %vm7064_vm6 = vcmask 228544   ;;  %v6419_v6 = vmul.f32 %v6295_v37, %v268_v62  ;;  %2010 = vrot.lane.b32.xlu0 %v4815_v18, %s5150_s28  ;;  %v831_v63 = vrot.slane %v829_v35, 7  ;;  %v2565_v10 = vshrl.u32 %v2264_v15, 16  ;;  %v455_v62 = vld [vmem:[#allocation2 + $0xc0] sm:$0x1] }
 0x155   : > { %3263 = vst.msk [vmem:[#allocation3 + $0x38] sm:$0xff] %vm7064_vm6, %v3222_v47  ;;  %v2568_v59 = vshll.u32 %v2264_v15, 16  ;;  %v2574_v20 = vshll.u32 %v2265_v3, 16  ;;  %v4816_v44 = vcombine.low %v6404_v19, %v1923_v54  ;;  %v2578_v48 = vshrl.u32 %v2265_v3, 16 }
 0x156   : > { %v2584_v41 = vshll.u32 %v2266_v7, 16  ;;  %v506_v43 = vsel %vm5218_vm7, 0, %v505_v4  ;;  %1688 = vrot.lane.b32.xlu1 %v4784_v0, %s5151_s29  ;;  %v834_v37 = vor.u32 %v832_v36, %v831_v63  ;;  %v2567_v29 = vrot.slane %v2565_v10, 4 }
 0x157   : > { %v2570_v24 = vrot.slane %v2568_v59, 5  ;;  %507 = vst [vmem:[#allocation2 + $0xb0] sm:$0x1] %v506_v43  ;;  %v4863_v38 = vrot.slane %v2809_v40, 9  ;;  %v836_v25 = vrot.slane %v831_v63, 4  ;;  %v2576_v55 = vrot.slane %v2574_v20, 5 }
 0x158   : > { %v1013_v30 = vld [vmem:[#allocation2 + $0xa8] sm:$0xf]  ;;  %v2580_v60 = vrot.slane %v2578_v48, 4  ;;  %v2955_v22 = vrot.slane %v2810_v50, 5  ;;  %2187 = vrot.lane.b32.xlu0 %v5117_v34, %s5152_s30  ;;  %v835_v51 = vsel %vm5308_vm14, %v827_v14, %v834_v37  ;;  %v2958_v31 = vrot.slane %v2811_v2, 5 }
 0x159   : > { %v1014_v49 = vsel %vm5298_vm13, %v826_v12, %v1013_v30  ;;  %v2571_v61 = vor.u32 %v2570_v24, %v2567_v29  ;;  %1016 = vst.msk [vmem:[#allocation2 + $0xac] sm:$0xf] %vm395_vm0, %v835_v51  ;;  %v2586_v58 = vrot.slane %v2584_v41, 5  ;;  %v375_v16 = vmax.f32 %v6310_v5, 0.0 }
 0x15a   : > { %1015 = vst [vmem:[#allocation2 + $0xa8] sm:$0xf] %v1014_v49  ;;  %v2581_v32 = vor.u32 %v2580_v60, %v2576_v55  ;;  %v2957_v56 = vrot.slane %v2955_v22, 4  ;;  %2012 = vrot.lane.b32.xlu1 %v4816_v44, %s5150_s28  ;;  %v376_v19 = vmax.f32 %v6343_v17, 0.0  ;;  %v453_v27 = vsel %vm5204_vm3, 0, %v452_v26  ;;  %v4144_v34 = vld [vmem:[#allocation3 + $0x30] sm:$0xff]  ;;  %v4088_v10 = vpop.permute.xlu0 %4087 }
 0x15b   : > { %v2572_v11 = vrot.slane %v2571_v61, 4  ;;  %v509_v15 = vsel %vm5218_vm7, 0, %v508_v57  ;;  %454 = vst [vmem:[#allocation2 + $0xb4] sm:$0x1] %v453_v27  ;;  %v4998_v45 = vpack.c.bf16 %v375_v16, %v375_v16  ;;  %v6443_v39 = vadd.f32 %v6233_v53, %v6350_v52  ;;  %5039 = vmatprep.mubr.msk.bf16.mxu0 %vm4174_vm10, %v4144_v34  ;;  %v3767_v41 = vpop.permute.xlu1 %3766 }
 0x15c   : > { %v2582_v42 = vrot.slane %v2581_v32, 4  ;;  %510 = vst [vmem:[#allocation2 + $0xbc] sm:$0x1] %v509_v15  ;;  %v2956_v17 = vsel %vm5232_vm8, %v4863_v38, %v2955_v22  ;;  %v2959_v35 = vsel %vm5232_vm8, %v2957_v56, %v2958_v31  ;;  %v4999_v3 = vpack.c.bf16 %v376_v19, %v376_v19  ;;  %3808 = vst.msk [vmem:[#allocation3 + $0x38] sm:$0xff] %vm3800_vm11, %v3767_v41 }
 0x15d   : > { %v2577_v5 = vsel %vm5290_vm12, %v2572_v11, %v2576_v55  ;;  %v838_v36 = vshrl.u32 %v4998_v45, 16  ;;  %v841_v7 = vshll.u32 %v4998_v45, 16  ;;  %v456_v52 = vsel %vm5204_vm3, 0, %v455_v62  ;;  %4129 = vst.msk [vmem:[#allocation3 + $0x38] sm:$0xff] %vm4121_vm1, %v4088_v10 }
 0x15e   : > { %v2587_v18 = vsel %vm5290_vm12, %v2582_v42, %v2586_v58  ;;  %v1017_v54 = vld [vmem:[#allocation2 + $0xb0] sm:$0x1]  ;;  %v846_v23 = vshrl.u32 %v4999_v3, 16  ;;  %v6459_v0 = vadd.f32 %v6233_v53, %v6419_v6  ;;  %457 = vst [vmem:[#allocation2 + $0xc0] sm:$0x1] %v456_v52  ;;  %v849_v14 = vshll.u32 %v4999_v3, 16  ;;  %v2003_v46 = vpop.permute.xlu0 %2002 }
 0x15f   : > { %v4847_v4 = vcombine.low %v2577_v5, %v2587_v18  ;;  %v1018_v47 = vsel %vm5204_vm3, %v836_v25, %v1017_v54  ;;  %v840_v12 = vrot.slane %v838_v36, 7  ;;  %v377_v40 = vmax.f32 %v6443_v39, 0.0  ;;  %v1679_v58 = vpop.permute.xlu1 %1678 }
 0x160   : > { %1019 = vst [vmem:[#allocation2 + $0xb0] sm:$0x1] %v1018_v47  ;;  %v512_v63 = vsel %vm5218_vm7, 0, %v511_v28  ;;  %v4879_v20 = vcombine.low %v2956_v17, %v2959_v35  ;;  %v6466_v50 = vrot.slane %v846_v23, 7  ;;  %v2268_v6 = vld [vmem:[#allocation2 + $0xac] sm:$0xf] }
 0x161   : > { %v5118_v59 = vld [vmem:[#allocation2 + $0xa8] sm:$0xff]   ;;  %2732 = vrot.lane.b32.xlu0 %v4847_v4, %s5156_s9  ;;  %513 = vst [vmem:[#allocation2 + $0xc8] sm:$0x1] %v512_v63  ;;  %v843_v48 = vor.u32 %v841_v7, %v840_v12  ;;  %v2598_v26 = vshll.u32 %v2268_v6, 16  ;;  %v2602_v37 = vshrl.u32 %v2268_v6, 16  ;;  %v378_v57 = vmax.f32 %v6459_v0, 0.0 }
 0x162   : > { %v2267_v53 = vld [vmem:[#allocation2 + $0xa8] sm:$0xf]  ;;  %2189 = vrot.lane.b32.xlu1 %v5118_v59, %s5152_s30  ;;  %v2813_v29 = vld [vmem:[#allocation2 + $0xac] sm:$0xf]  ;;  %v851_v38 = vor.u32 %v849_v14, %v6466_v50  ;;  %v844_v61 = vrot.slane %v840_v12, 4  ;;  %v853_v31 = vrot.slane %v6466_v50, 4  ;;  %v2180_v35 = vpop.permute.xlu0 %2179 }
 0x163   : > { %v2812_v44 = vld [vmem:[#allocation2 + $0xa8] sm:$0xe]  ;;  %v2589_v43 = vshrl.u32 %v2267_v53, 16  ;;  %v2592_v2 = vshll.u32 %v2267_v53, 16  ;;  %v2962_v24 = vrot.slane %v2813_v29, 5  ;;  %v2600_v55 = vrot.slane %v2598_v26, 5  ;;  %v1681_v34 = vpop.permute.xlu1 %1680 }
 0x164   : > { %v2604_v60 = vrot.slane %v2602_v37, 4  ;;  %v5121_v22 = vld [vmem:[#allocation2 + $0xa8] sm:$0xff]   ;;  %v4864_v51 = vrot.slane %v2812_v44, 9  ;;  %v1020_v32 = vld [vmem:[#allocation2 + $0xb4] sm:$0xf]  ;;  %1719 = vst.msk [vmem:[#allocation3 + $0x40] sm:$0xff] %vm1710_vm2, %v1679_v58  ;;  %v852_v45 = vsel %vm5308_vm14, %v844_v61, %v851_v38  ;;  %v6511_v58 = vpack.c.bf16 %v378_v57, %v378_v57 }
 0x165   : > { %v2591_v25 = vrot.slane %v2589_v43, 4  ;;  %v2594_v30 = vrot.slane %v2592_v2, 5  ;;  %3053 = vrot.lane.b32.xlu0 %v4879_v20, %s5154_s7  ;;  %v2964_v49 = vrot.slane %v2962_v24, 4  ;;  %v1021_v27 = vsel %vm5298_vm13, %v843_v48, %v1020_v32  ;;  %v3308_v15 = vld [vmem:[#allocation2 + $0xa8] sm:$0xf]  ;;  %2043 = vst.msk [vmem:[#allocation3 + $0x40] sm:$0xff] %vm2034_vm4, %v2003_v46 }
 0x166   : > { %v2605_v11 = vor.u32 %v2604_v60, %v2600_v55  ;;  %1022 = vst [vmem:[#allocation2 + $0xb4] sm:$0xf] %v1021_v27  ;;  %v3309_v5 = vld [vmem:[#allocation2 + $0xac] sm:$0xf]  ;;  %1023 = vst.msk [vmem:[#allocation2 + $0xb8] sm:$0xf] %vm395_vm0, %v852_v45  ;;  %v2963_v52 = vsel %vm5232_vm8, %v4864_v51, %v2962_v24 }
 0x167   : > { %v2269_v56 = vld [vmem:[#allocation2 + $0xb0] sm:$0x1]  ;;  %v2595_v16 = vor.u32 %v2594_v30, %v2591_v25  ;;  %v3609_v18 = vshrl.u32 %v3308_v15, 16  ;;  %v3612_v54 = vshll.u32 %v3308_v15, 16  ;;  %v1024_v36 = vld [vmem:[#allocation2 + $0xbc] sm:$0x1]  ;;  %v2005_v46 = vpop.permute.xlu1 %2004 }
 0x168   : > { %v2814_v19 = vld [vmem:[#allocation2 + $0xb0] sm:$0x1]  ;;  %v2608_v62 = vshll.u32 %v2269_v56, 16  ;;  %v2606_v28 = vrot.slane %v2605_v11, 4  ;;  %2220 = vst.msk [vmem:[#allocation3 + $0x40] sm:$0xff] %vm2211_vm5, %v2180_v35  ;;  %v3618_v4 = vshll.u32 %v3309_v5, 16  ;;  %v1025_v2 = vsel %vm5204_vm3, %v853_v31, %v1024_v36  ;;  %v2725_v51 = vpop.permute.xlu0 %2724 }
 0x169   : > { %v2965_v42 = vrot.slane %v2814_v19, 5  ;;  %v3310_v17 = vld [vmem:[#allocation2 + $0xb0] sm:$0x1]  ;;  %v2596_v3 = vrot.slane %v2595_v16, 4  ;;  %3231 = vrot.lane.b32.xlu0 %v5121_v22, %s5153_s6  ;;  %v3622_v47 = vshrl.u32 %v3309_v5, 16  ;;  %v3611_v63 = vrot.slane %v3609_v18, 4 }
 0x16a   : > { %v2610_v7 = vrot.slane %v2608_v62, 5  ;;  %v3853_v23 = vld [vmem:[#allocation2 + $0xa8] sm:$0xe]  ;;  %v3614_v10 = vrot.slane %v3612_v54, 5  ;;  %v3854_v59 = vld [vmem:[#allocation2 + $0xac] sm:$0xf]  ;;  %v6503_v22 = vpack.c.bf16 %v377_v40, %v377_v40 }
 0x16b   : > { %v2601_v12 = vsel %vm5290_vm12, %v2596_v3, %v2600_v55  ;;  %v2966_v14 = vsel %vm5232_vm8, %v2964_v49, %v2965_v42  ;;  %1720 = vst.msk [vmem:[#allocation3 + $0x48] sm:$0xff] %vm1710_vm2, %v1681_v34  ;;  %v3620_v50 = vrot.slane %v3618_v4, 5  ;;  %v3624_v53 = vrot.slane %v3622_v47, 4  ;;  %v6493_v44 = vld [vmem:[#allocation2 + $0xa8] sm:$0xf]  ;;  %v4145_v48 = vld [vmem:[#allocation3 + $0x38] sm:$0xff] }
 0x16c   : > { %v2611_v20 = vsel %vm5290_vm12, %v2606_v28, %v2610_v7  ;;  %v3628_v6 = vshll.u32 %v3310_v17, 16  ;;  %v3615_v43 = vor.u32 %v3614_v10, %v3611_v63  ;;  %v3855_v26 = vld [vmem:[#allocation2 + $0xb0] sm:$0x1]  ;;  %v4927_v37 = vrot.slane %v3853_v23, 9  ;;  %5040 = vmatmul.mubr.msk.bf16.gmra.mrb[12].mxu0 %vm4174_vm10, %v4145_v48  ;;  %1026 = vst [vmem:[#allocation2 + $0xbc] sm:$0x1] %v1025_v2 }
 0x16d   : > { %v4848_v41 = vcombine.low %v2601_v12, %v2611_v20  ;;  %v3625_v29 = vor.u32 %v3624_v53, %v3620_v50  ;;  %v3999_v38 = vrot.slane %v3854_v59, 5  ;;  %v4880_v25 = vcombine.low %v2963_v52, %v2966_v14  ;;  %v3311_v55 = vld [vmem:[#allocation2 + $0xb4] sm:$0xf]  ;;  %2044 = vst.msk [vmem:[#allocation3 + $0x48] sm:$0xff] %vm2034_vm4, %v2005_v46  ;;  %v3312_v61 = vld [vmem:[#allocation2 + $0xb8] sm:$0xf]  ;;  %v3046_v28 = vpop.permute.xlu0 %3045 }
 0x16e   : > { %v3630_v24 = vrot.slane %v3628_v6, 5  ;;  %v3616_v30 = vrot.slane %v3615_v43, 4  ;;  %v1567_v60 = vshrl.u32 %v6493_v44, 16  ;;  %v4002_v32 = vrot.slane %v3855_v26, 5  ;;  %2765 = vst.msk [vmem:[#allocation3 + $0x40] sm:$0xff] %vm7062_vm9, %v2725_v51  ;;  %v5133_v0 = vld [vmem:[#allocation2 + $0xa8] sm:$0xff]  }
 0x16f   : > { %2734 = vrot.lane.b32.xlu1 %v4848_v41, %s5156_s9  ;;  %v3626_v49 = vrot.slane %v3625_v29, 4  ;;  %v4000_v31 = vsel %vm5232_vm8, %v4927_v37, %v3999_v38  ;;  %v3633_v40 = vshrl.u32 %v3311_v55, 16  ;;  %v3636_v56 = vshll.u32 %v3311_v55, 16  ;;  %v1222_v11 = vld [vmem:[#allocation2 + $0xac] sm:$0xf]  ;;  %v5122_v57 = vld [vmem:[#allocation2 + $0xb4] sm:$0xff]   ;;  %v2182_v10 = vpop.permute.xlu1 %2181 }
 0x170   : > { %v3621_v39 = vsel %vm5290_vm12, %v3616_v30, %v3620_v50  ;;  %v3642_v16 = vshll.u32 %v3312_v61, 16  ;;  %v3646_v27 = vshrl.u32 %v3312_v61, 16  ;;  %v4001_v15 = vrot.slane %v3999_v38, 4  ;;  %v1223_v62 = vld [vmem:[#allocation2 + $0xb0] sm:$0x1]  ;;  %3086 = vst.msk [vmem:[#allocation3 + $0x40] sm:$0xff] %vm7063_vm15, %v3046_v28 }
 0x171   : > { %v3631_v19 = vsel %vm5290_vm12, %v3626_v49, %v3630_v24  ;;  %v1569_v42 = vrot.slane %v1567_v60, 4  ;;  %v3635_v5 = vrot.slane %v3633_v40, 4  ;;  %v3638_v17 = vrot.slane %v3636_v56, 5  ;;  %v3856_v3 = vld [vmem:[#allocation2 + $0xb4] sm:$0xe]  ;;  %2221 = vst.msk [vmem:[#allocation3 + $0x48] sm:$0xff] %vm2211_vm5, %v2182_v10 }
 0x172   : > { %v4911_v45 = vcombine.low %v3621_v39, %v3631_v19  ;;  %v3644_v35 = vrot.slane %v3642_v16, 5  ;;  %v3648_v18 = vrot.slane %v3646_v27, 4  ;;  %v4003_v54 = vsel %vm5232_vm8, %v4001_v15, %v4002_v32  ;;  %v3857_v52 = vld [vmem:[#allocation2 + $0xb8] sm:$0xf]  ;;  %v1224_v63 = vld [vmem:[#allocation2 + $0xb4] sm:$0xf] }
 0x173   : > { %3055 = vrot.lane.b32.xlu1 %v4880_v25, %s5154_s7  ;;  %v1570_v36 = vshll.u32 %v6493_v44, 16  ;;  %v1576_v7 = vshll.u32 %v1222_v11, 16  ;;  %vm7065_vm6 = vcmask 31744   ;;  %v5134_v4 = vld [vmem:[#allocation2 + $0xb4] sm:$0xff]   ;;  %v3313_v47 = vld [vmem:[#allocation2 + $0xbc] sm:$0x1]  ;;  %v3639_v23 = vor.u32 %v3638_v17, %v3635_v5  ;;  %v3224_v24 = vpop.permute.xlu0 %3223 }
 0x174   : > { %1177 = vst.msk [vmem:[#allocation3 + $0x70] sm:$0xff] %vm7065_vm6, %v5133_v0  ;;  %3776 = vrot.lane.b32.xlu0 %v4911_v45, %s5157_s10  ;;  %v4943_v34 = vcombine.low %v4000_v31, %v4003_v54  ;;  %v1580_v12 = vshrl.u32 %v1222_v11, 16  ;;  %v1586_v14 = vshll.u32 %v1223_v62, 16  ;;  %v3649_v59 = vor.u32 %v3648_v18, %v3644_v35  ;;  %v3858_v6 = vld [vmem:[#allocation2 + $0xbc] sm:$0x1]  ;;  %vm7066_vm9 = vmmov %vm7065_vm6 }
 0x175   : > { %v3652_v20 = vshll.u32 %v3313_v47, 16  ;;  %v1572_v50 = vrot.slane %v1570_v36, 5  ;;  %v1578_v53 = vrot.slane %v1576_v7, 5  ;;  %1178 = vst.msk [vmem:[#allocation3 + $0x78] sm:$0xff] %vm7066_vm9, %v5134_v4  ;;  %v3640_v44 = vrot.slane %v3639_v23, 4 }
 0x176   : > { %v1582_v48 = vrot.slane %v1580_v12, 4  ;;  %v1588_v41 = vrot.slane %v1586_v14, 5  ;;  %v4928_v43 = vrot.slane %v3856_v3, 9  ;;  %v3650_v2 = vrot.slane %v3649_v59, 4  ;;  %v1225_v30 = vld [vmem:[#allocation2 + $0xb8] sm:$0xf] }
 0x177   : > { %3233 = vrot.lane.b32.xlu1 %v5122_v57, %s5153_s6  ;;  %v3654_v26 = vrot.slane %v3652_v20, 5  ;;  %v1573_v37 = vor.u32 %v1572_v50, %v1569_v42  ;;  %v4006_v29 = vrot.slane %v3857_v52, 5  ;;  %v3645_v38 = vsel %vm5290_vm12, %v3640_v44, %v3644_v35  ;;  %v1226_v55 = vld [vmem:[#allocation2 + $0xbc] sm:$0x1]  ;;  %v1769_v51 = vld [vmem:[#allocation2 + $0xa8] sm:$0xe] }
 0x178   : > { %4097 = vrot.lane.b32.xlu0 %v4943_v34, %s5155_s8  ;;  %v1583_v46 = vor.u32 %v1582_v48, %v1578_v53  ;;  %v4009_v25 = vrot.slane %v3858_v6, 5  ;;  %v1591_v60 = vshrl.u32 %v1224_v63, 16  ;;  %vm7067_vm15 = vcmask 228544   ;;  %v1770_v39 = vld [vmem:[#allocation2 + $0xac] sm:$0xf] }
 0x179   : > { %3264 = vst.msk [vmem:[#allocation3 + $0x40] sm:$0xff] %vm7067_vm15, %v3224_v24  ;;  %v3655_v49 = vsel %vm5290_vm12, %v3650_v2, %v3654_v26  ;;  %v1574_v61 = vrot.slane %v1573_v37, 4  ;;  %v4007_v31 = vsel %vm5232_vm8, %v4928_v43, %v4006_v29  ;;  %v4008_v32 = vrot.slane %v4006_v29, 4  ;;  %v1771_v42 = vld [vmem:[#allocation2 + $0xb0] sm:$0x1]  ;;  %vm7072_vm7 = vmmov %vm7067_vm15 }
 0x17a   : > { %v4912_v40 = vcombine.low %v3645_v38, %v3655_v49  ;;  %v1584_v56 = vrot.slane %v1583_v46, 4  ;;  %v1593_v16 = vrot.slane %v1591_v60, 4  ;;  %v1594_v11 = vshll.u32 %v1224_v63, 16  ;;  %v1772_v0 = vld [vmem:[#allocation2 + $0xb4] sm:$0xe] }
 0x17b   : > { %v1579_v19 = vsel %vm5290_vm12, %v1574_v61, %v1578_v53  ;;  %v4010_v27 = vsel %vm5232_vm8, %v4008_v32, %v4009_v25  ;;  %v1600_v15 = vshll.u32 %v1225_v30, 16  ;;  %v1604_v62 = vshrl.u32 %v1225_v30, 16  ;;  %v1773_v35 = vld [vmem:[#allocation2 + $0xb8] sm:$0xf]  ;;  %v1774_v3 = vld [vmem:[#allocation2 + $0xbc] sm:$0x1] }
 0x17c   : > { %3778 = vrot.lane.b32.xlu1 %v4912_v40, %s5157_s10  ;;  %v1589_v57 = vsel %vm5290_vm12, %v1584_v56, %v1588_v41  ;;  %v4944_v45 = vcombine.low %v4007_v31, %v4010_v27  ;;  %v1596_v5 = vrot.slane %v1594_v11, 5  ;;  %v1610_v17 = vshll.u32 %v1226_v55, 16  ;;  %v2270_v53 = vld [vmem:[#allocation2 + $0xb4] sm:$0xf]  ;;  %v2271_v6 = vld [vmem:[#allocation2 + $0xb8] sm:$0xf] }
 0x17d   : > { %v4785_v28 = vcombine.low %v1579_v19, %v1589_v57  ;;  %v1602_v18 = vrot.slane %v1600_v15, 5  ;;  %v1606_v54 = vrot.slane %v1604_v62, 4  ;;  %v4801_v36 = vrot.slane %v1769_v51, 9  ;;  %v2727_v23 = vpop.permute.xlu1 %2726  ;;  %v1027_v2 = vld [vmem:[#allocation2 + $0xc0] sm:$0xf]  ;;  %v5123_v51 = vld [vmem:[#allocation2 + $0xb4] sm:$0xff]  }
 0x17e   : > { %4099 = vrot.lane.b32.xlu0 %v4944_v45, %s5155_s8  ;;  %v1597_v7 = vor.u32 %v1596_v5, %v1593_v16  ;;  %v1612_v52 = vrot.slane %v1610_v17, 5  ;;  %v1926_v4 = vrot.slane %v1770_v39, 5  ;;  %v1929_v47 = vrot.slane %v1771_v42, 5  ;;  %v2272_v55 = vld [vmem:[#allocation2 + $0xbc] sm:$0x1] }
 0x17f   : > { %v1607_v34 = vor.u32 %v1606_v54, %v1602_v18  ;;  %v4802_v12 = vrot.slane %v1772_v0, 9  ;;  %v1933_v14 = vrot.slane %v1773_v35, 5  ;;  %v1936_v63 = vrot.slane %v1774_v3, 5  ;;  %v2815_v31 = vld [vmem:[#allocation2 + $0xb4] sm:$0xe] }
 0x180   : > { %vm7068_vm6 = vcmask 162944   ;;  %1690 = vrot.lane.b32.xlu1 %v4785_v28, %s5151_s29  ;;  %v1598_v10 = vrot.slane %v1597_v7, 4  ;;  %v1927_v59 = vsel %vm5232_vm8, %v4801_v36, %v1926_v4  ;;  %v1928_v20 = vrot.slane %v1926_v4, 4  ;;  %v2816_v16 = vld [vmem:[#allocation2 + $0xb8] sm:$0xf] }
 0x181   : > { %2766 = vst.msk [vmem:[#allocation3 + $0x48] sm:$0xff] %vm7068_vm6, %v2727_v23  ;;  %v855_v50 = vshrl.u32 %v6503_v22, 16  ;;  %v1608_v44 = vrot.slane %v1607_v34, 4  ;;  %v1934_v48 = vsel %vm5232_vm8, %v4802_v12, %v1933_v14  ;;  %v1935_v41 = vrot.slane %v1933_v14, 4  ;;  %v3048_v38 = vpop.permute.xlu1 %3047  ;;  %v1031_v15 = vld [vmem:[#allocation2 + $0xc8] sm:$0x1] }
 0x182   : > { %v858_v43 = vshll.u32 %v6503_v22, 16  ;;  %v1603_v26 = vsel %vm5290_vm12, %v1598_v10, %v1602_v18  ;;  %v1930_v37 = vsel %vm5232_vm8, %v1928_v20, %v1929_v47  ;;  %v863_v24 = vshrl.u32 %v6511_v58, 16  ;;  %v458_v62 = vld [vmem:[#allocation2 + $0xcc] sm:$0x1]  ;;  %v2817_v17 = vld [vmem:[#allocation2 + $0xbc] sm:$0x1] }
 0x183   : > { %v857_v29 = vrot.slane %v855_v50, 7  ;;  %v1613_v46 = vsel %vm5290_vm12, %v1608_v44, %v1612_v52  ;;  %v4817_v25 = vcombine.low %v1927_v59, %v1930_v37  ;;  %v1937_v30 = vsel %vm5232_vm8, %v1935_v41, %v1936_v63  ;;  %v3318_v47 = vld [vmem:[#allocation2 + $0xd0] sm:$0xf] }
 0x184   : > { %v866_v22 = vshll.u32 %v6511_v58, 16  ;;  %vm7069_vm9 = vcmask 195744   ;;  %v4786_v60 = vcombine.low %v1603_v26, %v1613_v46  ;;  %v865_v32 = vrot.slane %v863_v24, 7 }
 0x185   : > { %3087 = vst.msk [vmem:[#allocation3 + $0x48] sm:$0xff] %vm7069_vm9, %v3048_v38  ;;  %v860_v49 = vor.u32 %v858_v43, %v857_v29  ;;  %v861_v61 = vrot.slane %v857_v29, 4  ;;  %2014 = vrot.lane.b32.xlu0 %v4817_v25, %s5150_s28  ;;  %v2613_v39 = vshrl.u32 %v2270_v53, 16  ;;  %v2616_v40 = vshll.u32 %v2270_v53, 16  ;;  %v3226_v42 = vpop.permute.xlu1 %3225 }
 0x186   : > { %v2622_v56 = vshll.u32 %v2271_v6, 16  ;;  %1692 = vrot.lane.b32.xlu1 %v4786_v60, %s5151_s29  ;;  %v4818_v11 = vcombine.low %v1934_v48, %v1937_v30  ;;  %v2626_v19 = vshrl.u32 %v2271_v6, 16  ;;  %v2632_v27 = vshll.u32 %v2272_v55, 16  ;;  %3265 = vst.msk [vmem:[#allocation3 + $0x48] sm:$0xff] %vm7067_vm15, %v3226_v42  ;;  %v3769_v35 = vpop.permute.xlu0 %3768  ;;  %s6666_s29 = scalar_lea.vmem %s7032_s4, %s4968_s20  ;;  %s4720_s20 = sshll.u32 %s7180_s19, 1 }
 0x187   : > { %v1028_v58 = vsel %vm5298_vm13, %v860_v49, %v1027_v2  ;;  %v868_v0 = vor.u32 %v866_v22, %v865_v32  ;;  %v870_v57 = vrot.slane %v865_v32, 4  ;;  %v2615_v45 = vrot.slane %v2613_v39, 4  ;;  %3809 = vst.msk [vmem:[#allocation3 + $0x40] sm:$0xff] %vm3800_vm11, %v3769_v35 }
 0x188   : > { %1029 = vst [vmem:[#allocation2 + $0xc0] sm:$0xf] %v1028_v58  ;;  %v2618_v5 = vrot.slane %v2616_v40, 5  ;;  %v2624_v3 = vrot.slane %v2622_v56, 5  ;;  %v2628_v28 = vrot.slane %v2626_v19, 4  ;;  %v4865_v18 = vrot.slane %v2815_v31, 9 }
 0x189   : > { %v2969_v54 = vrot.slane %v2816_v16, 5  ;;  %2191 = vrot.lane.b32.xlu0 %v5123_v51, %s5152_s30  ;;  %v869_v36 = vsel %vm5308_vm14, %v861_v61, %v868_v0  ;;  %v2634_v52 = vrot.slane %v2632_v27, 5  ;;  %v1032_v4 = vsel %vm5204_vm3, %v870_v57, %v1031_v15 }
 0x18a   : > { %v2619_v7 = vor.u32 %v2618_v5, %v2615_v45  ;;  %2016 = vrot.lane.b32.xlu1 %v4818_v11, %s5150_s28  ;;  %1030 = vst.msk [vmem:[#allocation2 + $0xc4] sm:$0xf] %vm395_vm0, %v869_v36  ;;  %v2629_v23 = vor.u32 %v2628_v28, %v2624_v3  ;;  %1033 = vst [vmem:[#allocation2 + $0xc8] sm:$0x1] %v1032_v4  ;;  %v2972_v12 = vrot.slane %v2817_v17, 5  ;;  %v459_v14 = vsel %vm5204_vm3, 0, %v458_v62  ;;  %v4090_v10 = vpop.permute.xlu0 %4089 }
 0x18b   : > { %v2971_v34 = vrot.slane %v2969_v54, 4  ;;  %460 = vst [vmem:[#allocation2 + $0xcc] sm:$0x1] %v459_v14  ;;  %v3690_v20 = vshll.u32 %v3318_v47, 16  ;;  %v3694_v50 = vshrl.u32 %v3318_v47, 16  ;;  %4130 = vst.msk [vmem:[#allocation3 + $0x40] sm:$0xff] %vm4121_vm1, %v4090_v10  ;;  %v2970_v44 = vsel %vm5232_vm8, %v4865_v18, %v2969_v54 }
 0x18c   : > { %v2620_v63 = vrot.slane %v2619_v7, 4  ;;  %v2630_v59 = vrot.slane %v2629_v23, 4  ;;  %vm7070_vm0 = vmmov %vm7068_vm6  ;;  %vm7079_vm15 = vcmask 31744  }
 0x18d   : > { %v2973_v9 = vsel %vm5232_vm8, %v2971_v34, %v2972_v12  ;;  %v6589_v37 = vrot.slane %v3690_v20, 5  ;;  %v6591_v29 = vrot.slane %v3694_v50, 4  ;;  %vm7071_vm3 = vmmov %vm7069_vm9 }
 0x18e   : > { %v2625_v53 = vsel %vm5290_vm12, %v2620_v63, %v2624_v3  ;;  %v2635_v6 = vsel %vm5290_vm12, %v2630_v59, %v2634_v52  ;;  %v4092_v26 = vpop.permute.xlu0 %4091  ;;  %v3771_v24 = vpop.permute.xlu1 %3770  ;;  %v4881_v30 = vcombine.low %v2970_v44, %v2973_v9  ;;  %v3319_v63 = vld [vmem:[#allocation2 + $0xd4] sm:$0x1]  ;;  %vm7074_vm13 = vmmov %vm7071_vm3 }
 0x18f   : > { %v2273_v1 = vld [vmem:[#allocation2 + $0xc0] sm:$0xf]  ;;  %v4849_v48 = vcombine.low %v2625_v53, %v2635_v6  ;;  %3810 = vst.msk [vmem:[#allocation3 + $0x48] sm:$0xff] %vm3800_vm11, %v3771_v24  ;;  %v3697_v33 = vor.u32 %v6591_v29, %v6589_v37  ;;  %v3700_v24 = vshll.u32 %v3319_v63, 16  ;;  %vm7076_vm14 = vmmov %vm7070_vm0 }
 0x190   : > { %v2637_v41 = vshrl.u32 %v2273_v1, 16  ;;  %v2640_v43 = vshll.u32 %v2273_v1, 16  ;;  %v2818_v2 = vld [vmem:[#allocation2 + $0xc0] sm:$0xe]  ;;  %4131 = vst.msk [vmem:[#allocation3 + $0x48] sm:$0xff] %vm4121_vm1, %v4092_v26  ;;  %vm7077_vm6 = vmmov %vm7071_vm3 }
 0x191   : > { %v5124_v38 = vld [vmem:[#allocation2 + $0xc0] sm:$0xff]   ;;  %2736 = vrot.lane.b32.xlu0 %v4849_v48, %s5156_s9  ;;  %v2275_v22 = vld [vmem:[#allocation2 + $0xc8] sm:$0x1]  ;;  %v4866_v49 = vrot.slane %v2818_v2, 9  ;;  %v3863_v2 = vld [vmem:[#allocation2 + $0xd0] sm:$0xf] }
 0x192   : > { %v2274_v46 = vld [vmem:[#allocation2 + $0xc4] sm:$0xf]  ;;  %v2639_v25 = vrot.slane %v2637_v41, 4  ;;  %v2642_v55 = vrot.slane %v2640_v43, 5  ;;  %v3314_v61 = vld [vmem:[#allocation2 + $0xc0] sm:$0xf]  ;;  %2193 = vrot.lane.b32.xlu1 %v5124_v38, %s5152_s30  ;;  %v1683_v19 = vpop.permute.xlu1 %1682  ;;  %vm7078_vm9 = vmmov %vm7072_vm7 }
 0x193   : > { %v2646_v60 = vshll.u32 %v2274_v46, 16  ;;  %v2650_v51 = vshrl.u32 %v2274_v46, 16  ;;  %v2656_v31 = vshll.u32 %v2275_v22, 16  ;;  %v2819_v32 = vld [vmem:[#allocation2 + $0xc4] sm:$0xf]  ;;  %v4146_v27 = vld [vmem:[#allocation3 + $0x40] sm:$0xff] }
 0x194   : > { %v2820_v39 = vld [vmem:[#allocation2 + $0xc8] sm:$0x1]  ;;  %v5127_v40 = vld [vmem:[#allocation2 + $0xc0] sm:$0xff]   ;;  %v2643_v56 = vor.u32 %v2642_v55, %v2639_v25  ;;  %v2976_v58 = vrot.slane %v2819_v32, 5  ;;  %1721 = vst.msk [vmem:[#allocation3 + $0x50] sm:$0xff] %vm1710_vm2, %v1683_v19  ;;  %5043 = vmatprep.mubr.msk.bf16.mxu1 %vm4174_vm10, %v4146_v27  ;;  %v3657_v3 = vshrl.u32 %v3314_v61, 16 }
 0x195   : > { %v2648_v16 = vrot.slane %v2646_v60, 5  ;;  %v2652_v11 = vrot.slane %v2650_v51, 4  ;;  %v2658_v15 = vrot.slane %v2656_v31, 5  ;;  %3057 = vrot.lane.b32.xlu0 %v4881_v30, %s5154_s7  ;;  %v2979_v62 = vrot.slane %v2820_v39, 5  ;;  %v3315_v42 = vld [vmem:[#allocation2 + $0xc4] sm:$0xf]  ;;  %v2007_v35 = vpop.permute.xlu0 %2006 }
 0x196   : > { %v2644_v0 = vrot.slane %v2643_v56, 4  ;;  %v2977_v45 = vsel %vm5232_vm8, %v4866_v49, %v2976_v58  ;;  %v2978_v5 = vrot.slane %v2976_v58, 4  ;;  %v3316_v17 = vld [vmem:[#allocation2 + $0xc8] sm:$0x1]  ;;  %v3660_v28 = vshll.u32 %v3314_v61, 16  ;;  %2045 = vst.msk [vmem:[#allocation3 + $0x50] sm:$0xff] %vm2034_vm4, %v2007_v35  ;;  %v1685_v23 = vpop.permute.xlu1 %1684 }
 0x197   : > { %v2653_v57 = vor.u32 %v2652_v11, %v2648_v16  ;;  %v3666_v18 = vshll.u32 %v3315_v42, 16  ;;  %v3670_v54 = vshrl.u32 %v3315_v42, 16  ;;  %v3317_v21 = vld [vmem:[#allocation2 + $0xcc] sm:$0xf]  ;;  %v3676_v4 = vshll.u32 %v3316_v17, 16  ;;  %1722 = vst.msk [vmem:[#allocation3 + $0x58] sm:$0xff] %vm1710_vm2, %v1685_v23 }
 0x198   : > { %v2649_v36 = vsel %vm5290_vm12, %v2644_v0, %v2648_v16  ;;  %v2980_v52 = vsel %vm5232_vm8, %v2978_v5, %v2979_v62  ;;  %v3859_v47 = vld [vmem:[#allocation2 + $0xc0] sm:$0xe]  ;;  %v3659_v34 = vrot.slane %v3657_v3, 4  ;;  %v3662_v12 = vrot.slane %v3660_v28, 5  ;;  %v3860_v6 = vld [vmem:[#allocation2 + $0xc4] sm:$0xf] }
 0x199   : > { %v2654_v7 = vrot.slane %v2653_v57, 4  ;;  %3235 = vrot.lane.b32.xlu0 %v5127_v40, %s5153_s6  ;;  %v3668_v14 = vrot.slane %v3666_v18, 5  ;;  %v4147_v10 = vld [vmem:[#allocation3 + $0x48] sm:$0xff]  ;;  %v4882_v20 = vcombine.low %v2977_v45, %v2980_v52  ;;  %v3672_v50 = vrot.slane %v3670_v54, 4  ;;  %v3861_v1 = vld [vmem:[#allocation2 + $0xc8] sm:$0x1]  ;;  %v2184_v44 = vpop.permute.xlu0 %2183 }
 0x19a   : > { %v3681_v53 = vshrl.u32 %v3317_v21, 16  ;;  %5044 = vmatmul.mubr.msk.bf16.vlgmr.msra.gmra.mrb[0].mxu1 %vm4174_vm10, %v4147_v10  ;;  %v3663_v48 = vor.u32 %v3662_v12, %v3659_v34  ;;  %v3678_v41 = vrot.slane %v3676_v4, 5  ;;  %v3684_v43 = vshll.u32 %v3317_v21, 16  ;;  %2222 = vst.msk [vmem:[#allocation3 + $0x50] sm:$0xff] %vm2211_vm5, %v2184_v44  ;;  %v2009_v46 = vpop.permute.xlu1 %2008  ;;  %v3862_v40 = vld [vmem:[#allocation2 + $0xcc] sm:$0xe] }
 0x19b   : > { %v2659_v59 = vsel %vm5290_vm12, %v2654_v7, %v2658_v15  ;;  %v3673_v26 = vor.u32 %v3672_v50, %v3668_v14  ;;  %v4929_v38 = vrot.slane %v3859_v47, 9  ;;  %v4013_v22 = vrot.slane %v3860_v6, 5  ;;  %2046 = vst.msk [vmem:[#allocation3 + $0x58] sm:$0xff] %vm2034_vm4, %v2009_v46  ;;  %v3864_v56 = vld [vmem:[#allocation2 + $0xd4] sm:$0x1]  ;;  %v5128_v58 = vld [vmem:[#allocation2 + $0xcc] sm:$0xff]  }
 0x19c   : > { %v4850_v9 = vcombine.low %v2649_v36, %v2659_v59  ;;  %v3683_v29 = vrot.slane %v3681_v53, 4  ;;  %v3664_v25 = vrot.slane %v3663_v48, 4  ;;  %v3686_v30 = vrot.slane %v3684_v43, 5 }
 0x19d   : > { %v4016_v55 = vrot.slane %v3861_v1, 5  ;;  %v3674_v60 = vrot.slane %v3673_v26, 4  ;;  %v3698_v51 = vrot.slane %v3697_v33, 4  ;;  %v3702_v49 = vrot.slane %v3700_v24, 5 }
 0x19e   : > { %2738 = vrot.lane.b32.xlu1 %v4850_v9, %s5156_s9  ;;  %v4020_v61 = vrot.slane %v3863_v2, 5  ;;  %v3669_v31 = vsel %vm5290_vm12, %v3664_v25, %v3668_v14  ;;  %v3687_v32 = vor.u32 %v3686_v30, %v3683_v29  ;;  %v4015_v39 = vrot.slane %v4013_v22, 4 }
 0x19f   : > { %v3679_v16 = vsel %vm5290_vm12, %v3674_v60, %v3678_v41  ;;  %v4014_v11 = vsel %vm5232_vm8, %v4929_v38, %v4013_v22  ;;  %v3703_v62 = vsel %vm5290_vm12, %v3698_v51, %v3702_v49  ;;  %v4930_v42 = vrot.slane %v3862_v40, 9 }
 0x1a0   : > { %v4913_v19 = vcombine.low %v3669_v31, %v3679_v16  ;;  %v3688_v27 = vrot.slane %v3687_v32, 4  ;;  %v4017_v15 = vsel %vm5232_vm8, %v4015_v39, %v4016_v55  ;;  %v4022_v0 = vrot.slane %v4020_v61, 4 }
 0x1a1   : > { %v4023_v57 = vrot.slane %v3864_v56, 5  ;;  %v2729_v45 = vpop.permute.xlu0 %2728  ;;  %v4945_v17 = vcombine.low %v4014_v11, %v4017_v15  ;;  %v4021_v28 = vsel %vm5232_vm8, %v4930_v42, %v4020_v61 }
 0x1a2   : > { %3059 = vrot.lane.b32.xlu1 %v4882_v20, %s5154_s7  ;;  %3780 = vrot.lane.b32.xlu0 %v4913_v19, %s5157_s10  ;;  %v3693_v5 = vsel %vm5290_vm12, %v3688_v27, %v6589_v37  ;;  %2767 = vst.msk [vmem:[#allocation3 + $0x50] sm:$0xff] %vm7070_vm0, %v2729_v45  ;;  %v2186_v35 = vpop.permute.xlu1 %2185  ;;  %vm7073_vm12 = vmmov %vm7070_vm0  ;;  %s6904_s7 = scalar_lea.vmem %s7033_s5, %s4720_s20 }
 0x1a3   : > { %v4914_v3 = vcombine.low %v3693_v5, %v3703_v62  ;;  %2223 = vst.msk [vmem:[#allocation3 + $0x58] sm:$0xff] %vm2211_vm5, %v2186_v35  ;;  %v4024_v18 = vsel %vm5232_vm8, %v4022_v0, %v4023_v57  ;;  %vm7075_vm8 = vmmov %vm7072_vm7 }
 0x1a4   : > { %v4946_v8 = vcombine.low %v4021_v28, %v4024_v18  ;;  %vm7080_vm0 = vmmov %vm7079_vm15 }
 0x1a5   : > { %v3050_v54 = vpop.permute.xlu0 %3049 }
 0x1a6   : > { %3237 = vrot.lane.b32.xlu1 %v5128_v58, %s5153_s6  ;;  %4101 = vrot.lane.b32.xlu0 %v4945_v17, %s5155_s8  ;;  %3088 = vst.msk [vmem:[#allocation3 + $0x50] sm:$0xff] %vm7071_vm3, %v3050_v54  ;;  %vm7081_vm3 = vmmov %vm7080_vm0 }
 0x1a9   : > { %v3228_v37 = vpop.permute.xlu0 %3227 }
 0x1aa   : > { %3782 = vrot.lane.b32.xlu1 %v4914_v3, %s5157_s10  ;;  %3266 = vst.msk [vmem:[#allocation3 + $0x50] sm:$0xff] %vm7072_vm7, %v3228_v37  ;;  %vm7082_vm7 = vmmov %vm7080_vm0 }
 0x1ae   : > { %4103 = vrot.lane.b32.xlu1 %v4946_v8, %s5155_s8  ;;  %v2731_v21 = vpop.permute.xlu1 %2730 }
 0x1af   : > { %2768 = vst.msk [vmem:[#allocation3 + $0x58] sm:$0xff] %vm7073_vm12, %v2731_v21  ;;  %vm7083_vm12 = vmmov %vm7080_vm0 }
 0x1b2   : > { %v3052_v36 = vpop.permute.xlu1 %3051 }
 0x1b3   : > { %3089 = vst.msk [vmem:[#allocation3 + $0x58] sm:$0xff] %vm7074_vm13, %v3052_v36  ;;  %vm7084_vm13 = vmmov %vm7080_vm0 }
 0x1b5   : > { %v3773_v7 = vpop.permute.xlu0 %3772 }
 0x1b6   : > { %v3230_v13 = vpop.permute.xlu1 %3229  ;;  %3811 = vst.msk [vmem:[#allocation3 + $0x50] sm:$0xff] %vm3800_vm11, %v3773_v7 }
 0x1b7   : > { %3267 = vst.msk [vmem:[#allocation3 + $0x58] sm:$0xff] %vm7075_vm8, %v3230_v13  ;;  %vm7085_vm8 = vmmov %vm7076_vm14 }
 0x1b9   : > { %v4094_v52 = vpop.permute.xlu0 %4093 }
 0x1ba   : > { %4132 = vst.msk [vmem:[#allocation3 + $0x50] sm:$0xff] %vm4121_vm1, %v4094_v52 }
 0x1bf   : > { %v4096_v4 = vpop.permute.xlu0 %4095 }
 0x1c0   : > { %v3775_v47 = vpop.permute.xlu1 %3774 }
 0x1c1   : > { %3812 = vst.msk [vmem:[#allocation3 + $0x58] sm:$0xff] %vm3800_vm11, %v3775_v47  ;;  %v4148_v23 = vld [vmem:[#allocation3 + $0x50] sm:$0xff] }
 0x1c2   : > { %4133 = vst.msk [vmem:[#allocation3 + $0x58] sm:$0xff] %vm4121_vm1, %v4096_v4  ;;  %5047 = vmatprep.mubr.msk.bf16.mxu1 %vm4174_vm10, %v4148_v23 }
 0x1c4   : > { %v1687_v34 = vpop.permute.xlu1 %1686 }
 0x1c5   : > { %1723 = vst.msk [vmem:[#allocation3 + $0x60] sm:$0xff] %vm1710_vm2, %v1687_v34 }
 0x1c6   : > { %v2011_v12 = vpop.permute.xlu0 %2010 }
 0x1c7   : > { %2047 = vst.msk [vmem:[#allocation3 + $0x60] sm:$0xff] %vm2034_vm4, %v2011_v12 }
 0x1c8   : > { %v1689_v14 = vpop.permute.xlu1 %1688 }
 0x1c9   : > { %1724 = vst.msk [vmem:[#allocation3 + $0x68] sm:$0xff] %vm1710_vm2, %v1689_v14  ;;  %v4149_v63 = vld [vmem:[#allocation3 + $0x58] sm:$0xff] }
 0x1ca   : > { %v2188_v33 = vpop.permute.xlu0 %2187  ;;  %5048 = vmatmul.mubr.msk.bf16.gmra.mrb[4].mxu1 %vm4174_vm10, %v4149_v63 }
 0x1cb   : > { %2224 = vst.msk [vmem:[#allocation3 + $0x60] sm:$0xff] %vm2211_vm5, %v2188_v33 }
 0x1cc   : > { %v2013_v10 = vpop.permute.xlu1 %2012 }
 0x1cd   : > { %2048 = vst.msk [vmem:[#allocation3 + $0x68] sm:$0xff] %vm2034_vm4, %v2013_v10 }
 0x1d3   : > { %v2733_v59 = vpop.permute.xlu0 %2732 }
 0x1d4   : > { %2769 = vst.msk [vmem:[#allocation3 + $0x60] sm:$0xff] %vm7076_vm14, %v2733_v59  ;;  %v2190_v20 = vpop.permute.xlu1 %2189  ;;  %vm7086_vm14 = vmmov %vm7080_vm0 }
 0x1d5   : > { %2225 = vst.msk [vmem:[#allocation3 + $0x68] sm:$0xff] %vm2211_vm5, %v2190_v20 }
 0x1d7   : > { %v3054_v50 = vpop.permute.xlu0 %3053 }
 0x1d8   : > { %3090 = vst.msk [vmem:[#allocation3 + $0x60] sm:$0xff] %vm7077_vm6, %v3054_v50  ;;  %vm7087_vm6 = vmmov %vm7080_vm0 }
 0x1db   : > { %v3232_v53 = vpop.permute.xlu0 %3231  ;;  %v6669_v6 = vpop.f32.mrb[0].mxu0 }
 0x1dc   : > { %3268 = vst.msk [vmem:[#allocation3 + $0x60] sm:$0xff] %vm7078_vm9, %v3232_v53  ;;  %v6674_v1 = vpop.f32.mrb[1].mxu0  ;;  %v4423_v26 = vsel %vm7086_vm14, %v6669_v6, 0.0  ;;  %vm7088_vm9 = vcmask 195744   ;;  %vm7095_vm14 = vmmov %vm7080_vm0 }
 0x1dd   : > { %4390 = vst.msk [vmem:[%s6666_s29 + $0x10] sm:$0xff] %vm7079_vm15, %v6669_v6  ;;  %v6679_v44 = vpop.f32.mrb[2].mxu0  ;;  %v4420_v41 = vsel %vm7082_vm7, %v6674_v1, 0.0  ;;  %vm7089_vm15 = vmmov %vm7080_vm0 }
 0x1de   : > { %4388 = vst.msk [vmem:[%s6666_s29] sm:$0xff] %vm7080_vm0, %v6674_v1  ;;  %v6684_v9 = vpop.f32.mrb[3].mxu0  ;;  %v4425_v38 = vsel %vm7087_vm6, %v6679_v44, 0.0  ;;  %vm7091_vm7 = vmmov %vm7080_vm0 }
 0x1df   : > { %4391 = vst.msk [vmem:[%s6666_s29 + $0x18] sm:$0xff] %vm7081_vm3, %v6679_v44  ;;  %v4421_v43 = vsel %vm7084_vm13, %v6684_v9, 0.0  ;;  %vm7090_vm3 = vmmov %vm7080_vm0 }
 0x1e0   : > { %4389 = vst.msk [vmem:[%s6666_s29 + $0x8] sm:$0xff] %vm7083_vm12, %v6684_v9  ;;  %v4422_v2 = vadd.f32 %v4421_v43, %v4420_v41  ;;  %vm7092_vm12 = vmmov %vm7080_vm0 }
 0x1e1   : > { %v2735_v48 = vpop.permute.xlu1 %2734  ;;  %vm7093_vm13 = vmmov %vm7080_vm0 }
 0x1e2   : > { %2770 = vst.msk [vmem:[#allocation3 + $0x68] sm:$0xff] %vm7085_vm8, %v2735_v48  ;;  %v4424_v29 = vadd.f32 %v4423_v26, %v4422_v2  ;;  %vm7094_vm8 = vcmask 228544   ;;  %vm7096_vm6 = vmmov %vm7080_vm0 }
 0x1e3   : > { %v6698_v46 = vpop.f32.mrb[4].mxu0 }
 0x1e4   : > { %4394 = vst.msk [vmem:[%s6666_s29 + $0x30] sm:$0xff] %vm7089_vm15, %v6698_v46  ;;  %v6704_v25 = vpop.f32.mrb[5].mxu0  ;;  %v4426_v30 = vadd.f32 %v4425_v38, %v4424_v29  ;;  %v4431_v40 = vsel %vm7095_vm14, %v6698_v46, 0.0  ;;  %vm7099_vm15 = vmmov %vm7080_vm0 }
 0x1e5   : > { %v3056_v24 = vpop.permute.xlu1 %3055  ;;  %4392 = vst.msk [vmem:[%s6666_s29 + $0x20] sm:$0xff] %vm7080_vm0, %v6704_v25  ;;  %v4427_v55 = vsel %vm7090_vm3, %v6704_v25, 0.0  ;;  %v6711_v60 = vpop.f32.mrb[6].mxu0  ;;  %vm7102_vm3 = vmmov %vm7080_vm0 }
 0x1e6   : > { %3091 = vst.msk [vmem:[#allocation3 + $0x68] sm:$0xff] %vm7088_vm9, %v3056_v24  ;;  %v3777_v22 = vpop.permute.xlu0 %3776  ;;  %v4428_v51 = vadd.f32 %v4427_v55, %v4426_v30  ;;  %v6717_v49 = vpop.f32.mrb[7].mxu0  ;;  %v4433_v16 = vsel %vm7096_vm6, %v6711_v60, 0.0  ;;  %vm7097_vm9 = vcmask 162944  }
 0x1e7   : > { %3813 = vst.msk [vmem:[#allocation3 + $0x60] sm:$0xff] %vm3800_vm11, %v3777_v22  ;;  %v4429_v31 = vsel %vm7093_vm13, %v6717_v49, 0.0  ;;  %vm7105_vm13 = vmmov %vm7080_vm0 }
 0x1e8   : > { %4395 = vst.msk [vmem:[%s6666_s29 + $0x38] sm:$0xff] %vm7091_vm7, %v6711_v60  ;;  %v4430_v32 = vadd.f32 %v4429_v31, %v4428_v51  ;;  %vm7103_vm7 = vmmov %vm7080_vm0 }
 0x1e9   : > { %v3234_v61 = vpop.permute.xlu1 %3233  ;;  %4393 = vst.msk [vmem:[%s6666_s29 + $0x28] sm:$0xff] %vm7092_vm12, %v6717_v49  ;;  %vm7104_vm12 = vmmov %vm7094_vm8 }
 0x1ea   : > { %3269 = vst.msk [vmem:[#allocation3 + $0x68] sm:$0xff] %vm7094_vm8, %v3234_v61  ;;  %v4098_v39 = vpop.permute.xlu0 %4097  ;;  %v4432_v56 = vadd.f32 %v4431_v40, %v4430_v32  ;;  %vm7106_vm8 = vmmov %vm7080_vm0 }
 0x1eb   : > { %4134 = vst.msk [vmem:[#allocation3 + $0x60] sm:$0xff] %vm4121_vm1, %v4098_v39  ;;  %vm7107_vm14 = vmmov %vm7097_vm9 }
 0x1ec   : > { %v4434_v11 = vadd.f32 %v4433_v16, %v4432_v56 }
 0x1ee   : > { %v3779_v58 = vpop.permute.xlu1 %3778 }
 0x1ef   : > { %3814 = vst.msk [vmem:[#allocation3 + $0x68] sm:$0xff] %vm3800_vm11, %v3779_v58 }
 0x1f0   : > { %v4100_v19 = vpop.permute.xlu0 %4099 }
 0x1f1   : > { %4135 = vst.msk [vmem:[#allocation3 + $0x68] sm:$0xff] %vm4121_vm1, %v4100_v19 }
 0x1f2   : > { %v1691_v27 = vpop.permute.xlu1 %1690  ;;  %v4150_v15 = vld [vmem:[#allocation3 + $0x60] sm:$0xff] }
 0x1f3   : > { %1725 = vst.msk [vmem:[#allocation3 + $0x70] sm:$0xff] %vm1710_vm2, %v1691_v27  ;;  %5051 = vmatprep.mubr.msk.bf16.mxu1 %vm4174_vm10, %v4150_v15 }
 0x1f7   : > { %v2015_v62 = vpop.permute.xlu0 %2014 }
 0x1f8   : > { %v1693_v42 = vpop.permute.xlu1 %1692  ;;  %2049 = vst.msk [vmem:[#allocation3 + $0x70] sm:$0xff] %vm2034_vm4, %v2015_v62  ;;  %v4151_v0 = vld [vmem:[#allocation3 + $0x68] sm:$0xff] }
 0x1f9   : > { %1726 = vst.msk [vmem:[#allocation3 + $0x78] sm:$0xff] %vm1710_vm2, %v1693_v42  ;;  %5052 = vmatmul.mubr.msk.bf16.gmra.mrb[8].mxu1 %vm4174_vm10, %v4151_v0  ;;  %vm7098_vm2 = vcmask 195744  }
 0x1fa   : > { %vm7108_vm6 = vmmov %vm7098_vm2 }
 0x1fb   : > { %v2192_v57 = vpop.permute.xlu0 %2191 }
 0x1fc   : > { %v2017_v45 = vpop.permute.xlu1 %2016  ;;  %2226 = vst.msk [vmem:[#allocation3 + $0x70] sm:$0xff] %vm2211_vm5, %v2192_v57 }
 0x1fd   : > { %2050 = vst.msk [vmem:[#allocation3 + $0x78] sm:$0xff] %vm2034_vm4, %v2017_v45  ;;  %vm7100_vm4 = vmmov %vm7080_vm0 }
 0x203   : > { %v2737_v5 = vpop.permute.xlu0 %2736 }
 0x204   : > { %2771 = vst.msk [vmem:[#allocation3 + $0x70] sm:$0xff] %vm7097_vm9, %v2737_v5  ;;  %v2194_v17 = vpop.permute.xlu1 %2193  ;;  %vm7109_vm9 = vmmov %vm7104_vm12 }
 0x205   : > { %2227 = vst.msk [vmem:[#allocation3 + $0x78] sm:$0xff] %vm2211_vm5, %v2194_v17  ;;  %v6741_v3 = vpop.f32.mrb[8].mxu0  ;;  %vm7101_vm5 = vmmov %vm7080_vm0 }
 0x206   : > { %4398 = vst.msk [vmem:[%s6666_s29 + $0x50] sm:$0xff] %vm7099_vm15, %v6741_v3  ;;  %v6747_v28 = vpop.f32.mrb[9].mxu0  ;;  %v4439_v7 = vsel %vm7105_vm13, %v6741_v3, 0.0  ;;  %vm7112_vm15 = vmmov %vm7080_vm0 }
 0x207   : > { %v3058_v35 = vpop.permute.xlu0 %3057  ;;  %4396 = vst.msk [vmem:[%s6666_s29 + $0x40] sm:$0xff] %vm7080_vm0, %v6747_v28  ;;  %v4435_v18 = vsel %vm7100_vm4, %v6747_v28, 0.0  ;;  %v6754_v54 = vpop.f32.mrb[10].mxu0  ;;  %vm7115_vm4 = vmmov %vm7080_vm0 }
 0x208   : > { %3092 = vst.msk [vmem:[#allocation3 + $0x70] sm:$0xff] %vm7098_vm2, %v3058_v35  ;;  %v4436_v8 = vadd.f32 %v4435_v18, %v4434_v11  ;;  %v6759_v37 = vpop.f32.mrb[11].mxu0  ;;  %v4441_v47 = vsel %vm7106_vm8, %v6754_v54, 0.0  ;;  %vm7110_vm2 = vmmov %vm7080_vm0 }
 0x209   : > { %4399 = vst.msk [vmem:[%s6666_s29 + $0x58] sm:$0xff] %vm7101_vm5, %v6754_v54  ;;  %v4437_v36 = vsel %vm7103_vm7, %v6759_v37, 0.0  ;;  %vm7116_vm5 = vmmov %vm7080_vm0 }
 0x20a   : > { %4397 = vst.msk [vmem:[%s6666_s29 + $0x48] sm:$0xff] %vm7102_vm3, %v6759_v37  ;;  %v4438_v13 = vadd.f32 %v4437_v36, %v4436_v8  ;;  %vm7117_vm3 = vmmov %vm7080_vm0 }
 0x20b   : > { %v3236_v21 = vpop.permute.xlu0 %3235  ;;  %vm7118_vm7 = vmmov %vm7080_vm0 }
 0x20c   : > { %3270 = vst.msk [vmem:[#allocation3 + $0x70] sm:$0xff] %vm7104_vm12, %v3236_v21  ;;  %v4440_v52 = vadd.f32 %v4439_v7, %v4438_v13  ;;  %vm7119_vm12 = vmmov %vm7080_vm0 }
 0x20d   : > { %vm7120_vm13 = vmmov %vm7080_vm0 }
 0x20e   : > { %v4442_v23 = vadd.f32 %v4441_v47, %v4440_v52  ;;  %vm7121_vm8 = vmmov %vm7080_vm0 }
 0x210   : > { %v2739_v4 = vpop.permute.xlu1 %2738 }
 0x211   : > { %2772 = vst.msk [vmem:[#allocation3 + $0x78] sm:$0xff] %vm7107_vm14, %v2739_v4  ;;  %vm7122_vm14 = vmmov %vm7080_vm0 }
 0x214   : > { %v3060_v34 = vpop.permute.xlu1 %3059  ;;  %v3781_v12 = vpop.permute.xlu0 %3780 }
 0x215   : > { %3093 = vst.msk [vmem:[#allocation3 + $0x78] sm:$0xff] %vm7108_vm6, %v3060_v34  ;;  %vm7123_vm6 = vmmov %vm7080_vm0 }
 0x216   : > { %3815 = vst.msk [vmem:[#allocation3 + $0x70] sm:$0xff] %vm3800_vm11, %v3781_v12 }
 0x218   : > { %v3238_v14 = vpop.permute.xlu1 %3237  ;;  %v4102_v63 = vpop.permute.xlu0 %4101 }
 0x219   : > { %3271 = vst.msk [vmem:[#allocation3 + $0x78] sm:$0xff] %vm7109_vm9, %v3238_v14  ;;  %vm7124_vm9 = vmmov %vm7080_vm0 }
 0x21a   : > { %4136 = vst.msk [vmem:[#allocation3 + $0x70] sm:$0xff] %vm4121_vm1, %v4102_v63 }
 0x21c   : > { %v3783_v33 = vpop.permute.xlu1 %3782 }
 0x21d   : > { %3816 = vst.msk [vmem:[#allocation3 + $0x78] sm:$0xff] %vm3800_vm11, %v3783_v33  ;;  %vm7111_vm11 = vmmov %vm7080_vm0 }
 0x220   : > { %v4104_v10 = vpop.permute.xlu1 %4103 }
 0x221   : > { %4137 = vst.msk [vmem:[#allocation3 + $0x78] sm:$0xff] %vm4121_vm1, %v4104_v10  ;;  %v4152_v59 = vld [vmem:[#allocation3 + $0x70] sm:$0xff]  ;;  %vm7113_vm1 = vmmov %vm7080_vm0 }
 0x222   : > { %5055 = vmatprep.mubr.msk.bf16.mxu1 %vm4174_vm10, %v4152_v59 }
 0x228   : > { %v4153_v20 = vld [vmem:[#allocation3 + $0x78] sm:$0xff] }
 0x229   : > { %5056 = vmatmul.mubr.msk.bf16.gmra.mrb[12].mxu1 %vm4174_vm10, %v4153_v20  ;;  %vm7114_vm10 = vmmov %vm7080_vm0 }
 0x23f   : > { %v6780_v50 = vpop.f32.mrb[12].mxu0 }
 0x240   : > { %4402 = vst.msk [vmem:[%s6666_s29 + $0x70] sm:$0xff] %vm7110_vm2, %v6780_v50  ;;  %v6785_v53 = vpop.f32.mrb[13].mxu0  ;;  %v4447_v24 = vsel %vm7115_vm4, %v6780_v50, 0.0  ;;  %vm7125_vm2 = vmmov %vm7080_vm0 }
 0x241   : > { %4400 = vst.msk [vmem:[%s6666_s29 + $0x60] sm:$0xff] %vm7111_vm11, %v6785_v53  ;;  %v4443_v48 = vsel %vm7112_vm15, %v6785_v53, 0.0  ;;  %v6792_v41 = vpop.f32.mrb[14].mxu0  ;;  %vm7126_vm11 = vmmov %vm7080_vm0 }
 0x242   : > { %v4444_v43 = vadd.f32 %v4443_v48, %v4442_v23  ;;  %4403 = vst.msk [vmem:[%s6666_s29 + $0x78] sm:$0xff] %vm7113_vm1, %v6792_v41  ;;  %v6797_v2 = vpop.f32.mrb[15].mxu0  ;;  %v4449_v30 = vsel %vm7116_vm5, %v6792_v41, 0.0  ;;  %vm7127_vm15 = vmmov %vm7080_vm0 }
 0x243   : > { %4401 = vst.msk [vmem:[%s6666_s29 + $0x68] sm:$0xff] %vm7114_vm10, %v6797_v2  ;;  %v4445_v26 = vsel %vm7080_vm0, %v6797_v2, 0.0  ;;  %vm7128_vm1 = vmmov %vm7080_vm0 }
 0x244   : > { %v4446_v29 = vadd.f32 %v4445_v26, %v4444_v43  ;;  %vm7129_vm10 = vmmov %vm7080_vm0 }
 0x245   : > { %vm7130_vm4 = vmmov %vm7080_vm0 }
 0x246   : > { %v4448_v38 = vadd.f32 %v4447_v24, %v4446_v29  ;;  %vm7131_vm5 = vmmov %vm7080_vm0 }
 0x248   : > { %v4450_v22 = vadd.f32 %v4449_v30, %v4448_v38 }
 0x26d   : > { %v6808_v55 = vpop.f32.mrb[0].mxu1 }
 0x26e   : > { %4406 = vst.msk [vmem:[%s6666_s29 + $0x90] sm:$0xff] %vm7117_vm3, %v6808_v55  ;;  %v6813_v51 = vpop.f32.mrb[1].mxu1  ;;  %v4455_v16 = vsel %vm7123_vm6, %v6808_v55, 0.0  ;;  %vm7132_vm3 = vmmov %vm7080_vm0 }
 0x26f   : > { %4404 = vst.msk [vmem:[%s6666_s29 + $0x80] sm:$0xff] %vm7118_vm7, %v6813_v51  ;;  %v4451_v61 = vsel %vm7119_vm12, %v6813_v51, 0.0  ;;  %v6820_v31 = vpop.f32.mrb[2].mxu1  ;;  %vm7133_vm7 = vmmov %vm7080_vm0 }
 0x270   : > { %v4452_v32 = vadd.f32 %v4451_v61, %v4450_v22  ;;  %4407 = vst.msk [vmem:[%s6666_s29 + $0x98] sm:$0xff] %vm7120_vm13, %v6820_v31  ;;  %v6825_v39 = vpop.f32.mrb[3].mxu1  ;;  %v4457_v58 = vsel %vm7124_vm9, %v6820_v31, 0.0  ;;  %vm7134_vm12 = vmmov %vm7080_vm0 }
 0x271   : > { %4405 = vst.msk [vmem:[%s6666_s29 + $0x88] sm:$0xff] %vm7121_vm8, %v6825_v39  ;;  %v4453_v40 = vsel %vm7122_vm14, %v6825_v39, 0.0  ;;  %vm7135_vm13 = vmmov %vm7080_vm0 }
 0x272   : > { %v4454_v56 = vadd.f32 %v4453_v40, %v4452_v32  ;;  %vm7136_vm8 = vmmov %vm7080_vm0 }
 0x273   : > { %vm7137_vm14 = vmmov %vm7080_vm0 }
 0x274   : > { %v4456_v11 = vadd.f32 %v4455_v16, %v4454_v56  ;;  %vm7138_vm6 = vmmov %vm7080_vm0 }
 0x275   : > { %vm7139_vm9 = vmmov %vm7080_vm0 }
 0x276   : > { %v4458_v19 = vadd.f32 %v4457_v58, %v4456_v11 }
 0x29d   : > { %v6836_v27 = vpop.f32.mrb[4].mxu1 }
 0x29e   : > { %4410 = vst.msk [vmem:[%s6666_s29 + $0xb0] sm:$0xff] %vm7125_vm2, %v6836_v27  ;;  %v6841_v15 = vpop.f32.mrb[5].mxu1  ;;  %v4463_v17 = vsel %vm7130_vm4, %v6836_v27, 0.0  ;;  %vm7140_vm2 = vmmov %vm7080_vm0 }
 0x29f   : > { %4408 = vst.msk [vmem:[%s6666_s29 + $0xa0] sm:$0xff] %vm7126_vm11, %v6841_v15  ;;  %v4459_v62 = vsel %vm7127_vm15, %v6841_v15, 0.0  ;;  %v6848_v42 = vpop.f32.mrb[6].mxu1  ;;  %vm7141_vm11 = vmmov %vm7080_vm0 }
 0x2a0   : > { %v4460_v0 = vadd.f32 %v4459_v62, %v4458_v19  ;;  %4411 = vst.msk [vmem:[%s6666_s29 + $0xb8] sm:$0xff] %vm7128_vm1, %v6848_v42  ;;  %v6853_v57 = vpop.f32.mrb[7].mxu1  ;;  %v4465_v18 = vsel %vm7131_vm5, %v6848_v42, 0.0  ;;  %vm7142_vm15 = vmmov %vm7080_vm0 }
 0x2a1   : > { %4409 = vst.msk [vmem:[%s6666_s29 + $0xa8] sm:$0xff] %vm7129_vm10, %v6853_v57  ;;  %v4461_v45 = vsel %vm7080_vm0, %v6853_v57, 0.0  ;;  %vm7143_vm1 = vmmov %vm7080_vm0 }
 0x2a2   : > { %v4462_v5 = vadd.f32 %v4461_v45, %v4460_v0  ;;  %vm7144_vm10 = vmmov %vm7080_vm0 }
 0x2a3   : > { %vm7145_vm4 = vmmov %vm7080_vm0 }
 0x2a4   : > { %v4464_v35 = vadd.f32 %v4463_v17, %v4462_v5  ;;  %vm7146_vm5 = vmmov %vm7080_vm0 }
 0x2a6   : > { %v4466_v8 = vadd.f32 %v4465_v18, %v4464_v35 }
 0x2cc   : > { %v6864_v21 = vpop.f32.mrb[8].mxu1 }
 0x2cd   : > { %4414 = vst.msk [vmem:[%s6666_s29 + $0xd0] sm:$0xff] %vm7132_vm3, %v6864_v21  ;;  %v6869_v36 = vpop.f32.mrb[9].mxu1  ;;  %v4471_v34 = vsel %vm7138_vm6, %v6864_v21, 0.0  ;;  %vm7147_vm3 = vcmask 24576   ;;  %vm7153_vm6 = vmmov %vm7080_vm0 }
 0x2ce   : > { %4412 = vst.msk [vmem:[%s6666_s29 + $0xc0] sm:$0xff] %vm7133_vm7, %v6869_v36  ;;  %v4467_v13 = vsel %vm7134_vm12, %v6869_v36, 0.0  ;;  %v6876_v7 = vpop.f32.mrb[10].mxu1  ;;  %vm7148_vm7 = vmmov %vm7080_vm0 }
 0x2cf   : > { %v4468_v52 = vadd.f32 %v4467_v13, %v4466_v8  ;;  %4415 = vst.msk [vmem:[%s6666_s29 + $0xd8] sm:$0xff] %vm7135_vm13, %v6876_v7  ;;  %v4360_v4 = vpop.f32.mrb[11].mxu1  ;;  %v4473_v14 = vsel %vm7139_vm9, %v6876_v7, 0.0  ;;  %vm7149_vm12 = vmmov %vm7080_vm0 }
 0x2d0   : > { %4413 = vst.msk [vmem:[%s6666_s29 + $0xc8] sm:$0xff] %vm7136_vm8, %v4360_v4  ;;  %v4469_v47 = vsel %vm7137_vm14, %v4360_v4, 0.0  ;;  %vm7150_vm13 = vmmov %vm7080_vm0 }
 0x2d1   : > { %v4470_v23 = vadd.f32 %v4469_v47, %v4468_v52  ;;  %vm7151_vm8 = vmmov %vm7080_vm0 }
 0x2d2   : > { %vm7152_vm14 = vmmov %vm7080_vm0 }
 0x2d3   : > { %v4472_v12 = vadd.f32 %v4471_v34, %v4470_v23  ;;  %vm7154_vm9 = vmmov %vm7080_vm0 }
 0x2d5   : > { %v4474_v63 = vadd.f32 %v4473_v14, %v4472_v12 }
 0x2fc   : > { %v5057_v33 = vpop.f32.mrb[12].mxu1 }
 0x2fd   : > { %4418 = vst.msk [vmem:[%s6666_s29 + $0xf0] sm:$0xff] %vm7140_vm2, %v5057_v33  ;;  %v4373_v10 = vpop.f32.mrb[13].mxu1  ;;  %v4479_v24 = vsel %vm7145_vm4, %v5057_v33, 0.0  ;;  %vm7155_vm2 = vmmov %vm7080_vm0 }
 0x2fe   : > { %4416 = vst.msk [vmem:[%s6666_s29 + $0xe0] sm:$0xff] %vm7141_vm11, %v4373_v10  ;;  %v4475_v59 = vsel %vm7142_vm15, %v4373_v10, 0.0  ;;  %v5058_v20 = vpop.f32.mrb[14].mxu1  ;;  %vm7156_vm11 = vmmov %vm7080_vm0 }
 0x2ff   : > { %v4476_v48 = vadd.f32 %v4475_v59, %v4474_v63  ;;  %4419 = vst.msk [vmem:[%s6666_s29 + $0xf8] sm:$0xff] %vm7143_vm1, %v5058_v20  ;;  %v4376_v43 = vpop.f32.mrb[15].mxu1  ;;  %v4481_v30 = vsel %vm7146_vm5, %v5058_v20, 0.0  ;;  %vm7157_vm15 = vmmov %vm7080_vm0 }
 0x300   : > { %4417 = vst.msk [vmem:[%s6666_s29 + $0xe8] sm:$0xff] %vm7144_vm10, %v4376_v43  ;;  %v4477_v26 = vsel %vm7080_vm0, %v4376_v43, 0.0  ;;  %vm7158_vm1 = vmmov %vm7080_vm0 }
 0x301   : > { %v4478_v29 = vadd.f32 %v4477_v26, %v4476_v48  ;;  %vm7159_vm10 = vmmov %vm7080_vm0 }
 0x302   : > { %vm7160_vm4 = vmmov %vm7080_vm0 }
 0x303   : > { %v4480_v38 = vadd.f32 %v4479_v24, %v4478_v29  ;;  %vm7161_vm5 = vmmov %vm7080_vm0 }
 0x305   : > { %v4482_v22 = vadd.f32 %v4481_v30, %v4480_v38 }
 0x307   : > { %v4483_v61 = vrot.slane %v4482_v22, 4 }
 0x309   : > { %v4484_v32 = vadd.f32 %v4483_v61, %v4482_v22 }
 0x30b   : > { %v4485_v40 = vrot.slane %v4484_v32, 2 }
 0x30d   : > { %v4486_v56 = vadd.f32 %v4485_v40, %v4484_v32 }
 0x30f   : > { %v4487_v16 = vrot.slane %v4486_v56, 1 }
 0x311   : > { %v4488_v11 = vadd.f32 %v4487_v16, %v4486_v56 }
 0x313   : > { %v4489_v58 = vmul.f32 0.00390625, %v4488_v11  ;;  %4522 = vst.msk [vmem:[%s6904_s7] sm:$0x1] %vm7147_vm3, %v4488_v11  ;;  %vm7162_vm3 = vmmov %vm7080_vm0 }
 0x315   : > { %v4490_v19 = vsub.f32 %v6674_v1, %v4489_v58  ;;  %v4491_v62 = vsub.f32 %v6684_v9, %v4489_v58  ;;  %v4492_v0 = vsub.f32 %v6669_v6, %v4489_v58  ;;  %v4493_v45 = vsub.f32 %v6679_v44, %v4489_v58 }
 0x316   : > { %v4494_v5 = vsub.f32 %v6704_v25, %v4489_v58  ;;  %v4495_v17 = vsub.f32 %v6717_v49, %v4489_v58  ;;  %v4496_v35 = vsub.f32 %v6698_v46, %v4489_v58  ;;  %v4497_v18 = vsub.f32 %v6711_v60, %v4489_v58 }
 0x317   : > { %v4498_v8 = vsub.f32 %v6747_v28, %v4489_v58  ;;  %v4499_v13 = vsub.f32 %v6759_v37, %v4489_v58  ;;  %v4500_v1 = vsub.f32 %v6741_v3, %v4489_v58  ;;  %v4501_v9 = vsub.f32 %v6754_v54, %v4489_v58 }
 0x318   : > { %v4502_v6 = vsub.f32 %v6785_v53, %v4489_v58  ;;  %v4503_v44 = vsub.f32 %v6797_v2, %v4489_v58  ;;  %v4504_v25 = vsub.f32 %v6780_v50, %v4489_v58  ;;  %v4505_v49 = vsub.f32 %v6792_v41, %v4489_v58 }
 0x319   : > { %v4506_v46 = vsub.f32 %v6813_v51, %v4489_v58  ;;  %v4507_v60 = vsub.f32 %v6825_v39, %v4489_v58  ;;  %v6927_v28 = vsub.f32 %v6808_v55, %v4489_v58  ;;  %v6930_v37 = vsub.f32 %v6820_v31, %v4489_v58 }
 0x31a   : > { %v6933_v3 = vsub.f32 %v6841_v15, %v4489_v58  ;;  %v6936_v54 = vsub.f32 %v6853_v57, %v4489_v58  ;;  %v6939_v50 = vsub.f32 %v6836_v27, %v4489_v58  ;;  %v6942_v53 = vsub.f32 %v6848_v42, %v4489_v58 }
 0x31b   : > { %v6945_v41 = vsub.f32 %v6869_v36, %v4489_v58  ;;  %v6947_v2 = vsub.f32 %v4360_v4, %v4489_v58  ;;  %v6950_v55 = vsub.f32 %v6864_v21, %v4489_v58  ;;  %v6953_v51 = vsub.f32 %v6876_v7, %v4489_v58 }
 0x31c   : > { %v6955_v31 = vsub.f32 %v4373_v10, %v4489_v58  ;;  %v6957_v39 = vsub.f32 %v4376_v43, %v4489_v58  ;;  %v6959_v27 = vsub.f32 %v5057_v33, %v4489_v58  ;;  %v6961_v15 = vsub.f32 %v5058_v20, %v4489_v58 }
 0x31d   : > { %v4523_v42 = vmul.f32 %v4490_v19, %v4490_v19  ;;  %v4524_v57 = vmul.f32 %v4491_v62, %v4491_v62  ;;  %v4525_v36 = vmul.f32 %v4492_v0, %v4492_v0  ;;  %v4526_v52 = vmul.f32 %v4493_v45, %v4493_v45 }
 0x31e   : > { %v4527_v23 = vmul.f32 %v4494_v5, %v4494_v5  ;;  %v4528_v12 = vmul.f32 %v4495_v17, %v4495_v17  ;;  %v4529_v33 = vmul.f32 %v4496_v35, %v4496_v35  ;;  %v4530_v20 = vmul.f32 %v4497_v18, %v4497_v18 }
 0x31f   : > { %v4555_v4 = vsel %vm7148_vm7, %v4523_v42, 0.0  ;;  %v4556_v21 = vsel %vm7149_vm12, %v4524_v57, 0.0  ;;  %v4558_v7 = vsel %vm7150_vm13, %v4525_v36, 0.0  ;;  %v4560_v14 = vsel %vm7151_vm8, %v4526_v52, 0.0  ;;  %vm7163_vm7 = vmmov %vm7080_vm0 }
 0x320   : > { %v4557_v47 = vadd.f32 %v4556_v21, %v4555_v4  ;;  %v4562_v10 = vsel %vm7152_vm14, %v4527_v23, 0.0  ;;  %v4564_v48 = vsel %vm7153_vm6, %v4528_v12, 0.0  ;;  %v4531_v26 = vmul.f32 %v4498_v8, %v4498_v8  ;;  %vm7164_vm12 = vmmov %vm7080_vm0 }
 0x321   : > { %v4566_v29 = vsel %vm7154_vm9, %v4529_v33, 0.0  ;;  %v4532_v38 = vmul.f32 %v4499_v13, %v4499_v13  ;;  %v4568_v30 = vsel %vm7155_vm2, %v4530_v20, 0.0  ;;  %v4533_v61 = vmul.f32 %v4500_v1, %v4500_v1  ;;  %vm7165_vm13 = vmmov %vm7080_vm0 }
 0x322   : > { %v4559_v34 = vadd.f32 %v4558_v7, %v4557_v47  ;;  %v4570_v32 = vsel %vm7156_vm11, %v4531_v26, 0.0  ;;  %v4534_v56 = vmul.f32 %v4501_v9, %v4501_v9  ;;  %v4535_v58 = vmul.f32 %v4502_v6, %v4502_v6  ;;  %vm7166_vm8 = vmmov %vm7080_vm0 }
 0x323   : > { %v4572_v16 = vsel %vm7157_vm15, %v4532_v38, 0.0  ;;  %v4574_v19 = vsel %vm7158_vm1, %v4533_v61, 0.0  ;;  %v4536_v0 = vmul.f32 %v4503_v44, %v4503_v44  ;;  %v4537_v17 = vmul.f32 %v4504_v25, %v4504_v25  ;;  %vm7167_vm14 = vmmov %vm7080_vm0 }
 0x324   : > { %v4561_v63 = vadd.f32 %v4560_v14, %v4559_v34  ;;  %v4576_v45 = vsel %vm7159_vm10, %v4534_v56, 0.0  ;;  %v4578_v35 = vsel %vm7080_vm0, %v4535_v58, 0.0  ;;  %v4538_v8 = vmul.f32 %v4505_v49, %v4505_v49  ;;  %vm7168_vm6 = vmmov %vm7080_vm0 }
 0x325   : > { %v4580_v13 = vsel %vm7160_vm4, %v4536_v0, 0.0  ;;  %v4539_v9 = vmul.f32 %v4506_v46, %v4506_v46  ;;  %v4582_v42 = vsel %vm7161_vm5, %v4537_v17, 0.0  ;;  %v4540_v6 = vmul.f32 %v4507_v60, %v4507_v60  ;;  %vm7169_vm9 = vmmov %vm7080_vm0 }
 0x326   : > { %v4563_v59 = vadd.f32 %v4562_v10, %v4561_v63  ;;  %v4584_v36 = vsel %vm7162_vm3, %v4538_v8, 0.0  ;;  %v4541_v44 = vmul.f32 %v6927_v28, %v6927_v28  ;;  %v4542_v49 = vmul.f32 %v6930_v37, %v6930_v37  ;;  %vm7170_vm2 = vmmov %vm7080_vm0 }
 0x327   : > { %v4586_v25 = vsel %vm7163_vm7, %v4539_v9, 0.0  ;;  %v4588_v21 = vsel %vm7164_vm12, %v4540_v6, 0.0  ;;  %v4543_v46 = vmul.f32 %v6933_v3, %v6933_v3  ;;  %v4544_v7 = vmul.f32 %v6936_v54, %v6936_v54  ;;  %vm7171_vm11 = vmmov %vm7080_vm0 }
 0x328   : > { %v4565_v43 = vadd.f32 %v4564_v48, %v4563_v59  ;;  %v4590_v60 = vsel %vm7165_vm13, %v4541_v44, 0.0  ;;  %v4592_v28 = vsel %vm7166_vm8, %v4542_v49, 0.0  ;;  %v4545_v12 = vmul.f32 %v6939_v50, %v6939_v50  ;;  %vm7172_vm15 = vmmov %vm7080_vm0 }
 0x329   : > { %v4594_v37 = vsel %vm7167_vm14, %v4543_v46, 0.0  ;;  %v4546_v63 = vmul.f32 %v6942_v53, %v6942_v53  ;;  %v4596_v3 = vsel %vm7168_vm6, %v4544_v7, 0.0  ;;  %v4547_v10 = vmul.f32 %v6945_v41, %v6945_v41  ;;  %vm7173_vm1 = vmmov %vm7080_vm0 }
 0x32a   : > { %v4567_v24 = vadd.f32 %v4566_v29, %v4565_v43  ;;  %v4598_v54 = vsel %vm7169_vm9, %v4545_v12, 0.0  ;;  %v4548_v20 = vmul.f32 %v6947_v2, %v6947_v2  ;;  %v4549_v43 = vmul.f32 %v6950_v55, %v6950_v55  ;;  %vm7174_vm10 = vmmov %vm7080_vm0 }
 0x32b   : > { %v4600_v50 = vsel %vm7170_vm2, %v4546_v63, 0.0  ;;  %v4602_v53 = vsel %vm7171_vm11, %v4547_v10, 0.0  ;;  %v4550_v29 = vmul.f32 %v6953_v51, %v6953_v51  ;;  %v4551_v38 = vmul.f32 %v6955_v31, %v6955_v31  ;;  %vm7175_vm4 = vmmov %vm7080_vm0 }
 0x32c   : > { %v4569_v22 = vadd.f32 %v4568_v30, %v4567_v24  ;;  %v4604_v41 = vsel %vm7172_vm15, %v4548_v20, 0.0  ;;  %v4606_v2 = vsel %vm7173_vm1, %v4549_v43, 0.0  ;;  %v4554_v56 = vmul.f32 %v6961_v15, %v6961_v15  ;;  %vm7176_vm5 = vmmov %vm7080_vm0 }
 0x32d   : > { %v4608_v55 = vsel %vm7174_vm10, %v4550_v29, 0.0  ;;  %v4610_v51 = vsel %vm7080_vm0, %v4551_v38, 0.0  ;;  %vm7177_vm3 = vmmov %vm7080_vm0  ;;  %vm7178_vm7 = vcmask 24576  }
 0x32e   : > { %v4571_v40 = vadd.f32 %v4570_v32, %v4569_v22  ;;  %v4552_v22 = vmul.f32 %v6957_v39, %v6957_v39  ;;  %v4553_v32 = vmul.f32 %v6959_v27, %v6959_v27  ;;  %v4616_v39 = vsel %vm7177_vm3, %v4554_v56, 0.0 }
 0x330   : > { %v4573_v11 = vadd.f32 %v4572_v16, %v4571_v40  ;;  %v4612_v31 = vsel %vm7175_vm4, %v4552_v22, 0.0 }
 0x332   : > { %v4575_v62 = vadd.f32 %v4574_v19, %v4573_v11  ;;  %v4614_v11 = vsel %vm7176_vm5, %v4553_v32, 0.0 }
 0x334   : > { %v4577_v5 = vadd.f32 %v4576_v45, %v4575_v62 }
 0x336   : > { %v4579_v18 = vadd.f32 %v4578_v35, %v4577_v5 }
 0x338   : > { %v4581_v1 = vadd.f32 %v4580_v13, %v4579_v18 }
 0x33a   : > { %v4583_v57 = vadd.f32 %v4582_v42, %v4581_v1 }
 0x33c   : > { %v4585_v52 = vadd.f32 %v4584_v36, %v4583_v57 }
 0x33e   : > { %v4587_v4 = vadd.f32 %v4586_v25, %v4585_v52 }
 0x340   : > { %v4589_v47 = vadd.f32 %v4588_v21, %v4587_v4 }
 0x342   : > { %v4591_v23 = vadd.f32 %v4590_v60, %v4589_v47 }
 0x344   : > { %v4593_v34 = vadd.f32 %v4592_v28, %v4591_v23 }
 0x346   : > { %v4595_v14 = vadd.f32 %v4594_v37, %v4593_v34 }
 0x348   : > { %v4597_v33 = vadd.f32 %v4596_v3, %v4595_v14 }
 0x34a   : > { %v4599_v59 = vadd.f32 %v4598_v54, %v4597_v33 }
 0x34c   : > { %v4601_v48 = vadd.f32 %v4600_v50, %v4599_v59 }
 0x34e   : > { %v4603_v26 = vadd.f32 %v4602_v53, %v4601_v48 }
 0x350   : > { %v4605_v24 = vadd.f32 %v4604_v41, %v4603_v26 }
 0x352   : > { %v4607_v30 = vadd.f32 %v4606_v2, %v4605_v24 }
 0x354   : > { %v4609_v61 = vadd.f32 %v4608_v55, %v4607_v30 }
 0x356   : > { %v4611_v40 = vadd.f32 %v4610_v51, %v4609_v61 }
 0x358   : > { %v4613_v16 = vadd.f32 %v4612_v31, %v4611_v40 }
 0x35a   : > { %v4615_v58 = vadd.f32 %v4614_v11, %v4613_v16 }
 0x35c   : > { %v4617_v19 = vadd.f32 %v4616_v39, %v4615_v58 }
 0x35e   : > { %v4618_v62 = vrot.slane %v4617_v19, 4 }
 0x360   : > { %v4619_v0 = vadd.f32 %v4618_v62, %v4617_v19 }
 0x362   : > { %v4620_v45 = vrot.slane %v4619_v0, 2 }
 0x364   : > { %v4621_v27 = vadd.f32 %v4620_v45, %v4619_v0 }
 0x366   : > { %v4622_v5 = vrot.slane %v4621_v27, 1 }
 0x368   : > { %v4623_v17 = vadd.f32 %v4622_v5, %v4621_v27 }
 0x36a   : > { %4624 = vst.msk [vmem:[%s6904_s7 + $0x1] sm:$0x1] %vm7178_vm7, %v4623_v17 }
 0x36b PF: > { %s16_s18 = sadd.s32 1, %s5147_s18  }
 0x36c   : > { %p13_p4 = scmp.ge.s32.totalorder %s16_s18, 4  }
 0x36e   :  { %15 = sbr.rel (!%p13_p4) target bundleno = 1 (0x1), region = 81 }

// kernel: basic_block.3
= control target key start
LH: loop header
LB: loop body
LE: loop exit
PB: predicated region body
PF: predicated region fallthrough
CT: control target
= control target key end

     0   :  { %s5006_s12 = smov 0   ;;  %s6642_s0 = inlined_call_operand.vmem [shape: f32[2,16,16,4], index: 0, kind: input, shape index: {}]   ;;  %s6643_s1 = inlined_call_operand.vmem [shape: bf16[36,4], index: 1, kind: input, shape index: {}]   ;;  %s6644_s2 = inlined_call_operand.vmem [shape: f32[2,256,4], index: 2, kind: output, shape index: {0}]   ;;  %s6645_s3 = inlined_call_operand.vmem [shape: f32[2,2,4], index: 3, kind: output, shape index: {1}]  }
   0x1 LB: > { %s4547_s13 = sadd.s32 4294967295, %s4975_s12   ;;  %p4551_p0 = scmp.ge.s32.totalorder %s4975_s12, 1  ;;  %s4975_s12 = sphi %s5006_s12, %s14_s12  }
   0x2   : > { %p140_p1 = scmp.lt.s32.totalorder %s4975_s12, 3 }
   0x4   : > { %p141_p2 = pnand %p4551_p0, %p140_p1 }
   0x5   : > { %p168_p3 = scmp.lt.s32.totalorder (!%p141_p2), %s4547_s13, 1  ;;  %vm231_vm0 = vcmask (!%p141_p2), 27648   ;;  %vm6646_vm1 = vcmask (!%p141_p2), 24576   ;;  %vm241_vm2 = vsmask.f32 (!%p141_p2), 256  ;;  %v4977_v3 = vmov (!%p141_p2), 0  }
   0x6   : > { %144 = sbr.rel (%p141_p2) target bundleno = 855 (0x357), region = 28  ;;  %vm5016_vm3 = vmand (!%p141_p2), %vm6646_vm1, %vm241_vm2  ;;  %v246_v1 = vld [vmem:[#allocation2 + $0xc] sm:$0x1] (!%p141_p2)  ;;  %vm297_vm4 = vsmask.f32 (!%p141_p2), 7938  ;;  %vm1659_vm7 = vcmask (!%p141_p2), 1042432  }
   0x7   : > { %v247_v2 = vsel (!%p141_p2), %vm5016_vm3, 0, %v246_v1  ;;  %232 = vst.msk [vmem:[#allocation2] sm:$0xf] (!%p141_p2), %vm231_vm0, %v4977_v3  ;;  %233 = vst.msk [vmem:[#allocation2 + $0x4] sm:$0xf] (!%p141_p2), %vm231_vm0, %v4977_v3  ;;  %vm1660_vm8 = vcmask (!%p141_p2), 1046532  }
   0x8   : > { %248 = vst [vmem:[#allocation2 + $0xc] sm:$0x1] (!%p141_p2), %v247_v2  ;;  %235 = vst.msk [vmem:[#allocation2 + $0x8] sm:$0x1] (!%p141_p2), %vm6646_vm1, %v4977_v3  ;;  %v249_v4 = vld [vmem:[#allocation2 + $0x18] sm:$0x1] (!%p141_p2) }
   0x9   : > { %237 = vst.msk [vmem:[#allocation2 + $0xcc] sm:$0xf] (!%p141_p2), %vm231_vm0, %v4977_v3  ;;  %238 = vst.msk [vmem:[#allocation2 + $0xd0] sm:$0xf] (!%p141_p2), %vm231_vm0, %v4977_v3  ;;  %v250_v5 = vsel (!%p141_p2), %vm5016_vm3, 0, %v249_v4  ;;  %s4978_s18 = smov (!%p141_p2), 12  }
   0xa   : > { %239 = vst.msk [vmem:[#allocation2 + $0xd4] sm:$0x1] (!%p141_p2), %vm6646_vm1, %v4977_v3  ;;  %vm5042_vm5 = vmand (!%p141_p2), %vm6646_vm1, %vm297_vm4  ;;  %vm433_vm6 = vsmask.f32 (!%p141_p2), 4368  ;;  %v252_v7 = vld [vmem:[#allocation2 + $0x24] sm:$0x1] (!%p141_p2) }
   0xb   : > { %251 = vst [vmem:[#allocation2 + $0x18] sm:$0x1] (!%p141_p2), %v250_v5  ;;  %v302_v8 = vld [vmem:[#allocation2 + $0x14] sm:$0x1] (!%p141_p2)  ;;  %v253_v12 = vsel (!%p141_p2), %vm5016_vm3, 0, %v252_v7  ;;  %vm5057_vm9 = vmor (!%p141_p2), %vm241_vm2, %vm433_vm6  ;;  %s4979_s19 = smov (!%p141_p2), 8  }
   0xc   : > { %v303_v13 = vsel (!%p141_p2), %vm5042_vm5, 0, %v302_v8  ;;  %254 = vst [vmem:[#allocation2 + $0x24] sm:$0x1] (!%p141_p2), %v253_v12  ;;  %vm5068_vm10 = vmor (!%p141_p2), %vm1659_vm7, %vm1660_vm8  ;;  %vm1063_vm12 = vsmask.f32 (!%p141_p2), 3328  ;;  %s4980_s20 = smov (!%p141_p2), 24  }
   0xd   : > { %s6775_s13 = smov (!%p168_p3, %s4547_s13), 1  ;;  %304 = vst [vmem:[#allocation2 + $0x14] sm:$0x1] %v303_v13  ;;  %vm5074_vm11 = vmand %vm231_vm0, %vm297_vm4  ;;  %vm1064_vm13 = vsmask.f32 7440  ;;  %s4981_s21 = smov 4  }
   0xe   : > { %s4802_s14 = sshll.u32 %s6775_s13, 8  ;;  %v1563_v26 = vld [vmem:[#allocation2] sm:$0xe]  ;;  %v1564_v32 = vld [vmem:[#allocation2 + $0x4] sm:$0xf]  ;;  %vm5130_vm14 = vmor %vm1063_vm12, %vm1064_vm13  ;;  %s4982_s22 = smov 20  }
   0xf   : > { %s5038_s17 = scalar_lea.vmem %s6642_s0, %s4802_s14  ;;  %v299_v25 = vld [vmem:[#allocation2 + $0x8] sm:$0x1]  ;;  %v4621_v34 = vrot.slane %v1563_v26, 9  ;;  %v758_v36 = vld [vmem:[#allocation2 + $0xc] sm:$0xf]  ;;  %v1664_v37 = vrot.slane %v1564_v32, 5  ;;  %s6282_s7 = scalar_lea.vmem %s6644_s2, %s4802_s14 }
  0x10   : > { %v183_v9 = vld [vmem:[%s5038_s17] sm:$0xff]  ;;  %v184_v10 = vld [vmem:[%s5038_s17 + $0x8] sm:$0xff]  ;;  %v185_v11 = vld [vmem:[%s5038_s17 + $0x10] sm:$0xff]  ;;  %v300_v31 = vsel %vm5042_vm5, 0, %v299_v25  ;;  %s4983_s23 = smov 32   ;;  %s4984_s24 = smov 16  }
  0x11   : > { %v4804_v14 = vpack.c.bf16 %v183_v9, %v183_v9  ;;  %v4805_v15 = vpack.c.bf16 %v184_v10, %v184_v10  ;;  %v186_v16 = vld [vmem:[%s5038_s17 + $0x18] sm:$0xff]  ;;  %v187_v17 = vld [vmem:[%s5038_s17 + $0x20] sm:$0xff]  ;;  %v4806_v18 = vpack.c.bf16 %v185_v11, %v185_v11  ;;  %v188_v27 = vld [vmem:[%s5038_s17 + $0x28] sm:$0xff]  ;;  %301 = vst [vmem:[#allocation2 + $0x8] sm:$0x1] %v300_v31  ;;  %v5080_v48 = vsel %vm5068_vm10, %v4621_v34, %v1664_v37  ;;  %s4985_s25 = smov 28  }
  0x12   : > { %v4807_v19 = vpack.c.bf16 %v186_v16, %v186_v16  ;;  %v5062_v28 = vpack.c.bf16 %v187_v17, %v187_v17  ;;  %v243_v44 = vld [vmem:[#allocation2] sm:$0x1]  ;;  %v1016_v45 = vld [vmem:[#allocation2 + $0x4] sm:$0xf]  ;;  %v4809_v46 = vpack.c.bf16 %v188_v27, %v188_v27  ;;  %v765_v54 = vld [vmem:[#allocation2 + $0x18] sm:$0xf] }
  0x13   : > { %v436_v21 = vshrl.u32 %v4804_v14, 16  ;;  %v439_v22 = vshll.u32 %v4804_v14, 16  ;;  %v444_v23 = vshrl.u32 %v4805_v15, 16  ;;  %v447_v24 = vshll.u32 %v4805_v15, 16  ;;  %v305_v2 = vld [vmem:[#allocation2 + $0x20] sm:$0x1] }
  0x14   : > { %v453_v38 = vshrl.u32 %v4806_v18, 16  ;;  %v456_v39 = vshll.u32 %v4806_v18, 16  ;;  %v461_v40 = vshrl.u32 %v4807_v19, 16  ;;  %v464_v53 = vshll.u32 %v4807_v19, 16  ;;  %v762_v60 = vld [vmem:[#allocation2 + $0x14] sm:$0x1] }
  0x15   : > { %v438_v29 = vrot.slane %v436_v21, 7  ;;  %v446_v30 = vrot.slane %v444_v23, 7  ;;  %v244_v55 = vsel %vm5016_vm3, 0, %v243_v44  ;;  %v1666_v56 = vrot.slane %v1664_v37, 4  ;;  %v308_v8 = vld [vmem:[#allocation2 + $0x2c] sm:$0x1] }
  0x16   : > { %v455_v49 = vrot.slane %v453_v38, 7  ;;  %v5082_v50 = vrot.slane %v461_v40, 7  ;;  %245 = vst [vmem:[#allocation2] sm:$0x1] %v244_v55  ;;  %v1076_v59 = vshll.u32 %v1016_v45, 16  ;;  %v1080_v62 = vshrl.u32 %v1016_v45, 16 }
  0x17   : > { %v441_v41 = vor.u32 %v439_v22, %v438_v29  ;;  %v442_v42 = vrot.slane %v438_v29, 4  ;;  %v449_v43 = vor.u32 %v447_v24, %v446_v30  ;;  %v451_v47 = vrot.slane %v446_v30, 4  ;;  %v772_v18 = vld [vmem:[#allocation2 + $0x24] sm:$0xf]  ;;  %v189_v25 = vld [vmem:[%s5038_s17 + $0x30] sm:$0xff]  ;;  %s4556_s8 = sshll.u32 %s6775_s13, 1 }
  0x18   : > { %v458_v57 = vor.u32 %v456_v39, %v455_v49  ;;  %v459_v58 = vrot.slane %v455_v49, 4  ;;  %v466_v61 = vor.u32 %v464_v53, %v5082_v50  ;;  %v470_v63 = vshrl.u32 %v5062_v28, 16  ;;  %v1565_v9 = vld [vmem:[#allocation2 + $0x8] sm:$0x1]  ;;  %v6192_v6 = vld [vmem:[#allocation2 + $0xd0] sm:$0xf]  ;;  %s6518_s11 = scalar_lea.vmem %s6645_s3, %s4556_s8 }
  0x19   : > { %v450_v51 = vsel %vm5057_vm9, %v442_v42, %v449_v43  ;;  %v759_v52 = vsel %vm5074_vm11, %v441_v41, %v758_v36  ;;  %v473_v1 = vshll.u32 %v5062_v28, 16  ;;  %v5096_v4 = vrot.slane %v1076_v59, 5  ;;  %v1017_v11 = vld [vmem:[#allocation2 + $0x8] sm:$0x1]  ;;  %v255_v36 = vld [vmem:[#allocation2 + $0x30] sm:$0x1] }
  0x1a   : > { %760 = vst [vmem:[#allocation2 + $0xc] sm:$0xf] %v759_v52  ;;  %761 = vst.msk [vmem:[#allocation2 + $0x10] sm:$0xf] %vm231_vm0, %v450_v51  ;;  %v766_v3 = vsel %vm5074_vm11, %v458_v57, %v765_v54  ;;  %v478_v5 = vshrl.u32 %v4809_v46, 16  ;;  %v481_v7 = vshll.u32 %v4809_v46, 16  ;;  %v467_v10 = vsel %vm5057_vm9, %v459_v58, %v466_v61 }
  0x1b   : > { %767 = vst [vmem:[#allocation2 + $0x18] sm:$0xf] %v766_v3  ;;  %v1082_v12 = vrot.slane %v1080_v62, 4  ;;  %v472_v13 = vrot.slane %v470_v63, 7  ;;  %v763_v14 = vsel %vm5016_vm3, %v451_v47, %v762_v60  ;;  %v1667_v15 = vrot.slane %v1565_v9, 5 }
  0x1c   : > { %768 = vst.msk [vmem:[#allocation2 + $0x1c] sm:$0xf] %vm231_vm0, %v467_v10  ;;  %v1086_v16 = vshll.u32 %v1017_v11, 16  ;;  %v5103_v17 = vrot.slane %v478_v5, 7  ;;  %764 = vst [vmem:[#allocation2 + $0x14] sm:$0x1] %v763_v14  ;;  %v5123_v41 = vpack.c.bf16 %v189_v25, %v189_v25 }
  0x1d   : > { %v306_v19 = vsel %vm5042_vm5, 0, %v305_v2  ;;  %v1083_v21 = vor.u32 %v1082_v12, %v5096_v4  ;;  %v475_v22 = vor.u32 %v473_v1, %v472_v13  ;;  %v476_v23 = vrot.slane %v472_v13, 4  ;;  %v1015_v37 = vld [vmem:[#allocation2] sm:$0xf] }
  0x1e   : > { %307 = vst [vmem:[#allocation2 + $0x20] sm:$0x1] %v306_v19  ;;  %v309_v24 = vsel %vm5042_vm5, 0, %v308_v8  ;;  %v1668_v26 = vsel %vm5068_vm10, %v1666_v56, %v1667_v15  ;;  %v468_v27 = vrot.slane %v5082_v50, 4  ;;  %v5114_v28 = vrot.slane %v1086_v16, 5  ;;  %v190_v56 = vld [vmem:[%s5038_s17 + $0x38] sm:$0xff] }
  0x1f   : > { %v483_v29 = vor.u32 %v481_v7, %v5103_v17  ;;  %310 = vst [vmem:[#allocation2 + $0x2c] sm:$0x1] %v309_v24  ;;  %v4637_v31 = vcombine.low %v5080_v48, %v1668_v26  ;;  %v485_v32 = vrot.slane %v5103_v17, 4  ;;  %v773_v34 = vsel %vm5074_vm11, %v475_v22, %v772_v18 }
  0x20   : > { %774 = vst [vmem:[#allocation2 + $0x24] sm:$0xf] %v773_v34  ;;  %v1067_v42 = vshrl.u32 %v1015_v37, 16  ;;  %v1070_v43 = vshll.u32 %v1015_v37, 16  ;;  %v1084_v44 = vrot.slane %v1083_v21, 4  ;;  %v256_v57 = vsel %vm5016_vm3, 0, %v255_v36 }
  0x21   : > { %v4918_v30 = vld [vmem:[#allocation2 + $0xc] sm:$0xff]   ;;  %v484_v38 = vsel %vm5057_vm9, %v476_v23, %v483_v29  ;;  %1822 = vrot.lane.b32.xlu1 %v4637_v31, %s4979_s19  ;;  %257 = vst [vmem:[#allocation2 + $0x30] sm:$0x1] %v256_v57  ;;  %v487_v61 = vshrl.u32 %v5123_v41, 16  ;;  %v5156_v23 = vpack.c.bf16 %v190_v56, %v190_v56  ;;  %v490_v24 = vshll.u32 %v5123_v41, 16 }
  0x22   : > { %v2609_v39 = vld [vmem:[#allocation2 + $0xc] sm:$0xe]  ;;  %v2610_v40 = vld [vmem:[#allocation2 + $0x10] sm:$0xf]  ;;  %1999 = vrot.lane.b32.xlu0 %v4918_v30, %s4978_s18  ;;  %775 = vst.msk [vmem:[#allocation2 + $0x28] sm:$0xf] %vm231_vm0, %v484_v38  ;;  %v1089_v7 = vsel %vm5130_vm14, %v1084_v44, %v5114_v28 }
  0x23   : > { %v4685_v45 = vrot.slane %v2609_v39, 9  ;;  %v1566_v46 = vld [vmem:[#allocation2 + $0xc] sm:$0xe]  ;;  %v2707_v47 = vrot.slane %v2610_v40, 5  ;;  %v4919_v49 = vld [vmem:[#allocation2 + $0x18] sm:$0xff]   ;;  %v1069_v50 = vrot.slane %v1067_v42, 4 }
  0x24   : > { %v4622_v48 = vrot.slane %v1566_v46, 9  ;;  %v4920_v51 = vld [vmem:[#allocation2 + $0x18] sm:$0xff]   ;;  %v1072_v53 = vrot.slane %v1070_v43, 5  ;;  %v2611_v54 = vld [vmem:[#allocation2 + $0x14] sm:$0x1]  ;;  %v5153_v16 = vrot.slane %v487_v61, 7 }
  0x25   : > { %v2709_v55 = vrot.slane %v2707_v47, 4  ;;  %v2710_v58 = vrot.slane %v2611_v54, 5  ;;  %v1567_v59 = vld [vmem:[#allocation2 + $0x10] sm:$0xf]  ;;  %v1568_v60 = vld [vmem:[#allocation2 + $0x14] sm:$0x1]  ;;  %2001 = vrot.lane.b32.xlu1 %v4920_v51, %s4978_s18  ;;  %v5142_v63 = vsel %vm5068_vm10, %v4685_v45, %v2707_v47 }
  0x26   : > { %3043 = vrot.lane.b32.xlu0 %v4919_v49, %s4980_s20  ;;  %v1073_v62 = vor.u32 %v1072_v53, %v1069_v50  ;;  %v1671_v1 = vrot.slane %v1567_v59, 5  ;;  %v1674_v2 = vrot.slane %v1568_v60, 5  ;;  %v769_v3 = vld [vmem:[#allocation2 + $0x20] sm:$0x1]  ;;  %v3653_v5 = vld [vmem:[#allocation2 + $0x18] sm:$0xe] }
  0x27   : > { %v2711_v8 = vsel %vm5068_vm10, %v2709_v55, %v2710_v58  ;;  %v770_v9 = vsel %vm5016_vm3, %v468_v27, %v769_v3  ;;  %v3654_v10 = vld [vmem:[#allocation2 + $0x1c] sm:$0xf]  ;;  %v4749_v11 = vrot.slane %v3653_v5, 9  ;;  %v2612_v21 = vld [vmem:[#allocation2 + $0x18] sm:$0xe]  ;;  %v5178_v58 = vor.u32 %v490_v24, %v5153_v16 }
  0x28   : > { %v1074_v12 = vrot.slane %v1073_v62, 4  ;;  %v1672_v14 = vsel %vm5068_vm10, %v4622_v48, %v1671_v1  ;;  %v1673_v15 = vrot.slane %v1671_v1, 4  ;;  %771 = vst [vmem:[#allocation2 + $0x20] sm:$0x1] %v770_v9  ;;  %v4701_v18 = vcombine.low %v5142_v63, %v2711_v8  ;;  %v2613_v22 = vld [vmem:[#allocation2 + $0x1c] sm:$0xf] }
  0x29   : > { %v4921_v13 = vld [vmem:[#allocation2 + $0x24] sm:$0xff]   ;;  %v3751_v19 = vrot.slane %v3654_v10, 5  ;;  %v4686_v27 = vrot.slane %v2612_v21, 9  ;;  %v2714_v28 = vrot.slane %v2613_v22, 5  ;;  %v776_v29 = vld [vmem:[#allocation2 + $0x2c] sm:$0x1] }
  0x2a   : > { %v1079_v25 = vsel %vm5130_vm14, %v1074_v12, %v5096_v4  ;;  %3045 = vrot.lane.b32.xlu1 %v4921_v13, %s4980_s20  ;;  %v1675_v26 = vsel %vm5068_vm10, %v1673_v15, %v1674_v2  ;;  %v3656_v30 = vld [vmem:[#allocation2 + $0x24] sm:$0xe]  ;;  %v3657_v38 = vld [vmem:[#allocation2 + $0x28] sm:$0xf]  ;;  %v2067_v39 = vld [vmem:[#allocation2 + $0x18] sm:$0xf]  ;;  %v777_v41 = vsel %vm5016_vm3, %v485_v32, %v776_v29 }
  0x2b   : > { %v4605_v31 = vcombine.low %v1079_v25, %v1089_v7  ;;  %v4638_v34 = vcombine.low %v1672_v14, %v1675_v26  ;;  %v3752_v36 = vsel %vm5068_vm10, %v4749_v11, %v3751_v19  ;;  %v3753_v37 = vrot.slane %v3751_v19, 4  ;;  %v2068_v43 = vld [vmem:[#allocation2 + $0x1c] sm:$0xf]  ;;  %v1018_v44 = vld [vmem:[#allocation2 + $0xc] sm:$0xf] }
  0x2c   : > { %v2715_v4 = vsel %vm5068_vm10, %v4686_v27, %v2714_v28  ;;  %v2716_v40 = vrot.slane %v2714_v28, 4  ;;  %v4750_v42 = vrot.slane %v3656_v30, 9  ;;  %778 = vst [vmem:[#allocation2 + $0x2c] sm:$0x1] %v777_v41  ;;  %v3758_v45 = vrot.slane %v3657_v38, 5 }
  0x2d   : > { %1498 = vrot.lane.b32.xlu0 %v4605_v31, %s4981_s21  ;;  %v2137_v46 = vshrl.u32 %v2067_v39, 16  ;;  %v2140_v47 = vshll.u32 %v2067_v39, 16  ;;  %v2146_v48 = vshll.u32 %v2068_v43, 16  ;;  %v1019_v49 = vld [vmem:[#allocation2 + $0x10] sm:$0xf]  ;;  %v2150_v50 = vshrl.u32 %v2068_v43, 16 }
  0x2e   : > { %1824 = vrot.lane.b32.xlu1 %v4638_v34, %s4979_s19  ;;  %v1091_v51 = vshrl.u32 %v1018_v44, 16  ;;  %v1094_v17 = vshll.u32 %v1018_v44, 16  ;;  %v1100_v53 = vshll.u32 %v1019_v49, 16  ;;  %v3759_v55 = vsel %vm5068_vm10, %v4750_v42, %v3758_v45  ;;  %v1020_v3 = vld [vmem:[#allocation2 + $0x14] sm:$0x1] }
  0x2f   : > { %v3655_v54 = vld [vmem:[#allocation2 + $0x20] sm:$0x1]  ;;  %v3760_v56 = vrot.slane %v3758_v45, 4  ;;  %v2139_v57 = vrot.slane %v2137_v46, 4  ;;  %v2142_v62 = vrot.slane %v2140_v47, 5  ;;  %v2148_v63 = vrot.slane %v2146_v48, 5 }
  0x30   : > { %v2614_v32 = vld [vmem:[#allocation2 + $0x20] sm:$0x1]  ;;  %v3754_v59 = vrot.slane %v3655_v54, 5  ;;  %v2152_v1 = vrot.slane %v2150_v50, 4  ;;  %v1093_v5 = vrot.slane %v1091_v51, 4  ;;  %v1096_v7 = vrot.slane %v1094_v17, 5 }
  0x31   : > { %v2717_v60 = vrot.slane %v2614_v32, 5  ;;  %v2069_v61 = vld [vmem:[#allocation2 + $0x20] sm:$0x1]  ;;  %2865 = vrot.lane.b32.xlu0 %v4701_v18, %s4982_s22  ;;  %v2143_v10 = vor.u32 %v2142_v62, %v2139_v57  ;;  %v1102_v11 = vrot.slane %v1100_v53, 5  ;;  %v3111_v12 = vld [vmem:[#allocation2 + $0x24] sm:$0xf] }
  0x32   : > { %v2156_v2 = vshll.u32 %v2069_v61, 16  ;;  %v3755_v8 = vsel %vm5068_vm10, %v3753_v37, %v3754_v59  ;;  %v2153_v15 = vor.u32 %v2152_v1, %v2148_v63  ;;  %v1097_v22 = vor.u32 %v1096_v7, %v1093_v5  ;;  %v3112_v28 = vld [vmem:[#allocation2 + $0x28] sm:$0xf]  ;;  %v2064_v42 = vld [vmem:[#allocation2 + $0xc] sm:$0xf] }
  0x33   : > { %v2718_v9 = vsel %vm5068_vm10, %v2716_v40, %v2717_v60  ;;  %v4765_v13 = vcombine.low %v3752_v36, %v3755_v8  ;;  %v3658_v21 = vld [vmem:[#allocation2 + $0x2c] sm:$0x1]  ;;  %v2144_v18 = vrot.slane %v2143_v10, 4  ;;  %v1104_v24 = vshrl.u32 %v1019_v49, 16  ;;  %v2065_v43 = vld [vmem:[#allocation2 + $0x10] sm:$0xf] }
  0x34   : > { %v4702_v14 = vcombine.low %v2715_v4, %v2718_v9  ;;  %v2158_v19 = vrot.slane %v2156_v2, 5  ;;  %v1110_v25 = vshll.u32 %v1020_v3, 16  ;;  %v3761_v26 = vrot.slane %v3658_v21, 5  ;;  %v3113_v38 = vld [vmem:[#allocation2 + $0x2c] sm:$0x1] }
  0x35   : > { %3909 = vrot.lane.b32.xlu0 %v4765_v13, %s4983_s23  ;;  %v2154_v27 = vrot.slane %v2153_v15, 4  ;;  %v3181_v29 = vshrl.u32 %v3111_v12, 16  ;;  %v3184_v30 = vshll.u32 %v3111_v12, 16  ;;  %v2149_v31 = vsel %vm5130_vm14, %v2144_v18, %v2148_v63  ;;  %v2066_v53 = vld [vmem:[#allocation2 + $0x14] sm:$0x1] }
  0x36   : > { %2867 = vrot.lane.b32.xlu1 %v4702_v14, %s4982_s22  ;;  %v1098_v34 = vrot.slane %v1097_v22, 4  ;;  %v1106_v36 = vrot.slane %v1104_v24, 4  ;;  %v1112_v37 = vrot.slane %v1110_v25, 5  ;;  %v3762_v39 = vsel %vm5068_vm10, %v3760_v56, %v3761_v26  ;;  %v1021_v61 = vld [vmem:[#allocation2 + $0x18] sm:$0xf] }
  0x37   : > { %v2159_v4 = vsel %vm5130_vm14, %v2154_v27, %v2158_v19  ;;  %v3183_v40 = vrot.slane %v3181_v29, 4  ;;  %v3186_v41 = vrot.slane %v3184_v30, 5  ;;  %v4766_v44 = vcombine.low %v3759_v55, %v3762_v39  ;;  %v1022_v3 = vld [vmem:[#allocation2 + $0x1c] sm:$0xf]  ;;  %v1023_v12 = vld [vmem:[#allocation2 + $0x20] sm:$0x1] }
  0x38   : > { %v4670_v45 = vcombine.low %v2149_v31, %v2159_v4  ;;  %v1103_v46 = vsel %vm5130_vm14, %v1098_v34, %v1102_v11  ;;  %v1107_v47 = vor.u32 %v1106_v36, %v1102_v11  ;;  %v3190_v49 = vshll.u32 %v3112_v28, 16  ;;  %v3108_v22 = vld [vmem:[#allocation2 + $0x18] sm:$0xf] }
  0x39   : > { %v3187_v48 = vor.u32 %v3186_v41, %v3183_v40  ;;  %v3194_v50 = vshrl.u32 %v3112_v28, 16  ;;  %v3200_v51 = vshll.u32 %v3113_v38, 16  ;;  %3911 = vrot.lane.b32.xlu0 %v4766_v44, %s4983_s23  ;;  %v2113_v54 = vshrl.u32 %v2064_v42, 16  ;;  %v3109_v28 = vld [vmem:[#allocation2 + $0x1c] sm:$0xf] }
  0x3a   : > { %2546 = vrot.lane.b32.xlu1 %v4670_v45, %s4984_s24  ;;  %v1108_v17 = vrot.slane %v1107_v47, 4  ;;  %v2116_v32 = vshll.u32 %v2064_v42, 16  ;;  %v2122_v56 = vshll.u32 %v2065_v43, 16  ;;  %v3192_v57 = vrot.slane %v3190_v49, 5  ;;  %v3110_v41 = vld [vmem:[#allocation2 + $0x20] sm:$0x1] }
  0x3b   : > { %v3188_v55 = vrot.slane %v3187_v48, 4  ;;  %v3196_v59 = vrot.slane %v3194_v50, 4  ;;  %v3202_v60 = vrot.slane %v3200_v51, 5  ;;  %v2115_v63 = vrot.slane %v2113_v54, 4  ;;  %v1024_v48 = vld [vmem:[#allocation2 + $0x24] sm:$0xf] }
  0x3c   : > { %v1113_v62 = vsel %vm5130_vm14, %v1108_v17, %v1112_v37  ;;  %v2118_v1 = vrot.slane %v2116_v32, 5  ;;  %v2124_v2 = vrot.slane %v2122_v56, 5  ;;  %v2126_v9 = vshrl.u32 %v2065_v43, 16 }
  0x3d   : > { %v4606_v5 = vcombine.low %v1103_v46, %v1113_v62  ;;  %v3193_v7 = vsel %vm5130_vm14, %v3188_v55, %v3192_v57  ;;  %v3197_v8 = vor.u32 %v3196_v59, %v3192_v57  ;;  %v2132_v11 = vshll.u32 %v2066_v53, 16  ;;  %v1025_v53 = vld [vmem:[#allocation2 + $0x28] sm:$0xf] }
  0x3e   : > { %v2119_v10 = vor.u32 %v2118_v1, %v2115_v63  ;;  %v1115_v13 = vshrl.u32 %v1021_v61, 16  ;;  %v1118_v14 = vshll.u32 %v1021_v61, 16  ;;  %v2128_v19 = vrot.slane %v2126_v9, 4  ;;  %v1026_v61 = vld [vmem:[#allocation2 + $0x2c] sm:$0x1] }
  0x3f   : > { %1500 = vrot.lane.b32.xlu0 %v4606_v5, %s4981_s21  ;;  %v3198_v15 = vrot.slane %v3197_v8, 4  ;;  %v1124_v21 = vshll.u32 %v1022_v3, 16  ;;  %v1128_v18 = vshrl.u32 %v1022_v3, 16  ;;  %v2134_v25 = vrot.slane %v2132_v11, 5  ;;  %v1569_v63 = vld [vmem:[#allocation2 + $0x18] sm:$0xe] }
  0x40   : > { %v2120_v24 = vrot.slane %v2119_v10, 4  ;;  %v1117_v26 = vrot.slane %v1115_v13, 4  ;;  %v1120_v27 = vrot.slane %v1118_v14, 5  ;;  %v2129_v30 = vor.u32 %v2128_v19, %v2124_v2  ;;  %v1571_v8 = vld [vmem:[#allocation2 + $0x20] sm:$0x1] }
  0x41   : > { %v3203_v29 = vsel %vm5130_vm14, %v3198_v15, %v3202_v60  ;;  %v1126_v31 = vrot.slane %v1124_v21, 5  ;;  %v1130_v34 = vrot.slane %v1128_v18, 4  ;;  %v1134_v39 = vshll.u32 %v1023_v12, 16  ;;  %v1572_v13 = vld [vmem:[#allocation2 + $0x24] sm:$0xe] }
  0x42   : > { %v4734_v36 = vcombine.low %v3193_v7, %v3203_v29  ;;  %v2125_v37 = vsel %vm5130_vm14, %v2120_v24, %v2124_v2  ;;  %v1121_v38 = vor.u32 %v1120_v27, %v1117_v26  ;;  %v2130_v4 = vrot.slane %v2129_v30, 4  ;;  %v1570_v7 = vld [vmem:[#allocation2 + $0x1c] sm:$0xf]  ;;  %v1573_v14 = vld [vmem:[#allocation2 + $0x28] sm:$0xf] }
  0x43   : > { %v1131_v40 = vor.u32 %v1130_v34, %v1126_v31  ;;  %v3157_v42 = vshrl.u32 %v3108_v22, 16  ;;  %v3160_v43 = vshll.u32 %v3108_v22, 16  ;;  %v1136_v45 = vrot.slane %v1134_v39, 5  ;;  %v1574_v15 = vld [vmem:[#allocation2 + $0x2c] sm:$0x1] }
  0x44   : > { %3590 = vrot.lane.b32.xlu1 %v4734_v36, %s4985_s25  ;;  %v1122_v44 = vrot.slane %v1121_v38, 4  ;;  %v3166_v46 = vshll.u32 %v3109_v28, 16  ;;  %v3170_v47 = vshrl.u32 %v3109_v28, 16  ;;  %v2135_v49 = vsel %vm5130_vm14, %v2130_v4, %v2134_v25  ;;  %v779_v34 = vld [vmem:[#allocation2 + $0x30] sm:$0xf] }
  0x45   : > { %v1132_v50 = vrot.slane %v1131_v40, 4  ;;  %v3159_v51 = vrot.slane %v3157_v42, 4  ;;  %v3162_v17 = vrot.slane %v3160_v43, 5  ;;  %v4669_v54 = vcombine.low %v2125_v37, %v2135_v49  ;;  %v2070_v4 = vld [vmem:[#allocation2 + $0x24] sm:$0xf] }
  0x46   : > { %v1127_v32 = vsel %vm5130_vm14, %v1122_v44, %v1126_v31  ;;  %v3168_v56 = vrot.slane %v3166_v46, 5  ;;  %v3172_v55 = vrot.slane %v3170_v47, 4  ;;  %v3176_v60 = vshll.u32 %v3110_v41, 16  ;;  %v2071_v44 = vld [vmem:[#allocation2 + $0x28] sm:$0xf] }
  0x47   : > { %v1137_v57 = vsel %vm5130_vm14, %v1132_v50, %v1136_v45  ;;  %v3163_v59 = vor.u32 %v3162_v17, %v3159_v51  ;;  %v1139_v62 = vshrl.u32 %v1024_v48, 16  ;;  %2544 = vrot.lane.b32.xlu0 %v4669_v54, %s4984_s24  ;;  %v1142_v3 = vshll.u32 %v1024_v48, 16  ;;  %v2072_v49 = vld [vmem:[#allocation2 + $0x2c] sm:$0x1]  ;;  %v311_v54 = vld [vmem:[#allocation2 + $0x38] sm:$0x1] }
  0x48   : > { %v4607_v1 = vcombine.low %v1127_v32, %v1137_v57  ;;  %v3173_v2 = vor.u32 %v3172_v55, %v3168_v56  ;;  %v1148_v5 = vshll.u32 %v1025_v53, 16  ;;  %v3178_v10 = vrot.slane %v3176_v60, 5  ;;  %v191_v32 = vld [vmem:[%s5038_s17 + $0x40] sm:$0xff] }
  0x49   : > { %v3164_v9 = vrot.slane %v3163_v59, 4  ;;  %v1141_v11 = vrot.slane %v1139_v62, 4  ;;  %v1152_v12 = vshrl.u32 %v1025_v53, 16  ;;  %v1144_v21 = vrot.slane %v1142_v3, 5  ;;  %v192_v59 = vld [vmem:[%s5038_s17 + $0x48] sm:$0xff] }
  0x4a   : > { %1502 = vrot.lane.b32.xlu1 %v4607_v1, %s4981_s21  ;;  %v3174_v19 = vrot.slane %v3173_v2, 4  ;;  %v1150_v18 = vrot.slane %v1148_v5, 5  ;;  %v1158_v22 = vshll.u32 %v1026_v61, 16  ;;  %v4623_v26 = vrot.slane %v1569_v63, 9  ;;  %v2615_v1 = vld [vmem:[#allocation2 + $0x24] sm:$0xe] }
  0x4b   : > { %v3169_v24 = vsel %vm5130_vm14, %v3164_v9, %v3168_v56  ;;  %v1154_v25 = vrot.slane %v1152_v12, 4  ;;  %v1678_v27 = vrot.slane %v1570_v7, 5  ;;  %v1145_v29 = vor.u32 %v1144_v21, %v1141_v11  ;;  %v258_v2 = vld [vmem:[#allocation2 + $0x3c] sm:$0x1]  ;;  %v4922_v5 = vld [vmem:[#allocation2 + $0x24] sm:$0xff]  }
  0x4c   : > { %v3179_v28 = vsel %vm5130_vm14, %v3174_v19, %v3178_v10  ;;  %v1160_v30 = vrot.slane %v1158_v22, 5  ;;  %v1681_v31 = vrot.slane %v1571_v8, 5  ;;  %v4624_v41 = vrot.slane %v1572_v13, 9  ;;  %v2616_v8 = vld [vmem:[#allocation2 + $0x28] sm:$0xf] }
  0x4d   : > { %v4733_v36 = vcombine.low %v3169_v24, %v3179_v28  ;;  %v1155_v37 = vor.u32 %v1154_v25, %v1150_v18  ;;  %v1679_v38 = vsel %vm5068_vm10, %v4623_v26, %v1678_v27  ;;  %v1680_v39 = vrot.slane %v1678_v27, 4  ;;  %v2617_v13 = vld [vmem:[#allocation2 + $0x2c] sm:$0x1] }
  0x4e   : > { %v1146_v40 = vrot.slane %v1145_v29, 4  ;;  %v1685_v42 = vrot.slane %v1573_v14, 5  ;;  %v1688_v43 = vrot.slane %v1574_v15, 5  ;;  %v493_v47 = vrot.slane %v5153_v16, 4 }
  0x4f   : > { %3588 = vrot.lane.b32.xlu0 %v4733_v36, %s4985_s25  ;;  %v1156_v45 = vrot.slane %v1155_v37, 4  ;;  %v1682_v46 = vsel %vm5068_vm10, %v1680_v39, %v1681_v31  ;;  %v495_v48 = vshrl.u32 %v5156_v23, 16  ;;  %v498_v16 = vshll.u32 %v5156_v23, 16 }
  0x50   : > { %v1151_v50 = vsel %vm5130_vm14, %v1146_v40, %v1150_v18  ;;  %v4639_v51 = vcombine.low %v1679_v38, %v1682_v46  ;;  %v1686_v17 = vsel %vm5068_vm10, %v4624_v41, %v1685_v42  ;;  %v1687_v53 = vrot.slane %v1685_v42, 4 }
  0x51   : > { %v1161_v56 = vsel %vm5130_vm14, %v1156_v45, %v1160_v30  ;;  %v5233_v55 = vrot.slane %v495_v48, 7  ;;  %v780_v57 = vsel %vm5074_vm11, %v5178_v58, %v779_v34  ;;  %v2161_v62 = vshrl.u32 %v2070_v4, 16 }
  0x52   : > { %v4608_v60 = vcombine.low %v1151_v50, %v1161_v56  ;;  %v1689_v61 = vsel %vm5068_vm10, %v1687_v53, %v1688_v43  ;;  %781 = vst [vmem:[#allocation2 + $0x30] sm:$0xf] %v780_v57  ;;  %v2164_v63 = vshll.u32 %v2070_v4, 16  ;;  %v2170_v7 = vshll.u32 %v2071_v44, 16 }
  0x53   : > { %1826 = vrot.lane.b32.xlu0 %v4639_v51, %s4979_s19  ;;  %v4640_v3 = vcombine.low %v1686_v17, %v1689_v61  ;;  %v500_v23 = vor.u32 %v498_v16, %v5233_v55  ;;  %v4812_v9 = vpack.c.bf16 %v191_v32, %v191_v32  ;;  %v2163_v58 = vrot.slane %v2161_v62, 4 }
  0x54   : > { %1504 = vrot.lane.b32.xlu1 %v4608_v60, %s4981_s21  ;;  %v2166_v10 = vrot.slane %v2164_v63, 5  ;;  %v2174_v11 = vshrl.u32 %v2071_v44, 16  ;;  %v2180_v12 = vshll.u32 %v2072_v49, 16  ;;  %v2172_v15 = vrot.slane %v2170_v7, 5 }
  0x55   : > { %v501_v14 = vsel %vm5057_vm9, %v493_v47, %v500_v23  ;;  %v312_v19 = vsel %vm5042_vm5, 0, %v311_v54  ;;  %v2721_v22 = vrot.slane %v2616_v8, 5  ;;  %v4813_v24 = vpack.c.bf16 %v192_v59, %v192_v59 }
  0x56   : > { %782 = vst.msk [vmem:[#allocation2 + $0x34] sm:$0xf] %vm231_vm0, %v501_v14  ;;  %v2167_v21 = vor.u32 %v2166_v10, %v2163_v58  ;;  %v2176_v18 = vrot.slane %v2174_v11, 4  ;;  %313 = vst [vmem:[#allocation2 + $0x38] sm:$0x1] %v312_v19  ;;  %v4687_v25 = vrot.slane %v2615_v1, 9 }
  0x57   : > { %2003 = vrot.lane.b32.xlu0 %v4922_v5, %s4978_s18  ;;  %v2724_v26 = vrot.slane %v2617_v13, 5  ;;  %v259_v27 = vsel %vm5016_vm3, 0, %v258_v2  ;;  %v504_v28 = vshrl.u32 %v4812_v9, 16  ;;  %v2182_v31 = vrot.slane %v2180_v12, 5 }
  0x58   : > { %1828 = vrot.lane.b32.xlu1 %v4640_v3, %s4979_s19  ;;  %v2168_v29 = vrot.slane %v2167_v21, 4  ;;  %v2177_v30 = vor.u32 %v2176_v18, %v2172_v15  ;;  %v2723_v34 = vrot.slane %v2721_v22, 4  ;;  %260 = vst [vmem:[#allocation2 + $0x3c] sm:$0x1] %v259_v27  ;;  %v502_v36 = vrot.slane %v5233_v55, 4 }
  0x59   : > { %v2073_v37 = vld [vmem:[#allocation2 + $0x30] sm:$0xf]  ;;  %v507_v38 = vshll.u32 %v4812_v9, 16  ;;  %v2722_v42 = vsel %vm5068_vm10, %v4687_v25, %v2721_v22  ;;  %v506_v44 = vrot.slane %v504_v28, 7  ;;  %v512_v45 = vshrl.u32 %v4813_v24, 16 }
  0x5a   : > { %v2173_v39 = vsel %vm5130_vm14, %v2168_v29, %v2172_v15  ;;  %v2178_v4 = vrot.slane %v2177_v30, 4  ;;  %v2185_v40 = vshrl.u32 %v2073_v37, 16  ;;  %v2188_v41 = vshll.u32 %v2073_v37, 16  ;;  %v2618_v49 = vld [vmem:[#allocation2 + $0x30] sm:$0xe] }
  0x5b   : > { %v2725_v43 = vsel %vm5068_vm10, %v2723_v34, %v2724_v26  ;;  %v509_v16 = vor.u32 %v507_v38, %v506_v44  ;;  %v5267_v61 = vrot.slane %v512_v45, 7  ;;  %v3114_v62 = vld [vmem:[#allocation2 + $0x30] sm:$0xf]  ;;  %v510_v63 = vrot.slane %v506_v44, 4  ;;  %v314_v9 = vld [vmem:[#allocation2 + $0x44] sm:$0x1] }
  0x5c   : > { %v2183_v46 = vsel %vm5130_vm14, %v2178_v4, %v2182_v31  ;;  %v2187_v47 = vrot.slane %v2185_v40, 4  ;;  %v2190_v48 = vrot.slane %v2188_v41, 5  ;;  %v4703_v56 = vcombine.low %v2722_v42, %v2725_v43  ;;  %v3659_v13 = vld [vmem:[#allocation2 + $0x30] sm:$0xe] }
  0x5d   : > { %v4923_v50 = vld [vmem:[#allocation2 + $0x30] sm:$0xff]   ;;  %v4671_v51 = vcombine.low %v2173_v39, %v2183_v46  ;;  %v783_v17 = vld [vmem:[#allocation2 + $0x38] sm:$0x1]  ;;  %v515_v1 = vshll.u32 %v4813_v24, 16  ;;  %v4688_v8 = vrot.slane %v2618_v49, 9  ;;  %v3205_v12 = vshrl.u32 %v3114_v62, 16 }
  0x5e   : > { %v784_v53 = vsel %vm5016_vm3, %v502_v36, %v783_v17  ;;  %v2074_v54 = vld [vmem:[#allocation2 + $0x34] sm:$0xf]  ;;  %v2191_v32 = vor.u32 %v2190_v48, %v2187_v47  ;;  %2005 = vrot.lane.b32.xlu1 %v4923_v50, %s4978_s18  ;;  %v519_v19 = vrot.slane %v5267_v61, 4  ;;  %v3208_v21 = vshll.u32 %v3114_v62, 16  ;;  %v5274_v24 = vld [vmem:[#allocation2 + $0x30] sm:$0xf] }
  0x5f   : > { %v2619_v55 = vld [vmem:[#allocation2 + $0x34] sm:$0xf]  ;;  %2548 = vrot.lane.b32.xlu0 %v4671_v51, %s4984_s24  ;;  %785 = vst [vmem:[#allocation2 + $0x38] sm:$0x1] %v784_v53  ;;  %v2194_v57 = vshll.u32 %v2074_v54, 16  ;;  %v2198_v59 = vshrl.u32 %v2074_v54, 16  ;;  %v517_v10 = vor.u32 %v515_v1, %v5267_v61 }
  0x60   : > { %v2728_v60 = vrot.slane %v2619_v55, 5  ;;  %v786_v2 = vld [vmem:[#allocation2 + $0x3c] sm:$0xf]  ;;  %v3115_v3 = vld [vmem:[#allocation2 + $0x34] sm:$0xf]  ;;  %v2192_v5 = vrot.slane %v2191_v32, 4 }
  0x61   : > { %v2196_v23 = vrot.slane %v2194_v57, 5  ;;  %v2200_v7 = vrot.slane %v2198_v59, 4  ;;  %v787_v11 = vsel %vm5074_vm11, %v509_v16, %v786_v2  ;;  %v4924_v15 = vld [vmem:[#allocation2 + $0x30] sm:$0xff]   ;;  %v3214_v18 = vshll.u32 %v3115_v3, 16 }
  0x62   : > { %v2730_v58 = vrot.slane %v2728_v60, 4  ;;  %788 = vst [vmem:[#allocation2 + $0x3c] sm:$0xf] %v787_v11  ;;  %v3660_v22 = vld [vmem:[#allocation2 + $0x34] sm:$0xf]  ;;  %v518_v25 = vsel %vm5057_vm9, %v510_v63, %v517_v10  ;;  %v3207_v26 = vrot.slane %v3205_v12, 4  ;;  %v2729_v39 = vsel %vm5068_vm10, %v4688_v8, %v2728_v60 }
  0x63   : > { %v2201_v14 = vor.u32 %v2200_v7, %v2196_v23  ;;  %2869 = vrot.lane.b32.xlu0 %v4703_v56, %s4982_s22  ;;  %v3218_v27 = vshrl.u32 %v3115_v3, 16  ;;  %v315_v28 = vsel %vm5042_vm5, 0, %v314_v9  ;;  %789 = vst.msk [vmem:[#allocation2 + $0x40] sm:$0xf] %vm231_vm0, %v518_v25  ;;  %v3210_v30 = vrot.slane %v3208_v21, 5 }
  0x64   : > { %v3216_v31 = vrot.slane %v3214_v18, 5  ;;  %316 = vst [vmem:[#allocation2 + $0x44] sm:$0x1] %v315_v28  ;;  %v4751_v34 = vrot.slane %v3659_v13, 9  ;;  %v2197_v37 = vsel %vm5130_vm14, %v2192_v5, %v2196_v23  ;;  %v3765_v46 = vrot.slane %v3660_v22, 5  ;;  %v193_v22 = vld [vmem:[%s5038_s17 + $0x50] sm:$0xff] }
  0x65   : > { %v2202_v29 = vrot.slane %v2201_v14, 4  ;;  %v3211_v42 = vor.u32 %v3210_v30, %v3207_v26  ;;  %v3220_v43 = vrot.slane %v3218_v27, 4  ;;  %v1163_v48 = vshrl.u32 %v5274_v24, 16  ;;  %v1028_v60 = vld [vmem:[#allocation2 + $0x34] sm:$0xf]  ;;  %v194_v30 = vld [vmem:[%s5038_s17 + $0x58] sm:$0xff] }
  0x66   : > { %v2075_v36 = vld [vmem:[#allocation2 + $0x38] sm:$0x1]  ;;  %v3766_v32 = vsel %vm5068_vm10, %v4751_v34, %v3765_v46  ;;  %v3767_v56 = vrot.slane %v3765_v46, 4  ;;  %v1172_v21 = vshll.u32 %v1028_v60, 16  ;;  %v1176_v18 = vshrl.u32 %v1028_v60, 16 }
  0x67   : > { %v2620_v38 = vld [vmem:[#allocation2 + $0x38] sm:$0x1]  ;;  %v2204_v40 = vshll.u32 %v2075_v36, 16  ;;  %3047 = vrot.lane.b32.xlu0 %v4924_v15, %s4980_s20  ;;  %v3212_v51 = vrot.slane %v3211_v42, 4  ;;  %v3221_v17 = vor.u32 %v3220_v43, %v3216_v31  ;;  %v1165_v14 = vrot.slane %v1163_v48, 4 }
  0x68   : > { %v3116_v4 = vld [vmem:[#allocation2 + $0x38] sm:$0x1]  ;;  %v2731_v41 = vrot.slane %v2620_v38, 5  ;;  %v1166_v15 = vshll.u32 %v5274_v24, 16  ;;  %v1174_v34 = vrot.slane %v1172_v21, 5  ;;  %v1178_v36 = vrot.slane %v1176_v18, 4 }
  0x69   : > { %v3661_v44 = vld [vmem:[#allocation2 + $0x38] sm:$0x1]  ;;  %v3224_v45 = vshll.u32 %v3116_v4, 16  ;;  %v2206_v49 = vrot.slane %v2204_v40, 5  ;;  %v3117_v54 = vld [vmem:[#allocation2 + $0x3c] sm:$0xf]  ;;  %v3217_v16 = vsel %vm5130_vm14, %v3212_v51, %v3216_v31  ;;  %v5308_v48 = vpack.c.bf16 %v193_v22, %v193_v22 }
  0x6a   : > { %v3768_v47 = vrot.slane %v3661_v44, 5  ;;  %v2732_v50 = vsel %vm5068_vm10, %v2730_v58, %v2731_v41  ;;  %v3222_v57 = vrot.slane %v3221_v17, 4  ;;  %v3229_v59 = vshrl.u32 %v3117_v54, 16  ;;  %v3118_v23 = vld [vmem:[#allocation2 + $0x40] sm:$0xf] }
  0x6b   : > { %v3226_v53 = vrot.slane %v3224_v45, 5  ;;  %v2207_v55 = vsel %vm5130_vm14, %v2202_v29, %v2206_v49  ;;  %v4704_v62 = vcombine.low %v2729_v39, %v2732_v50  ;;  %v790_v63 = vld [vmem:[#allocation2 + $0x44] sm:$0x1]  ;;  %v3232_v1 = vshll.u32 %v3117_v54, 16  ;;  %v1029_v9 = vld [vmem:[#allocation2 + $0x38] sm:$0x1] }
  0x6c   : > { %v4672_v61 = vcombine.low %v2197_v37, %v2207_v55  ;;  %v3769_v2 = vsel %vm5068_vm10, %v3767_v56, %v3768_v47  ;;  %v791_v5 = vsel %vm5016_vm3, %v519_v19, %v790_v63  ;;  %v3231_v7 = vrot.slane %v3229_v59, 4  ;;  %v3662_v13 = vld [vmem:[#allocation2 + $0x3c] sm:$0xe]  ;;  %v3663_v19 = vld [vmem:[#allocation2 + $0x40] sm:$0xf] }
  0x6d   : > { %v3227_v3 = vsel %vm5130_vm14, %v3222_v57, %v3226_v53  ;;  %v4767_v8 = vcombine.low %v3766_v32, %v3769_v2  ;;  %792 = vst [vmem:[#allocation2 + $0x44] sm:$0x1] %v791_v5  ;;  %v3234_v10 = vrot.slane %v3232_v1, 5  ;;  %v3238_v11 = vshll.u32 %v3118_v23, 16  ;;  %v1030_v29 = vld [vmem:[#allocation2 + $0x3c] sm:$0xf] }
  0x6e   : > { %2550 = vrot.lane.b32.xlu1 %v4672_v61, %s4984_s24  ;;  %v4735_v58 = vcombine.low %v3217_v16, %v3227_v3  ;;  %v3242_v12 = vshrl.u32 %v3118_v23, 16  ;;  %v1182_v28 = vshll.u32 %v1029_v9, 16  ;;  %v1168_v31 = vrot.slane %v1166_v15, 5  ;;  %v4925_v38 = vld [vmem:[#allocation2 + $0x3c] sm:$0xff]   ;;  %v1575_v56 = vld [vmem:[#allocation2 + $0x30] sm:$0xe] }
  0x6f   : > { %v3235_v25 = vor.u32 %v3234_v10, %v3231_v7  ;;  %v3240_v26 = vrot.slane %v3238_v11, 5  ;;  %v4752_v37 = vrot.slane %v3662_v13, 9  ;;  %v3772_v40 = vrot.slane %v3663_v19, 5  ;;  %v1031_v47 = vld [vmem:[#allocation2 + $0x40] sm:$0xf] }
  0x70   : > { %3592 = vrot.lane.b32.xlu0 %v4735_v58, %s4985_s25  ;;  %v3244_v27 = vrot.slane %v3242_v12, 4  ;;  %v1184_v4 = vrot.slane %v1182_v28, 5  ;;  %v1169_v41 = vor.u32 %v1168_v31, %v1165_v14  ;;  %v1179_v42 = vor.u32 %v1178_v36, %v1174_v34  ;;  %v1576_v2 = vld [vmem:[#allocation2 + $0x34] sm:$0xf]  ;;  %v1577_v3 = vld [vmem:[#allocation2 + $0x38] sm:$0x1] }
  0x71   : > { %v3236_v24 = vrot.slane %v3235_v25, 4  ;;  %v1187_v43 = vshrl.u32 %v1030_v29, 16  ;;  %v1190_v44 = vshll.u32 %v1030_v29, 16  ;;  %v3774_v46 = vrot.slane %v3772_v40, 4  ;;  %v1578_v9 = vld [vmem:[#allocation2 + $0x3c] sm:$0xe] }
  0x72   : > { %2871 = vrot.lane.b32.xlu1 %v4704_v62, %s4982_s22  ;;  %v3245_v39 = vor.u32 %v3244_v27, %v3240_v26  ;;  %v5310_v49 = vpack.c.bf16 %v194_v30, %v194_v30  ;;  %v1170_v17 = vrot.slane %v1169_v41, 4  ;;  %v1180_v53 = vrot.slane %v1179_v42, 4  ;;  %v1579_v58 = vld [vmem:[#allocation2 + $0x40] sm:$0xf]  ;;  %v261_v10 = vld [vmem:[#allocation2 + $0x48] sm:$0x1] }
  0x73   : > { %v3241_v51 = vsel %vm5130_vm14, %v3236_v24, %v3240_v26  ;;  %v3773_v32 = vsel %vm5068_vm10, %v4752_v37, %v3772_v40  ;;  %v1189_v59 = vrot.slane %v1187_v43, 4  ;;  %v1192_v60 = vrot.slane %v1190_v44, 5  ;;  %v195_v36 = vld [vmem:[%s5038_s17 + $0x60] sm:$0xff]  ;;  %v2076_v40 = vld [vmem:[#allocation2 + $0x3c] sm:$0xf] }
  0x74   : > { %v3246_v45 = vrot.slane %v3245_v39, 4  ;;  %3913 = vrot.lane.b32.xlu0 %v4767_v8, %s4983_s23  ;;  %v3119_v50 = vld [vmem:[#allocation2 + $0x44] sm:$0x1]  ;;  %v1175_v61 = vsel %vm5130_vm14, %v1170_v17, %v1174_v34  ;;  %v1185_v62 = vsel %vm5130_vm14, %v1180_v53, %v1184_v4  ;;  %v1196_v63 = vshll.u32 %v1031_v47, 16 }
  0x75   : > { %v3664_v54 = vld [vmem:[#allocation2 + $0x44] sm:$0x1]  ;;  %v3248_v55 = vshll.u32 %v3119_v50, 16  ;;  %v1200_v1 = vshrl.u32 %v1031_v47, 16  ;;  %v4609_v23 = vcombine.low %v1175_v61, %v1185_v62  ;;  %v1193_v8 = vor.u32 %v1192_v60, %v1189_v59 }
  0x76   : > { %3049 = vrot.lane.b32.xlu1 %v4925_v38, %s4980_s20  ;;  %v3775_v16 = vrot.slane %v3664_v54, 5  ;;  %v1032_v57 = vld [vmem:[#allocation2 + $0x44] sm:$0x1]  ;;  %v1198_v12 = vrot.slane %v1196_v63, 5  ;;  %v4625_v19 = vrot.slane %v1575_v56, 9  ;;  %v1692_v22 = vrot.slane %v1576_v2, 5 }
  0x77   : > { %v3250_v5 = vrot.slane %v3248_v55, 5  ;;  %v1202_v13 = vrot.slane %v1200_v1, 4  ;;  %v1206_v14 = vshll.u32 %v1032_v57, 16  ;;  %v1580_v15 = vld [vmem:[#allocation2 + $0x44] sm:$0x1]  ;;  %v1194_v18 = vrot.slane %v1193_v8, 4 }
  0x78   : > { %v3776_v7 = vsel %vm5068_vm10, %v3774_v46, %v3775_v16  ;;  %v1695_v28 = vrot.slane %v1577_v3, 5  ;;  %v1693_v30 = vsel %vm5068_vm10, %v4625_v19, %v1692_v22  ;;  %v1694_v31 = vrot.slane %v1692_v22, 4  ;;  %v4939_v37 = vld [vmem:[%s6643_s1] sm:$0xff]   ;;  %v196_v56 = vld [vmem:[%s5038_s17 + $0x68] sm:$0xff] }
  0x79   : > { %v4768_v11 = vcombine.low %v3773_v32, %v3776_v7  ;;  %v3251_v21 = vsel %vm5130_vm14, %v3246_v45, %v3250_v5  ;;  %v1203_v26 = vor.u32 %v1202_v13, %v1198_v12  ;;  %v1208_v27 = vrot.slane %v1206_v14, 5  ;;  %v2077_v45 = vld [vmem:[#allocation2 + $0x40] sm:$0xf]  ;;  %4855 = vmatprep.subr.bf16.mxu0 %v4939_v37  ;;  %4893 = vmatprep.subr.bf16.mxu1 %v4939_v37  ;;  %v4942_v55 = vld [vmem:[%s6643_s1 + $0x8] sm:$0xff]   ;;  %v2078_v59 = vld [vmem:[#allocation2 + $0x44] sm:$0x1] }
  0x7a   : > { %v4736_v25 = vcombine.low %v3241_v51, %v3251_v21  ;;  %v1199_v29 = vsel %vm5130_vm14, %v1194_v18, %v1198_v12  ;;  %v4626_v34 = vrot.slane %v1578_v9, 9  ;;  %v1699_v24 = vrot.slane %v1579_v58, 5  ;;  %v317_v51 = vld [vmem:[#allocation2 + $0x50] sm:$0x1]  ;;  %4856 = vmatpush3.bf16.msra.mxu0 %v4939_v37  ;;  %4896 = vmatpush3.bf16.msra.mxu1 %v4939_v37  ;;  %v4926_v57 = vld [vmem:[#allocation2 + $0x3c] sm:$0xff]  }
  0x7b   : > { %3915 = vrot.lane.b32.xlu0 %v4768_v11, %s4983_s23  ;;  %v1204_v38 = vrot.slane %v1203_v26, 4  ;;  %v1702_v39 = vrot.slane %v1580_v15, 5  ;;  %v262_v4 = vsel %vm5016_vm3, 0, %v261_v10  ;;  %v1696_v41 = vsel %vm5068_vm10, %v1694_v31, %v1695_v28  ;;  %v2622_v3 = vld [vmem:[#allocation2 + $0x40] sm:$0xf]  ;;  %4857 = vmatprep.subr.bf16.mxu0 %v4942_v55 }
  0x7c   : > { %3594 = vrot.lane.b32.xlu1 %v4736_v25, %s4985_s25  ;;  %263 = vst [vmem:[#allocation2 + $0x48] sm:$0x1] %v262_v4  ;;  %v521_v42 = vshrl.u32 %v5308_v48, 16  ;;  %v524_v43 = vshll.u32 %v5308_v48, 16  ;;  %v529_v44 = vshrl.u32 %v5310_v49, 16  ;;  %v4641_v47 = vcombine.low %v1693_v30, %v1696_v41  ;;  %4894 = vmatprep.subr.bf16.mxu1 %v4942_v55 }
  0x7d   : > { %v1209_v46 = vsel %vm5130_vm14, %v1204_v38, %v1208_v27  ;;  %v1701_v50 = vrot.slane %v1699_v24, 4  ;;  %v5344_v17 = vpack.c.bf16 %v195_v36, %v195_v36  ;;  %v1700_v53 = vsel %vm5068_vm10, %v4626_v34, %v1699_v24  ;;  %v264_v5 = vld [vmem:[#allocation2 + $0x54] sm:$0x1]  ;;  %v2621_v9 = vld [vmem:[#allocation2 + $0x3c] sm:$0xe] }
  0x7e   : > { %v523_v48 = vrot.slane %v521_v42, 7  ;;  %v5348_v54 = vrot.slane %v529_v44, 7  ;;  %v532_v32 = vshll.u32 %v5310_v49, 16  ;;  %v4610_v16 = vcombine.low %v1199_v29, %v1209_v46  ;;  %4858 = vmatpush3.bf16.msra.mxu0 %v4942_v55  ;;  %4897 = vmatpush3.bf16.msra.mxu1 %v4942_v55  ;;  %v2623_v14 = vld [vmem:[#allocation2 + $0x44] sm:$0x1] }
  0x7f   : > { %1830 = vrot.lane.b32.xlu0 %v4641_v47, %s4979_s19  ;;  %v2209_v60 = vshrl.u32 %v2076_v40, 16  ;;  %v2212_v61 = vshll.u32 %v2076_v40, 16  ;;  %v2218_v62 = vshll.u32 %v2077_v45, 16  ;;  %v1703_v63 = vsel %vm5068_vm10, %v1701_v50, %v1702_v39  ;;  %v320_v28 = vld [vmem:[#allocation2 + $0x5c] sm:$0x1] }
  0x80   : > { %1506 = vrot.lane.b32.xlu1 %v4609_v23, %s4981_s21  ;;  %v526_v1 = vor.u32 %v524_v43, %v523_v48  ;;  %v527_v49 = vrot.slane %v523_v48, 4  ;;  %v534_v2 = vor.u32 %v532_v32, %v5348_v54  ;;  %v4817_v58 = vpack.c.bf16 %v196_v56, %v196_v56  ;;  %v267_v36 = vld [vmem:[#allocation2 + $0x60] sm:$0x1]  ;;  %v197_v43 = vld [vmem:[%s5038_s17 + $0x70] sm:$0xff] }
  0x81   : > { %v2211_v23 = vrot.slane %v2209_v60, 4  ;;  %v2214_v7 = vrot.slane %v2212_v61, 5  ;;  %v2220_v8 = vrot.slane %v2218_v62, 5  ;;  %v2222_v11 = vshrl.u32 %v2077_v45, 16 }
  0x82   : > { %v535_v10 = vsel %vm5057_vm9, %v527_v49, %v534_v2  ;;  %v2228_v12 = vshll.u32 %v2078_v59, 16  ;;  %v318_v13 = vsel %vm5042_vm5, 0, %v317_v51  ;;  %v4642_v15 = vcombine.low %v1700_v53, %v1703_v63 }
  0x83   : > { %2007 = vrot.lane.b32.xlu0 %v4926_v57, %s4978_s18  ;;  %v793_v21 = vld [vmem:[#allocation2 + $0x48] sm:$0xf]  ;;  %796 = vst.msk [vmem:[#allocation2 + $0x4c] sm:$0xf] %vm231_vm0, %v535_v10  ;;  %v2215_v18 = vor.u32 %v2214_v7, %v2211_v23  ;;  %319 = vst [vmem:[#allocation2 + $0x50] sm:$0x1] %v318_v13  ;;  %v5388_v56 = vpack.c.bf16 %v197_v43, %v197_v43 }
  0x84   : > { %1508 = vrot.lane.b32.xlu1 %v4610_v16, %s4981_s21  ;;  %v2735_v19 = vrot.slane %v2622_v3, 5  ;;  %v794_v22 = vsel %vm5074_vm11, %v526_v1, %v793_v21  ;;  %v2224_v25 = vrot.slane %v2222_v11, 4  ;;  %v4689_v26 = vrot.slane %v2621_v9, 9 }
  0x85   : > { %v265_v27 = vsel %vm5016_vm3, 0, %v264_v5  ;;  %795 = vst [vmem:[#allocation2 + $0x48] sm:$0xf] %v794_v22  ;;  %v2216_v29 = vrot.slane %v2215_v18, 4  ;;  %v2738_v31 = vrot.slane %v2623_v14, 5  ;;  %v538_v34 = vshrl.u32 %v5344_v17, 16 }
  0x86   : > { %v2737_v30 = vrot.slane %v2735_v19, 4  ;;  %266 = vst [vmem:[#allocation2 + $0x54] sm:$0x1] %v265_v27  ;;  %v2225_v37 = vor.u32 %v2224_v25, %v2220_v8  ;;  %v2230_v38 = vrot.slane %v2228_v12, 5  ;;  %v546_v24 = vshrl.u32 %v4817_v58, 16 }
  0x87   : > { %v549_v39 = vshll.u32 %v4817_v58, 16  ;;  %v536_v4 = vrot.slane %v5348_v54, 4  ;;  %v540_v40 = vrot.slane %v538_v34, 7  ;;  %v541_v41 = vshll.u32 %v5344_v17, 16 }
  0x88   : > { %1832 = vrot.lane.b32.xlu1 %v4642_v15, %s4979_s19  ;;  %v321_v42 = vsel %vm5042_vm5, 0, %v320_v28  ;;  %v2221_v44 = vsel %vm5130_vm14, %v2216_v29, %v2220_v8  ;;  %v2226_v45 = vrot.slane %v2225_v37, 4  ;;  %v548_v46 = vrot.slane %v546_v24, 7 }
  0x89   : > { %322 = vst [vmem:[#allocation2 + $0x5c] sm:$0x1] %v321_v42  ;;  %v268_v47 = vsel %vm5016_vm3, 0, %v267_v36  ;;  %v2736_v50 = vsel %vm5068_vm10, %v4689_v26, %v2735_v19  ;;  %v2739_v51 = vsel %vm5068_vm10, %v2737_v30, %v2738_v31  ;;  %v544_v17 = vrot.slane %v540_v40, 4 }
  0x8a   : > { %269 = vst [vmem:[#allocation2 + $0x60] sm:$0x1] %v268_v47  ;;  %v2231_v53 = vsel %vm5130_vm14, %v2226_v45, %v2230_v38  ;;  %v797_v48 = vld [vmem:[#allocation2 + $0x50] sm:$0x1]  ;;  %v2080_v54 = vld [vmem:[#allocation2 + $0x4c] sm:$0xf]  ;;  %v551_v32 = vor.u32 %v549_v39, %v548_v46  ;;  %v4705_v63 = vcombine.low %v2736_v50, %v2739_v51  ;;  %v543_v49 = vor.u32 %v541_v41, %v540_v40 }
  0x8b   : > { %v4673_v55 = vcombine.low %v2221_v44, %v2231_v53  ;;  %v798_v16 = vsel %vm5016_vm3, %v536_v4, %v797_v48  ;;  %v2242_v57 = vshll.u32 %v2080_v54, 16  ;;  %v2246_v59 = vshrl.u32 %v2080_v54, 16  ;;  %v2625_v60 = vld [vmem:[#allocation2 + $0x4c] sm:$0xf]  ;;  %v198_v4 = vld [vmem:[%s5038_s17 + $0x78] sm:$0xff] }
  0x8c   : > { %v4927_v61 = vld [vmem:[#allocation2 + $0x48] sm:$0xff]   ;;  %799 = vst [vmem:[#allocation2 + $0x50] sm:$0x1] %v798_v16  ;;  %v2742_v1 = vrot.slane %v2625_v60, 5  ;;  %v552_v2 = vsel %vm5057_vm9, %v544_v17, %v551_v32  ;;  %v553_v58 = vrot.slane %v548_v46, 4  ;;  %v555_v10 = vshrl.u32 %v5388_v56, 16 }
  0x8d   : > { %v2079_v62 = vld [vmem:[#allocation2 + $0x48] sm:$0xf]  ;;  %2552 = vrot.lane.b32.xlu0 %v4673_v55, %s4984_s24  ;;  %v5395_v23 = vrot.slane %v2242_v57, 5  ;;  %v2248_v7 = vrot.slane %v2246_v59, 4  ;;  %803 = vst.msk [vmem:[#allocation2 + $0x58] sm:$0xf] %vm231_vm0, %v552_v2  ;;  %2009 = vrot.lane.b32.xlu1 %v4927_v61, %s4978_s18  ;;  %v5420_v2 = vpack.c.bf16 %v198_v4, %v198_v4 }
  0x8e   : > { %v2233_v3 = vshrl.u32 %v2079_v62, 16  ;;  %v2236_v5 = vshll.u32 %v2079_v62, 16  ;;  %v2624_v8 = vld [vmem:[#allocation2 + $0x48] sm:$0xe]  ;;  %v558_v11 = vshll.u32 %v5388_v56, 16  ;;  %v2744_v28 = vrot.slane %v2742_v1, 4 }
  0x8f   : > { %v4690_v9 = vrot.slane %v2624_v8, 9  ;;  %v2249_v14 = vor.u32 %v2248_v7, %v5395_v23  ;;  %v800_v15 = vld [vmem:[#allocation2 + $0x54] sm:$0xf]  ;;  %v3120_v21 = vld [vmem:[#allocation2 + $0x48] sm:$0xf]  ;;  %vm6647_vm15 = vcmask 31744  }
  0x90   : > { %v2235_v12 = vrot.slane %v2233_v3, 4  ;;  %v2238_v13 = vrot.slane %v2236_v5, 5  ;;  %v801_v18 = vsel %vm5074_vm11, %v543_v49, %v800_v15  ;;  %v3121_v19 = vld [vmem:[#allocation2 + $0x4c] sm:$0xf]  ;;  %v3253_v22 = vshrl.u32 %v3120_v21, 16 }
  0x91   : > { %v3256_v25 = vshll.u32 %v3120_v21, 16  ;;  %v804_v26 = vld [vmem:[#allocation2 + $0x5c] sm:$0x1]  ;;  %2873 = vrot.lane.b32.xlu0 %v4705_v63, %s4982_s22  ;;  %v4928_v29 = vld [vmem:[#allocation2 + $0x48] sm:$0xff]   ;;  %802 = vst [vmem:[#allocation2 + $0x54] sm:$0xf] %v801_v18  ;;  %v2743_v45 = vsel %vm5068_vm10, %v4690_v9, %v2742_v1 }
  0x92   : > { %v2239_v27 = vor.u32 %v2238_v13, %v2235_v12  ;;  %v3262_v30 = vshll.u32 %v3121_v19, 16  ;;  %v3266_v31 = vshrl.u32 %v3121_v19, 16  ;;  %v2250_v36 = vrot.slane %v2249_v14, 4  ;;  %v3665_v39 = vld [vmem:[#allocation2 + $0x48] sm:$0xe] }
  0x93   : > { %v3255_v37 = vrot.slane %v3253_v22, 4  ;;  %v3258_v38 = vrot.slane %v3256_v25, 5  ;;  %v805_v24 = vsel %vm5016_vm3, %v553_v58, %v804_v26  ;;  %v2081_v40 = vld [vmem:[#allocation2 + $0x50] sm:$0x1]  ;;  %v5412_v51 = vpop.permute.xlu1 %1822  ;;  %v4753_v32 = vrot.slane %v3665_v39, 9 }
  0x94   : > { %v5405_v34 = vpop.permute.xlu0 %1999  ;;  %v2240_v41 = vrot.slane %v2239_v27, 4  ;;  %v2626_v42 = vld [vmem:[#allocation2 + $0x50] sm:$0x1]  ;;  %v3264_v43 = vrot.slane %v3262_v30, 5  ;;  %806 = vst [vmem:[#allocation2 + $0x5c] sm:$0x1] %v805_v24 }
  0x95   : > { %v2252_v44 = vshll.u32 %v2081_v40, 16  ;;  %v2745_v46 = vrot.slane %v2626_v42, 5  ;;  %v3122_v47 = vld [vmem:[#allocation2 + $0x50] sm:$0x1]  ;;  %v3259_v50 = vor.u32 %v3258_v38, %v3255_v37  ;;  %3051 = vrot.lane.b32.xlu0 %v4928_v29, %s4980_s20  ;;  %v3268_v53 = vrot.slane %v3266_v31, 4 }
  0x96   : > { %v2245_v17 = vsel %vm5130_vm14, %v2240_v41, %v5395_v23  ;;  %v3272_v48 = vshll.u32 %v3122_v47, 16  ;;  %v3124_v54 = vld [vmem:[#allocation2 + $0x58] sm:$0xf]  ;;  %v3666_v60 = vld [vmem:[#allocation2 + $0x4c] sm:$0xf]  ;;  %vm1546_vm2 = vcmask 64544  }
  0x97   : > { %v2254_v55 = vrot.slane %v2252_v44, 5  ;;  %v2746_v16 = vsel %vm5068_vm10, %v2744_v28, %v2745_v46  ;;  %v3260_v57 = vrot.slane %v3259_v50, 4  ;;  %v3286_v59 = vshll.u32 %v3124_v54, 16  ;;  %v3667_v1 = vld [vmem:[#allocation2 + $0x50] sm:$0x1]  ;;  %v5428_v25 = vpop.permute.xlu1 %2001 }
  0x98   : > { %v3269_v61 = vor.u32 %v3268_v53, %v3264_v43  ;;  %v3274_v62 = vrot.slane %v3272_v48, 5  ;;  %v3290_v63 = vshrl.u32 %v3124_v54, 16  ;;  %v1033_v49 = vld [vmem:[#allocation2 + $0x48] sm:$0xf]  ;;  %v5422_v3 = vpop.permute.xlu0 %3043  ;;  %v4706_v23 = vcombine.low %v2743_v45, %v2746_v16  ;;  %v3123_v8 = vld [vmem:[#allocation2 + $0x54] sm:$0xf] }
  0x99   : > { %v2255_v5 = vsel %vm5130_vm14, %v2250_v36, %v2254_v55  ;;  %v3265_v7 = vsel %vm5130_vm14, %v3260_v57, %v3264_v43  ;;  %v3288_v9 = vrot.slane %v3286_v59, 5  ;;  %v3277_v13 = vshrl.u32 %v3123_v8, 16  ;;  %v1034_v30 = vld [vmem:[#allocation2 + $0x4c] sm:$0xf]  ;;  %v1035_v24 = vld [vmem:[#allocation2 + $0x50] sm:$0x1] }
  0x9a   : > { %v4674_v58 = vcombine.low %v2245_v17, %v2255_v5  ;;  %v3270_v12 = vrot.slane %v3269_v61, 4  ;;  %v3280_v14 = vshll.u32 %v3123_v8, 16  ;;  %v3292_v21 = vrot.slane %v3290_v63, 4  ;;  %v3668_v39 = vld [vmem:[#allocation2 + $0x54] sm:$0xe] }
  0x9b   : > { %v3125_v15 = vld [vmem:[#allocation2 + $0x5c] sm:$0x1]  ;;  %v3779_v18 = vrot.slane %v3666_v60, 5  ;;  %v3782_v19 = vrot.slane %v3667_v1, 5  ;;  %v1211_v22 = vshrl.u32 %v1033_v49, 16  ;;  %v3279_v27 = vrot.slane %v3277_v13, 4 }
  0x9c   : > { %2554 = vrot.lane.b32.xlu1 %v4674_v58, %s4984_s24  ;;  %v3275_v26 = vsel %vm5130_vm14, %v3270_v12, %v3274_v62  ;;  %v3282_v28 = vrot.slane %v3280_v14, 5  ;;  %v3296_v29 = vshll.u32 %v3125_v15, 16  ;;  %v3293_v36 = vor.u32 %v3292_v21, %v3288_v9  ;;  %v3669_v43 = vld [vmem:[#allocation2 + $0x58] sm:$0xf]  ;;  %v3670_v17 = vld [vmem:[#allocation2 + $0x5c] sm:$0x1]  ;;  %v5443_v62 = vpop.permute.xlu1 %3045 }
  0x9d   : > { %v4737_v31 = vcombine.low %v3265_v7, %v3275_v26  ;;  %v3780_v37 = vsel %vm5068_vm10, %v4753_v32, %v3779_v18  ;;  %v3781_v38 = vrot.slane %v3779_v18, 4  ;;  %v1213_v41 = vrot.slane %v1211_v22, 4  ;;  %v4929_v53 = vld [vmem:[#allocation2 + $0x54] sm:$0xff]   ;;  %v1038_v13 = vld [vmem:[#allocation2 + $0x5c] sm:$0x1] }
  0x9e   : > { %v3283_v4 = vor.u32 %v3282_v28, %v3279_v27  ;;  %v3298_v40 = vrot.slane %v3296_v29, 5  ;;  %v1214_v42 = vshll.u32 %v1033_v49, 16  ;;  %v3294_v45 = vrot.slane %v3293_v36, 4  ;;  %v1036_v16 = vld [vmem:[#allocation2 + $0x54] sm:$0xf] }
  0x9f   : > { %v5435_v44 = vpop.permute.xlu0 %1498  ;;  %3596 = vrot.lane.b32.xlu0 %v4737_v31, %s4985_s25  ;;  %v3783_v46 = vsel %vm5068_vm10, %v3781_v38, %v3782_v19  ;;  %v1220_v47 = vshll.u32 %v1034_v30, 16  ;;  %v1224_v50 = vshrl.u32 %v1034_v30, 16  ;;  %v1230_v55 = vshll.u32 %v1035_v24, 16  ;;  %v1581_v15 = vld [vmem:[#allocation2 + $0x48] sm:$0xe] }
  0xa0   : > { %2875 = vrot.lane.b32.xlu1 %v4706_v23, %s4982_s22  ;;  %v3284_v48 = vrot.slane %v3283_v4, 4  ;;  %v4769_v54 = vcombine.low %v3780_v37, %v3783_v46  ;;  %v1216_v32 = vrot.slane %v1214_v42, 5  ;;  %v3299_v57 = vsel %vm5130_vm14, %v3294_v45, %v3298_v40  ;;  %v1037_v23 = vld [vmem:[#allocation2 + $0x58] sm:$0xf]  ;;  %v1582_v22 = vld [vmem:[#allocation2 + $0x4c] sm:$0xf]  ;;  %v5459_v45 = vpop.permute.xlu1 %1824 }
  0xa1   : > { %v1222_v59 = vrot.slane %v1220_v47, 5  ;;  %v1226_v60 = vrot.slane %v1224_v50, 4  ;;  %v4754_v61 = vrot.slane %v3668_v39, 9  ;;  %v1232_v49 = vrot.slane %v1230_v55, 5  ;;  %v1583_v38 = vld [vmem:[#allocation2 + $0x50] sm:$0x1] }
  0xa2   : > { %v3289_v63 = vsel %vm5130_vm14, %v3284_v48, %v3288_v9  ;;  %v1217_v1 = vor.u32 %v1216_v32, %v1213_v41  ;;  %v3786_v5 = vrot.slane %v3669_v43, 5  ;;  %v3789_v12 = vrot.slane %v3670_v17, 5  ;;  %v1584_v24 = vld [vmem:[#allocation2 + $0x54] sm:$0xe]  ;;  %v1585_v42 = vld [vmem:[#allocation2 + $0x58] sm:$0xf] }
  0xa3   : > { %v5447_v7 = vpop.permute.xlu0 %2865  ;;  %v4738_v8 = vcombine.low %v3289_v63, %v3299_v57  ;;  %3917 = vrot.lane.b32.xlu0 %v4769_v54, %s4983_s23  ;;  %v1227_v58 = vor.u32 %v1226_v60, %v1222_v59  ;;  %v1235_v14 = vshrl.u32 %v1036_v16, 16  ;;  %v1238_v19 = vshll.u32 %v1036_v16, 16  ;;  %v1586_v43 = vld [vmem:[#allocation2 + $0x5c] sm:$0x1] }
  0xa4   : > { %3053 = vrot.lane.b32.xlu1 %v4929_v53, %s4980_s20  ;;  %v1218_v21 = vrot.slane %v1217_v1, 4  ;;  %v3787_v9 = vsel %vm5068_vm10, %v4754_v61, %v3786_v5  ;;  %v3788_v18 = vrot.slane %v3786_v5, 4  ;;  %v1244_v28 = vshll.u32 %v1037_v23, 16  ;;  %v807_v61 = vld [vmem:[#allocation2 + $0x60] sm:$0xf] }
  0xa5   : > { %v1228_v26 = vrot.slane %v1227_v58, 4  ;;  %v1237_v27 = vrot.slane %v1235_v14, 4  ;;  %v1248_v29 = vshrl.u32 %v1037_v23, 16  ;;  %v1240_v36 = vrot.slane %v1238_v19, 5  ;;  %v2082_v23 = vld [vmem:[#allocation2 + $0x54] sm:$0xf] }
  0xa6   : > { %v1223_v30 = vsel %vm5130_vm14, %v1218_v21, %v1222_v59  ;;  %v3790_v31 = vsel %vm5068_vm10, %v3788_v18, %v3789_v12  ;;  %v1254_v37 = vshll.u32 %v1038_v13, 16  ;;  %v1246_v40 = vrot.slane %v1244_v28, 5  ;;  %v2083_v13 = vld [vmem:[#allocation2 + $0x58] sm:$0xf]  ;;  %v323_v14 = vld [vmem:[#allocation2 + $0x68] sm:$0x1] }
  0xa7   : > { %v1233_v39 = vsel %vm5130_vm14, %v1228_v26, %v1232_v49  ;;  %v4770_v4 = vcombine.low %v3787_v9, %v3790_v31  ;;  %v1250_v41 = vrot.slane %v1248_v29, 4  ;;  %v1241_v47 = vor.u32 %v1240_v36, %v1237_v27  ;;  %v5462_v53 = vpop.permute.xlu0 %3909  ;;  %v2084_v28 = vld [vmem:[#allocation2 + $0x5c] sm:$0x1]  ;;  %v200_v29 = vld [vmem:[%s5038_s17 + $0x88] sm:$0xff] }
  0xa8   : > { %3598 = vrot.lane.b32.xlu1 %v4738_v8, %s4985_s25  ;;  %v4611_v46 = vcombine.low %v1223_v30, %v1233_v39  ;;  %v1256_v50 = vrot.slane %v1254_v37, 5  ;;  %v4627_v17 = vrot.slane %v1581_v15, 9  ;;  %v1706_v54 = vrot.slane %v1582_v22, 5  ;;  %v199_v15 = vld [vmem:[%s5038_s17 + $0x80] sm:$0xff]  ;;  %v5484_v22 = vpop.permute.xlu1 %2867  ;;  %v270_v30 = vld [vmem:[#allocation2 + $0x6c] sm:$0x1] }
  0xa9   : > { %3919 = vrot.lane.b32.xlu0 %v4770_v4, %s4983_s23  ;;  %v1251_v48 = vor.u32 %v1250_v41, %v1246_v40  ;;  %v1709_v32 = vrot.slane %v1583_v38, 5  ;;  %v4628_v55 = vrot.slane %v1584_v24, 9  ;;  %v1242_v16 = vrot.slane %v1241_v47, 4  ;;  %v2627_v24 = vld [vmem:[#allocation2 + $0x54] sm:$0xe] }
  0xaa   : > { %v1713_v57 = vrot.slane %v1585_v42, 5  ;;  %v1716_v59 = vrot.slane %v1586_v43, 5  ;;  %v557_v60 = vrot.slane %v555_v10, 7  ;;  %v1707_v1 = vsel %vm5068_vm10, %v4627_v17, %v1706_v54  ;;  %v2628_v39 = vld [vmem:[#allocation2 + $0x58] sm:$0xf] }
  0xab   : > { %v1252_v63 = vrot.slane %v1251_v48, 4  ;;  %v1708_v49 = vrot.slane %v1706_v54, 4  ;;  %v563_v5 = vshrl.u32 %v5420_v2, 16  ;;  %v1247_v8 = vsel %vm5130_vm14, %v1242_v16, %v1246_v40  ;;  %v5490_v31 = vpop.permute.xlu0 %3911  ;;  %v4930_v40 = vld [vmem:[#allocation2 + $0x54] sm:$0xff]  }
  0xac   : > { %1510 = vrot.lane.b32.xlu1 %v4611_v46, %s4981_s21  ;;  %v1714_v58 = vsel %vm5068_vm10, %v4628_v55, %v1713_v57  ;;  %v1715_v12 = vrot.slane %v1713_v57, 4  ;;  %v560_v10 = vor.u32 %v558_v11, %v557_v60  ;;  %v561_v18 = vrot.slane %v557_v60, 4  ;;  %v2629_v46 = vld [vmem:[#allocation2 + $0x5c] sm:$0x1] }
  0xad   : > { %v1257_v21 = vsel %vm5130_vm14, %v1252_v63, %v1256_v50  ;;  %v1710_v9 = vsel %vm5068_vm10, %v1708_v49, %v1709_v32  ;;  %v5482_v19 = vrot.slane %v563_v5, 7  ;;  %v566_v11 = vshll.u32 %v5420_v2, 16  ;;  %v326_v63 = vld [vmem:[#allocation2 + $0x74] sm:$0x1] }
  0xae   : > { %v4612_v26 = vcombine.low %v1247_v8, %v1257_v21  ;;  %v4643_v27 = vcombine.low %v1707_v1, %v1710_v9  ;;  %v1717_v56 = vsel %vm5068_vm10, %v1715_v12, %v1716_v59  ;;  %v808_v37 = vsel %vm5074_vm11, %v560_v10, %v807_v61  ;;  %v5508_v1 = vpop.permute.xlu1 %2546 }
  0xaf   : > { %v4644_v36 = vcombine.low %v1714_v58, %v1717_v56  ;;  %v2257_v38 = vshrl.u32 %v2082_v23, 16  ;;  %v5494_v4 = vpack.c.bf16 %v199_v15, %v199_v15  ;;  %v568_v2 = vor.u32 %v566_v11, %v5482_v19  ;;  %809 = vst [vmem:[#allocation2 + $0x60] sm:$0xf] %v808_v37 }
  0xb0   : > { %1512 = vrot.lane.b32.xlu1 %v4612_v26, %s4981_s21  ;;  %1834 = vrot.lane.b32.xlu0 %v4643_v27, %s4979_s19  ;;  %v2260_v41 = vshll.u32 %v2082_v23, 16  ;;  %v2266_v42 = vshll.u32 %v2083_v13, 16  ;;  %v2270_v43 = vshrl.u32 %v2083_v13, 16  ;;  %v2276_v50 = vshll.u32 %v2084_v28, 16 }
  0xb1   : > { %v2259_v47 = vrot.slane %v2257_v38, 4  ;;  %v324_v17 = vsel %vm5042_vm5, 0, %v323_v14  ;;  %v5501_v48 = vpack.c.bf16 %v200_v29, %v200_v29  ;;  %v569_v54 = vsel %vm5057_vm9, %v561_v18, %v568_v2  ;;  %v5513_v58 = vpop.permute.xlu0 %1500 }
  0xb2   : > { %v2262_v32 = vrot.slane %v2260_v41, 5  ;;  %v2268_v55 = vrot.slane %v2266_v42, 5  ;;  %v2272_v16 = vrot.slane %v2270_v43, 4  ;;  %325 = vst [vmem:[#allocation2 + $0x68] sm:$0x1] %v324_v17  ;;  %v4691_v57 = vrot.slane %v2627_v24, 9 }
  0xb3   : > { %810 = vst.msk [vmem:[#allocation2 + $0x64] sm:$0xf] %vm231_vm0, %v569_v54  ;;  %v2749_v59 = vrot.slane %v2628_v39, 5  ;;  %v2752_v60 = vrot.slane %v2629_v46, 5  ;;  %v271_v61 = vsel %vm5016_vm3, 0, %v270_v30  ;;  %v2278_v23 = vrot.slane %v2276_v50, 5 }
  0xb4   : > { %1836 = vrot.lane.b32.xlu1 %v4644_v36, %s4979_s19  ;;  %2011 = vrot.lane.b32.xlu0 %v4930_v40, %s4978_s18  ;;  %v2263_v49 = vor.u32 %v2262_v32, %v2259_v47  ;;  %v2273_v5 = vor.u32 %v2272_v16, %v2268_v55  ;;  %272 = vst [vmem:[#allocation2 + $0x6c] sm:$0x1] %v271_v61  ;;  %v572_v8 = vshrl.u32 %v5494_v4, 16  ;;  %v570_v12 = vrot.slane %v5482_v19, 4  ;;  %v4940_v61 = vld [vmem:[#allocation2 + $0x24] sm:$0xff]  }
  0xb5   : > { %v2751_v10 = vrot.slane %v2749_v59, 4  ;;  %v575_v13 = vshll.u32 %v5494_v4, 16  ;;  %v580_v21 = vshrl.u32 %v5501_v48, 16  ;;  %v327_v9 = vsel %vm5042_vm5, 0, %v326_v63  ;;  %1002 = vst.msk [vmem:[#allocation3 + $0x18] sm:$0xff] %vm6647_vm15, %v4940_v61 }
  0xb6   : > { %v2264_v14 = vrot.slane %v2263_v49, 4  ;;  %v2274_v15 = vrot.slane %v2273_v5, 4  ;;  %v2085_v18 = vld [vmem:[#allocation2 + $0x60] sm:$0xf]  ;;  %v2750_v26 = vsel %vm5068_vm10, %v4691_v57, %v2749_v59  ;;  %v574_v56 = vrot.slane %v572_v8, 7  ;;  %v5531_v39 = vpop.permute.xlu1 %3590  ;;  %v4937_v59 = vld [vmem:[#allocation2 + $0xc] sm:$0xff]  }
  0xb7   : > { %v2753_v27 = vsel %vm5068_vm10, %v2751_v10, %v2752_v60  ;;  %v583_v19 = vshll.u32 %v5501_v48, 16  ;;  %328 = vst [vmem:[#allocation2 + $0x74] sm:$0x1] %v327_v9  ;;  %v2281_v29 = vshrl.u32 %v2085_v18, 16  ;;  %v2284_v30 = vshll.u32 %v2085_v18, 16  ;;  %v4934_v57 = vld [vmem:[#allocation2] sm:$0xff]  }
  0xb8   : > { %v2269_v11 = vsel %vm5130_vm14, %v2264_v14, %v2268_v55  ;;  %v2279_v28 = vsel %vm5130_vm14, %v2274_v15, %v2278_v23  ;;  %v2630_v38 = vld [vmem:[#allocation2 + $0x60] sm:$0xe]  ;;  %v4707_v42 = vcombine.low %v2750_v26, %v2753_v27  ;;  %v577_v48 = vor.u32 %v575_v13, %v574_v56  ;;  %v4938_v60 = vld [vmem:[#allocation2 + $0x18] sm:$0xff]   ;;  %v4947_v15 = vld [vmem:[#allocation2 + $0x30] sm:$0xff]   ;;  %999 = vst.msk [vmem:[#allocation3] sm:$0xff] %vm6647_vm15, %v4934_v57 }
  0xb9   : > { %v4675_v36 = vcombine.low %v2269_v11, %v2279_v28  ;;  %v811_v37 = vld [vmem:[#allocation2 + $0x68] sm:$0x1]  ;;  %v5529_v24 = vld [vmem:[#allocation2 + $0x60] sm:$0xf]  ;;  %v2283_v41 = vrot.slane %v2281_v29, 4  ;;  %v5535_v43 = vpop.permute.xlu0 %2544  ;;  %v2286_v46 = vrot.slane %v2284_v30, 5 }
  0xba   : > { %v4931_v4 = vld [vmem:[#allocation2 + $0x60] sm:$0xff]   ;;  %v812_v40 = vsel %vm5016_vm3, %v570_v12, %v811_v37  ;;  %v578_v32 = vrot.slane %v574_v56, 4  ;;  %v582_v55 = vrot.slane %v580_v21, 7  ;;  %v3301_v16 = vshrl.u32 %v5529_v24, 16  ;;  %v201_v11 = vld [vmem:[%s5038_s17 + $0x90] sm:$0xff]  ;;  %1000 = vst.msk [vmem:[#allocation3 + $0x8] sm:$0xff] %vm6647_vm15, %v4937_v59 }
  0xbb   : > { %v2086_v2 = vld [vmem:[#allocation2 + $0x64] sm:$0xf]  ;;  %2556 = vrot.lane.b32.xlu0 %v4675_v36, %s4984_s24  ;;  %813 = vst [vmem:[#allocation2 + $0x68] sm:$0x1] %v812_v40  ;;  %2013 = vrot.lane.b32.xlu1 %v4931_v4, %s4978_s18  ;;  %v2287_v63 = vor.u32 %v2286_v46, %v2283_v41  ;;  %v814_v23 = vld [vmem:[#allocation2 + $0x6c] sm:$0xf] }
  0xbc   : > { %v2290_v47 = vshll.u32 %v2086_v2, 16  ;;  %v2294_v50 = vshrl.u32 %v2086_v2, 16  ;;  %v2631_v17 = vld [vmem:[#allocation2 + $0x64] sm:$0xf]  ;;  %v4692_v12 = vrot.slane %v2630_v38, 9  ;;  %v585_v10 = vor.u32 %v583_v19, %v582_v55  ;;  %v4948_v9 = vld [vmem:[#allocation2 + $0x3c] sm:$0xff]   ;;  %v1503_v28 = vpop.permute.xlu1 %1502 }
  0xbd   : > { %v2756_v54 = vrot.slane %v2631_v17, 5  ;;  %v3127_v8 = vld [vmem:[#allocation2 + $0x64] sm:$0xf]  ;;  %v587_v13 = vrot.slane %v582_v55, 4  ;;  %v5542_v21 = vrot.slane %v2287_v63, 4  ;;  %v815_v56 = vsel %vm5074_vm11, %v577_v48, %v814_v23  ;;  %v202_v41 = vld [vmem:[%s5038_s17 + $0x98] sm:$0xff] }
  0xbe   : > { %v5540_v49 = vrot.slane %v2290_v47, 5  ;;  %v2296_v5 = vrot.slane %v2294_v50, 4  ;;  %v818_v14 = vld [vmem:[#allocation2 + $0x74] sm:$0x1]  ;;  %v4932_v27 = vld [vmem:[#allocation2 + $0x60] sm:$0xff]   ;;  %v586_v19 = vsel %vm5057_vm9, %v578_v32, %v585_v10  ;;  %v3304_v29 = vshll.u32 %v5529_v24, 16 }
  0xbf   : > { %2877 = vrot.lane.b32.xlu0 %v4707_v42, %s4982_s22  ;;  %v2758_v26 = vrot.slane %v2756_v54, 4  ;;  %816 = vst [vmem:[#allocation2 + $0x6c] sm:$0xf] %v815_v56  ;;  %v3310_v30 = vshll.u32 %v3127_v8, 16  ;;  %v3314_v36 = vshrl.u32 %v3127_v8, 16  ;;  %v3303_v4 = vrot.slane %v3301_v16, 4 }
  0xc0   : > { %v2297_v18 = vor.u32 %v2296_v5, %v5540_v49  ;;  %817 = vst.msk [vmem:[#allocation2 + $0x70] sm:$0xf] %vm231_vm0, %v586_v19  ;;  %v819_v40 = vsel %vm5016_vm3, %v587_v13, %v818_v14  ;;  %v3671_v2 = vld [vmem:[#allocation2 + $0x60] sm:$0xe]  ;;  %v2293_v24 = vsel %vm5130_vm14, %v5542_v21, %v5540_v49  ;;  %v5564_v47 = vsel %vm5068_vm10, %v4692_v12, %v2756_v54  ;;  %v3672_v16 = vld [vmem:[#allocation2 + $0x64] sm:$0xf] }
  0xc1   : > { %v5552_v37 = vpop.permute.xlu0 %3588  ;;  %820 = vst [vmem:[#allocation2 + $0x74] sm:$0x1] %v819_v40  ;;  %v5567_v17 = vpack.c.bf16 %v201_v11, %v201_v11  ;;  %1001 = vst.msk [vmem:[#allocation3 + $0x10] sm:$0xff] %vm6647_vm15, %v4938_v60  ;;  %v3306_v32 = vrot.slane %v3304_v29, 5  ;;  %v3312_v55 = vrot.slane %v3310_v30, 5  ;;  %v3316_v57 = vrot.slane %v3314_v36, 4 }
  0xc2   : > { %v2298_v38 = vrot.slane %v2297_v18, 4  ;;  %v2087_v42 = vld [vmem:[#allocation2 + $0x68] sm:$0x1]  ;;  %1003 = vst.msk [vmem:[#allocation3 + $0x20] sm:$0xff] %vm6647_vm15, %v4947_v15  ;;  %1004 = vst.msk [vmem:[#allocation3 + $0x28] sm:$0xff] %vm6647_vm15, %v4948_v9  ;;  %vm1870_vm4 = vcmask 97344   ;;  %v5585_v15 = vpack.c.bf16 %v202_v41, %v202_v41 }
  0xc3   : > { %v2632_v46 = vld [vmem:[#allocation2 + $0x68] sm:$0x1]  ;;  %v2300_v48 = vshll.u32 %v2087_v42, 16  ;;  %3055 = vrot.lane.b32.xlu0 %v4932_v27, %s4980_s20  ;;  %v203_v59 = vld [vmem:[%s5038_s17 + $0xa0] sm:$0xff]  ;;  %v3307_v5 = vor.u32 %v3306_v32, %v3303_v4  ;;  %1547 = vst.msk [vmem:[#allocation3] sm:$0xff] %vm1546_vm2, %v5435_v44  ;;  %v4755_v8 = vrot.slane %v3671_v2, 9  ;;  %v3317_v10 = vor.u32 %v3316_v57, %v3312_v55 }
  0xc4   : > { %v3128_v50 = vld [vmem:[#allocation2 + $0x68] sm:$0x1]  ;;  %v2759_v54 = vrot.slane %v2632_v46, 5  ;;  %1548 = vst.msk [vmem:[#allocation3 + $0x8] sm:$0xff] %vm1546_vm2, %v5513_v58  ;;  %1549 = vst.msk [vmem:[#allocation3 + $0x10] sm:$0xff] %vm1546_vm2, %v1503_v28  ;;  %v3793_v14 = vrot.slane %v3672_v16, 5 }
  0xc5   : > { %v3320_v63 = vshll.u32 %v3128_v50, 16  ;;  %v1827_v49 = vpop.permute.xlu0 %1826  ;;  %v2302_v60 = vrot.slane %v2300_v48, 5  ;;  %v3673_v23 = vld [vmem:[#allocation2 + $0x68] sm:$0x1]  ;;  %1871 = vst.msk [vmem:[#allocation3] sm:$0xff] %vm1870_vm4, %v5412_v51  ;;  %1872 = vst.msk [vmem:[#allocation3 + $0x8] sm:$0xff] %vm1870_vm4, %v5459_v45 }
  0xc6   : > { %v2760_v61 = vsel %vm5068_vm10, %v2758_v26, %v2759_v54  ;;  %v1505_v12 = vpop.permute.xlu1 %1504  ;;  %1873 = vst.msk [vmem:[#allocation3 + $0x10] sm:$0xff] %vm1870_vm4, %v1827_v49  ;;  %v3308_v9 = vrot.slane %v3307_v5, 4  ;;  %v3129_v21 = vld [vmem:[#allocation2 + $0x6c] sm:$0xf]  ;;  %v1039_v18 = vld [vmem:[#allocation2 + $0x60] sm:$0xf]  ;;  %v5594_v26 = vpack.c.bf16 %v203_v59, %v203_v59  ;;  %v3794_v45 = vsel %vm5068_vm10, %v4755_v8, %v3793_v14 }
  0xc7   : > { %v3322_v13 = vrot.slane %v3320_v63, 5  ;;  %1550 = vst.msk [vmem:[#allocation3 + $0x18] sm:$0xff] %vm1546_vm2, %v1505_v12  ;;  %v2303_v44 = vsel %vm5130_vm14, %v2298_v38, %v2302_v60  ;;  %v4708_v58 = vcombine.low %v5564_v47, %v2760_v61  ;;  %v3318_v27 = vrot.slane %v3317_v10, 4  ;;  %v3130_v56 = vld [vmem:[#allocation2 + $0x70] sm:$0xf] }
  0xc8   : > { %v4676_v51 = vcombine.low %v2293_v24, %v2303_v44  ;;  %v3796_v11 = vrot.slane %v3673_v23, 5  ;;  %v3313_v28 = vsel %vm5130_vm14, %v3308_v9, %v3312_v55  ;;  %v3131_v19 = vld [vmem:[#allocation2 + $0x74] sm:$0x1]  ;;  %v3325_v29 = vshrl.u32 %v3129_v21, 16  ;;  %v1040_v42 = vld [vmem:[#allocation2 + $0x64] sm:$0xf] }
  0xc9   : > { %v3328_v30 = vshll.u32 %v3129_v21, 16  ;;  %v3334_v36 = vshll.u32 %v3130_v56, 16  ;;  %v3323_v4 = vsel %vm5130_vm14, %v3318_v27, %v3322_v13  ;;  %v3338_v40 = vshrl.u32 %v3130_v56, 16  ;;  %v5604_v24 = vpop.permute.xlu0 %2003  ;;  %v1041_v54 = vld [vmem:[#allocation2 + $0x68] sm:$0x1]  ;;  %v4933_v8 = vld [vmem:[#allocation2 + $0x6c] sm:$0xff]  }
  0xca   : > { %v1829_v38 = vpop.permute.xlu1 %1828  ;;  %2558 = vrot.lane.b32.xlu1 %v4676_v51, %s4984_s24  ;;  %v3344_v2 = vshll.u32 %v3131_v19, 16  ;;  %v3795_v41 = vrot.slane %v3793_v14, 4  ;;  %v4739_v46 = vcombine.low %v3313_v28, %v3323_v4  ;;  %v3327_v47 = vrot.slane %v3325_v29, 4  ;;  %v3674_v63 = vld [vmem:[#allocation2 + $0x6c] sm:$0xe] }
  0xcb   : > { %1874 = vst.msk [vmem:[#allocation3 + $0x18] sm:$0xff] %vm1870_vm4, %v1829_v38  ;;  %v3330_v50 = vrot.slane %v3328_v30, 5  ;;  %v3336_v48 = vrot.slane %v3334_v36, 5  ;;  %v3340_v32 = vrot.slane %v3338_v40, 4  ;;  %v1259_v57 = vshrl.u32 %v1039_v18, 16 }
  0xcc   : > { %v3346_v55 = vrot.slane %v3344_v2, 5  ;;  %v3797_v16 = vsel %vm5068_vm10, %v3795_v41, %v3796_v11  ;;  %3600 = vrot.lane.b32.xlu0 %v4739_v46, %s4985_s25  ;;  %v1262_v60 = vshll.u32 %v1039_v18, 16  ;;  %v1268_v61 = vshll.u32 %v1040_v42, 16  ;;  %v3675_v5 = vld [vmem:[#allocation2 + $0x70] sm:$0xf] }
  0xcd   : > { %v3331_v59 = vor.u32 %v3330_v50, %v3327_v47  ;;  %v4771_v49 = vcombine.low %v3794_v45, %v3797_v16  ;;  %v3676_v23 = vld [vmem:[#allocation2 + $0x74] sm:$0x1]  ;;  %v3341_v12 = vor.u32 %v3340_v32, %v3336_v48  ;;  %v1261_v10 = vrot.slane %v1259_v57, 4  ;;  %v1042_v44 = vld [vmem:[#allocation2 + $0x6c] sm:$0xf] }
  0xce   : > { %2879 = vrot.lane.b32.xlu1 %v4708_v58, %s4982_s22  ;;  %v1272_v13 = vshrl.u32 %v1040_v42, 16  ;;  %v1278_v14 = vshll.u32 %v1041_v54, 16  ;;  %v1264_v21 = vrot.slane %v1262_v60, 5  ;;  %v1270_v51 = vrot.slane %v1268_v61, 5  ;;  %v1043_v30 = vld [vmem:[#allocation2 + $0x70] sm:$0xf] }
  0xcf   : > { %v3332_v9 = vrot.slane %v3331_v59, 4  ;;  %v4756_v27 = vrot.slane %v3674_v63, 9  ;;  %v3342_v56 = vrot.slane %v3341_v12, 4  ;;  %v3800_v45 = vrot.slane %v3675_v5, 5  ;;  %v1587_v38 = vld [vmem:[#allocation2 + $0x60] sm:$0xe] }
  0xd0   : > { %v1274_v11 = vrot.slane %v1272_v13, 4  ;;  %v1280_v28 = vrot.slane %v1278_v14, 5  ;;  %3921 = vrot.lane.b32.xlu0 %v4771_v49, %s4983_s23  ;;  %v1265_v58 = vor.u32 %v1264_v21, %v1261_v10  ;;  %v3803_v29 = vrot.slane %v3676_v23, 5  ;;  %v1044_v42 = vld [vmem:[#allocation2 + $0x74] sm:$0x1] }
  0xd1   : > { %v5610_v18 = vpop.permute.xlu0 %2548  ;;  %v3337_v19 = vsel %vm5130_vm14, %v3332_v9, %v3336_v48  ;;  %v1283_v36 = vshrl.u32 %v1042_v44, 16  ;;  %v3347_v4 = vsel %vm5130_vm14, %v3342_v56, %v3346_v55  ;;  %v3801_v2 = vsel %vm5068_vm10, %v4756_v27, %v3800_v45  ;;  %v1588_v54 = vld [vmem:[#allocation2 + $0x64] sm:$0xf]  ;;  %v1589_v59 = vld [vmem:[#allocation2 + $0x68] sm:$0x1] }
  0xd2   : > { %3057 = vrot.lane.b32.xlu1 %v4933_v8, %s4980_s20  ;;  %v1275_v40 = vor.u32 %v1274_v11, %v1270_v51  ;;  %v3802_v41 = vrot.slane %v3800_v45, 4  ;;  %v4740_v46 = vcombine.low %v3337_v19, %v3347_v4  ;;  %v1266_v47 = vrot.slane %v1265_v58, 4  ;;  %v1590_v5 = vld [vmem:[#allocation2 + $0x6c] sm:$0xe]  ;;  %v1591_v23 = vld [vmem:[#allocation2 + $0x70] sm:$0xf] }
  0xd3   : > { %v1285_v50 = vrot.slane %v1283_v36, 4  ;;  %v1286_v48 = vshll.u32 %v1042_v44, 16  ;;  %v1292_v57 = vshll.u32 %v1043_v30, 16  ;;  %v1296_v63 = vshrl.u32 %v1043_v30, 16  ;;  %v1592_v44 = vld [vmem:[#allocation2 + $0x74] sm:$0x1] }
  0xd4   : > { %v1276_v32 = vrot.slane %v1275_v40, 4  ;;  %v3804_v16 = vsel %vm5068_vm10, %v3802_v41, %v3803_v29  ;;  %v1271_v55 = vsel %vm5130_vm14, %v1266_v47, %v1270_v51  ;;  %v1302_v61 = vshll.u32 %v1044_v42, 16  ;;  %v273_v56 = vld [vmem:[#allocation2 + $0x78] sm:$0x1]  ;;  %v204_v42 = vld [vmem:[%s5038_s17 + $0xa8] sm:$0xff] }
  0xd5   : > { %v4772_v49 = vcombine.low %v3801_v2, %v3804_v16  ;;  %v1288_v60 = vrot.slane %v1286_v48, 5  ;;  %v5624_v8 = vpop.permute.xlu0 %2869  ;;  %v1294_v10 = vrot.slane %v1292_v57, 5  ;;  %v1298_v13 = vrot.slane %v1296_v63, 4 }
  0xd6   : > { %3602 = vrot.lane.b32.xlu1 %v4740_v46, %s4985_s25  ;;  %v1281_v12 = vsel %vm5130_vm14, %v1276_v32, %v1280_v28  ;;  %v4629_v14 = vrot.slane %v1587_v38, 9  ;;  %v1304_v51 = vrot.slane %v1302_v61, 5  ;;  %v1720_v27 = vrot.slane %v1588_v54, 5  ;;  %v2006_v38 = vpop.permute.xlu1 %2005  ;;  %v4953_v46 = vld [vmem:[#allocation2 + $0x48] sm:$0xff]  }
  0xd7   : > { %v4613_v9 = vcombine.low %v1271_v55, %v1281_v12  ;;  %3923 = vrot.lane.b32.xlu0 %v4772_v49, %s4983_s23  ;;  %v1289_v21 = vor.u32 %v1288_v60, %v1285_v50  ;;  %v1299_v11 = vor.u32 %v1298_v13, %v1294_v10  ;;  %v1723_v45 = vrot.slane %v1589_v59, 5  ;;  %v2088_v55 = vld [vmem:[#allocation2 + $0x6c] sm:$0xf]  ;;  %1005 = vst.msk [vmem:[#allocation3 + $0x30] sm:$0xff] %vm6647_vm15, %v4953_v46 }
  0xd8   : > { %v4630_v19 = vrot.slane %v1590_v5, 9  ;;  %v1727_v58 = vrot.slane %v1591_v23, 5  ;;  %v1721_v28 = vsel %vm5068_vm10, %v4629_v14, %v1720_v27  ;;  %v1722_v30 = vrot.slane %v1720_v27, 4  ;;  %v2089_v5 = vld [vmem:[#allocation2 + $0x70] sm:$0xf]  ;;  %v4954_v14 = vld [vmem:[#allocation2 + $0x54] sm:$0xff]  }
  0xd9   : > { %v1290_v29 = vrot.slane %v1289_v21, 4  ;;  %v1730_v36 = vrot.slane %v1592_v44, 5  ;;  %v1300_v4 = vrot.slane %v1299_v11, 4  ;;  %v274_v41 = vsel %vm5016_vm3, 0, %v273_v56  ;;  %v3048_v32 = vpop.permute.xlu0 %3047  ;;  %v5653_v23 = vld [vmem:[#allocation2 + $0x74] sm:$0x1] }
  0xda   : > { %1514 = vrot.lane.b32.xlu1 %v4613_v9, %s4981_s21  ;;  %v5635_v40 = vsel %vm5068_vm10, %v4630_v19, %v1727_v58  ;;  %v1729_v2 = vrot.slane %v1727_v58, 4  ;;  %v1724_v50 = vsel %vm5068_vm10, %v1722_v30, %v1723_v45  ;;  %275 = vst [vmem:[#allocation2 + $0x78] sm:$0x1] %v274_v41  ;;  %v589_v48 = vshrl.u32 %v5567_v17, 16  ;;  %v5666_v21 = vld [vmem:[#allocation2 + $0x6c] sm:$0xe] }
  0xdb   : > { %v1295_v47 = vsel %vm5130_vm14, %v1290_v29, %v1294_v10  ;;  %v592_v54 = vshll.u32 %v5567_v17, 16  ;;  %v1305_v16 = vsel %vm5130_vm14, %v1300_v4, %v1304_v51  ;;  %v4645_v57 = vcombine.low %v1721_v28, %v1724_v50  ;;  %v329_v17 = vld [vmem:[#allocation2 + $0x80] sm:$0x1]  ;;  %v4935_v10 = vld [vmem:[#allocation2 + $0x6c] sm:$0xff]   ;;  %v276_v51 = vld [vmem:[#allocation2 + $0x84] sm:$0x1] }
  0xdc   : > { %v1731_v63 = vsel %vm5068_vm10, %v1729_v2, %v1730_v36  ;;  %v597_v59 = vshrl.u32 %v5585_v15, 16  ;;  %v4614_v49 = vcombine.low %v1295_v47, %v1305_v16  ;;  %v591_v60 = vrot.slane %v589_v48, 7  ;;  %1006 = vst.msk [vmem:[#allocation3 + $0x38] sm:$0xff] %vm6647_vm15, %v4954_v14  ;;  %v4944_v4 = vld [vmem:[%s6643_s1 + $0x10] ss:$0 sps:$4 sm:$0x33]  }
  0xdd   : > { %v600_v61 = vshll.u32 %v5585_v15, 16  ;;  %v5655_v12 = vpack.c.bf16 %v204_v42, %v204_v42  ;;  %1838 = vrot.lane.b32.xlu0 %v4645_v57, %s4979_s19  ;;  %vm6648_vm6 = vcmask 130144   ;;  %vm2592_vm7 = vcmask 162944   ;;  %v332_v41 = vld [vmem:[#allocation2 + $0x8c] sm:$0x1] }
  0xde   : > { %v5658_v13 = vrot.slane %v597_v59, 7  ;;  %vm2913_vm8 = vcmask 195744   ;;  %1516 = vrot.lane.b32.xlu1 %v4614_v49, %s4981_s21  ;;  %v4646_v44 = vcombine.low %v5635_v40, %v1731_v63  ;;  %v594_v15 = vor.u32 %v592_v54, %v591_v60  ;;  %2049 = vst.msk [vmem:[#allocation3 + $0x8] sm:$0xff] %vm6648_vm6, %v5428_v25  ;;  %2048 = vst.msk [vmem:[#allocation3] sm:$0xff] %vm6648_vm6, %v5405_v34  ;;  %v2634_v34 = vld [vmem:[#allocation2 + $0x70] sm:$0xf] }
  0xdf   : > { %v595_v9 = vrot.slane %v591_v60, 4  ;;  %vm6649_vm12 = vcmask 228544   ;;  %2050 = vst.msk [vmem:[#allocation3 + $0x10] sm:$0xff] %vm6648_vm6, %v5604_v24  ;;  %2051 = vst.msk [vmem:[#allocation3 + $0x18] sm:$0xff] %vm6648_vm6, %v2006_v38  ;;  %vm3636_vm13 = vcmask 261344   ;;  %vm3957_vm1 = vcmask 294144  }
  0xe0   : > { %v2551_v27 = vpop.permute.xlu1 %2550  ;;  %v602_v56 = vor.u32 %v600_v61, %v5658_v13  ;;  %2594 = vst.msk [vmem:[#allocation3 + $0x8] sm:$0xff] %vm2592_vm7, %v5508_v1  ;;  %v2305_v25 = vshrl.u32 %v2088_v55, 16  ;;  %2593 = vst.msk [vmem:[#allocation3] sm:$0xff] %vm2592_vm7, %v5535_v43  ;;  %v2308_v24 = vshll.u32 %v2088_v55, 16  ;;  %v2314_v11 = vshll.u32 %v2089_v5, 16 }
  0xe1   : > { %2595 = vst.msk [vmem:[#allocation3 + $0x10] sm:$0xff] %vm2592_vm7, %v5610_v18  ;;  %2596 = vst.msk [vmem:[#allocation3 + $0x18] sm:$0xff] %vm2592_vm7, %v2551_v27  ;;  %v2318_v45 = vshrl.u32 %v2089_v5, 16  ;;  %v2324_v1 = vshll.u32 %v5653_v23, 16  ;;  %v2635_v43 = vld [vmem:[#allocation2 + $0x74] sm:$0x1]  ;;  %2015 = vrot.lane.b32.xlu0 %v4935_v10, %s4978_s18 }
  0xe2   : > { %2915 = vst.msk [vmem:[#allocation3 + $0x8] sm:$0xff] %vm2913_vm8, %v5484_v22  ;;  %2914 = vst.msk [vmem:[#allocation3] sm:$0xff] %vm2913_vm8, %v5447_v7  ;;  %v3593_v18 = vpop.permute.xlu0 %3592  ;;  %v603_v19 = vsel %vm5057_vm9, %v595_v9, %v602_v56  ;;  %v821_v58 = vld [vmem:[#allocation2 + $0x78] sm:$0xf]  ;;  %v2307_v22 = vrot.slane %v2305_v25, 4  ;;  %v330_v29 = vsel %vm5042_vm5, 0, %v329_v17  ;;  %1840 = vrot.lane.b32.xlu1 %v4646_v44, %s4979_s19 }
  0xe3   : > { %2916 = vst.msk [vmem:[#allocation3 + $0x10] sm:$0xff] %vm2913_vm8, %v5624_v8  ;;  %v4693_v7 = vrot.slane %v5666_v21, 9  ;;  %v822_v8 = vsel %vm5074_vm11, %v594_v15, %v821_v58  ;;  %v2316_v28 = vrot.slane %v2314_v11, 5  ;;  %v2320_v30 = vrot.slane %v2318_v45, 4  ;;  %331 = vst [vmem:[#allocation2 + $0x80] sm:$0x1] %v330_v29 }
  0xe4   : > { %3093 = vst.msk [vmem:[#allocation3 + $0x8] sm:$0xff] %vm6649_vm12, %v5443_v62  ;;  %3092 = vst.msk [vmem:[#allocation3] sm:$0xff] %vm6649_vm12, %v5422_v3  ;;  %v2310_v62 = vrot.slane %v2308_v24, 5  ;;  %v2872_v3 = vpop.permute.xlu1 %2871  ;;  %v2326_v36 = vrot.slane %v2324_v1, 5  ;;  %v2763_v38 = vrot.slane %v2634_v34, 5  ;;  %v2766_v2 = vrot.slane %v2635_v43, 5 }
  0xe5   : > { %3094 = vst.msk [vmem:[#allocation3 + $0x10] sm:$0xff] %vm6649_vm12, %v3048_v32  ;;  %823 = vst [vmem:[#allocation2 + $0x78] sm:$0xf] %v822_v8  ;;  %v2321_v40 = vor.u32 %v2320_v30, %v2316_v28  ;;  %v604_v46 = vrot.slane %v5658_v13, 4  ;;  %v609_v47 = vshll.u32 %v5594_v26, 16  ;;  %v614_v50 = vshrl.u32 %v5655_v12, 16 }
  0xe6   : > { %824 = vst.msk [vmem:[#allocation2 + $0x7c] sm:$0xf] %vm231_vm0, %v603_v19  ;;  %v3914_v42 = vpop.permute.xlu0 %3913  ;;  %v2764_v32 = vsel %vm5068_vm10, %v4693_v7, %v2763_v38  ;;  %vm4059_vm15 = vcmask 1041408   ;;  %v617_v63 = vshll.u32 %v5655_v12, 16  ;;  %v333_v59 = vsel %vm5042_vm5, 0, %v332_v41  ;;  %v206_v19 = vld [vmem:[%s5038_s17 + $0xb8] sm:$0xff] }
  0xe7   : > { %3638 = vst.msk [vmem:[#allocation3 + $0x8] sm:$0xff] %vm3636_vm13, %v5531_v39  ;;  %3637 = vst.msk [vmem:[#allocation3] sm:$0xff] %vm3636_vm13, %v5552_v37  ;;  %v277_v39 = vsel %vm5016_vm3, 0, %v276_v51  ;;  %v2311_v37 = vor.u32 %v2310_v62, %v2307_v22  ;;  %v2322_v54 = vrot.slane %v2321_v40, 4  ;;  %4899 = vmatprep.subr.msk.bf16.mxu0 %vm4059_vm15, %v4944_v4  ;;  %v4061_v55 = vsel %vm4059_vm15, %v4944_v4, 0  ;;  %4900 = vmatprep.subr.msk.bf16.mxu1 %vm4059_vm15, %v4944_v4 }
  0xe8   : > { %3639 = vst.msk [vmem:[#allocation3 + $0x10] sm:$0xff] %vm3636_vm13, %v3593_v18  ;;  %278 = vst [vmem:[#allocation2 + $0x84] sm:$0x1] %v277_v39  ;;  %v3050_v16 = vpop.permute.xlu1 %3049  ;;  %v5734_v61 = vrot.slane %v614_v50, 7  ;;  %4860 = vmatpush3.bf16.msra.mxu0 %v4061_v55  ;;  %4898 = vmatpush3.bf16.msra.mxu1 %v4061_v55  ;;  %v205_v18 = vld [vmem:[%s5038_s17 + $0xb0] sm:$0xff]  ;;  %vm4010_vm15 = vcmask 293888  }
  0xe9   : > { %3959 = vst.msk [vmem:[#allocation3 + $0x8] sm:$0xff] %vm3957_vm1, %v5490_v31  ;;  %3958 = vst.msk [vmem:[#allocation3] sm:$0xff] %vm3957_vm1, %v5462_v53  ;;  %v606_v31 = vshrl.u32 %v5594_v26, 16  ;;  %v2765_v53 = vrot.slane %v2763_v38, 4  ;;  %v2312_v48 = vrot.slane %v2311_v37, 4  ;;  %v2327_v49 = vsel %vm5130_vm14, %v2322_v54, %v2326_v36 }
  0xea   : > { %2917 = vst.msk [vmem:[#allocation3 + $0x18] sm:$0xff] %vm2913_vm8, %v2872_v3  ;;  %334 = vst [vmem:[#allocation2 + $0x8c] sm:$0x1] %v333_v59  ;;  %v825_v23 = vld [vmem:[#allocation2 + $0x80] sm:$0x1]  ;;  %v619_v24 = vor.u32 %v617_v63, %v5734_v61  ;;  %v621_v29 = vrot.slane %v5734_v61, 4  ;;  %v5765_v63 = vpack.c.bf16 %v206_v19, %v206_v19 }
  0xeb   : > { %3960 = vst.msk [vmem:[#allocation3 + $0x10] sm:$0xff] %vm3957_vm1, %v3914_v42  ;;  %v608_v57 = vrot.slane %v606_v31, 7  ;;  %v2317_v26 = vsel %vm5130_vm14, %v2312_v48, %v2316_v28  ;;  %v2767_v60 = vsel %vm5068_vm10, %v2765_v53, %v2766_v2  ;;  %v826_v10 = vsel %vm5016_vm3, %v604_v46, %v825_v23 }
  0xec   : > { %3095 = vst.msk [vmem:[#allocation3 + $0x18] sm:$0xff] %vm6649_vm12, %v3050_v16  ;;  %v4677_v5 = vcombine.low %v2317_v26, %v2327_v49  ;;  %v2091_v13 = vld [vmem:[#allocation2 + $0x78] sm:$0xf]  ;;  %827 = vst [vmem:[#allocation2 + $0x80] sm:$0x1] %v826_v10  ;;  %v4709_v21 = vcombine.low %v2764_v32, %v2767_v60 }
  0xed   : > { %v2092_v17 = vld [vmem:[#allocation2 + $0x7c] sm:$0xf]  ;;  %v2329_v44 = vshrl.u32 %v2091_v13, 16  ;;  %v2332_v15 = vshll.u32 %v2091_v13, 16  ;;  %v5739_v51 = vld [vmem:[#allocation2 + $0x78] sm:$0xe]  ;;  %v3916_v27 = vpop.permute.xlu0 %3915  ;;  %v611_v34 = vor.u32 %v609_v47, %v608_v57 }
  0xee   : > { %v4936_v12 = vld [vmem:[#allocation2 + $0x78] sm:$0xff]   ;;  %v2338_v14 = vshll.u32 %v2092_v17, 16  ;;  %2560 = vrot.lane.b32.xlu0 %v4677_v5, %s4984_s24  ;;  %v2342_v9 = vshrl.u32 %v2092_v17, 16  ;;  %v3595_v58 = vpop.permute.xlu1 %3594  ;;  %v612_v22 = vrot.slane %v608_v57, 4  ;;  %v4694_v30 = vrot.slane %v5739_v51, 9 }
  0xef   : > { %2017 = vrot.lane.b32.xlu1 %v4936_v12, %s4978_s18  ;;  %v5744_v25 = vld [vmem:[#allocation2 + $0x7c] sm:$0xf]  ;;  %v2331_v11 = vrot.slane %v2329_v44, 4  ;;  %v2334_v45 = vrot.slane %v2332_v15, 5  ;;  %v828_v7 = vld [vmem:[#allocation2 + $0x84] sm:$0xf]  ;;  %v5763_v57 = vpack.c.bf16 %v205_v18, %v205_v18 }
  0xf0   : > { %v5742_v56 = vrot.slane %v2338_v14, 5  ;;  %v2344_v1 = vrot.slane %v2342_v9, 4  ;;  %v2770_v43 = vrot.slane %v5744_v25, 5  ;;  %v3132_v8 = vld [vmem:[#allocation2 + $0x78] sm:$0xf]  ;;  %3640 = vst.msk [vmem:[#allocation3 + $0x18] sm:$0xff] %vm3636_vm13, %v3595_v58  ;;  %v620_v39 = vsel %vm5057_vm9, %v612_v22, %v619_v24 }
  0xf1   : > { %v2335_v62 = vor.u32 %v2334_v45, %v2331_v11  ;;  %v4941_v3 = vld [vmem:[#allocation2 + $0x78] sm:$0xff]   ;;  %v832_v38 = vld [vmem:[#allocation2 + $0x8c] sm:$0x1]  ;;  %3961 = vst.msk [vmem:[#allocation3 + $0x18] sm:$0xff] %vm3957_vm1, %v3916_v27  ;;  %v829_v4 = vsel %vm5074_vm11, %v611_v34, %v828_v7  ;;  %v3349_v37 = vshrl.u32 %v3132_v8, 16  ;;  %v3352_v40 = vshll.u32 %v3132_v8, 16  ;;  %v1831_v50 = vpop.permute.xlu0 %1830 }
  0xf2   : > { %v2345_v28 = vor.u32 %v2344_v1, %v5742_v56  ;;  %2881 = vrot.lane.b32.xlu0 %v4709_v21, %s4982_s22  ;;  %v3133_v36 = vld [vmem:[#allocation2 + $0x7c] sm:$0xf]  ;;  %v3677_v2 = vld [vmem:[#allocation2 + $0x78] sm:$0xe]  ;;  %v2772_v41 = vrot.slane %v2770_v43, 4  ;;  %v1507_v47 = vpop.permute.xlu1 %1506  ;;  %v833_v16 = vsel %vm5016_vm3, %v621_v29, %v832_v38  ;;  %v207_v15 = vld [vmem:[%s5038_s17 + $0xc0] sm:$0xff]  ;;  %v2771_v21 = vsel %vm5068_vm10, %v4694_v30, %v2770_v43 }
  0xf3   : > { %v2336_v31 = vrot.slane %v2335_v62, 4  ;;  %830 = vst [vmem:[#allocation2 + $0x84] sm:$0xf] %v829_v4  ;;  %831 = vst.msk [vmem:[#allocation2 + $0x88] sm:$0xf] %vm231_vm0, %v620_v39  ;;  %v3358_v42 = vshll.u32 %v3133_v36, 16  ;;  %v5786_v58 = vpack.c.bf16 %v207_v15, %v207_v15 }
  0xf4   : > { %v3362_v46 = vshrl.u32 %v3133_v36, 16  ;;  %v3678_v53 = vld [vmem:[#allocation2 + $0x7c] sm:$0xf]  ;;  %v2093_v48 = vld [vmem:[#allocation2 + $0x80] sm:$0x1]  ;;  %1551 = vst.msk [vmem:[#allocation3 + $0x20] sm:$0xff] %vm1546_vm2, %v1507_v47 }
  0xf5   : > { %v2638_v54 = vld [vmem:[#allocation2 + $0x80] sm:$0x1]  ;;  %v2346_v59 = vrot.slane %v2345_v28, 4  ;;  %v2348_v55 = vshll.u32 %v2093_v48, 16  ;;  %v3351_v49 = vrot.slane %v3349_v37, 4  ;;  %1875 = vst.msk [vmem:[#allocation3 + $0x20] sm:$0xff] %vm1870_vm4, %v1831_v50  ;;  %v2341_v12 = vsel %vm5130_vm14, %v2336_v31, %v5742_v56  ;;  %v2008_v9 = vpop.permute.xlu0 %2007 }
  0xf6   : > { %v3134_v32 = vld [vmem:[#allocation2 + $0x80] sm:$0x1]  ;;  %v2773_v26 = vrot.slane %v2638_v54, 5  ;;  %3059 = vrot.lane.b32.xlu0 %v4941_v3, %s4980_s20  ;;  %834 = vst [vmem:[#allocation2 + $0x8c] sm:$0x1] %v833_v16  ;;  %v3354_v60 = vrot.slane %v3352_v40, 5  ;;  %v1509_v44 = vpop.permute.xlu1 %1508 }
  0xf7   : > { %v3360_v61 = vrot.slane %v3358_v42, 5  ;;  %v3364_v5 = vrot.slane %v3362_v46, 4  ;;  %v3368_v23 = vshll.u32 %v3134_v32, 16  ;;  %v3679_v17 = vld [vmem:[#allocation2 + $0x80] sm:$0x1]  ;;  %v2350_v10 = vrot.slane %v2348_v55, 5 }
  0xf8   : > { %v4757_v13 = vrot.slane %v3677_v2, 9  ;;  %v3807_v14 = vrot.slane %v3678_v53, 5  ;;  %v2774_v51 = vsel %vm5068_vm10, %v2772_v41, %v2773_v26  ;;  %v3355_v27 = vor.u32 %v3354_v60, %v3351_v49  ;;  %1552 = vst.msk [vmem:[#allocation3 + $0x28] sm:$0xff] %vm1546_vm2, %v1509_v44  ;;  %v3974_v45 = vld [vmem:[#allocation3] sm:$0xff]  ;;  %v3976_v22 = vld [vmem:[#allocation3 + $0x10] sm:$0xff]  ;;  %v3975_v37 = vld [vmem:[#allocation3 + $0x8] sm:$0xff] }
  0xf9   : > { %v3365_v25 = vor.u32 %v3364_v5, %v3360_v61  ;;  %2052 = vst.msk [vmem:[#allocation3 + $0x20] sm:$0xff] %vm6648_vm6, %v2008_v9  ;;  %v2351_v56 = vsel %vm5130_vm14, %v2346_v59, %v2350_v10  ;;  %v3370_v34 = vrot.slane %v3368_v23, 5  ;;  %v3810_v11 = vrot.slane %v3679_v17, 5  ;;  %v1045_v19 = vld [vmem:[#allocation2 + $0x78] sm:$0xf]  ;;  %4861 = vmatprep.mubr.msk.bf16.mxu0 %vm4010_vm15, %v3974_v45 }
  0xfa   : > { %v3809_v24 = vrot.slane %v3807_v14, 4  ;;  %v4678_v1 = vcombine.low %v2341_v12, %v2351_v56  ;;  %v3356_v18 = vrot.slane %v3355_v27, 4  ;;  %v5784_v43 = vsel %vm5068_vm10, %v4757_v13, %v3807_v14  ;;  %v3135_v8 = vld [vmem:[#allocation2 + $0x84] sm:$0xf]  ;;  %v3136_v62 = vld [vmem:[#allocation2 + $0x88] sm:$0xf]  ;;  %v1833_v30 = vpop.permute.xlu1 %1832  ;;  %4862 = vmatmul.mubr.msk.bf16.vlgmr.msra.gmra.mrb[0].mxu0 %vm4010_vm15, %v3975_v37 }
  0xfb   : > { %v4710_v29 = vcombine.low %v2771_v21, %v2774_v51  ;;  %v3366_v7 = vrot.slane %v3365_v25, 4  ;;  %v3373_v38 = vshrl.u32 %v3135_v8, 16  ;;  %v3376_v39 = vshll.u32 %v3135_v8, 16  ;;  %1876 = vst.msk [vmem:[#allocation3 + $0x28] sm:$0xff] %vm1870_vm4, %v1833_v30  ;;  %v1046_v42 = vld [vmem:[#allocation2 + $0x7c] sm:$0xf]  ;;  %4865 = vmatprep.mubr.msk.bf16.mxu0 %vm4010_vm15, %v3976_v22 }
  0xfc   : > { %v3811_v28 = vsel %vm5068_vm10, %v3809_v24, %v3810_v11  ;;  %2562 = vrot.lane.b32.xlu1 %v4678_v1, %s4984_s24  ;;  %v3361_v3 = vsel %vm5130_vm14, %v3356_v18, %v3360_v61  ;;  %v3382_v4 = vshll.u32 %v3136_v62, 16  ;;  %v3386_v2 = vshrl.u32 %v3136_v62, 16  ;;  %v1047_v46 = vld [vmem:[#allocation2 + $0x80] sm:$0x1]  ;;  %v3680_v54 = vld [vmem:[#allocation2 + $0x84] sm:$0xe] }
  0xfd   : > { %v3137_v36 = vld [vmem:[#allocation2 + $0x8c] sm:$0x1]  ;;  %v3371_v40 = vsel %vm5130_vm14, %v3366_v7, %v3370_v34  ;;  %v4773_v41 = vcombine.low %v5784_v43, %v3811_v28  ;;  %v3375_v47 = vrot.slane %v3373_v38, 4  ;;  %v3378_v50 = vrot.slane %v3376_v39, 5  ;;  %v3681_v26 = vld [vmem:[#allocation2 + $0x88] sm:$0xf] }
  0xfe   : > { %v3392_v31 = vshll.u32 %v3137_v36, 16  ;;  %v4741_v53 = vcombine.low %v3361_v3, %v3371_v40  ;;  %v3384_v48 = vrot.slane %v3382_v4, 5  ;;  %v3388_v32 = vrot.slane %v3386_v2, 4  ;;  %v4943_v49 = vld [vmem:[#allocation2 + $0x84] sm:$0xff]   ;;  %v3682_v17 = vld [vmem:[#allocation2 + $0x8c] sm:$0x1] }
  0xff   : > { %v1307_v59 = vshrl.u32 %v1045_v19, 16  ;;  %v1310_v55 = vshll.u32 %v1045_v19, 16  ;;  %v3379_v60 = vor.u32 %v3378_v50, %v3375_v47  ;;  %v1316_v61 = vshll.u32 %v1046_v42, 16  ;;  %v1048_v44 = vld [vmem:[#allocation2 + $0x84] sm:$0xf]  ;;  %v2553_v15 = vpop.permute.xlu0 %2552  ;;  %v2010_v25 = vpop.permute.xlu1 %2009  ;;  %v3977_v56 = vld [vmem:[#allocation3 + $0x18] sm:$0xff] }
 0x100   : > { %v3394_v16 = vrot.slane %v3392_v31, 5  ;;  %2883 = vrot.lane.b32.xlu1 %v4710_v29, %s4982_s22  ;;  %3604 = vrot.lane.b32.xlu0 %v4741_v53, %s4985_s25  ;;  %v1320_v5 = vshrl.u32 %v1046_v42, 16  ;;  %v1326_v23 = vshll.u32 %v1047_v46, 16  ;;  %v3389_v12 = vor.u32 %v3388_v32, %v3384_v48  ;;  %2597 = vst.msk [vmem:[#allocation3 + $0x20] sm:$0xff] %vm2592_vm7, %v2553_v15  ;;  %v1049_v43 = vld [vmem:[#allocation2 + $0x88] sm:$0xf] }
 0x101   : > { %v1309_v10 = vrot.slane %v1307_v59, 4  ;;  %v1312_v13 = vrot.slane %v1310_v55, 5  ;;  %v4758_v14 = vrot.slane %v3680_v54, 9  ;;  %v3380_v9 = vrot.slane %v3379_v60, 4  ;;  %2053 = vst.msk [vmem:[#allocation3 + $0x28] sm:$0xff] %vm6648_vm6, %v2010_v25 }
 0x102   : > { %v1318_v21 = vrot.slane %v1316_v61, 5  ;;  %v1322_v51 = vrot.slane %v1320_v5, 4  ;;  %v1328_v27 = vrot.slane %v1326_v23, 5  ;;  %v3390_v34 = vrot.slane %v3389_v12, 4  ;;  %v1593_v29 = vld [vmem:[#allocation2 + $0x78] sm:$0xe]  ;;  %4866 = vmatmul.mubr.msk.bf16.gmra.mrb[4].mxu0 %vm4010_vm15, %v3977_v56 }
 0x103   : > { %v1313_v24 = vor.u32 %v1312_v13, %v1309_v10  ;;  %v3814_v11 = vrot.slane %v3681_v26, 5  ;;  %v3817_v45 = vrot.slane %v3682_v17, 5  ;;  %v3385_v1 = vsel %vm5130_vm14, %v3380_v9, %v3384_v48  ;;  %v1050_v30 = vld [vmem:[#allocation2 + $0x8c] sm:$0x1]  ;;  %v2874_v3 = vpop.permute.xlu0 %2873  ;;  %v1594_v37 = vld [vmem:[#allocation2 + $0x7c] sm:$0xf] }
 0x104   : > { %3061 = vrot.lane.b32.xlu1 %v4943_v49, %s4980_s20  ;;  %3925 = vrot.lane.b32.xlu0 %v4773_v41, %s4983_s23  ;;  %v1323_v18 = vor.u32 %v1322_v51, %v1318_v21  ;;  %v1331_v19 = vshrl.u32 %v1048_v44, 16  ;;  %v1334_v22 = vshll.u32 %v1048_v44, 16  ;;  %v3395_v7 = vsel %vm5130_vm14, %v3390_v34, %v3394_v16  ;;  %2918 = vst.msk [vmem:[#allocation3 + $0x20] sm:$0xff] %vm2913_vm8, %v2874_v3  ;;  %v1595_v42 = vld [vmem:[#allocation2 + $0x80] sm:$0x1]  ;;  %v208_v9 = vld [vmem:[%s5038_s17 + $0xc8] sm:$0xff] }
 0x105   : > { %v1314_v8 = vrot.slane %v1313_v24, 4  ;;  %v3815_v62 = vsel %vm5068_vm10, %v4758_v14, %v3814_v11  ;;  %v3816_v28 = vrot.slane %v3814_v11, 4  ;;  %v4742_v36 = vcombine.low %v3385_v1, %v3395_v7  ;;  %v1596_v46 = vld [vmem:[#allocation2 + $0x84] sm:$0xe]  ;;  %v1597_v54 = vld [vmem:[#allocation2 + $0x88] sm:$0xf] }
 0x106   : > { %v1324_v38 = vrot.slane %v1323_v18, 4  ;;  %v1333_v39 = vrot.slane %v1331_v19, 4  ;;  %v1336_v4 = vrot.slane %v1334_v22, 5  ;;  %v1340_v31 = vshll.u32 %v1049_v43, 16  ;;  %v1598_v32 = vld [vmem:[#allocation2 + $0x8c] sm:$0x1] }
 0x107   : > { %v1319_v40 = vsel %vm5130_vm14, %v1314_v8, %v1318_v21  ;;  %v3818_v2 = vsel %vm5068_vm10, %v3816_v28, %v3817_v45  ;;  %v1344_v41 = vshrl.u32 %v1049_v43, 16  ;;  %v1350_v48 = vshll.u32 %v1050_v30, 16  ;;  %v279_v49 = vld [vmem:[#allocation2 + $0x90] sm:$0x1]  ;;  %v3052_v60 = vpop.permute.xlu0 %3051  ;;  %v4959_v61 = vld [vmem:[#allocation2 + $0x60] sm:$0xff]  }
 0x108   : > { %3606 = vrot.lane.b32.xlu1 %v4742_v36, %s4985_s25  ;;  %v1329_v53 = vsel %vm5130_vm14, %v1324_v38, %v1328_v27  ;;  %v4774_v47 = vcombine.low %v3815_v62, %v3818_v2  ;;  %v1337_v50 = vor.u32 %v1336_v4, %v1333_v39  ;;  %v1342_v59 = vrot.slane %v1340_v31, 5  ;;  %3096 = vst.msk [vmem:[#allocation3 + $0x20] sm:$0xff] %vm6649_vm12, %v3052_v60  ;;  %v2094_v15 = vld [vmem:[#allocation2 + $0x84] sm:$0xf]  ;;  %v2095_v56 = vld [vmem:[#allocation2 + $0x88] sm:$0xf] }
 0x109   : > { %v4615_v16 = vcombine.low %v1319_v40, %v1329_v53  ;;  %v1346_v55 = vrot.slane %v1344_v41, 4  ;;  %v4631_v26 = vrot.slane %v1593_v29, 9  ;;  %v1352_v23 = vrot.slane %v1350_v48, 5  ;;  %v4960_v1 = vld [vmem:[#allocation2 + $0x6c] sm:$0xff]   ;;  %v335_v28 = vld [vmem:[#allocation2 + $0x98] sm:$0x1] }
 0x10a   : > { %3927 = vrot.lane.b32.xlu0 %v4774_v47, %s4983_s23  ;;  %v1338_v5 = vrot.slane %v1337_v50, 4  ;;  %v1734_v17 = vrot.slane %v1594_v37, 5  ;;  %v1737_v12 = vrot.slane %v1595_v42, 5  ;;  %v4632_v13 = vrot.slane %v1596_v46, 9  ;;  %v2639_v39 = vld [vmem:[#allocation2 + $0x84] sm:$0xe] }
 0x10b   : > { %v1347_v10 = vor.u32 %v1346_v55, %v1342_v59  ;;  %v1741_v14 = vrot.slane %v1597_v54, 5  ;;  %v1744_v44 = vrot.slane %v1598_v32, 5  ;;  %vm6662_vm6 = vcmask 31744   ;;  %v4945_v4 = vld [vmem:[#allocation2 + $0x84] sm:$0xff]   ;;  %v282_v50 = vld [vmem:[#allocation2 + $0x9c] sm:$0x1] }
 0x10c   : > { %1007 = vst.msk [vmem:[#allocation3 + $0x40] sm:$0xff] %vm6662_vm6, %v4959_v61  ;;  %1518 = vrot.lane.b32.xlu1 %v4615_v16, %s4981_s21  ;;  %v1343_v21 = vsel %vm5130_vm14, %v1338_v5, %v1342_v59  ;;  %v1735_v51 = vsel %vm5068_vm10, %v4631_v26, %v1734_v17  ;;  %v1736_v27 = vrot.slane %v1734_v17, 4  ;;  %v280_v25 = vsel %vm5016_vm3, 0, %v279_v49  ;;  %1008 = vst.msk [vmem:[#allocation3 + $0x48] sm:$0xff] %vm6662_vm6, %v4960_v1  ;;  %v2640_v41 = vld [vmem:[#allocation2 + $0x88] sm:$0xf] }
 0x10d   : > { %v1348_v34 = vrot.slane %v1347_v10, 4  ;;  %v1742_v24 = vsel %vm5068_vm10, %v4632_v13, %v1741_v14  ;;  %v1743_v11 = vrot.slane %v1741_v14, 4  ;;  %281 = vst [vmem:[#allocation2 + $0x90] sm:$0x1] %v280_v25  ;;  %v623_v45 = vshrl.u32 %v5763_v57, 16  ;;  %v209_v48 = vld [vmem:[%s5038_s17 + $0xd0] sm:$0xff] }
 0x10e   : > { %v1738_v18 = vsel %vm5068_vm10, %v1736_v27, %v1737_v12  ;;  %v626_v43 = vshll.u32 %v5763_v57, 16  ;;  %v631_v19 = vshrl.u32 %v5765_v63, 16  ;;  %v634_v22 = vshll.u32 %v5765_v63, 16  ;;  %v2555_v30 = vpop.permute.xlu1 %2554  ;;  %v2096_v57 = vld [vmem:[#allocation2 + $0x8c] sm:$0x1] }
 0x10f   : > { %v1353_v29 = vsel %vm5130_vm14, %v1348_v34, %v1352_v23  ;;  %v4647_v7 = vcombine.low %v1735_v51, %v1738_v18  ;;  %v1745_v8 = vsel %vm5068_vm10, %v1743_v11, %v1744_v44  ;;  %v625_v62 = vrot.slane %v623_v45, 7  ;;  %2598 = vst.msk [vmem:[#allocation3 + $0x28] sm:$0xff] %vm2592_vm7, %v2555_v30  ;;  %v2641_v26 = vld [vmem:[#allocation2 + $0x8c] sm:$0x1]  ;;  %v338_v14 = vld [vmem:[#allocation2 + $0xa4] sm:$0x1] }
 0x110   : > { %v4616_v3 = vcombine.low %v1343_v21, %v1353_v29  ;;  %v5845_v36 = vrot.slane %v631_v19, 7  ;;  %v2353_v38 = vshrl.u32 %v2094_v15, 16  ;;  %v5847_v63 = vpack.c.bf16 %v208_v9, %v208_v9  ;;  %v285_v45 = vld [vmem:[#allocation2 + $0xa8] sm:$0x1] }
 0x111   : > { %1842 = vrot.lane.b32.xlu0 %v4647_v7, %s4979_s19  ;;  %v628_v37 = vor.u32 %v626_v43, %v625_v62  ;;  %v629_v40 = vrot.slane %v625_v62, 4  ;;  %v2356_v2 = vshll.u32 %v2094_v15, 16  ;;  %v2362_v31 = vshll.u32 %v2095_v56, 16  ;;  %v3597_v54 = vpop.permute.xlu0 %3596  ;;  %v4963_v62 = vld [vmem:[#allocation2 + $0x78] sm:$0xff]  }
 0x112   : > { %1520 = vrot.lane.b32.xlu1 %v4616_v3, %s4981_s21  ;;  %v4648_v42 = vcombine.low %v1742_v24, %v1745_v8  ;;  %v636_v46 = vor.u32 %v634_v22, %v5845_v36  ;;  %v2355_v53 = vrot.slane %v2353_v38, 4  ;;  %v2366_v47 = vshrl.u32 %v2095_v56, 16  ;;  %v2876_v49 = vpop.permute.xlu1 %2875  ;;  %3641 = vst.msk [vmem:[#allocation3 + $0x20] sm:$0xff] %vm3636_vm13, %v3597_v54 }
 0x113   : > { %v2358_v32 = vrot.slane %v2356_v2, 5  ;;  %v2364_v16 = vrot.slane %v2362_v31, 5  ;;  %v2372_v59 = vshll.u32 %v2096_v57, 16  ;;  %v336_v55 = vsel %vm5042_vm5, 0, %v335_v28  ;;  %2919 = vst.msk [vmem:[#allocation3 + $0x28] sm:$0xff] %vm2913_vm8, %v2876_v49  ;;  %v4964_v28 = vld [vmem:[#allocation2 + $0x84] sm:$0xff]  }
 0x114   : > { %v637_v60 = vsel %vm5057_vm9, %v629_v40, %v636_v46  ;;  %v835_v61 = vld [vmem:[#allocation2 + $0x90] sm:$0xf]  ;;  %v2368_v5 = vrot.slane %v2366_v47, 4  ;;  %337 = vst [vmem:[#allocation2 + $0x98] sm:$0x1] %v336_v55  ;;  %v4695_v23 = vrot.slane %v2639_v39, 9  ;;  %v5864_v44 = vpack.c.bf16 %v209_v48, %v209_v48 }
 0x115   : > { %v2777_v17 = vrot.slane %v2640_v41, 5  ;;  %2019 = vrot.lane.b32.xlu0 %v4945_v4, %s4978_s18  ;;  %v836_v12 = vsel %vm5074_vm11, %v628_v37, %v835_v61  ;;  %838 = vst.msk [vmem:[#allocation2 + $0x94] sm:$0xf] %vm231_vm0, %v637_v60  ;;  %v2359_v10 = vor.u32 %v2358_v32, %v2355_v53  ;;  %v2374_v13 = vrot.slane %v2372_v59, 5  ;;  %v3918_v27 = vpop.permute.xlu0 %3917  ;;  %v210_v60 = vld [vmem:[%s5038_s17 + $0xd8] sm:$0xff] }
 0x116   : > { %1844 = vrot.lane.b32.xlu1 %v4648_v42, %s4979_s19  ;;  %837 = vst [vmem:[#allocation2 + $0x90] sm:$0xf] %v836_v12  ;;  %v2369_v15 = vor.u32 %v2368_v5, %v2364_v16  ;;  %v2780_v21 = vrot.slane %v2641_v26, 5  ;;  %v283_v51 = vsel %vm5016_vm3, 0, %v282_v50  ;;  %v638_v25 = vrot.slane %v5845_v36, 4  ;;  %v3054_v11 = vpop.permute.xlu1 %3053  ;;  %3962 = vst.msk [vmem:[#allocation3 + $0x20] sm:$0xff] %vm3957_vm1, %v3918_v27 }
 0x117   : > { %v2779_v9 = vrot.slane %v2777_v17, 4  ;;  %v2360_v56 = vrot.slane %v2359_v10, 4  ;;  %284 = vst [vmem:[#allocation2 + $0x9c] sm:$0x1] %v283_v51  ;;  %v640_v34 = vshrl.u32 %v5786_v58, 16  ;;  %v648_v24 = vshrl.u32 %v5847_v63, 16 }
 0x118   : > { %v2370_v1 = vrot.slane %v2369_v15, 4  ;;  %v2778_v18 = vsel %vm5068_vm10, %v4695_v23, %v2777_v17  ;;  %v651_v43 = vshll.u32 %v5847_v63, 16  ;;  %v339_v19 = vsel %vm5042_vm5, 0, %v338_v14  ;;  %3097 = vst.msk [vmem:[#allocation3 + $0x28] sm:$0xff] %vm6649_vm12, %v3054_v11  ;;  %vm6663_vm12 = vmmov %vm6662_vm6  ;;  %v211_v11 = vld [vmem:[%s5038_s17 + $0xe0] sm:$0xff] }
 0x119   : > { %v2365_v22 = vsel %vm5130_vm14, %v2360_v56, %v2364_v16  ;;  %v642_v29 = vrot.slane %v640_v34, 7  ;;  %v643_v7 = vshll.u32 %v5786_v58, 16  ;;  %v5882_v8 = vrot.slane %v648_v24, 7  ;;  %340 = vst [vmem:[#allocation2 + $0xa4] sm:$0x1] %v339_v19  ;;  %1009 = vst.msk [vmem:[#allocation3 + $0x50] sm:$0xff] %vm6662_vm6, %v4963_v62 }
 0x11a   : > { %v2375_v30 = vsel %vm5130_vm14, %v2370_v1, %v2374_v13  ;;  %v2781_v3 = vsel %vm5068_vm10, %v2779_v9, %v2780_v21  ;;  %v286_v36 = vsel %vm5016_vm3, 0, %v285_v45  ;;  %v657_v57 = vshrl.u32 %v5864_v44, 16  ;;  %v3599_v37 = vpop.permute.xlu1 %3598  ;;  %1010 = vst.msk [vmem:[#allocation3 + $0x58] sm:$0xff] %vm6663_vm12, %v4964_v28 }
 0x11b   : > { %v4679_v38 = vcombine.low %v2365_v22, %v2375_v30  ;;  %v839_v39 = vld [vmem:[#allocation2 + $0x98] sm:$0x1]  ;;  %v646_v63 = vrot.slane %v642_v29, 4  ;;  %v653_v58 = vor.u32 %v651_v43, %v5882_v8  ;;  %287 = vst [vmem:[#allocation2 + $0xa8] sm:$0x1] %v286_v36  ;;  %v660_v4 = vshll.u32 %v5864_v44, 16  ;;  %v3920_v41 = vpop.permute.xlu0 %3919 }
 0x11c   : > { %v840_v40 = vsel %vm5016_vm3, %v638_v25, %v839_v39  ;;  %v2098_v2 = vld [vmem:[#allocation2 + $0x94] sm:$0xf]  ;;  %3642 = vst.msk [vmem:[#allocation3 + $0x28] sm:$0xff] %vm3636_vm13, %v3599_v37  ;;  %v4711_v47 = vcombine.low %v2778_v18, %v2781_v3  ;;  %v645_v50 = vor.u32 %v643_v7, %v642_v29  ;;  %v655_v14 = vrot.slane %v5882_v8, 4  ;;  %v212_v22 = vld [vmem:[%s5038_s17 + $0xe8] sm:$0xff] }
 0x11d   : > { %v2643_v31 = vld [vmem:[#allocation2 + $0x94] sm:$0xf]  ;;  %2564 = vrot.lane.b32.xlu0 %v4679_v38, %s4984_s24  ;;  %841 = vst [vmem:[#allocation2 + $0x98] sm:$0x1] %v840_v40  ;;  %v2097_v46 = vld [vmem:[#allocation2 + $0x90] sm:$0xf]  ;;  %v654_v48 = vsel %vm5057_vm9, %v646_v63, %v653_v58  ;;  %v5920_v30 = vpack.c.bf16 %v210_v60, %v210_v60  ;;  %v5929_v39 = vpack.c.bf16 %v211_v11, %v211_v11 }
 0x11e   : > { %v4946_v42 = vld [vmem:[#allocation2 + $0x90] sm:$0xff]   ;;  %v2386_v53 = vshll.u32 %v2098_v2, 16  ;;  %3963 = vst.msk [vmem:[#allocation3 + $0x28] sm:$0xff] %vm3957_vm1, %v3920_v41  ;;  %v2377_v54 = vshrl.u32 %v2097_v46, 16  ;;  %v2380_v32 = vshll.u32 %v2097_v46, 16  ;;  %v2390_v16 = vshrl.u32 %v2098_v2, 16  ;;  %v1511_v61 = vpop.permute.xlu1 %1510 }
 0x11f   : > { %v2642_v59 = vld [vmem:[#allocation2 + $0x90] sm:$0xe]  ;;  %v2784_v55 = vrot.slane %v2643_v31, 5  ;;  %845 = vst.msk [vmem:[#allocation2 + $0xa0] sm:$0xf] %vm231_vm0, %v654_v48  ;;  %2021 = vrot.lane.b32.xlu1 %v4946_v42, %s4978_s18  ;;  %v3978_v13 = vld [vmem:[#allocation3 + $0x20] sm:$0xff] }
 0x120   : > { %v5904_v26 = vrot.slane %v2386_v53, 5  ;;  %v4696_v49 = vrot.slane %v2642_v59, 9  ;;  %v2379_v5 = vrot.slane %v2377_v54, 4  ;;  %v2382_v23 = vrot.slane %v2380_v32, 5  ;;  %v4949_v10 = vld [vmem:[#allocation2 + $0x90] sm:$0xff]   ;;  %1553 = vst.msk [vmem:[#allocation3 + $0x30] sm:$0xff] %vm1546_vm2, %v1511_v61  ;;  %4869 = vmatprep.mubr.msk.bf16.mxu0 %vm4010_vm15, %v3978_v13 }
 0x121   : > { %v2392_v17 = vrot.slane %v2390_v16, 4  ;;  %v2786_v12 = vrot.slane %v2784_v55, 4  ;;  %2885 = vrot.lane.b32.xlu0 %v4711_v47, %s4982_s22  ;;  %v842_v15 = vld [vmem:[#allocation2 + $0x9c] sm:$0xf]  ;;  %v3138_v9 = vld [vmem:[#allocation2 + $0x90] sm:$0xf]  ;;  %v5937_v59 = vpack.c.bf16 %v212_v22, %v212_v22 }
 0x122   : > { %v5910_v21 = vrot.slane %v657_v57, 7  ;;  %v2383_v51 = vor.u32 %v2382_v23, %v2379_v5  ;;  %v843_v25 = vsel %vm5074_vm11, %v645_v50, %v842_v15  ;;  %v3139_v56 = vld [vmem:[#allocation2 + $0x94] sm:$0xf]  ;;  %v3397_v34 = vshrl.u32 %v3138_v9, 16  ;;  %v846_v24 = vld [vmem:[#allocation2 + $0xa4] sm:$0x1]  ;;  %v1513_v19 = vpop.permute.xlu1 %1512  ;;  %v1835_v29 = vpop.permute.xlu0 %1834 }
 0x123   : > { %v2393_v27 = vor.u32 %v2392_v17, %v5904_v26  ;;  %844 = vst [vmem:[#allocation2 + $0x9c] sm:$0xf] %v843_v25  ;;  %v3400_v45 = vshll.u32 %v3138_v9, 16  ;;  %v3406_v1 = vshll.u32 %v3139_v56, 16  ;;  %v3410_v18 = vshrl.u32 %v3139_v56, 16  ;;  %1554 = vst.msk [vmem:[#allocation3 + $0x38] sm:$0xff] %vm1546_vm2, %v1513_v19 }
 0x124   : > { %v847_v43 = vsel %vm5016_vm3, %v655_v14, %v846_v24  ;;  %v2099_v7 = vld [vmem:[#allocation2 + $0x98] sm:$0x1]  ;;  %v2384_v8 = vrot.slane %v2383_v51, 4  ;;  %1877 = vst.msk [vmem:[#allocation3 + $0x30] sm:$0xff] %vm1870_vm4, %v1835_v29  ;;  %v5926_v36 = vsel %vm5068_vm10, %v4696_v49, %v2784_v55  ;;  %v3399_v58 = vrot.slane %v3397_v34, 4  ;;  %v4965_v19 = vld [vmem:[#allocation2 + $0x90] sm:$0xff]  }
 0x125   : > { %v2394_v62 = vrot.slane %v2393_v27, 4  ;;  %v2644_v28 = vld [vmem:[#allocation2 + $0x98] sm:$0x1]  ;;  %848 = vst [vmem:[#allocation2 + $0xa4] sm:$0x1] %v847_v43  ;;  %v2396_v3 = vshll.u32 %v2099_v7, 16  ;;  %3063 = vrot.lane.b32.xlu0 %v4949_v10, %s4980_s20  ;;  %v5946_v5 = vor.u32 %v660_v4, %v5910_v21 }
 0x126   : > { %v2787_v57 = vrot.slane %v2644_v28, 5  ;;  %v3140_v38 = vld [vmem:[#allocation2 + $0x98] sm:$0x1]  ;;  %v2389_v63 = vsel %vm5130_vm14, %v2384_v8, %v5904_v26  ;;  %v3402_v37 = vrot.slane %v3400_v45, 5  ;;  %v3408_v40 = vrot.slane %v3406_v1, 5  ;;  %v3979_v31 = vld [vmem:[#allocation3 + $0x28] sm:$0xff]  ;;  %v1837_v50 = vpop.permute.xlu1 %1836  ;;  %v2012_v48 = vpop.permute.xlu0 %2011 }
 0x127   : > { %v3142_v2 = vld [vmem:[#allocation2 + $0xa0] sm:$0xf]  ;;  %v2398_v41 = vrot.slane %v2396_v3, 5  ;;  %v3412_v46 = vrot.slane %v3410_v18, 4  ;;  %v3416_v53 = vshll.u32 %v3140_v38, 16  ;;  %4870 = vmatmul.mubr.msk.bf16.gmra.mrb[8].mxu0 %vm4010_vm15, %v3979_v31  ;;  %1878 = vst.msk [vmem:[#allocation3 + $0x38] sm:$0xff] %vm1870_vm4, %v1837_v50 }
 0x128   : > { %v2788_v42 = vsel %vm5068_vm10, %v2786_v12, %v2787_v57  ;;  %v3683_v47 = vld [vmem:[#allocation2 + $0x90] sm:$0xe]  ;;  %v3403_v54 = vor.u32 %v3402_v37, %v3399_v58  ;;  %v3430_v32 = vshll.u32 %v3142_v2, 16  ;;  %v3434_v16 = vshrl.u32 %v3142_v2, 16  ;;  %v3684_v60 = vld [vmem:[#allocation2 + $0x94] sm:$0xf] }
 0x129   : > { %vm6664_vm12 = vcmask 130144   ;;  %v2399_v55 = vsel %vm5130_vm14, %v2394_v62, %v2398_v41  ;;  %v3413_v26 = vor.u32 %v3412_v46, %v3408_v40  ;;  %v3418_v49 = vrot.slane %v3416_v53, 5  ;;  %v3685_v61 = vld [vmem:[#allocation2 + $0x98] sm:$0x1]  ;;  %v1051_v14 = vld [vmem:[#allocation2 + $0x90] sm:$0xf] }
 0x12a   : > { %2054 = vst.msk [vmem:[#allocation3 + $0x30] sm:$0xff] %vm6664_vm12, %v2012_v48  ;;  %v4680_v23 = vcombine.low %v2389_v63, %v2399_v55  ;;  %v4712_v17 = vcombine.low %v5926_v36, %v2788_v42  ;;  %v3404_v12 = vrot.slane %v3403_v54, 4  ;;  %v3141_v10 = vld [vmem:[#allocation2 + $0x9c] sm:$0xf]  ;;  %v4759_v13 = vrot.slane %v3683_v47, 9 }
 0x12b   : > { %v3414_v15 = vrot.slane %v3413_v26, 4  ;;  %v3421_v51 = vshrl.u32 %v3141_v10, 16  ;;  %v3424_v27 = vshll.u32 %v3141_v10, 16  ;;  %v3432_v25 = vrot.slane %v3430_v32, 5  ;;  %v1052_v24 = vld [vmem:[#allocation2 + $0x94] sm:$0xf] }
 0x12c   : > { %v3143_v9 = vld [vmem:[#allocation2 + $0xa4] sm:$0x1]  ;;  %2566 = vrot.lane.b32.xlu1 %v4680_v23, %s4984_s24  ;;  %v3409_v56 = vsel %vm5130_vm14, %v3404_v12, %v3408_v40  ;;  %v3436_v44 = vrot.slane %v3434_v16, 4  ;;  %v3821_v34 = vrot.slane %v3684_v60, 5  ;;  %v3824_v18 = vrot.slane %v3685_v61, 5  ;;  %v4950_v22 = vld [vmem:[#allocation2 + $0x9c] sm:$0xff]  }
 0x12d   : > { %v3440_v4 = vshll.u32 %v3143_v9, 16  ;;  %v3419_v11 = vsel %vm5130_vm14, %v3414_v15, %v3418_v49  ;;  %v3423_v45 = vrot.slane %v3421_v51, 4  ;;  %v3426_v1 = vrot.slane %v3424_v27, 5  ;;  %v1053_v43 = vld [vmem:[#allocation2 + $0x98] sm:$0x1]  ;;  %v2557_v28 = vpop.permute.xlu0 %2556  ;;  %v2014_v58 = vpop.permute.xlu1 %2013  ;;  %1011 = vst.msk [vmem:[#allocation3 + $0x60] sm:$0xff] %vm6662_vm6, %v4965_v19 }
 0x12e   : > { %v4743_v29 = vcombine.low %v3409_v56, %v3419_v11  ;;  %v3437_v7 = vor.u32 %v3436_v44, %v3432_v25  ;;  %v3822_v62 = vsel %vm5068_vm10, %v4759_v13, %v3821_v34  ;;  %v3823_v36 = vrot.slane %v3821_v34, 4  ;;  %v3686_v63 = vld [vmem:[#allocation2 + $0x9c] sm:$0xe]  ;;  %2599 = vst.msk [vmem:[#allocation3 + $0x30] sm:$0xff] %vm2592_vm7, %v2557_v28  ;;  %v3687_v42 = vld [vmem:[#allocation2 + $0xa0] sm:$0xf] }
 0x12f   : > { %v3442_v8 = vrot.slane %v3440_v4, 5  ;;  %v3427_v3 = vor.u32 %v3426_v1, %v3423_v45  ;;  %v1355_v57 = vshrl.u32 %v1051_v14, 16  ;;  %v1358_v38 = vshll.u32 %v1051_v14, 16  ;;  %v4966_v37 = vld [vmem:[#allocation2 + $0x9c] sm:$0xff]   ;;  %2055 = vst.msk [vmem:[#allocation3 + $0x38] sm:$0xff] %vm6664_vm12, %v2014_v58 }
 0x130   : > { %2887 = vrot.lane.b32.xlu1 %v4712_v17, %s4982_s22  ;;  %3608 = vrot.lane.b32.xlu0 %v4743_v29, %s4985_s25  ;;  %v3438_v40 = vrot.slane %v3437_v7, 4  ;;  %v1364_v2 = vshll.u32 %v1052_v24, 16  ;;  %v1368_v31 = vshrl.u32 %v1052_v24, 16  ;;  %v1374_v41 = vshll.u32 %v1053_v43, 16  ;;  %v3688_v48 = vld [vmem:[#allocation2 + $0xa4] sm:$0x1] }
 0x131   : > { %v3428_v46 = vrot.slane %v3427_v3, 4  ;;  %v3825_v53 = vsel %vm5068_vm10, %v3823_v36, %v3824_v18  ;;  %v1357_v47 = vrot.slane %v1355_v57, 4  ;;  %v1360_v50 = vrot.slane %v1358_v38, 5  ;;  %1012 = vst.msk [vmem:[#allocation3 + $0x68] sm:$0xff] %vm6662_vm6, %v4966_v37  ;;  %v1054_v26 = vld [vmem:[#allocation2 + $0x9c] sm:$0xf]  ;;  %v2878_v60 = vpop.permute.xlu0 %2877 }
 0x132   : > { %v3443_v54 = vsel %vm5130_vm14, %v3438_v40, %v3442_v8  ;;  %v4775_v32 = vcombine.low %v3822_v62, %v3825_v53  ;;  %v1366_v16 = vrot.slane %v1364_v2, 5  ;;  %v1370_v55 = vrot.slane %v1368_v31, 4  ;;  %v1055_v49 = vld [vmem:[#allocation2 + $0xa0] sm:$0xf]  ;;  %v1056_v10 = vld [vmem:[#allocation2 + $0xa4] sm:$0x1] }
 0x133   : > { %v3433_v61 = vsel %vm5130_vm14, %v3428_v46, %v3432_v25  ;;  %v1361_v23 = vor.u32 %v1360_v50, %v1357_v47  ;;  %v1376_v17 = vrot.slane %v1374_v41, 5  ;;  %v4760_v12 = vrot.slane %v3686_v63, 9  ;;  %2920 = vst.msk [vmem:[#allocation3 + $0x30] sm:$0xff] %vm2913_vm8, %v2878_v60  ;;  %v1599_v51 = vld [vmem:[#allocation2 + $0x90] sm:$0xe] }
 0x134   : > { %3065 = vrot.lane.b32.xlu1 %v4950_v22, %s4980_s20  ;;  %v4744_v13 = vcombine.low %v3433_v61, %v3443_v54  ;;  %3929 = vrot.lane.b32.xlu0 %v4775_v32, %s4983_s23  ;;  %v1371_v14 = vor.u32 %v1370_v55, %v1366_v16  ;;  %v3828_v15 = vrot.slane %v3687_v42, 5  ;;  %v3831_v9 = vrot.slane %v3688_v48, 5  ;;  %v1600_v25 = vld [vmem:[#allocation2 + $0x94] sm:$0xf]  ;;  %v1601_v1 = vld [vmem:[#allocation2 + $0x98] sm:$0x1] }
 0x135   : > { %v1362_v27 = vrot.slane %v1361_v23, 4  ;;  %v1379_v56 = vshrl.u32 %v1054_v26, 16  ;;  %v1382_v44 = vshll.u32 %v1054_v26, 16  ;;  %v1388_v4 = vshll.u32 %v1055_v49, 16  ;;  %v3056_v18 = vpop.permute.xlu0 %3055  ;;  %v1602_v7 = vld [vmem:[#allocation2 + $0x9c] sm:$0xe] }
 0x136   : > { %v1372_v34 = vrot.slane %v1371_v14, 4  ;;  %v3829_v24 = vsel %vm5068_vm10, %v4760_v12, %v3828_v15  ;;  %v3830_v11 = vrot.slane %v3828_v15, 4  ;;  %v1392_v45 = vshrl.u32 %v1055_v49, 16  ;;  %v1603_v36 = vld [vmem:[#allocation2 + $0xa0] sm:$0xf] }
 0x137   : > { %v1367_v43 = vsel %vm5130_vm14, %v1362_v27, %v1366_v16  ;;  %v1381_v19 = vrot.slane %v1379_v56, 4  ;;  %v1384_v22 = vrot.slane %v1382_v44, 5  ;;  %v1390_v29 = vrot.slane %v1388_v4, 5  ;;  %v1604_v57 = vld [vmem:[#allocation2 + $0xa4] sm:$0x1] }
 0x138   : > { %vm6665_vm12 = vcmask 228544   ;;  %3610 = vrot.lane.b32.xlu1 %v4744_v13, %s4985_s25  ;;  %v1377_v8 = vsel %vm5130_vm14, %v1372_v34, %v1376_v17  ;;  %v3832_v62 = vsel %vm5068_vm10, %v3830_v11, %v3831_v9  ;;  %v1394_v28 = vrot.slane %v1392_v45, 4  ;;  %v849_v42 = vld [vmem:[#allocation2 + $0xa8] sm:$0xf]  ;;  %v2100_v48 = vld [vmem:[#allocation2 + $0x9c] sm:$0xf] }
 0x139   : > { %3098 = vst.msk [vmem:[#allocation3 + $0x30] sm:$0xff] %vm6665_vm12, %v3056_v18  ;;  %v1398_v3 = vshll.u32 %v1056_v10, 16  ;;  %v4617_v38 = vcombine.low %v1367_v43, %v1377_v8  ;;  %v4776_v63 = vcombine.low %v3829_v24, %v3832_v62  ;;  %v1385_v58 = vor.u32 %v1384_v22, %v1381_v19  ;;  %v2101_v54 = vld [vmem:[#allocation2 + $0xa0] sm:$0xf]  ;;  %v2102_v14 = vld [vmem:[#allocation2 + $0xa4] sm:$0x1]  ;;  %vm6666_vm6 = vmmov %vm6665_vm12 }
 0x13a   : > { %v4633_v37 = vrot.slane %v1599_v51, 9  ;;  %v1395_v40 = vor.u32 %v1394_v28, %v1390_v29  ;;  %v1748_v31 = vrot.slane %v1600_v25, 5  ;;  %v1751_v41 = vrot.slane %v1601_v1, 5  ;;  %v341_v15 = vld [vmem:[#allocation2 + $0xb0] sm:$0x1]  ;;  %v4951_v45 = vld [vmem:[#allocation2 + $0x9c] sm:$0xff]  }
 0x13b   : > { %v1400_v2 = vrot.slane %v1398_v3, 5  ;;  %3931 = vrot.lane.b32.xlu0 %v4776_v63, %s4983_s23  ;;  %v1386_v46 = vrot.slane %v1385_v58, 4  ;;  %v4634_v53 = vrot.slane %v1602_v7, 9  ;;  %v1755_v47 = vrot.slane %v1603_v36, 5  ;;  %v2645_v44 = vld [vmem:[#allocation2 + $0x9c] sm:$0xe] }
 0x13c   : > { %v1758_v50 = vrot.slane %v1604_v57, 5  ;;  %1522 = vrot.lane.b32.xlu1 %v4617_v38, %s4981_s21  ;;  %v1396_v32 = vrot.slane %v1395_v40, 4  ;;  %v1749_v16 = vsel %vm5068_vm10, %v4633_v37, %v1748_v31  ;;  %v1750_v55 = vrot.slane %v1748_v31, 4  ;;  %v2559_v17 = vpop.permute.xlu1 %2558  ;;  %v288_v4 = vld [vmem:[#allocation2 + $0xb4] sm:$0x1] }
 0x13d   : > { %v663_v26 = vrot.slane %v5910_v21, 4  ;;  %v1391_v49 = vsel %vm5130_vm14, %v1386_v46, %v1390_v29  ;;  %v1756_v60 = vsel %vm5068_vm10, %v4634_v53, %v1755_v47  ;;  %v1757_v61 = vrot.slane %v1755_v47, 4  ;;  %2600 = vst.msk [vmem:[#allocation3 + $0x38] sm:$0xff] %vm2592_vm7, %v2559_v17  ;;  %v2646_v11 = vld [vmem:[#allocation2 + $0xa0] sm:$0xf] }
 0x13e   : > { %v665_v23 = vshrl.u32 %v5920_v30, 16  ;;  %v1401_v12 = vsel %vm5130_vm14, %v1396_v32, %v1400_v2  ;;  %v1752_v10 = vsel %vm5068_vm10, %v1750_v55, %v1751_v41  ;;  %v668_v13 = vshll.u32 %v5920_v30, 16  ;;  %v2647_v22 = vld [vmem:[#allocation2 + $0xa4] sm:$0x1] }
 0x13f   : > { %v850_v21 = vsel %vm5074_vm11, %v5946_v5, %v849_v42  ;;  %v4618_v9 = vcombine.low %v1391_v49, %v1401_v12  ;;  %v4649_v51 = vcombine.low %v1749_v16, %v1752_v10  ;;  %v1759_v27 = vsel %vm5068_vm10, %v1757_v61, %v1758_v50  ;;  %v3601_v5 = vpop.permute.xlu0 %3600 }
 0x140   : > { %v6002_v56 = vrot.slane %v665_v23, 7  ;;  %851 = vst [vmem:[#allocation2 + $0xa8] sm:$0xf] %v850_v21  ;;  %v4650_v25 = vcombine.low %v1756_v60, %v1759_v27  ;;  %v2401_v30 = vshrl.u32 %v2100_v48, 16  ;;  %v2404_v34 = vshll.u32 %v2100_v48, 16  ;;  %v2880_v29 = vpop.permute.xlu1 %2879  ;;  %3643 = vst.msk [vmem:[#allocation3 + $0x30] sm:$0xff] %vm3636_vm13, %v3601_v5 }
 0x141   : > { %v2410_v24 = vshll.u32 %v2101_v54, 16  ;;  %1524 = vrot.lane.b32.xlu1 %v4618_v9, %s4981_s21  ;;  %1846 = vrot.lane.b32.xlu0 %v4649_v51, %s4979_s19  ;;  %v2414_v43 = vshrl.u32 %v2101_v54, 16  ;;  %v2420_v19 = vshll.u32 %v2102_v14, 16  ;;  %v342_v28 = vsel %vm5042_vm5, 0, %v341_v15  ;;  %2921 = vst.msk [vmem:[#allocation3 + $0x38] sm:$0xff] %vm2913_vm8, %v2880_v29 }
 0x142   : > { %v670_v1 = vor.u32 %v668_v13, %v6002_v56  ;;  %v672_v18 = vrot.slane %v6002_v56, 4  ;;  %v2403_v7 = vrot.slane %v2401_v30, 4  ;;  %v2406_v8 = vrot.slane %v2404_v34, 5  ;;  %343 = vst [vmem:[#allocation2 + $0xb0] sm:$0x1] %v342_v28 }
 0x143   : > { %v2412_v62 = vrot.slane %v2410_v24, 5  ;;  %v2416_v36 = vrot.slane %v2414_v43, 4  ;;  %v2422_v57 = vrot.slane %v2420_v19, 5  ;;  %v4697_v38 = vrot.slane %v2645_v44, 9  ;;  %v3922_v2 = vpop.permute.xlu0 %3921 }
 0x144   : > { %v671_v3 = vsel %vm5057_vm9, %v663_v26, %v670_v1  ;;  %v2407_v63 = vor.u32 %v2406_v8, %v2403_v7  ;;  %v2791_v58 = vrot.slane %v2646_v11, 5  ;;  %v2794_v37 = vrot.slane %v2647_v22, 5  ;;  %v3058_v53 = vpop.permute.xlu1 %3057  ;;  %3964 = vst.msk [vmem:[#allocation3 + $0x30] sm:$0xff] %vm3957_vm1, %v3922_v2 }
 0x145   : > { %852 = vst.msk [vmem:[#allocation2 + $0xac] sm:$0xf] %vm231_vm0, %v671_v3  ;;  %v289_v40 = vsel %vm5016_vm3, 0, %v288_v4  ;;  %1848 = vrot.lane.b32.xlu1 %v4650_v25, %s4979_s19  ;;  %2023 = vrot.lane.b32.xlu0 %v4951_v45, %s4978_s18  ;;  %v2417_v31 = vor.u32 %v2416_v36, %v2412_v62  ;;  %v674_v41 = vshrl.u32 %v5929_v39, 16  ;;  %v677_v42 = vshll.u32 %v5929_v39, 16 }
 0x146   : > { %290 = vst [vmem:[#allocation2 + $0xb4] sm:$0x1] %v289_v40  ;;  %v682_v46 = vshrl.u32 %v5937_v59, 16  ;;  %v2408_v47 = vrot.slane %v2407_v63, 4  ;;  %v2793_v48 = vrot.slane %v2791_v58, 4  ;;  %3099 = vst.msk [vmem:[#allocation3 + $0x38] sm:$0xff] %vm6666_vm6, %v3058_v53  ;;  %v2792_v39 = vsel %vm5068_vm10, %v4697_v38, %v2791_v58 }
 0x147   : > { %v2103_v50 = vld [vmem:[#allocation2 + $0xa8] sm:$0xf]  ;;  %v2418_v54 = vrot.slane %v2417_v31, 4  ;;  %v676_v55 = vrot.slane %v674_v41, 7  ;;  %v685_v9 = vshll.u32 %v5937_v59, 16  ;;  %vm6667_vm12 = vcmask 130144  }
 0x148   : > { %v2425_v32 = vshrl.u32 %v2103_v50, 16  ;;  %v2428_v16 = vshll.u32 %v2103_v50, 16  ;;  %v2413_v26 = vsel %vm5130_vm14, %v2408_v47, %v2412_v62  ;;  %v6028_v49 = vld [vmem:[#allocation2 + $0xa8] sm:$0xe]  ;;  %v6030_v60 = vrot.slane %v682_v46, 7  ;;  %v3603_v10 = vpop.permute.xlu1 %3602 }
 0x149   : > { %v2423_v61 = vsel %vm5130_vm14, %v2418_v54, %v2422_v57  ;;  %v2795_v12 = vsel %vm5068_vm10, %v2793_v48, %v2794_v37  ;;  %v853_v21 = vld [vmem:[#allocation2 + $0xb0] sm:$0x1]  ;;  %v679_v14 = vor.u32 %v677_v42, %v676_v55  ;;  %v680_v15 = vrot.slane %v676_v55, 4  ;;  %v3144_v51 = vld [vmem:[#allocation2 + $0xa8] sm:$0xf]  ;;  %3644 = vst.msk [vmem:[#allocation3 + $0x38] sm:$0xff] %vm3636_vm13, %v3603_v10  ;;  %v3924_v27 = vpop.permute.xlu0 %3923 }
 0x14a   : > { %v2427_v23 = vrot.slane %v2425_v32, 4  ;;  %v2430_v17 = vrot.slane %v2428_v16, 5  ;;  %v4681_v13 = vcombine.low %v2413_v26, %v2423_v61  ;;  %v854_v44 = vsel %vm5016_vm3, %v672_v18, %v853_v21  ;;  %3965 = vst.msk [vmem:[#allocation3 + $0x38] sm:$0xff] %vm3957_vm1, %v3924_v27  ;;  %v344_v45 = vld [vmem:[#allocation2 + $0xbc] sm:$0x1] }
 0x14b   : > { %v4698_v30 = vrot.slane %v6028_v49, 9  ;;  %855 = vst [vmem:[#allocation2 + $0xb0] sm:$0x1] %v854_v44  ;;  %v4713_v59 = vcombine.low %v2792_v39, %v2795_v12  ;;  %v687_v5 = vor.u32 %v685_v9, %v6030_v60  ;;  %v6044_v1 = vld [vmem:[#allocation2 + $0xa8] sm:$0xe]  ;;  %v3445_v19 = vshrl.u32 %v3144_v51, 16 }
 0x14c   : > { %v4952_v56 = vld [vmem:[#allocation2 + $0xa8] sm:$0xff]   ;;  %v2431_v25 = vor.u32 %v2430_v17, %v2427_v23  ;;  %2568 = vrot.lane.b32.xlu0 %v4681_v13, %s4984_s24  ;;  %v1515_v29 = vpop.permute.xlu1 %1514  ;;  %v689_v38 = vrot.slane %v6030_v60, 4  ;;  %v3448_v58 = vshll.u32 %v3144_v51, 16  ;;  %v345_v53 = vsel %vm5042_vm5, 0, %v344_v45 }
 0x14d   : > { %v2104_v4 = vld [vmem:[#allocation2 + $0xac] sm:$0xf]  ;;  %2025 = vrot.lane.b32.xlu1 %v4952_v56, %s4978_s18  ;;  %v856_v43 = vld [vmem:[#allocation2 + $0xb4] sm:$0xf]  ;;  %v6047_v22 = vld [vmem:[#allocation2 + $0xa8] sm:$0xf]  ;;  %v688_v62 = vsel %vm5057_vm9, %v680_v15, %v687_v5 }
 0x14e   : > { %v2434_v34 = vshll.u32 %v2104_v4, 16  ;;  %v2438_v24 = vshrl.u32 %v2104_v4, 16  ;;  %v2649_v11 = vld [vmem:[#allocation2 + $0xac] sm:$0xf]  ;;  %v857_v28 = vsel %vm5074_vm11, %v679_v14, %v856_v43  ;;  %1555 = vst.msk [vmem:[#allocation3 + $0x40] sm:$0xff] %vm1546_vm2, %v1515_v29  ;;  %v6056_v57 = vrot.slane %v2431_v25, 4 }
 0x14f   : > { %v2798_v18 = vrot.slane %v2649_v11, 5  ;;  %v3145_v3 = vld [vmem:[#allocation2 + $0xac] sm:$0xf]  ;;  %858 = vst [vmem:[#allocation2 + $0xb4] sm:$0xf] %v857_v28  ;;  %v3447_v63 = vrot.slane %v3445_v19, 4  ;;  %v1839_v48 = vpop.permute.xlu0 %1838 }
 0x150   : > { %v6049_v7 = vrot.slane %v2434_v34, 5  ;;  %v2440_v8 = vrot.slane %v2438_v24, 4  ;;  %v3690_v36 = vld [vmem:[#allocation2 + $0xac] sm:$0xf]  ;;  %859 = vst.msk [vmem:[#allocation2 + $0xb8] sm:$0xf] %vm231_vm0, %v688_v62  ;;  %2889 = vrot.lane.b32.xlu0 %v4713_v59, %s4982_s22  ;;  %v1517_v26 = vpop.permute.xlu1 %1516 }
 0x151   : > { %v3980_v37 = vld [vmem:[#allocation3 + $0x30] sm:$0xff]  ;;  %v2800_v2 = vrot.slane %v2798_v18, 4  ;;  %v3454_v41 = vshll.u32 %v3145_v3, 16  ;;  %v3458_v42 = vshrl.u32 %v3145_v3, 16  ;;  %v3450_v46 = vrot.slane %v3448_v58, 5  ;;  %1879 = vst.msk [vmem:[#allocation3 + $0x40] sm:$0xff] %vm1870_vm4, %v1839_v48 }
 0x152   : > { %v2441_v40 = vor.u32 %v2440_v8, %v6049_v7  ;;  %v4955_v31 = vld [vmem:[#allocation2 + $0xa8] sm:$0xff]   ;;  %4873 = vmatprep.mubr.msk.bf16.mxu0 %vm4010_vm15, %v3980_v37  ;;  %v4761_v47 = vrot.slane %v6044_v1, 9  ;;  %v3835_v50 = vrot.slane %v3690_v36, 5  ;;  %346 = vst [vmem:[#allocation2 + $0xbc] sm:$0x1] %v345_v53  ;;  %v1403_v55 = vshrl.u32 %v6047_v22, 16 }
 0x153   : > { %v3456_v32 = vrot.slane %v3454_v41, 5  ;;  %v3460_v16 = vrot.slane %v3458_v42, 4  ;;  %v3981_v39 = vld [vmem:[#allocation3 + $0x38] sm:$0xff]  ;;  %v6070_v23 = vsel %vm5068_vm10, %v4698_v30, %v2798_v18  ;;  %v3451_v12 = vor.u32 %v3450_v46, %v3447_v63  ;;  %1556 = vst.msk [vmem:[#allocation3 + $0x48] sm:$0xff] %vm1546_vm2, %v1517_v26  ;;  %v2016_v44 = vpop.permute.xlu0 %2015  ;;  %v1058_v8 = vld [vmem:[#allocation2 + $0xac] sm:$0xf] }
 0x154   : > { %v2442_v54 = vrot.slane %v2441_v40, 4  ;;  %v2105_v49 = vld [vmem:[#allocation2 + $0xb0] sm:$0x1]  ;;  %4874 = vmatmul.mubr.msk.bf16.gmra.mrb[12].mxu0 %vm4010_vm15, %v3981_v39  ;;  %3067 = vrot.lane.b32.xlu0 %v4955_v31, %s4980_s20  ;;  %v2437_v9 = vsel %vm5130_vm14, %v6056_v57, %v6049_v7  ;;  %v3837_v27 = vrot.slane %v3835_v50, 4  ;;  %v3836_v30 = vsel %vm5068_vm10, %v4761_v47, %v3835_v50  ;;  %v1841_v24 = vpop.permute.xlu1 %1840  ;;  %2056 = vst.msk [vmem:[#allocation3 + $0x40] sm:$0xff] %vm6667_vm12, %v2016_v44 }
 0x155   : > { %v2650_v61 = vld [vmem:[#allocation2 + $0xb0] sm:$0x1]  ;;  %v2444_v10 = vshll.u32 %v2105_v49, 16  ;;  %v3461_v21 = vor.u32 %v3460_v16, %v3456_v32  ;;  %v3452_v51 = vrot.slane %v3451_v12, 4  ;;  %v6083_v34 = vrot.slane %v1403_v55, 4  ;;  %1880 = vst.msk [vmem:[#allocation3 + $0x48] sm:$0xff] %vm1870_vm4, %v1841_v24 }
 0x156   : > { %v3146_v17 = vld [vmem:[#allocation2 + $0xb0] sm:$0x1]  ;;  %v2801_v13 = vrot.slane %v2650_v61, 5  ;;  %v3147_v1 = vld [vmem:[#allocation2 + $0xb4] sm:$0xf]  ;;  %v1406_v53 = vshll.u32 %v6047_v22, 16 }
 0x157   : > { %v3464_v14 = vshll.u32 %v3146_v17, 16  ;;  %v3691_v15 = vld [vmem:[#allocation2 + $0xb0] sm:$0x1]  ;;  %v2446_v4 = vrot.slane %v2444_v10, 5  ;;  %v3457_v11 = vsel %vm5130_vm14, %v3452_v51, %v3456_v32  ;;  %v3462_v5 = vrot.slane %v3461_v21, 4  ;;  %v4967_v61 = vld [vmem:[#allocation2 + $0xa8] sm:$0xff]  }
 0x158   : > { %v3838_v56 = vrot.slane %v3691_v15, 5  ;;  %v2802_v25 = vsel %vm5068_vm10, %v2800_v2, %v2801_v13  ;;  %v3148_v18 = vld [vmem:[#allocation2 + $0xb8] sm:$0xf]  ;;  %v3469_v19 = vshrl.u32 %v3147_v1, 16  ;;  %v3472_v29 = vshll.u32 %v3147_v1, 16  ;;  %v213_v50 = vld [vmem:[%s5038_s17 + $0xf0] sm:$0xff] }
 0x159   : > { %v4714_v59 = vcombine.low %v6070_v23, %v2802_v25  ;;  %v3466_v45 = vrot.slane %v3464_v14, 5  ;;  %v2447_v43 = vsel %vm5130_vm14, %v2442_v54, %v2446_v4  ;;  %v3478_v7 = vshll.u32 %v3148_v18, 16  ;;  %v860_v3 = vld [vmem:[#allocation2 + $0xbc] sm:$0x1]  ;;  %v1059_v63 = vld [vmem:[#allocation2 + $0xb0] sm:$0x1] }
 0x15a   : > { %v4682_v62 = vcombine.low %v2437_v9, %v2447_v43  ;;  %v3482_v36 = vshrl.u32 %v3148_v18, 16  ;;  %v3839_v57 = vsel %vm5068_vm10, %v3837_v27, %v3838_v56  ;;  %v861_v37 = vsel %vm5016_vm3, %v689_v38, %v860_v3  ;;  %v3693_v31 = vld [vmem:[#allocation2 + $0xb8] sm:$0xf]  ;;  %v3692_v47 = vld [vmem:[#allocation2 + $0xb4] sm:$0xe] }
 0x15b   : > { %v3467_v28 = vsel %vm5130_vm14, %v3462_v5, %v3466_v45  ;;  %v3471_v40 = vrot.slane %v3469_v19, 4  ;;  %v3474_v2 = vrot.slane %v3472_v29, 5  ;;  %862 = vst [vmem:[#allocation2 + $0xbc] sm:$0x1] %v861_v37  ;;  %v6101_v41 = vrot.slane %v3478_v7, 5  ;;  %v214_v12 = vld [vmem:[%s5038_s17 + $0xf8] sm:$0xff] }
 0x15c   : > { %v4745_v58 = vcombine.low %v3457_v11, %v3467_v28  ;;  %2570 = vrot.lane.b32.xlu1 %v4682_v62, %s4984_s24  ;;  %v3484_v42 = vrot.slane %v3482_v36, 4  ;;  %v4777_v46 = vcombine.low %v3836_v30, %v3839_v57  ;;  %v1412_v48 = vshll.u32 %v1058_v8, 16  ;;  %v1060_v32 = vld [vmem:[#allocation2 + $0xb4] sm:$0xf]  ;;  %v6106_v16 = vld [vmem:[#allocation2 + $0xa8] sm:$0xe] }
 0x15d   : > { %v3475_v60 = vor.u32 %v3474_v2, %v3471_v40  ;;  %v1416_v38 = vshrl.u32 %v1058_v8, 16  ;;  %v1422_v54 = vshll.u32 %v1059_v63, 16  ;;  %v1408_v26 = vrot.slane %v1406_v53, 5  ;;  %v1061_v49 = vld [vmem:[#allocation2 + $0xb8] sm:$0xf] }
 0x15e   : > { %3612 = vrot.lane.b32.xlu0 %v4745_v58, %s4985_s25  ;;  %v3485_v55 = vor.u32 %v3484_v42, %v6101_v41  ;;  %v3842_v39 = vrot.slane %v3693_v31, 5  ;;  %v6109_v23 = vrot.slane %v1412_v48, 5  ;;  %v4762_v17 = vrot.slane %v3692_v47, 9  ;;  %v4956_v13 = vld [vmem:[#allocation2 + $0xb4] sm:$0xff]   ;;  %v1606_v11 = vld [vmem:[#allocation2 + $0xac] sm:$0xf] }
 0x15f   : > { %v1418_v22 = vrot.slane %v1416_v38, 4  ;;  %v6112_v10 = vpack.c.bf16 %v213_v50, %v213_v50  ;;  %v3476_v21 = vrot.slane %v3475_v60, 4  ;;  %v1409_v15 = vor.u32 %v1408_v26, %v6083_v34  ;;  %v1607_v19 = vld [vmem:[#allocation2 + $0xb0] sm:$0x1]  ;;  %v4968_v57 = vld [vmem:[#allocation2 + $0xb4] sm:$0xff]  }
 0x160   : > { %2891 = vrot.lane.b32.xlu1 %v4714_v59, %s4982_s22  ;;  %v3486_v14 = vrot.slane %v3485_v55, 4  ;;  %v1424_v9 = vrot.slane %v1422_v54, 5  ;;  %v2561_v51 = vpop.permute.xlu0 %2560  ;;  %vm6668_vm6 = vcmask 31744   ;;  %v3844_v56 = vrot.slane %v3842_v39, 4  ;;  %v1608_v2 = vld [vmem:[#allocation2 + $0xb4] sm:$0xe] }
 0x161   : > { %1013 = vst.msk [vmem:[#allocation3 + $0x70] sm:$0xff] %vm6668_vm6, %v4967_v61  ;;  %v1419_v27 = vor.u32 %v1418_v22, %v6109_v23  ;;  %v1427_v44 = vshrl.u32 %v1060_v32, 16  ;;  %v1430_v4 = vshll.u32 %v1060_v32, 16  ;;  %v2018_v25 = vpop.permute.xlu1 %2017  ;;  %v1410_v30 = vrot.slane %v1409_v15, 4  ;;  %v291_v31 = vld [vmem:[#allocation2 + $0xc0] sm:$0x1] }
 0x162   : > { %3933 = vrot.lane.b32.xlu0 %v4777_v46, %s4983_s23  ;;  %2601 = vst.msk [vmem:[#allocation3 + $0x40] sm:$0xff] %vm2592_vm7, %v2561_v51  ;;  %v1436_v24 = vshll.u32 %v1061_v49, 16  ;;  %v1440_v59 = vshrl.u32 %v1061_v49, 16  ;;  %v4635_v34 = vrot.slane %v6106_v16, 9  ;;  %v3149_v5 = vld [vmem:[#allocation2 + $0xbc] sm:$0x1]  ;;  %v3843_v18 = vsel %vm5068_vm10, %v4762_v17, %v3842_v39 }
 0x163   : > { %2057 = vst.msk [vmem:[#allocation3 + $0x48] sm:$0xff] %vm6667_vm12, %v2018_v25  ;;  %v1420_v45 = vrot.slane %v1419_v27, 4  ;;  %v3694_v1 = vld [vmem:[#allocation2 + $0xbc] sm:$0x1]  ;;  %v1429_v43 = vrot.slane %v1427_v44, 4  ;;  %v6124_v29 = vpack.c.bf16 %v214_v12, %v214_v12  ;;  %v3481_v7 = vsel %vm5130_vm14, %v3476_v21, %v6101_v41 }
 0x164   : > { %3069 = vrot.lane.b32.xlu1 %v4956_v13, %s4980_s20  ;;  %v3488_v8 = vshll.u32 %v3149_v5, 16  ;;  %v3845_v62 = vrot.slane %v3694_v1, 5  ;;  %v1062_v28 = vld [vmem:[#allocation2 + $0xbc] sm:$0x1]  ;;  %v1432_v3 = vrot.slane %v1430_v4, 5  ;;  %v2882_v36 = vpop.permute.xlu0 %2881  ;;  %v1415_v63 = vsel %vm5130_vm14, %v1410_v30, %v6109_v23  ;;  %1014 = vst.msk [vmem:[#allocation3 + $0x78] sm:$0xff] %vm6668_vm6, %v4968_v57 }
 0x165   : > { %v1438_v58 = vrot.slane %v1436_v24, 5  ;;  %v1442_v37 = vrot.slane %v1440_v59, 4  ;;  %v1446_v40 = vshll.u32 %v1062_v28, 16  ;;  %2922 = vst.msk [vmem:[#allocation3 + $0x40] sm:$0xff] %vm2913_vm8, %v2882_v36  ;;  %v1425_v41 = vsel %vm5130_vm14, %v1420_v45, %v1424_v9  ;;  %v1609_v47 = vld [vmem:[#allocation2 + $0xb8] sm:$0xf] }
 0x166   : > { %v3490_v42 = vrot.slane %v3488_v8, 5  ;;  %v3846_v46 = vsel %vm5068_vm10, %v3844_v56, %v3845_v62  ;;  %v1433_v53 = vor.u32 %v1432_v3, %v1429_v43  ;;  %v1610_v50 = vld [vmem:[#allocation2 + $0xbc] sm:$0x1]  ;;  %v1762_v54 = vrot.slane %v1606_v11, 5  ;;  %v2107_v56 = vld [vmem:[#allocation2 + $0xb8] sm:$0xf] }
 0x167   : > { %v4778_v60 = vcombine.low %v3843_v18, %v3846_v46  ;;  %v1443_v48 = vor.u32 %v1442_v37, %v1438_v58  ;;  %v1448_v38 = vrot.slane %v1446_v40, 5  ;;  %v1765_v55 = vrot.slane %v1607_v19, 5  ;;  %v347_v5 = vld [vmem:[#allocation2 + $0xc8] sm:$0x1]  ;;  %v4957_v45 = vld [vmem:[#allocation2 + $0xb4] sm:$0xff]  }
 0x168   : > { %v3491_v32 = vsel %vm5130_vm14, %v3486_v14, %v3490_v42  ;;  %v1434_v16 = vrot.slane %v1433_v53, 4  ;;  %v4636_v26 = vrot.slane %v1608_v2, 9  ;;  %v3060_v39 = vpop.permute.xlu0 %3059  ;;  %v1763_v23 = vsel %vm5068_vm10, %v4635_v34, %v1762_v54  ;;  %v2106_v14 = vld [vmem:[#allocation2 + $0xb4] sm:$0xf]  ;;  %v2108_v1 = vld [vmem:[#allocation2 + $0xbc] sm:$0x1] }
 0x169   : > { %v4746_v49 = vcombine.low %v3481_v7, %v3491_v32  ;;  %3935 = vrot.lane.b32.xlu0 %v4778_v60, %s4983_s23  ;;  %v1444_v61 = vrot.slane %v1443_v48, 4  ;;  %v1764_v22 = vrot.slane %v1762_v54, 4  ;;  %vm6669_vm12 = vcmask 228544   ;;  %v2651_v3 = vld [vmem:[#allocation2 + $0xb4] sm:$0xe] }
 0x16a   : > { %3100 = vst.msk [vmem:[#allocation3 + $0x40] sm:$0xff] %vm6669_vm12, %v3060_v39  ;;  %v4619_v17 = vcombine.low %v1415_v63, %v1425_v41  ;;  %v1769_v12 = vrot.slane %v1609_v47, 5  ;;  %v1772_v13 = vrot.slane %v1610_v50, 5  ;;  %v292_v21 = vsel %vm5016_vm3, 0, %v291_v31  ;;  %v2653_v40 = vld [vmem:[#allocation2 + $0xbc] sm:$0x1] }
 0x16b   : > { %3614 = vrot.lane.b32.xlu1 %v4746_v49, %s4985_s25  ;;  %v1439_v15 = vsel %vm5130_vm14, %v1434_v16, %v1438_v58  ;;  %v1766_v9 = vsel %vm5068_vm10, %v1764_v22, %v1765_v55  ;;  %293 = vst [vmem:[#allocation2 + $0xc0] sm:$0x1] %v292_v21  ;;  %v691_v51 = vshrl.u32 %v6112_v10, 16  ;;  %v694_v27 = vshll.u32 %v6112_v10, 16  ;;  %v294_v46 = vld [vmem:[#allocation2 + $0xcc] sm:$0x1] }
 0x16c   : > { %v1449_v44 = vsel %vm5130_vm14, %v1444_v61, %v1448_v38  ;;  %v4651_v4 = vcombine.low %v1763_v23, %v1766_v9  ;;  %v6158_v25 = vsel %vm5068_vm10, %v4636_v26, %v1769_v12  ;;  %v1771_v30 = vrot.slane %v1769_v12, 4  ;;  %v350_v53 = vld [vmem:[#allocation2 + $0xd4] sm:$0x1]  ;;  %v3154_v54 = vld [vmem:[#allocation2 + $0xd0] sm:$0xf] }
 0x16d   : > { %v693_v24 = vrot.slane %v691_v51, 7  ;;  %v699_v59 = vshrl.u32 %v6124_v29, 16  ;;  %v702_v11 = vshll.u32 %v6124_v29, 16  ;;  %v2449_v34 = vshrl.u32 %v2106_v14, 16  ;;  %v2652_v29 = vld [vmem:[#allocation2 + $0xb8] sm:$0xf] }
 0x16e   : > { %1850 = vrot.lane.b32.xlu0 %v4651_v4, %s4979_s19  ;;  %v1773_v10 = vsel %vm5068_vm10, %v1771_v30, %v1772_v13  ;;  %v2452_v18 = vshll.u32 %v2106_v14, 16  ;;  %v2458_v43 = vshll.u32 %v2107_v56, 16  ;;  %v2462_v19 = vshrl.u32 %v2107_v56, 16  ;;  %v2563_v36 = vpop.permute.xlu1 %2562 }
 0x16f   : > { %1526 = vrot.lane.b32.xlu1 %v4619_v17, %s4981_s21  ;;  %v4620_v7 = vcombine.low %v1439_v15, %v1449_v44  ;;  %v696_v8 = vor.u32 %v694_v27, %v693_v24  ;;  %v697_v62 = vrot.slane %v693_v24, 4  ;;  %v701_v28 = vrot.slane %v699_v59, 7  ;;  %2602 = vst.msk [vmem:[#allocation3 + $0x48] sm:$0xff] %vm2592_vm7, %v2563_v36 }
 0x170   : > { %v2451_v57 = vrot.slane %v2449_v34, 4  ;;  %v2454_v63 = vrot.slane %v2452_v18, 5  ;;  %v2460_v58 = vrot.slane %v2458_v43, 5  ;;  %v2464_v37 = vrot.slane %v2462_v19, 4 }
 0x171   : > { %v4652_v2 = vcombine.low %v6158_v25, %v1773_v10  ;;  %v704_v31 = vor.u32 %v702_v11, %v701_v28  ;;  %v2468_v42 = vshll.u32 %v2108_v1, 16  ;;  %v348_v41 = vsel %vm5042_vm5, 0, %v347_v5 }
 0x172   : > { %2027 = vrot.lane.b32.xlu0 %v4957_v45, %s4978_s18  ;;  %v863_v47 = vld [vmem:[#allocation2 + $0xc0] sm:$0xf]  ;;  %v2455_v50 = vor.u32 %v2454_v63, %v2451_v57  ;;  %v2465_v60 = vor.u32 %v2464_v37, %v2460_v58  ;;  %349 = vst [vmem:[#allocation2 + $0xc8] sm:$0x1] %v348_v41  ;;  %v4699_v48 = vrot.slane %v2651_v3, 9  ;;  %v2805_v38 = vrot.slane %v2652_v29, 5  ;;  %v2884_v39 = vpop.permute.xlu1 %2883  ;;  %v3605_v49 = vpop.permute.xlu0 %3604 }
 0x173   : > { %1528 = vrot.lane.b32.xlu1 %v4620_v7, %s4981_s21  ;;  %v705_v32 = vsel %vm5057_vm9, %v697_v62, %v704_v31  ;;  %v864_v16 = vsel %vm5074_vm11, %v696_v8, %v863_v47  ;;  %v2470_v55 = vrot.slane %v2468_v42, 5  ;;  %v2808_v26 = vrot.slane %v2653_v40, 5  ;;  %2923 = vst.msk [vmem:[#allocation3 + $0x48] sm:$0xff] %vm2913_vm8, %v2884_v39 }
 0x174   : > { %v706_v61 = vrot.slane %v701_v28, 4  ;;  %865 = vst [vmem:[#allocation2 + $0xc0] sm:$0xf] %v864_v16  ;;  %866 = vst.msk [vmem:[#allocation2 + $0xc4] sm:$0xf] %vm231_vm0, %v705_v32  ;;  %v2456_v23 = vrot.slane %v2455_v50, 4  ;;  %v2806_v20 = vsel %vm5068_vm10, %v4699_v48, %v2805_v38 }
 0x175   : > { %v2466_v22 = vrot.slane %v2465_v60, 4  ;;  %v2807_v17 = vrot.slane %v2805_v38, 4  ;;  %3645 = vst.msk [vmem:[#allocation3 + $0x40] sm:$0xff] %vm3636_vm13, %v3605_v49  ;;  %v295_v35 = vsel %vm5016_vm3, 0, %v294_v46  ;;  %v351_v12 = vsel %vm5042_vm5, 0, %v350_v53  ;;  %vm6670_vm0 = vmmov %vm6669_vm12 }
 0x176   : > { %v3526_v13 = vshll.u32 %v3154_v54, 16  ;;  %v2461_v21 = vsel %vm5130_vm14, %v2456_v23, %v2460_v58  ;;  %296 = vst [vmem:[#allocation2 + $0xcc] sm:$0x1] %v295_v35  ;;  %352 = vst [vmem:[#allocation2 + $0xd4] sm:$0x1] %v351_v12  ;;  %v3530_v9 = vshrl.u32 %v3154_v54, 16  ;;  %v3062_v27 = vpop.permute.xlu1 %3061  ;;  %v3926_v56 = vpop.permute.xlu0 %3925 }
 0x177   : > { %v2471_v14 = vsel %vm5130_vm14, %v2466_v22, %v2470_v55  ;;  %v2809_v15 = vsel %vm5068_vm10, %v2807_v17, %v2808_v26  ;;  %1852 = vrot.lane.b32.xlu1 %v4652_v2, %s4979_s19  ;;  %3101 = vst.msk [vmem:[#allocation3 + $0x48] sm:$0xff] %vm6670_vm0, %v3062_v27  ;;  %v3856_v11 = vrot.slane %v6192_v6, 5  ;;  %vm6673_vm9 = vmmov %vm6670_vm0  ;;  %vm6678_vm12 = vcmask 31744  }
 0x178   : > { %v4683_v51 = vcombine.low %v2461_v21, %v2471_v14  ;;  %3966 = vst.msk [vmem:[#allocation3 + $0x40] sm:$0xff] %vm3957_vm1, %v3926_v56  ;;  %v4715_v4 = vcombine.low %v2806_v20, %v2809_v15  ;;  %v6199_v30 = vrot.slane %v3526_v13, 5  ;;  %v6201_v24 = vrot.slane %v3530_v9, 4  ;;  %vm6677_vm6 = vmmov %vm6670_vm0 }
 0x179   : > { %v867_v44 = vld [vmem:[#allocation2 + $0xc8] sm:$0x1] }
 0x17a   : > { %2572 = vrot.lane.b32.xlu0 %v4683_v51, %s4984_s24  ;;  %v868_v25 = vsel %vm5016_vm3, %v706_v61, %v867_v44  ;;  %v3607_v34 = vpop.permute.xlu1 %3606  ;;  %v3533_v60 = vor.u32 %v6201_v24, %v6199_v30  ;;  %vm6671_vm3 = vcmask 130144  }
 0x17b   : > { %v4958_v59 = vld [vmem:[#allocation2 + $0xc0] sm:$0xff]   ;;  %869 = vst [vmem:[#allocation2 + $0xc8] sm:$0x1] %v868_v25  ;;  %3646 = vst.msk [vmem:[#allocation3 + $0x48] sm:$0xff] %vm3636_vm13, %v3607_v34 }
 0x17c   : > { %v2109_v5 = vld [vmem:[#allocation2 + $0xc0] sm:$0xf]  ;;  %v2110_v10 = vld [vmem:[#allocation2 + $0xc4] sm:$0xf]  ;;  %2029 = vrot.lane.b32.xlu1 %v4958_v59, %s4978_s18  ;;  %v3928_v7 = vpop.permute.xlu0 %3927  ;;  %vm6672_vm5 = vmmov %vm6671_vm3 }
 0x17d   : > { %v2654_v45 = vld [vmem:[#allocation2 + $0xc0] sm:$0xe]  ;;  %v2473_v1 = vshrl.u32 %v2109_v5, 16  ;;  %v2476_v18 = vshll.u32 %v2109_v5, 16  ;;  %v2482_v0 = vshll.u32 %v2110_v10, 16  ;;  %v2486_v43 = vshrl.u32 %v2110_v10, 16  ;;  %vm6675_vm11 = vmmov %vm6671_vm3 }
 0x17e   : > { %2893 = vrot.lane.b32.xlu0 %v4715_v4, %s4982_s22  ;;  %v2655_v19 = vld [vmem:[#allocation2 + $0xc4] sm:$0xf]  ;;  %v4700_v8 = vrot.slane %v2654_v45, 9  ;;  %3967 = vst.msk [vmem:[#allocation3 + $0x48] sm:$0xff] %vm3957_vm1, %v3928_v7  ;;  %v1519_v63 = vpop.permute.xlu1 %1518  ;;  %v3150_v37 = vld [vmem:[#allocation2 + $0xc0] sm:$0xf] }
 0x17f   : > { %v2812_v62 = vrot.slane %v2655_v19, 5  ;;  %v2475_v28 = vrot.slane %v2473_v1, 4  ;;  %v2478_v3 = vrot.slane %v2476_v18, 5  ;;  %v2484_v29 = vrot.slane %v2482_v0, 5  ;;  %v4961_v57 = vld [vmem:[#allocation2 + $0xc0] sm:$0xff]   ;;  %1557 = vst.msk [vmem:[#allocation3 + $0x50] sm:$0xff] %vm1546_vm2, %v1519_v63 }
 0x180   : > { %v2488_v36 = vrot.slane %v2486_v43, 4  ;;  %v3982_v40 = vld [vmem:[#allocation3 + $0x40] sm:$0xff]  ;;  %v3151_v42 = vld [vmem:[#allocation2 + $0xc4] sm:$0xf]  ;;  %v3493_v41 = vshrl.u32 %v3150_v37, 16  ;;  %v3496_v46 = vshll.u32 %v3150_v37, 16 }
 0x181   : > { %v2814_v58 = vrot.slane %v2812_v62, 4  ;;  %v2479_v2 = vor.u32 %v2478_v3, %v2475_v28  ;;  %4877 = vmatprep.mubr.msk.bf16.mxu1 %vm4010_vm15, %v3982_v40  ;;  %v3502_v26 = vshll.u32 %v3151_v42, 16  ;;  %v3506_v39 = vshrl.u32 %v3151_v42, 16  ;;  %v3153_v49 = vld [vmem:[#allocation2 + $0xcc] sm:$0xf] }
 0x182   : > { %v2489_v31 = vor.u32 %v2488_v36, %v2484_v29  ;;  %3071 = vrot.lane.b32.xlu0 %v4961_v57, %s4980_s20  ;;  %v2111_v53 = vld [vmem:[#allocation2 + $0xc8] sm:$0x1]  ;;  %v3495_v16 = vrot.slane %v3493_v41, 4  ;;  %v3498_v55 = vrot.slane %v3496_v46, 5  ;;  %v2813_v17 = vsel %vm5068_vm10, %v4700_v8, %v2812_v62  ;;  %v3155_v35 = vld [vmem:[#allocation2 + $0xd4] sm:$0x1] }
 0x183   : > { %v2656_v47 = vld [vmem:[#allocation2 + $0xc8] sm:$0x1]  ;;  %v2480_v48 = vrot.slane %v2479_v2, 4  ;;  %v2492_v54 = vshll.u32 %v2111_v53, 16  ;;  %v1843_v61 = vpop.permute.xlu0 %1842  ;;  %v3695_v12 = vld [vmem:[#allocation2 + $0xc0] sm:$0xe] }
 0x184   : > { %v3152_v50 = vld [vmem:[#allocation2 + $0xc8] sm:$0x1]  ;;  %v2490_v38 = vrot.slane %v2489_v31, 4  ;;  %v2815_v32 = vrot.slane %v2656_v47, 5  ;;  %v1521_v13 = vpop.permute.xlu1 %1520  ;;  %1881 = vst.msk [vmem:[#allocation3 + $0x50] sm:$0xff] %vm1870_vm4, %v1843_v61  ;;  %v3499_v14 = vor.u32 %v3498_v55, %v3495_v16  ;;  %v3504_v15 = vrot.slane %v3502_v26, 5 }
 0x185   : > { %v2485_v23 = vsel %vm5130_vm14, %v2480_v48, %v2484_v29  ;;  %v2494_v22 = vrot.slane %v2492_v54, 5  ;;  %v3512_v20 = vshll.u32 %v3152_v50, 16  ;;  %v3508_v9 = vrot.slane %v3506_v39, 4  ;;  %v3696_v51 = vld [vmem:[#allocation2 + $0xc4] sm:$0xf]  ;;  %1558 = vst.msk [vmem:[#allocation3 + $0x58] sm:$0xff] %vm1546_vm2, %v1521_v13 }
 0x186   : > { %v2816_v21 = vsel %vm5068_vm10, %v2814_v58, %v2815_v32  ;;  %v3983_v27 = vld [vmem:[#allocation3 + $0x48] sm:$0xff]  ;;  %v3517_v4 = vshrl.u32 %v3153_v49, 16  ;;  %v3520_v25 = vshll.u32 %v3153_v49, 16  ;;  %v3697_v24 = vld [vmem:[#allocation2 + $0xc8] sm:$0x1]  ;;  %v3500_v34 = vrot.slane %v3499_v14, 4 }
 0x187   : > { %v2495_v56 = vsel %vm5130_vm14, %v2490_v38, %v2494_v22  ;;  %v3514_v44 = vrot.slane %v3512_v20, 5  ;;  %4878 = vmatmul.mubr.msk.bf16.vlgmr.msra.gmra.mrb[0].mxu1 %vm4010_vm15, %v3983_v27  ;;  %v3509_v5 = vor.u32 %v3508_v9, %v3504_v15  ;;  %v3536_v10 = vshll.u32 %v3155_v35, 16  ;;  %v2020_v45 = vpop.permute.xlu0 %2019  ;;  %v3698_v63 = vld [vmem:[#allocation2 + $0xcc] sm:$0xe]  ;;  %v3700_v40 = vld [vmem:[#allocation2 + $0xd4] sm:$0x1] }
 0x188   : > { %v4684_v59 = vcombine.low %v2485_v23, %v2495_v56  ;;  %v3519_v1 = vrot.slane %v3517_v4, 4  ;;  %v3522_v18 = vrot.slane %v3520_v25, 5  ;;  %v4763_v0 = vrot.slane %v3695_v12, 9  ;;  %v1845_v19 = vpop.permute.xlu1 %1844  ;;  %2058 = vst.msk [vmem:[#allocation3 + $0x50] sm:$0xff] %vm6671_vm3, %v2020_v45  ;;  %v4962_v41 = vld [vmem:[#allocation2 + $0xcc] sm:$0xff]  }
 0x189   : > { %v3849_v43 = vrot.slane %v3696_v51, 5  ;;  %v4716_v7 = vcombine.low %v2813_v17, %v2816_v21  ;;  %v3505_v8 = vsel %vm5130_vm14, %v3500_v34, %v3504_v15  ;;  %v3510_v62 = vrot.slane %v3509_v5, 4  ;;  %1882 = vst.msk [vmem:[#allocation3 + $0x58] sm:$0xff] %vm1870_vm4, %v1845_v19 }
 0x18a   : > { %2574 = vrot.lane.b32.xlu1 %v4684_v59, %s4984_s24  ;;  %v3852_v28 = vrot.slane %v3697_v24, 5  ;;  %v3523_v3 = vor.u32 %v3522_v18, %v3519_v1  ;;  %v3534_v29 = vrot.slane %v3533_v60, 4  ;;  %v3538_v36 = vrot.slane %v3536_v10, 5 }
 0x18b   : > { %v3851_v57 = vrot.slane %v3849_v43, 4  ;;  %v3515_v58 = vsel %vm5130_vm14, %v3510_v62, %v3514_v44  ;;  %v3850_v37 = vsel %vm5068_vm10, %v4763_v0, %v3849_v43  ;;  %v4764_v46 = vrot.slane %v3698_v63, 9 }
 0x18c   : > { %v4747_v2 = vcombine.low %v3505_v8, %v3515_v58  ;;  %v3524_v31 = vrot.slane %v3523_v3, 4  ;;  %v3858_v53 = vrot.slane %v3856_v11, 4  ;;  %v3539_v50 = vsel %vm5130_vm14, %v3534_v29, %v3538_v36 }
 0x18d   : > { %v3853_v42 = vsel %vm5068_vm10, %v3851_v57, %v3852_v28  ;;  %v3859_v48 = vrot.slane %v3700_v40, 5  ;;  %v3857_v16 = vsel %vm5068_vm10, %v4764_v46, %v3856_v11 }
 0x18e   : > { %2895 = vrot.lane.b32.xlu1 %v4716_v7, %s4982_s22  ;;  %3616 = vrot.lane.b32.xlu0 %v4747_v2, %s4985_s25  ;;  %v3529_v47 = vsel %vm5130_vm14, %v3524_v31, %v6199_v30  ;;  %v4779_v60 = vcombine.low %v3850_v37, %v3853_v42  ;;  %vm6676_vm14 = vmmov %vm6671_vm3 }
 0x18f   : > { %v2565_v38 = vpop.permute.xlu0 %2564  ;;  %v4748_v54 = vcombine.low %v3529_v47, %v3539_v50  ;;  %v3860_v52 = vsel %vm5068_vm10, %v3858_v53, %v3859_v48  ;;  %vm6674_vm10 = vmmov %vm6670_vm0 }
 0x190   : > { %2603 = vst.msk [vmem:[#allocation3 + $0x50] sm:$0xff] %vm2592_vm7, %v2565_v38  ;;  %v4780_v55 = vcombine.low %v3857_v16, %v3860_v52  ;;  %vm6679_vm0 = vmmov %vm6678_vm12 }
 0x191   : > { %v2022_v32 = vpop.permute.xlu1 %2021  ;;  %vm6680_vm3 = vmmov %vm6679_vm0 }
 0x192   : > { %3073 = vrot.lane.b32.xlu1 %v4962_v41, %s4980_s20  ;;  %3937 = vrot.lane.b32.xlu0 %v4779_v60, %s4983_s23  ;;  %2059 = vst.msk [vmem:[#allocation3 + $0x58] sm:$0xff] %vm6672_vm5, %v2022_v32  ;;  %vm6681_vm5 = vmmov %vm6679_vm0 }
 0x193   : > { %v2886_v30 = vpop.permute.xlu0 %2885 }
 0x194   : > { %2924 = vst.msk [vmem:[#allocation3 + $0x50] sm:$0xff] %vm2913_vm8, %v2886_v30 }
 0x196   : > { %3618 = vrot.lane.b32.xlu1 %v4748_v54, %s4985_s25 }
 0x197   : > { %v3064_v26 = vpop.permute.xlu0 %3063 }
 0x198   : > { %3102 = vst.msk [vmem:[#allocation3 + $0x50] sm:$0xff] %vm6673_vm9, %v3064_v26  ;;  %vm6682_vm9 = vmmov %vm6679_vm0 }
 0x19a   : > { %3939 = vrot.lane.b32.xlu1 %v4780_v55, %s4983_s23 }
 0x19e   : > { %v2567_v6 = vpop.permute.xlu1 %2566 }
 0x19f   : > { %2604 = vst.msk [vmem:[#allocation3 + $0x58] sm:$0xff] %vm2592_vm7, %v2567_v6 }
 0x1a2   : > { %v2888_v11 = vpop.permute.xlu1 %2887  ;;  %v3609_v39 = vpop.permute.xlu0 %3608 }
 0x1a3   : > { %2925 = vst.msk [vmem:[#allocation3 + $0x58] sm:$0xff] %vm2913_vm8, %v2888_v11 }
 0x1a4   : > { %3647 = vst.msk [vmem:[#allocation3 + $0x50] sm:$0xff] %vm3636_vm13, %v3609_v39 }
 0x1a6   : > { %v3066_v33 = vpop.permute.xlu1 %3065  ;;  %v3930_v49 = vpop.permute.xlu0 %3929 }
 0x1a7   : > { %3103 = vst.msk [vmem:[#allocation3 + $0x58] sm:$0xff] %vm6674_vm10, %v3066_v33  ;;  %vm6683_vm10 = vmmov %vm6679_vm0 }
 0x1a8   : > { %3968 = vst.msk [vmem:[#allocation3 + $0x50] sm:$0xff] %vm3957_vm1, %v3930_v49 }
 0x1aa   : > { %v3611_v61 = vpop.permute.xlu1 %3610 }
 0x1ab   : > { %3648 = vst.msk [vmem:[#allocation3 + $0x58] sm:$0xff] %vm3636_vm13, %v3611_v61 }
 0x1ad   : > { %v3932_v23 = vpop.permute.xlu0 %3931 }
 0x1ae   : > { %v1523_v22 = vpop.permute.xlu1 %1522  ;;  %3969 = vst.msk [vmem:[#allocation3 + $0x58] sm:$0xff] %vm3957_vm1, %v3932_v23 }
 0x1af   : > { %v3984_v17 = vld [vmem:[#allocation3 + $0x50] sm:$0xff]  ;;  %1559 = vst.msk [vmem:[#allocation3 + $0x60] sm:$0xff] %vm1546_vm2, %v1523_v22 }
 0x1b0   : > { %4881 = vmatprep.mubr.msk.bf16.mxu1 %vm4010_vm15, %v3984_v17 }
 0x1b3   : > { %v1525_v20 = vpop.permute.xlu1 %1524  ;;  %v1847_v35 = vpop.permute.xlu0 %1846 }
 0x1b4   : > { %1560 = vst.msk [vmem:[#allocation3 + $0x68] sm:$0xff] %vm1546_vm2, %v1525_v20 }
 0x1b5   : > { %1883 = vst.msk [vmem:[#allocation3 + $0x60] sm:$0xff] %vm1870_vm4, %v1847_v35  ;;  %v3985_v12 = vld [vmem:[#allocation3 + $0x58] sm:$0xff] }
 0x1b6   : > { %4882 = vmatmul.mubr.msk.bf16.gmra.mrb[4].mxu1 %vm4010_vm15, %v3985_v12 }
 0x1b7   : > { %v1849_v13 = vpop.permute.xlu1 %1848  ;;  %v2024_v21 = vpop.permute.xlu0 %2023 }
 0x1b8   : > { %1884 = vst.msk [vmem:[#allocation3 + $0x68] sm:$0xff] %vm1870_vm4, %v1849_v13 }
 0x1b9   : > { %2060 = vst.msk [vmem:[#allocation3 + $0x60] sm:$0xff] %vm6675_vm11, %v2024_v21  ;;  %vm6684_vm11 = vmmov %vm6677_vm6 }
 0x1be   : > { %v2569_v14 = vpop.permute.xlu0 %2568 }
 0x1bf   : > { %v2026_v15 = vpop.permute.xlu1 %2025  ;;  %2605 = vst.msk [vmem:[#allocation3 + $0x60] sm:$0xff] %vm2592_vm7, %v2569_v14 }
 0x1c0   : > { %2061 = vst.msk [vmem:[#allocation3 + $0x68] sm:$0xff] %vm6676_vm14, %v2026_v15  ;;  %vm6685_vm14 = vmmov %vm6679_vm0 }
 0x1c2   : > { %v2890_v9 = vpop.permute.xlu0 %2889 }
 0x1c3   : > { %2926 = vst.msk [vmem:[#allocation3 + $0x60] sm:$0xff] %vm2913_vm8, %v2890_v9 }
 0x1c6   : > { %v3068_v51 = vpop.permute.xlu0 %3067 }
 0x1c7   : > { %3104 = vst.msk [vmem:[#allocation3 + $0x60] sm:$0xff] %vm6677_vm6, %v3068_v51  ;;  %vm6686_vm6 = vmmov %vm6679_vm0 }
 0x1cd   : > { %v6285_v44 = vpop.f32.mrb[0].mxu0 }
 0x1ce   : > { %v2571_v27 = vpop.permute.xlu1 %2570  ;;  %4226 = vst.msk [vmem:[%s6282_s7 + $0x10] sm:$0xff] %vm6678_vm12, %v6285_v44  ;;  %v6290_v25 = vpop.f32.mrb[1].mxu0  ;;  %v4259_v18 = vsel %vm6685_vm14, %v6285_v44, 0.0  ;;  %vm6687_vm12 = vmmov %vm6679_vm0 }
 0x1cf   : > { %2606 = vst.msk [vmem:[#allocation3 + $0x68] sm:$0xff] %vm2592_vm7, %v2571_v27  ;;  %v6296_v59 = vpop.f32.mrb[2].mxu0  ;;  %v4256_v5 = vsel %vm6681_vm5, %v6290_v25, 0.0  ;;  %vm6689_vm5 = vmmov %vm6679_vm0 }
 0x1d0   : > { %v3613_v56 = vpop.permute.xlu0 %3612  ;;  %4224 = vst.msk [vmem:[%s6282_s7] sm:$0xff] %vm6679_vm0, %v6290_v25  ;;  %v6302_v34 = vpop.f32.mrb[3].mxu0  ;;  %v4261_v43 = vsel %vm6686_vm6, %v6296_v59, 0.0  ;;  %vm6693_vm14 = vmmov %vm6679_vm0  ;;  %vm6694_vm6 = vcmask 130144  }
 0x1d1   : > { %3649 = vst.msk [vmem:[#allocation3 + $0x60] sm:$0xff] %vm3636_vm13, %v3613_v56  ;;  %v4257_v10 = vsel %vm6683_vm10, %v6302_v34, 0.0  ;;  %vm6691_vm10 = vmmov %vm6679_vm0 }
 0x1d2   : > { %v2892_v4 = vpop.permute.xlu1 %2891  ;;  %4227 = vst.msk [vmem:[%s6282_s7 + $0x18] sm:$0xff] %vm6680_vm3, %v6296_v59  ;;  %v4258_v1 = vadd.f32 %v4257_v10, %v4256_v5  ;;  %vm6688_vm3 = vmmov %vm6679_vm0 }
 0x1d3   : > { %2927 = vst.msk [vmem:[#allocation3 + $0x68] sm:$0xff] %vm2913_vm8, %v2892_v4 }
 0x1d4   : > { %v3934_v24 = vpop.permute.xlu0 %3933  ;;  %4225 = vst.msk [vmem:[%s6282_s7 + $0x8] sm:$0xff] %vm6682_vm9, %v6302_v34  ;;  %v4260_v0 = vadd.f32 %v4259_v18, %v4258_v1  ;;  %vm6690_vm9 = vmmov %vm6679_vm0 }
 0x1d5   : > { %3970 = vst.msk [vmem:[#allocation3 + $0x60] sm:$0xff] %vm3957_vm1, %v3934_v24  ;;  %v6316_v19 = vpop.f32.mrb[4].mxu0 }
 0x1d6   : > { %v3070_v45 = vpop.permute.xlu1 %3069  ;;  %4230 = vst.msk [vmem:[%s6282_s7 + $0x30] sm:$0xff] %vm6687_vm12, %v6316_v19  ;;  %v6321_v7 = vpop.f32.mrb[5].mxu0  ;;  %v4262_v8 = vadd.f32 %v4261_v43, %v4260_v0  ;;  %vm6695_vm12 = vmmov %vm6694_vm6 }
 0x1d7   : > { %3105 = vst.msk [vmem:[#allocation3 + $0x68] sm:$0xff] %vm6684_vm11, %v3070_v45  ;;  %v4263_v3 = vsel %vm6688_vm3, %v6321_v7, 0.0  ;;  %v6328_v29 = vpop.f32.mrb[6].mxu0  ;;  %vm6692_vm11 = vmmov %vm6679_vm0 }
 0x1d8   : > { %4228 = vst.msk [vmem:[%s6282_s7 + $0x20] sm:$0xff] %vm6679_vm0, %v6321_v7  ;;  %v4264_v36 = vadd.f32 %v4263_v3, %v4262_v8  ;;  %v6334_v57 = vpop.f32.mrb[7].mxu0  ;;  %v4267_v40 = vsel %vm6692_vm11, %v6316_v19, 0.0  ;;  %v4269_v41 = vsel %vm6693_vm14, %v6328_v29, 0.0  ;;  %vm6698_vm3 = vmmov %vm6679_vm0 }
 0x1d9   : > { %4231 = vst.msk [vmem:[%s6282_s7 + $0x38] sm:$0xff] %vm6689_vm5, %v6328_v29  ;;  %v4265_v58 = vsel %vm6691_vm10, %v6334_v57, 0.0  ;;  %vm6699_vm5 = vmmov %vm6679_vm0 }
 0x1da   : > { %4229 = vst.msk [vmem:[%s6282_s7 + $0x28] sm:$0xff] %vm6690_vm9, %v6334_v57  ;;  %v4266_v37 = vadd.f32 %v4265_v58, %v4264_v36  ;;  %vm6700_vm9 = vmmov %vm6679_vm0 }
 0x1db   : > { %v3936_v62 = vpop.permute.xlu0 %3935  ;;  %vm6701_vm10 = vmmov %vm6679_vm0 }
 0x1dc   : > { %v3986_v28 = vld [vmem:[#allocation3 + $0x60] sm:$0xff]  ;;  %v4268_v31 = vadd.f32 %v4267_v40, %v4266_v37  ;;  %vm6703_vm11 = vmmov %vm6679_vm0 }
 0x1dd   : > { %4885 = vmatprep.mubr.msk.bf16.mxu1 %vm4010_vm15, %v3986_v28  ;;  %v3615_v63 = vpop.permute.xlu1 %3614 }
 0x1de   : > { %3650 = vst.msk [vmem:[#allocation3 + $0x68] sm:$0xff] %vm3636_vm13, %v3615_v63  ;;  %v4270_v46 = vadd.f32 %v4269_v41, %v4268_v31 }
 0x1df   : > { %3971 = vst.msk [vmem:[#allocation3 + $0x68] sm:$0xff] %vm3957_vm1, %v3936_v62 }
 0x1e0   : > { %v1851_v2 = vpop.permute.xlu0 %1850 }
 0x1e1   : > { %v1527_v42 = vpop.permute.xlu1 %1526 }
 0x1e2   : > { %1561 = vst.msk [vmem:[#allocation3 + $0x70] sm:$0xff] %vm1546_vm2, %v1527_v42 }
 0x1e3   : > { %1885 = vst.msk [vmem:[#allocation3 + $0x70] sm:$0xff] %vm1870_vm4, %v1851_v2 }
 0x1e4   : > { %v2028_v53 = vpop.permute.xlu0 %2027 }
 0x1e5   : > { %v1529_v47 = vpop.permute.xlu1 %1528  ;;  %2062 = vst.msk [vmem:[#allocation3 + $0x70] sm:$0xff] %vm6694_vm6, %v2028_v53  ;;  %vm6707_vm6 = vmmov %vm6679_vm0 }
 0x1e6   : > { %1562 = vst.msk [vmem:[#allocation3 + $0x78] sm:$0xff] %vm1546_vm2, %v1529_v47  ;;  %v3987_v50 = vld [vmem:[#allocation3 + $0x68] sm:$0xff]  ;;  %vm6696_vm2 = vcmask 228544  }
 0x1e7   : > { %4886 = vmatmul.mubr.msk.bf16.gmra.mrb[8].mxu1 %vm4010_vm15, %v3987_v50  ;;  %vm6704_vm14 = vmmov %vm6696_vm2 }
 0x1e9   : > { %v1853_v60 = vpop.permute.xlu1 %1852 }
 0x1ea   : > { %1886 = vst.msk [vmem:[#allocation3 + $0x78] sm:$0xff] %vm1870_vm4, %v1853_v60  ;;  %vm6697_vm4 = vmmov %vm6679_vm0 }
 0x1ec   : > { %v2573_v48 = vpop.permute.xlu0 %2572 }
 0x1ed   : > { %2607 = vst.msk [vmem:[#allocation3 + $0x70] sm:$0xff] %vm2592_vm7, %v2573_v48 }
 0x1ee   : > { %v2030_v38 = vpop.permute.xlu1 %2029 }
 0x1ef   : > { %2063 = vst.msk [vmem:[#allocation3 + $0x78] sm:$0xff] %vm6695_vm12, %v2030_v38  ;;  %vm6710_vm12 = vmmov %vm6679_vm0 }
 0x1f0   : > { %v2894_v54 = vpop.permute.xlu0 %2893 }
 0x1f1   : > { %2928 = vst.msk [vmem:[#allocation3 + $0x70] sm:$0xff] %vm2913_vm8, %v2894_v54 }
 0x1f4   : > { %v3072_v32 = vpop.permute.xlu0 %3071 }
 0x1f5   : > { %3106 = vst.msk [vmem:[#allocation3 + $0x70] sm:$0xff] %vm6696_vm2, %v3072_v32  ;;  %vm6711_vm2 = vmmov %vm6679_vm0 }
 0x1fa   : > { %v6357_v16 = vpop.f32.mrb[8].mxu0 }
 0x1fb   : > { %4234 = vst.msk [vmem:[%s6282_s7 + $0x50] sm:$0xff] %vm6679_vm0, %v6357_v16  ;;  %v6362_v30 = vpop.f32.mrb[9].mxu0 }
 0x1fc   : > { %v2575_v52 = vpop.permute.xlu1 %2574  ;;  %4232 = vst.msk [vmem:[%s6282_s7 + $0x40] sm:$0xff] %vm6697_vm4, %v6362_v30  ;;  %v4271_v55 = vsel %vm6698_vm3, %v6362_v30, 0.0  ;;  %v6370_v26 = vpop.f32.mrb[10].mxu0  ;;  %vm6712_vm4 = vmmov %vm6679_vm0 }
 0x1fd   : > { %2608 = vst.msk [vmem:[#allocation3 + $0x78] sm:$0xff] %vm2592_vm7, %v2575_v52  ;;  %v4272_v6 = vadd.f32 %v4271_v55, %v4270_v46  ;;  %v6375_v11 = vpop.f32.mrb[11].mxu0  ;;  %vm6702_vm7 = vmmov %vm6679_vm0  ;;  %v4277_v17 = vsel %vm6703_vm11, %v6370_v26, 0.0 }
 0x1fe   : > { %4235 = vst.msk [vmem:[%s6282_s7 + $0x58] sm:$0xff] %vm6699_vm5, %v6370_v26  ;;  %v4273_v39 = vsel %vm6701_vm10, %v6375_v11, 0.0  ;;  %v4275_v23 = vsel %vm6702_vm7, %v6357_v16, 0.0  ;;  %vm6713_vm3 = vmmov %vm6679_vm0 }
 0x1ff   : > { %4233 = vst.msk [vmem:[%s6282_s7 + $0x48] sm:$0xff] %vm6700_vm9, %v6375_v11  ;;  %v4274_v49 = vadd.f32 %v4273_v39, %v4272_v6  ;;  %vm6714_vm5 = vmmov %vm6679_vm0 }
 0x200   : > { %v2896_v33 = vpop.permute.xlu1 %2895  ;;  %v3617_v61 = vpop.permute.xlu0 %3616  ;;  %vm6715_vm9 = vmmov %vm6679_vm0 }
 0x201   : > { %2929 = vst.msk [vmem:[#allocation3 + $0x78] sm:$0xff] %vm2913_vm8, %v2896_v33  ;;  %v4276_v22 = vadd.f32 %v4275_v23, %v4274_v49  ;;  %vm6705_vm8 = vmmov %vm6679_vm0 }
 0x202   : > { %3651 = vst.msk [vmem:[#allocation3 + $0x70] sm:$0xff] %vm3636_vm13, %v3617_v61  ;;  %vm6716_vm10 = vmmov %vm6679_vm0 }
 0x203   : > { %v4278_v35 = vadd.f32 %v4277_v17, %v4276_v22  ;;  %vm6717_vm7 = vmmov %vm6679_vm0 }
 0x204   : > { %v3074_v20 = vpop.permute.xlu1 %3073  ;;  %v3938_v12 = vpop.permute.xlu0 %3937  ;;  %vm6718_vm11 = vmmov %vm6679_vm0 }
 0x205   : > { %3107 = vst.msk [vmem:[#allocation3 + $0x78] sm:$0xff] %vm6704_vm14, %v3074_v20  ;;  %vm6719_vm14 = vmmov %vm6679_vm0 }
 0x206   : > { %3972 = vst.msk [vmem:[#allocation3 + $0x70] sm:$0xff] %vm3957_vm1, %v3938_v12 }
 0x208   : > { %v3619_v13 = vpop.permute.xlu1 %3618 }
 0x209   : > { %3652 = vst.msk [vmem:[#allocation3 + $0x78] sm:$0xff] %vm3636_vm13, %v3619_v13  ;;  %vm6706_vm13 = vmmov %vm6679_vm0 }
 0x20c   : > { %v3940_v21 = vpop.permute.xlu1 %3939 }
 0x20d   : > { %3973 = vst.msk [vmem:[#allocation3 + $0x78] sm:$0xff] %vm3957_vm1, %v3940_v21  ;;  %v3988_v14 = vld [vmem:[#allocation3 + $0x70] sm:$0xff]  ;;  %vm6708_vm1 = vmmov %vm6679_vm0 }
 0x20e   : > { %4889 = vmatprep.mubr.msk.bf16.mxu1 %vm4010_vm15, %v3988_v14 }
 0x214   : > { %v3989_v15 = vld [vmem:[#allocation3 + $0x78] sm:$0xff] }
 0x215   : > { %4890 = vmatmul.mubr.msk.bf16.gmra.mrb[12].mxu1 %vm4010_vm15, %v3989_v15  ;;  %vm6709_vm15 = vmmov %vm6679_vm0 }
 0x227   : > { %v6394_v9 = vpop.f32.mrb[12].mxu0 }
 0x228   : > { %4238 = vst.msk [vmem:[%s6282_s7 + $0x70] sm:$0xff] %vm6705_vm8, %v6394_v9  ;;  %v6399_v51 = vpop.f32.mrb[13].mxu0  ;;  %v4283_v45 = vsel %vm6711_vm2, %v6394_v9, 0.0  ;;  %vm6720_vm8 = vmmov %vm6679_vm0 }
 0x229   : > { %4236 = vst.msk [vmem:[%s6282_s7 + $0x60] sm:$0xff] %vm6706_vm13, %v6399_v51  ;;  %v4279_v27 = vsel %vm6707_vm6, %v6399_v51, 0.0  ;;  %v6406_v56 = vpop.f32.mrb[14].mxu0  ;;  %vm6721_vm13 = vmmov %vm6679_vm0 }
 0x22a   : > { %v4280_v4 = vadd.f32 %v4279_v27, %v4278_v35  ;;  %4239 = vst.msk [vmem:[%s6282_s7 + $0x78] sm:$0xff] %vm6708_vm1, %v6406_v56  ;;  %v6411_v24 = vpop.f32.mrb[15].mxu0  ;;  %v4285_v18 = vsel %vm6679_vm0, %v6406_v56, 0.0  ;;  %vm6722_vm6 = vmmov %vm6679_vm0 }
 0x22b   : > { %4237 = vst.msk [vmem:[%s6282_s7 + $0x68] sm:$0xff] %vm6709_vm15, %v6411_v24  ;;  %v4281_v5 = vsel %vm6710_vm12, %v6411_v24, 0.0  ;;  %vm6723_vm1 = vmmov %vm6679_vm0 }
 0x22c   : > { %v4282_v10 = vadd.f32 %v4281_v5, %v4280_v4  ;;  %vm6724_vm15 = vmmov %vm6679_vm0 }
 0x22d   : > { %vm6725_vm12 = vmmov %vm6679_vm0 }
 0x22e   : > { %v4284_v1 = vadd.f32 %v4283_v45, %v4282_v10  ;;  %vm6726_vm2 = vmmov %vm6679_vm0 }
 0x230   : > { %v4286_v0 = vadd.f32 %v4285_v18, %v4284_v1 }
 0x25a   : > { %v6422_v43 = vpop.f32.mrb[0].mxu1 }
 0x25b   : > { %4242 = vst.msk [vmem:[%s6282_s7 + $0x90] sm:$0xff] %vm6712_vm4, %v6422_v43  ;;  %v6427_v8 = vpop.f32.mrb[1].mxu1  ;;  %v4291_v37 = vsel %vm6718_vm11, %v6422_v43, 0.0  ;;  %vm6727_vm4 = vmmov %vm6679_vm0 }
 0x25c   : > { %4240 = vst.msk [vmem:[%s6282_s7 + $0x80] sm:$0xff] %vm6713_vm3, %v6427_v8  ;;  %v4287_v62 = vsel %vm6714_vm5, %v6427_v8, 0.0  ;;  %v6434_v28 = vpop.f32.mrb[2].mxu1  ;;  %vm6728_vm3 = vmmov %vm6679_vm0 }
 0x25d   : > { %v4288_v3 = vadd.f32 %v4287_v62, %v4286_v0  ;;  %4243 = vst.msk [vmem:[%s6282_s7 + $0x98] sm:$0xff] %vm6715_vm9, %v6434_v28  ;;  %v6439_v36 = vpop.f32.mrb[3].mxu1  ;;  %v4293_v2 = vsel %vm6719_vm14, %v6434_v28, 0.0  ;;  %vm6729_vm5 = vmmov %vm6679_vm0 }
 0x25e   : > { %4241 = vst.msk [vmem:[%s6282_s7 + $0x88] sm:$0xff] %vm6716_vm10, %v6439_v36  ;;  %v4289_v63 = vsel %vm6717_vm7, %v6439_v36, 0.0  ;;  %vm6730_vm9 = vmmov %vm6679_vm0 }
 0x25f   : > { %v4290_v58 = vadd.f32 %v4289_v63, %v4288_v3  ;;  %vm6731_vm10 = vmmov %vm6679_vm0 }
 0x260   : > { %vm6732_vm7 = vmmov %vm6679_vm0 }
 0x261   : > { %v4292_v40 = vadd.f32 %v4291_v37, %v4290_v58  ;;  %vm6733_vm11 = vmmov %vm6679_vm0 }
 0x262   : > { %vm6734_vm14 = vmmov %vm6679_vm0 }
 0x263   : > { %v4294_v31 = vadd.f32 %v4293_v2, %v4292_v40 }
 0x289   : > { %v6450_v42 = vpop.f32.mrb[4].mxu1 }
 0x28a   : > { %4246 = vst.msk [vmem:[%s6282_s7 + $0xb0] sm:$0xff] %vm6720_vm8, %v6450_v42  ;;  %v6455_v41 = vpop.f32.mrb[5].mxu1  ;;  %v4299_v38 = vsel %vm6726_vm2, %v6450_v42, 0.0  ;;  %vm6735_vm8 = vmmov %vm6679_vm0 }
 0x28b   : > { %4244 = vst.msk [vmem:[%s6282_s7 + $0xa0] sm:$0xff] %vm6721_vm13, %v6455_v41  ;;  %v4295_v46 = vsel %vm6722_vm6, %v6455_v41, 0.0  ;;  %v6462_v53 = vpop.f32.mrb[6].mxu1  ;;  %vm6736_vm13 = vmmov %vm6679_vm0 }
 0x28c   : > { %v4296_v47 = vadd.f32 %v4295_v46, %v4294_v31  ;;  %4247 = vst.msk [vmem:[%s6282_s7 + $0xb8] sm:$0xff] %vm6723_vm1, %v6462_v53  ;;  %v6467_v50 = vpop.f32.mrb[7].mxu1  ;;  %v4301_v32 = vsel %vm6679_vm0, %v6462_v53, 0.0  ;;  %vm6737_vm6 = vmmov %vm6679_vm0 }
 0x28d   : > { %4245 = vst.msk [vmem:[%s6282_s7 + $0xa8] sm:$0xff] %vm6724_vm15, %v6467_v50  ;;  %v4297_v60 = vsel %vm6725_vm12, %v6467_v50, 0.0  ;;  %vm6738_vm1 = vmmov %vm6679_vm0 }
 0x28e   : > { %v4298_v48 = vadd.f32 %v4297_v60, %v4296_v47  ;;  %vm6739_vm15 = vmmov %vm6679_vm0 }
 0x28f   : > { %vm6740_vm12 = vmmov %vm6679_vm0 }
 0x290   : > { %v4300_v54 = vadd.f32 %v4299_v38, %v4298_v48  ;;  %vm6741_vm2 = vmmov %vm6679_vm0 }
 0x292   : > { %v4302_v52 = vadd.f32 %v4301_v32, %v4300_v54 }
 0x2ba   : > { %v6478_v55 = vpop.f32.mrb[8].mxu1 }
 0x2bb   : > { %4250 = vst.msk [vmem:[%s6282_s7 + $0xd0] sm:$0xff] %vm6727_vm4, %v6478_v55  ;;  %v6483_v6 = vpop.f32.mrb[9].mxu1  ;;  %v4307_v17 = vsel %vm6733_vm11, %v6478_v55, 0.0  ;;  %vm6742_vm4 = vcmask 24576   ;;  %vm6748_vm11 = vmmov %vm6679_vm0 }
 0x2bc   : > { %4248 = vst.msk [vmem:[%s6282_s7 + $0xc0] sm:$0xff] %vm6728_vm3, %v6483_v6  ;;  %v4303_v39 = vsel %vm6729_vm5, %v6483_v6, 0.0  ;;  %v6490_v33 = vpop.f32.mrb[10].mxu1  ;;  %vm6743_vm3 = vmmov %vm6679_vm0 }
 0x2bd   : > { %v4304_v49 = vadd.f32 %v4303_v39, %v4302_v52  ;;  %4251 = vst.msk [vmem:[%s6282_s7 + $0xd8] sm:$0xff] %vm6730_vm9, %v6490_v33  ;;  %v4196_v61 = vpop.f32.mrb[11].mxu1  ;;  %v4309_v35 = vsel %vm6734_vm14, %v6490_v33, 0.0  ;;  %vm6744_vm5 = vmmov %vm6679_vm0 }
 0x2be   : > { %4249 = vst.msk [vmem:[%s6282_s7 + $0xc8] sm:$0xff] %vm6731_vm10, %v4196_v61  ;;  %v4305_v23 = vsel %vm6732_vm7, %v4196_v61, 0.0  ;;  %vm6745_vm9 = vmmov %vm6679_vm0 }
 0x2bf   : > { %v4306_v22 = vadd.f32 %v4305_v23, %v4304_v49  ;;  %vm6746_vm10 = vmmov %vm6679_vm0 }
 0x2c0   : > { %vm6747_vm7 = vmmov %vm6679_vm0 }
 0x2c1   : > { %v4308_v20 = vadd.f32 %v4307_v17, %v4306_v22  ;;  %vm6749_vm14 = vmmov %vm6679_vm0 }
 0x2c3   : > { %v4310_v12 = vadd.f32 %v4309_v35, %v4308_v20 }
 0x2e8   : > { %v4891_v13 = vpop.f32.mrb[12].mxu1 }
 0x2e9   : > { %4254 = vst.msk [vmem:[%s6282_s7 + $0xf0] sm:$0xff] %vm6735_vm8, %v4891_v13  ;;  %v4209_v21 = vpop.f32.mrb[13].mxu1  ;;  %v4315_v45 = vsel %vm6741_vm2, %v4891_v13, 0.0  ;;  %vm6750_vm8 = vmmov %vm6679_vm0 }
 0x2ea   : > { %4252 = vst.msk [vmem:[%s6282_s7 + $0xe0] sm:$0xff] %vm6736_vm13, %v4209_v21  ;;  %v4311_v14 = vsel %vm6737_vm6, %v4209_v21, 0.0  ;;  %v4892_v15 = vpop.f32.mrb[14].mxu1  ;;  %vm6751_vm13 = vmmov %vm6679_vm0 }
 0x2eb   : > { %v4312_v27 = vadd.f32 %v4311_v14, %v4310_v12  ;;  %4255 = vst.msk [vmem:[%s6282_s7 + $0xf8] sm:$0xff] %vm6738_vm1, %v4892_v15  ;;  %v4212_v4 = vpop.f32.mrb[15].mxu1  ;;  %v4317_v18 = vsel %vm6679_vm0, %v4892_v15, 0.0  ;;  %vm6752_vm6 = vmmov %vm6679_vm0 }
 0x2ec   : > { %4253 = vst.msk [vmem:[%s6282_s7 + $0xe8] sm:$0xff] %vm6739_vm15, %v4212_v4  ;;  %v4313_v5 = vsel %vm6740_vm12, %v4212_v4, 0.0  ;;  %vm6753_vm1 = vmmov %vm6679_vm0 }
 0x2ed   : > { %v4314_v10 = vadd.f32 %v4313_v5, %v4312_v27  ;;  %vm6754_vm15 = vmmov %vm6679_vm0 }
 0x2ee   : > { %vm6755_vm12 = vmmov %vm6679_vm0 }
 0x2ef   : > { %v4316_v1 = vadd.f32 %v4315_v45, %v4314_v10  ;;  %vm6756_vm2 = vmmov %vm6679_vm0 }
 0x2f1   : > { %v4318_v0 = vadd.f32 %v4317_v18, %v4316_v1 }
 0x2f3   : > { %v4319_v62 = vrot.slane %v4318_v0, 4 }
 0x2f5   : > { %v4320_v3 = vadd.f32 %v4319_v62, %v4318_v0 }
 0x2f7   : > { %v4321_v63 = vrot.slane %v4320_v3, 2 }
 0x2f9   : > { %v4322_v58 = vadd.f32 %v4321_v63, %v4320_v3 }
 0x2fb   : > { %v4323_v37 = vrot.slane %v4322_v58, 1 }
 0x2fd   : > { %v4324_v40 = vadd.f32 %v4323_v37, %v4322_v58 }
 0x2ff   : > { %v4325_v2 = vmul.f32 0.00390625, %v4324_v40  ;;  %4358 = vst.msk [vmem:[%s6518_s11] sm:$0x1] %vm6742_vm4, %v4324_v40  ;;  %vm6757_vm4 = vmmov %vm6679_vm0 }
 0x301   : > { %v4326_v31 = vsub.f32 %v6290_v25, %v4325_v2  ;;  %v4327_v46 = vsub.f32 %v6302_v34, %v4325_v2  ;;  %v4328_v47 = vsub.f32 %v6285_v44, %v4325_v2  ;;  %v4329_v60 = vsub.f32 %v6296_v59, %v4325_v2 }
 0x302   : > { %v4330_v48 = vsub.f32 %v6321_v7, %v4325_v2  ;;  %v4331_v38 = vsub.f32 %v6334_v57, %v4325_v2  ;;  %v4332_v54 = vsub.f32 %v6316_v19, %v4325_v2  ;;  %v4333_v32 = vsub.f32 %v6328_v29, %v4325_v2 }
 0x303   : > { %v4334_v52 = vsub.f32 %v6362_v30, %v4325_v2  ;;  %v4335_v39 = vsub.f32 %v6375_v11, %v4325_v2  ;;  %v4336_v25 = vsub.f32 %v6357_v16, %v4325_v2  ;;  %v4337_v34 = vsub.f32 %v6370_v26, %v4325_v2 }
 0x304   : > { %v4338_v44 = vsub.f32 %v6399_v51, %v4325_v2  ;;  %v4339_v59 = vsub.f32 %v6411_v24, %v4325_v2  ;;  %v4340_v7 = vsub.f32 %v6394_v9, %v4325_v2  ;;  %v4341_v57 = vsub.f32 %v6406_v56, %v4325_v2 }
 0x305   : > { %v4342_v19 = vsub.f32 %v6427_v8, %v4325_v2  ;;  %v4343_v29 = vsub.f32 %v6439_v36, %v4325_v2  ;;  %v6541_v30 = vsub.f32 %v6422_v43, %v4325_v2  ;;  %v6544_v11 = vsub.f32 %v6434_v28, %v4325_v2 }
 0x306   : > { %v6547_v16 = vsub.f32 %v6455_v41, %v4325_v2  ;;  %v6550_v26 = vsub.f32 %v6467_v50, %v4325_v2  ;;  %v6553_v9 = vsub.f32 %v6450_v42, %v4325_v2  ;;  %v6556_v51 = vsub.f32 %v6462_v53, %v4325_v2 }
 0x307   : > { %v6559_v56 = vsub.f32 %v6483_v6, %v4325_v2  ;;  %v6561_v24 = vsub.f32 %v4196_v61, %v4325_v2  ;;  %v6564_v43 = vsub.f32 %v6478_v55, %v4325_v2  ;;  %v6567_v8 = vsub.f32 %v6490_v33, %v4325_v2 }
 0x308   : > { %v6569_v28 = vsub.f32 %v4209_v21, %v4325_v2  ;;  %v6571_v36 = vsub.f32 %v4212_v4, %v4325_v2  ;;  %v6573_v42 = vsub.f32 %v4891_v13, %v4325_v2  ;;  %v6575_v41 = vsub.f32 %v4892_v15, %v4325_v2 }
 0x309   : > { %v4359_v53 = vmul.f32 %v4326_v31, %v4326_v31  ;;  %v4360_v50 = vmul.f32 %v4327_v46, %v4327_v46  ;;  %v4361_v6 = vmul.f32 %v4328_v47, %v4328_v47  ;;  %v4362_v49 = vmul.f32 %v4329_v60, %v4329_v60 }
 0x30a   : > { %v4363_v22 = vmul.f32 %v4330_v48, %v4330_v48  ;;  %v4364_v20 = vmul.f32 %v4331_v38, %v4331_v38  ;;  %v4365_v13 = vmul.f32 %v4332_v54, %v4332_v54  ;;  %v4366_v15 = vmul.f32 %v4333_v32, %v4333_v32 }
 0x30b   : > { %v4391_v61 = vsel %vm6743_vm3, %v4359_v53, 0.0  ;;  %v4392_v55 = vsel %vm6744_vm5, %v4360_v50, 0.0  ;;  %v4394_v33 = vsel %vm6745_vm9, %v4361_v6, 0.0  ;;  %v4396_v35 = vsel %vm6746_vm10, %v4362_v49, 0.0  ;;  %vm6758_vm3 = vmmov %vm6679_vm0 }
 0x30c   : > { %v4393_v23 = vadd.f32 %v4392_v55, %v4391_v61  ;;  %v4398_v21 = vsel %vm6747_vm7, %v4363_v22, 0.0  ;;  %v4400_v27 = vsel %vm6748_vm11, %v4364_v20, 0.0  ;;  %v4367_v5 = vmul.f32 %v4334_v52, %v4334_v52  ;;  %vm6759_vm5 = vmmov %vm6679_vm0 }
 0x30d   : > { %v4402_v10 = vsel %vm6749_vm14, %v4365_v13, 0.0  ;;  %v4368_v1 = vmul.f32 %v4335_v39, %v4335_v39  ;;  %v4404_v18 = vsel %vm6750_vm8, %v4366_v15, 0.0  ;;  %v4369_v62 = vmul.f32 %v4336_v25, %v4336_v25  ;;  %vm6760_vm9 = vmmov %vm6679_vm0 }
 0x30e   : > { %v4395_v17 = vadd.f32 %v4394_v33, %v4393_v23  ;;  %v4406_v3 = vsel %vm6751_vm13, %v4367_v5, 0.0  ;;  %v4370_v58 = vmul.f32 %v4337_v34, %v4337_v34  ;;  %v4371_v2 = vmul.f32 %v4338_v44, %v4338_v44  ;;  %vm6761_vm10 = vmmov %vm6679_vm0 }
 0x30f   : > { %v4408_v37 = vsel %vm6752_vm6, %v4368_v1, 0.0  ;;  %v4410_v31 = vsel %vm6753_vm1, %v4369_v62, 0.0  ;;  %v4372_v47 = vmul.f32 %v4339_v59, %v4339_v59  ;;  %v4373_v38 = vmul.f32 %v4340_v7, %v4340_v7  ;;  %vm6762_vm7 = vmmov %vm6679_vm0 }
 0x310   : > { %v4397_v12 = vadd.f32 %v4396_v35, %v4395_v17  ;;  %v4412_v60 = vsel %vm6754_vm15, %v4370_v58, 0.0  ;;  %v4414_v54 = vsel %vm6755_vm12, %v4371_v2, 0.0  ;;  %v4374_v52 = vmul.f32 %v4341_v57, %v4341_v57  ;;  %vm6763_vm11 = vmmov %vm6679_vm0 }
 0x311   : > { %v4416_v39 = vsel %vm6756_vm2, %v4372_v47, 0.0  ;;  %v4375_v34 = vmul.f32 %v4342_v19, %v4342_v19  ;;  %v4418_v53 = vsel %vm6679_vm0, %v4373_v38, 0.0  ;;  %v4376_v44 = vmul.f32 %v4343_v29, %v4343_v29  ;;  %vm6764_vm14 = vmmov %vm6679_vm0 }
 0x312   : > { %v4399_v14 = vadd.f32 %v4398_v21, %v4397_v12  ;;  %v4420_v6 = vsel %vm6757_vm4, %v4374_v52, 0.0  ;;  %v4377_v59 = vmul.f32 %v6541_v30, %v6541_v30  ;;  %v4378_v57 = vmul.f32 %v6544_v11, %v6544_v11  ;;  %vm6765_vm8 = vmmov %vm6679_vm0 }
 0x313   : > { %v4422_v7 = vsel %vm6758_vm3, %v4375_v34, 0.0  ;;  %v4424_v55 = vsel %vm6759_vm5, %v4376_v44, 0.0  ;;  %v4379_v19 = vmul.f32 %v6547_v16, %v6547_v16  ;;  %v4380_v33 = vmul.f32 %v6550_v26, %v6550_v26  ;;  %vm6766_vm13 = vmmov %vm6679_vm0 }
 0x314   : > { %v4401_v4 = vadd.f32 %v4400_v27, %v4399_v14  ;;  %v4426_v29 = vsel %vm6760_vm9, %v4377_v59, 0.0  ;;  %v4428_v30 = vsel %vm6761_vm10, %v4378_v57, 0.0  ;;  %v4381_v20 = vmul.f32 %v6553_v9, %v6553_v9  ;;  %vm6767_vm6 = vmmov %vm6679_vm0 }
 0x315   : > { %v4430_v11 = vsel %vm6762_vm7, %v4379_v19, 0.0  ;;  %v4382_v12 = vmul.f32 %v6556_v51, %v6556_v51  ;;  %v4432_v16 = vsel %vm6763_vm11, %v4380_v33, 0.0  ;;  %v4383_v21 = vmul.f32 %v6559_v56, %v6559_v56  ;;  %vm6768_vm1 = vmmov %vm6679_vm0 }
 0x316   : > { %v4403_v45 = vadd.f32 %v4402_v10, %v4401_v4  ;;  %v4434_v26 = vsel %vm6764_vm14, %v4381_v20, 0.0  ;;  %v4384_v15 = vmul.f32 %v6561_v24, %v6561_v24  ;;  %v4385_v4 = vmul.f32 %v6564_v43, %v6564_v43  ;;  %vm6769_vm15 = vmmov %vm6679_vm0 }
 0x317   : > { %v4436_v9 = vsel %vm6765_vm8, %v4382_v12, 0.0  ;;  %v4438_v51 = vsel %vm6766_vm13, %v4383_v21, 0.0  ;;  %v4386_v10 = vmul.f32 %v6567_v8, %v6567_v8  ;;  %v4387_v1 = vmul.f32 %v6569_v28, %v6569_v28  ;;  %vm6770_vm12 = vmmov %vm6679_vm0 }
 0x318   : > { %v4405_v0 = vadd.f32 %v4404_v18, %v4403_v45  ;;  %v4440_v56 = vsel %vm6767_vm6, %v4384_v15, 0.0  ;;  %v4442_v24 = vsel %vm6768_vm1, %v4385_v4, 0.0  ;;  %v4390_v58 = vmul.f32 %v6575_v41, %v6575_v41  ;;  %vm6771_vm2 = vmmov %vm6679_vm0 }
 0x319   : > { %v4444_v43 = vsel %vm6769_vm15, %v4386_v10, 0.0  ;;  %v4446_v8 = vsel %vm6770_vm12, %v4387_v1, 0.0  ;;  %vm6772_vm4 = vmmov %vm6679_vm0  ;;  %vm6773_vm3 = vcmask 24576  }
 0x31a   : > { %v4407_v63 = vadd.f32 %v4406_v3, %v4405_v0  ;;  %v4388_v0 = vmul.f32 %v6571_v36, %v6571_v36  ;;  %v4389_v3 = vmul.f32 %v6573_v42, %v6573_v42  ;;  %v4452_v36 = vsel %vm6772_vm4, %v4390_v58, 0.0 }
 0x31c   : > { %v4409_v40 = vadd.f32 %v4408_v37, %v4407_v63  ;;  %v4448_v28 = vsel %vm6771_vm2, %v4388_v0, 0.0 }
 0x31e   : > { %v4411_v46 = vadd.f32 %v4410_v31, %v4409_v40  ;;  %v4450_v40 = vsel %vm6679_vm0, %v4389_v3, 0.0 }
 0x320   : > { %v4413_v48 = vadd.f32 %v4412_v60, %v4411_v46 }
 0x322   : > { %v4415_v32 = vadd.f32 %v4414_v54, %v4413_v48 }
 0x324   : > { %v4417_v25 = vadd.f32 %v4416_v39, %v4415_v32 }
 0x326   : > { %v4419_v50 = vadd.f32 %v4418_v53, %v4417_v25 }
 0x328   : > { %v4421_v49 = vadd.f32 %v4420_v6, %v4419_v50 }
 0x32a   : > { %v4423_v61 = vadd.f32 %v4422_v7, %v4421_v49 }
 0x32c   : > { %v4425_v23 = vadd.f32 %v4424_v55, %v4423_v61 }
 0x32e   : > { %v4427_v22 = vadd.f32 %v4426_v29, %v4425_v23 }
 0x330   : > { %v4429_v17 = vadd.f32 %v4428_v30, %v4427_v22 }
 0x332   : > { %v4431_v35 = vadd.f32 %v4430_v11, %v4429_v17 }
 0x334   : > { %v4433_v13 = vadd.f32 %v4432_v16, %v4431_v35 }
 0x336   : > { %v4435_v14 = vadd.f32 %v4434_v26, %v4433_v13 }
 0x338   : > { %v4437_v27 = vadd.f32 %v4436_v9, %v4435_v14 }
 0x33a   : > { %v4439_v5 = vadd.f32 %v4438_v51, %v4437_v27 }
 0x33c   : > { %v4441_v45 = vadd.f32 %v4440_v56, %v4439_v5 }
 0x33e   : > { %v4443_v18 = vadd.f32 %v4442_v24, %v4441_v45 }
 0x340   : > { %v4445_v62 = vadd.f32 %v4444_v43, %v4443_v18 }
 0x342   : > { %v4447_v63 = vadd.f32 %v4446_v8, %v4445_v62 }
 0x344   : > { %v4449_v37 = vadd.f32 %v4448_v28, %v4447_v63 }
 0x346   : > { %v4451_v2 = vadd.f32 %v4450_v40, %v4449_v37 }
 0x348   : > { %v4453_v31 = vadd.f32 %v4452_v36, %v4451_v2 }
 0x34a   : > { %v4454_v46 = vrot.slane %v4453_v31, 4 }
 0x34c   : > { %v4455_v47 = vadd.f32 %v4454_v46, %v4453_v31 }
 0x34e   : > { %v4456_v60 = vrot.slane %v4455_v47, 2 }
 0x350   : > { %v4457_v42 = vadd.f32 %v4456_v60, %v4455_v47 }
 0x352   : > { %v4458_v48 = vrot.slane %v4457_v42, 1 }
 0x354   : > { %v4459_v38 = vadd.f32 %v4458_v48, %v4457_v42 }
 0x356   : > { %4460 = vst.msk [vmem:[%s6518_s11 + $0x1] sm:$0x1] %vm6773_vm3, %v4459_v38 }
 0x357 PF: > { %s14_s12 = sadd.s32 1, %s4975_s12  }
 0x358   : > { %p11_p4 = scmp.ge.s32.totalorder %s14_s12, 4  }
 0x35a   :  { %13 = sbr.rel (!%p11_p4) target bundleno = 1 (0x1), region = 73 }

</bundles_post_ra>
